<compile_context>
chip_gen: v6e
topology: v6e:2x2x1
jax: 0.10.0
libtpu: 0.0.40
codegen_flags: <defaults>
</compile_context>

<pallas_src>
import functools

import jax
import jax.numpy as jnp
from jax.experimental import pallas as pl
from jax.experimental.pallas import tpu as pltpu

_LANE = 128


def _round_up(n, m):
    return (n + m - 1) // m * m


def _prep_weight(w_hwio, cin_p, cout_p):
    """(3, 3, Cin, Cout) HWIO f32 -> zero-padded (9, Cin_p, Cout_p) bf16 slab."""
    kh, kw, cin, cout = w_hwio.shape
    w = jnp.zeros((kh * kw, cin_p, cout_p), jnp.float32)
    w = w.at[:, :cin, :cout].set(w_hwio.reshape(kh * kw, cin, cout))
    return w.astype(jnp.bfloat16)


def _pad_row(v, cp):
    """(C,) f32 -> zero-padded (1, Cp) f32 row (padded channels get 0)."""
    return jnp.zeros((1, cp), jnp.float32).at[0, : v.shape[0]].set(v)


def _bn_scale_shift(gamma, beta, mean, var, eps):
    """Eval-mode BatchNorm folded to per-channel scale/shift (f32)."""
    scale = gamma / jnp.sqrt(var + eps)
    return scale, beta - mean * scale


def _basic_block_kernel(x_ref, w1_ref, s1_ref, b1_ref, w2_ref, s2_ref, b2_ref,
                        o_ref, xpad_ref, midpad_ref, acc_ref, *, H, W):
    """Fused BasicBlock for one image (grid step).

    x_ref:   (1, H, W, Cin_p)     bf16 input block (channel-padded)
    w*_ref:  (9, Cin_p, Cout_p)   bf16 packed 3x3 weights
    s*_ref:  (1, Cout_p)          f32 folded-BN scale
    b*_ref:  (1, Cout_p)          f32 folded-BN shift
    o_ref:   (1, H, W, Cout_p)    f32 output block (lane-dense)
    xpad_ref:   (H+2, W+2, Cin_p)  bf16 scratch (input + halo)
    midpad_ref: (H+2, W+2, Cmid_p) bf16 scratch (conv1 output + halo)
    acc_ref:    (H*W, Cout_p)      f32 matmul accumulator scratch
    """
    rows = H * W
    cp_in = xpad_ref.shape[-1]
    cp_mid = midpad_ref.shape[-1]
    cp_out = o_ref.shape[-1]

    # Zero the halo scratches (halo region stays zero), then stage the image.
    # Pure VMEM stores -- cheap, no HBM traffic, safe across megacore sharding.
    xpad_ref[...] = jnp.zeros_like(xpad_ref)
    midpad_ref[...] = jnp.zeros_like(midpad_ref)
    xpad_ref[pl.ds(1, H), pl.ds(1, W), :] = x_ref[0]

    def conv3x3_acc(src_ref, w_ref):
        # 3x3 conv as 9 shifted-window matmuls, one per tap:
        # (H*W, Cp) x (Cp, Cp') bf16 MXU matmul, f32 accumulation in VMEM.
        for t in range(9):
            ky, kx = divmod(t, 3)
            patch = src_ref[pl.ds(ky, H), pl.ds(kx, W), :]
            patch = patch.reshape(rows, src_ref.shape[-1])
            tap = jnp.dot(patch, w_ref[t], preferred_element_type=jnp.float32)
            if t == 0:
                acc_ref[...] = tap
            else:
                acc_ref[...] += tap

    # ---- conv1 -> bn1 (scale/shift) -> relu, kept resident in VMEM ----
    conv3x3_acc(xpad_ref, w1_ref)
    y1 = jnp.maximum(acc_ref[...] * s1_ref[...] + b1_ref[...], 0.0)
    midpad_ref[pl.ds(1, H), pl.ds(1, W), :] = (
        y1.reshape(H, W, cp_mid).astype(midpad_ref.dtype))

    # ---- conv2 -> bn2 -> + identity -> relu ----
    conv3x3_acc(midpad_ref, w2_ref)
    y2 = acc_ref[...] * s2_ref[...] + b2_ref[...]
    identity = xpad_ref[pl.ds(1, H), pl.ds(1, W), :].reshape(rows, cp_in)
    y2 = jnp.maximum(y2 + identity.astype(jnp.float32), 0.0)
    o_ref[...] = y2.reshape(1, H, W, cp_out)


def _basic_block_fused(x, w1, s1, b1, w2, s2, b2):
    """x: (N, H, W, Cin_p) bf16 (channel-padded). Returns (N, H, W, Cout_p) f32."""
    n, h, w, cp_in = x.shape
    cp_mid = w1.shape[-1]
    cp_out = w2.shape[-1]
    assert cp_mid == cp_out and cp_in == cp_out, "identity residual path only"

    kernel = functools.partial(_basic_block_kernel, H=h, W=w)
    return pl.pallas_call(
        kernel,
        out_shape=jax.ShapeDtypeStruct((n, h, w, cp_out), jnp.float32),
        grid=(n,),
        in_specs=[
            pl.BlockSpec((1, h, w, cp_in), lambda i: (i, 0, 0, 0)),   # x
            pl.BlockSpec((9, cp_in, cp_mid), lambda i: (0, 0, 0)),    # w1 (resident)
            pl.BlockSpec((1, cp_mid), lambda i: (0, 0)),              # bn1 scale
            pl.BlockSpec((1, cp_mid), lambda i: (0, 0)),              # bn1 shift
            pl.BlockSpec((9, cp_mid, cp_out), lambda i: (0, 0, 0)),   # w2 (resident)
            pl.BlockSpec((1, cp_out), lambda i: (0, 0)),              # bn2 scale
            pl.BlockSpec((1, cp_out), lambda i: (0, 0)),              # bn2 shift
        ],
        out_specs=pl.BlockSpec((1, h, w, cp_out), lambda i: (i, 0, 0, 0)),
        scratch_shapes=[
            pltpu.VMEM((h + 2, w + 2, cp_in), jnp.bfloat16),   # padded input
            pltpu.VMEM((h + 2, w + 2, cp_mid), jnp.bfloat16),  # padded conv1 out
            pltpu.VMEM((h * w, cp_out), jnp.float32),          # f32 accumulator
        ],
        compiler_params=pltpu.CompilerParams(
            dimension_semantics=("parallel",)),
    )(x, w1, s1, b1, w2, s2, b2)


class BasicBlockPallas:
    """JAX/Pallas port of torchvision ResNet BasicBlock (inference forward)."""

    expansion = 1

    def __init__(self, inplanes, planes, stride=1, downsample=None,
                 eps=1e-5, key=None):
        if downsample is not None:
            raise NotImplementedError(
                "TODO(synk): downsample branch not implemented")
        if stride != 1:
            raise NotImplementedError(
                "identity residual requires stride == 1 when downsample is None")
        if inplanes != planes * self.expansion:
            raise ValueError(
                "identity residual requires inplanes == planes when downsample is None")
        if key is None:
            key = jax.random.PRNGKey(0)
        ks = jax.random.split(key, 10)

        self.inplanes, self.planes = inplanes, planes
        self.stride, self.eps = stride, eps

        def conv_init(k, cin, cout):
            # nn.Conv2d default init (kaiming_uniform, a=sqrt(5)) -> U(-1/sqrt(fan_in), ...)
            bound = 1.0 / (cin * 9) ** 0.5
            return jax.random.uniform(k, (3, 3, cin, cout), jnp.float32,
                                      -bound, bound)   # HWIO

        # conv1 / conv2 (bias=False, as in conv3x3)
        self.w1 = conv_init(ks[0], inplanes, planes)
        self.w2 = conv_init(ks[1], planes, planes)

        # BatchNorm (eval-mode) parameters -- non-trivial so the test is meaningful.
        self.g1 = jax.random.uniform(ks[2], (planes,), jnp.float32, 0.5, 1.5)
        self.be1 = 0.1 * jax.random.normal(ks[3], (planes,), jnp.float32)
        self.m1 = 0.1 * jax.random.normal(ks[4], (planes,), jnp.float32)
        self.v1 = jax.random.uniform(ks[5], (planes,), jnp.float32, 0.5, 1.5)
        self.g2 = jax.random.uniform(ks[6], (planes,), jnp.float32, 0.5, 1.5)
        self.be2 = 0.1 * jax.random.normal(ks[7], (planes,), jnp.float32)
        self.m2 = 0.1 * jax.random.normal(ks[8], (planes,), jnp.float32)
        self.v2 = jax.random.uniform(ks[9], (planes,), jnp.float32, 0.5, 1.5)

        # ---- kernel-side packed parameters (computed once) ----
        self.cp_in = _round_up(inplanes, _LANE)
        self.cp_mid = _round_up(planes, _LANE)
        self.cp_out = self.cp_mid
        self.w1p = _prep_weight(self.w1, self.cp_in, self.cp_mid)
        self.w2p = _prep_weight(self.w2, self.cp_mid, self.cp_out)
        s1, b1 = _bn_scale_shift(self.g1, self.be1, self.m1, self.v1, eps)
        s2, b2 = _bn_scale_shift(self.g2, self.be2, self.m2, self.v2, eps)
        self.s1p, self.b1p = _pad_row(s1, self.cp_mid), _pad_row(b1, self.cp_mid)
        self.s2p, self.b2p = _pad_row(s2, self.cp_out), _pad_row(b2, self.cp_out)

    def __call__(self, x_nchw):
        n, c, h, w = x_nchw.shape
        assert c == self.inplanes
        # NCHW -> NHWC for the TPU kernel; bf16 MXU operands; pad channels to
        # the 128-lane width (one fused XLA pass; halo padding is in-kernel).
        x = jnp.transpose(x_nchw, (0, 2, 3, 1)).astype(jnp.bfloat16)
        if self.cp_in != c:
            x = jnp.pad(x, ((0, 0), (0, 0), (0, 0), (0, self.cp_in - c)))
        out = _basic_block_fused(x, self.w1p, self.s1p, self.b1p,
                                 self.w2p, self.s2p, self.b2p)
        out = out[..., : self.planes]          # drop channel padding
        # TODO(synk): keep activations NHWC across a whole ResNet stack; these
        # boundary transposes only exist to match the PyTorch NCHW interface.
        return jnp.transpose(out, (0, 3, 1, 2))


def _reference_forward(x_nchw, block):
    """Pure-JAX eval-mode BasicBlock (lax.conv), same bf16-operand /
    f32-accumulate numerics as the kernel, BN applied with the textbook formula."""
    x = jnp.transpose(x_nchw, (0, 2, 3, 1))
    dn = ("NHWC", "HWIO", "NHWC")
    eps = block.eps

    def conv_bn(inp, w, gamma, beta, mean, var):
        y = jax.lax.conv_general_dilated(
            inp.astype(jnp.bfloat16), w.astype(jnp.bfloat16),
            window_strides=(1, 1), padding=((1, 1), (1, 1)),
            dimension_numbers=dn, preferred_element_type=jnp.float32)
        return (y - mean) / jnp.sqrt(var + eps) * gamma + beta

    y = jnp.maximum(conv_bn(x, block.w1, block.g1, block.be1, block.m1, block.v1), 0.0)
    y = conv_bn(y, block.w2, block.g2, block.be2, block.m2, block.v2)
    y = y + x.astype(jnp.bfloat16).astype(jnp.float32)   # identity (downsample=None)
    y = jnp.maximum(y, 0.0)
    return jnp.transpose(y, (0, 3, 1, 2))


if __name__ == "__main__":
    key = jax.random.PRNGKey(0)
    kx, kp = jax.random.split(key)

    # Small shapes: batch=2, channels=4, spatial=16x16.  downsample=None in the
    # reference module implies inplanes == planes (identity residual).
    N, C, H, W = 2, 4, 16, 16
    PLANES = 4

    x = jax.random.normal(kx, (N, C, H, W), jnp.float32)
    block = BasicBlockPallas(C, PLANES, stride=1, key=kp)

    out = jax.block_until_ready(block(x))
    ref = jax.block_until_ready(_reference_forward(x, block))

    assert out.shape == (N, PLANES, H, W), out.shape
    max_err = float(jnp.max(jnp.abs(out - ref)))
    assert jnp.allclose(out, ref, atol=2e-3, rtol=2e-3), max_err
    print("KERNEL_OK")
</pallas_src>

<mosaic_0001>
module attributes {stable_mosaic.version = 11 : i64} {
  func.func @_basic_block_kernel(%arg0: i32, %arg1: memref<1x16x16x128xbf16, #tpu.memory_space<vmem>>, %arg2: memref<9x128x128xbf16, #tpu.memory_space<vmem>>, %arg3: memref<1x128xf32, #tpu.memory_space<vmem>>, %arg4: memref<1x128xf32, #tpu.memory_space<vmem>>, %arg5: memref<9x128x128xbf16, #tpu.memory_space<vmem>>, %arg6: memref<1x128xf32, #tpu.memory_space<vmem>>, %arg7: memref<1x128xf32, #tpu.memory_space<vmem>>, %arg8: memref<1x16x16x128xf32, #tpu.memory_space<vmem>>, %arg9: memref<18x18x128xbf16, #tpu.memory_space<vmem>>, %arg10: memref<18x18x128xbf16, #tpu.memory_space<vmem>>, %arg11: memref<256x128xf32, #tpu.memory_space<vmem>>) attributes {dimension_semantics = [#tpu.dimension_semantics<parallel>], iteration_bounds = array<i64: 2>, scalar_prefetch = 0 : i64, scratch_operands = 3 : i64, tpu.core_type = #tpu.core_type<tc>, window_params = [{transform_indices = @transform_0, window_bounds = array<i64: 1, 16, 16, 128>}, {pipeline_mode = #tpu.pipeline_mode<synchronous>, transform_indices = @transform_1, window_bounds = array<i64: 9, 128, 128>}, {pipeline_mode = #tpu.pipeline_mode<synchronous>, transform_indices = @transform_2, window_bounds = array<i64: 1, 128>}, {pipeline_mode = #tpu.pipeline_mode<synchronous>, transform_indices = @transform_3, window_bounds = array<i64: 1, 128>}, {pipeline_mode = #tpu.pipeline_mode<synchronous>, transform_indices = @transform_4, window_bounds = array<i64: 9, 128, 128>}, {pipeline_mode = #tpu.pipeline_mode<synchronous>, transform_indices = @transform_5, window_bounds = array<i64: 1, 128>}, {pipeline_mode = #tpu.pipeline_mode<synchronous>, transform_indices = @transform_6, window_bounds = array<i64: 1, 128>}, {transform_indices = @transform_7, window_bounds = array<i64: 1, 16, 16, 128>}]} {
    %cst = arith.constant 0.000000e+00 : bf16
    %0 = vector.broadcast %cst : bf16 to vector<18x18x128xbf16>
    %c0 = arith.constant 0 : index
    %c0_0 = arith.constant 0 : index
    %c0_1 = arith.constant 0 : index
    %1 = vector.load %arg9[%c0, %c0_0, %c0_1] : memref<18x18x128xbf16, #tpu.memory_space<vmem>>, vector<18x18x128xbf16>
    tpu.vector_store %arg9[%c0, %c0_0, %c0_1], %0 {strides = array<i32>} : memref<18x18x128xbf16, #tpu.memory_space<vmem>>, vector<18x18x128xbf16>,
    %cst_2 = arith.constant 0.000000e+00 : bf16
    %2 = vector.broadcast %cst_2 : bf16 to vector<18x18x128xbf16>
    %c0_3 = arith.constant 0 : index
    %c0_4 = arith.constant 0 : index
    %c0_5 = arith.constant 0 : index
    %3 = vector.load %arg10[%c0_3, %c0_4, %c0_5] : memref<18x18x128xbf16, #tpu.memory_space<vmem>>, vector<18x18x128xbf16>
    tpu.vector_store %arg10[%c0_3, %c0_4, %c0_5], %2 {strides = array<i32>} : memref<18x18x128xbf16, #tpu.memory_space<vmem>>, vector<18x18x128xbf16>,
    %c0_6 = arith.constant 0 : index
    %c0_7 = arith.constant 0 : index
    %c0_8 = arith.constant 0 : index
    %c0_9 = arith.constant 0 : index
    %4 = vector.load %arg1[%c0_6, %c0_7, %c0_8, %c0_9] : memref<1x16x16x128xbf16, #tpu.memory_space<vmem>>, vector<1x16x16x128xbf16>
    %5 = vector.shape_cast %4 : vector<1x16x16x128xbf16> to vector<16x16x128xbf16>
    %c1 = arith.constant 1 : index
    %c1_10 = arith.constant 1 : index
    %c0_11 = arith.constant 0 : index
    %6 = vector.load %arg9[%c1, %c1_10, %c0_11] : memref<18x18x128xbf16, #tpu.memory_space<vmem>>, vector<16x16x128xbf16>
    tpu.vector_store %arg9[%c1, %c1_10, %c0_11], %5 {strides = array<i32>} : memref<18x18x128xbf16, #tpu.memory_space<vmem>>, vector<16x16x128xbf16>,
    %c0_12 = arith.constant 0 : index
    %c0_13 = arith.constant 0 : index
    %c0_14 = arith.constant 0 : index
    %7 = vector.load %arg9[%c0_12, %c0_13, %c0_14] : memref<18x18x128xbf16, #tpu.memory_space<vmem>>, vector<16x16x128xbf16>
    %8 = vector.shape_cast %7 : vector<16x16x128xbf16> to vector<256x128xbf16>
    %c0_15 = arith.constant 0 : index
    %c0_16 = arith.constant 0 : index
    %c0_17 = arith.constant 0 : index
    %9 = vector.load %arg2[%c0_15, %c0_16, %c0_17] : memref<9x128x128xbf16, #tpu.memory_space<vmem>>, vector<1x128x128xbf16>
    %10 = vector.shape_cast %9 : vector<1x128x128xbf16> to vector<128x128xbf16>
    %cst_18 = arith.constant dense<0.000000e+00> : vector<256x128xf32>
    %11 = tpu.matmul %8, %10, %cst_18 {dimension_numbers = #tpu.dot_dimension_numbers<[1], [0], [0], [1], [0, 0, 1, 1], [], []>} : vector<256x128xbf16>, vector<128x128xbf16>, vector<256x128xf32> -> vector<256x128xf32>
    %c0_19 = arith.constant 0 : index
    %c0_20 = arith.constant 0 : index
    %12 = vector.load %arg11[%c0_19, %c0_20] : memref<256x128xf32, #tpu.memory_space<vmem>>, vector<256x128xf32>
    tpu.vector_store %arg11[%c0_19, %c0_20], %11 {strides = array<i32>} : memref<256x128xf32, #tpu.memory_space<vmem>>, vector<256x128xf32>,
    %c0_21 = arith.constant 0 : index
    %c1_22 = arith.constant 1 : index
    %c0_23 = arith.constant 0 : index
    %13 = vector.load %arg9[%c0_21, %c1_22, %c0_23] : memref<18x18x128xbf16, #tpu.memory_space<vmem>>, vector<16x16x128xbf16>
    %14 = vector.shape_cast %13 : vector<16x16x128xbf16> to vector<256x128xbf16>
    %c1_24 = arith.constant 1 : index
    %c0_25 = arith.constant 0 : index
    %c0_26 = arith.constant 0 : index
    %15 = vector.load %arg2[%c1_24, %c0_25, %c0_26] : memref<9x128x128xbf16, #tpu.memory_space<vmem>>, vector<1x128x128xbf16>
    %16 = vector.shape_cast %15 : vector<1x128x128xbf16> to vector<128x128xbf16>
    %cst_27 = arith.constant dense<0.000000e+00> : vector<256x128xf32>
    %17 = tpu.matmul %14, %16, %cst_27 {dimension_numbers = #tpu.dot_dimension_numbers<[1], [0], [0], [1], [0, 0, 1, 1], [], []>} : vector<256x128xbf16>, vector<128x128xbf16>, vector<256x128xf32> -> vector<256x128xf32>
    %c0_28 = arith.constant 0 : index
    %c0_29 = arith.constant 0 : index
    %18 = vector.load %arg11[%c0_28, %c0_29] : memref<256x128xf32, #tpu.memory_space<vmem>>, vector<256x128xf32>
    %19 = arith.addf %18, %17 : vector<256x128xf32>
    %c0_30 = arith.constant 0 : index
    %c0_31 = arith.constant 0 : index
    %20 = vector.load %arg11[%c0_30, %c0_31] : memref<256x128xf32, #tpu.memory_space<vmem>>, vector<256x128xf32>
    tpu.vector_store %arg11[%c0_30, %c0_31], %19 {strides = array<i32>} : memref<256x128xf32, #tpu.memory_space<vmem>>, vector<256x128xf32>,
    %c0_32 = arith.constant 0 : index
    %c2 = arith.constant 2 : index
    %c0_33 = arith.constant 0 : index
    %21 = vector.load %arg9[%c0_32, %c2, %c0_33] : memref<18x18x128xbf16, #tpu.memory_space<vmem>>, vector<16x16x128xbf16>
    %22 = vector.shape_cast %21 : vector<16x16x128xbf16> to vector<256x128xbf16>
    %c2_34 = arith.constant 2 : index
    %c0_35 = arith.constant 0 : index
    %c0_36 = arith.constant 0 : index
    %23 = vector.load %arg2[%c2_34, %c0_35, %c0_36] : memref<9x128x128xbf16, #tpu.memory_space<vmem>>, vector<1x128x128xbf16>
    %24 = vector.shape_cast %23 : vector<1x128x128xbf16> to vector<128x128xbf16>
    %cst_37 = arith.constant dense<0.000000e+00> : vector<256x128xf32>
    %25 = tpu.matmul %22, %24, %cst_37 {dimension_numbers = #tpu.dot_dimension_numbers<[1], [0], [0], [1], [0, 0, 1, 1], [], []>} : vector<256x128xbf16>, vector<128x128xbf16>, vector<256x128xf32> -> vector<256x128xf32>
    %c0_38 = arith.constant 0 : index
    %c0_39 = arith.constant 0 : index
    %26 = vector.load %arg11[%c0_38, %c0_39] : memref<256x128xf32, #tpu.memory_space<vmem>>, vector<256x128xf32>
    %27 = arith.addf %26, %25 : vector<256x128xf32>
    %c0_40 = arith.constant 0 : index
    %c0_41 = arith.constant 0 : index
    %28 = vector.load %arg11[%c0_40, %c0_41] : memref<256x128xf32, #tpu.memory_space<vmem>>, vector<256x128xf32>
    tpu.vector_store %arg11[%c0_40, %c0_41], %27 {strides = array<i32>} : memref<256x128xf32, #tpu.memory_space<vmem>>, vector<256x128xf32>,
    %c1_42 = arith.constant 1 : index
    %c0_43 = arith.constant 0 : index
    %c0_44 = arith.constant 0 : index
    %29 = vector.load %arg9[%c1_42, %c0_43, %c0_44] : memref<18x18x128xbf16, #tpu.memory_space<vmem>>, vector<16x16x128xbf16>
    %30 = vector.shape_cast %29 : vector<16x16x128xbf16> to vector<256x128xbf16>
    %c3 = arith.constant 3 : index
    %c0_45 = arith.constant 0 : index
    %c0_46 = arith.constant 0 : index
    %31 = vector.load %arg2[%c3, %c0_45, %c0_46] : memref<9x128x128xbf16, #tpu.memory_space<vmem>>, vector<1x128x128xbf16>
    %32 = vector.shape_cast %31 : vector<1x128x128xbf16> to vector<128x128xbf16>
    %cst_47 = arith.constant dense<0.000000e+00> : vector<256x128xf32>
    %33 = tpu.matmul %30, %32, %cst_47 {dimension_numbers = #tpu.dot_dimension_numbers<[1], [0], [0], [1], [0, 0, 1, 1], [], []>} : vector<256x128xbf16>, vector<128x128xbf16>, vector<256x128xf32> -> vector<256x128xf32>
    %c0_48 = arith.constant 0 : index
    %c0_49 = arith.constant 0 : index
    %34 = vector.load %arg11[%c0_48, %c0_49] : memref<256x128xf32, #tpu.memory_space<vmem>>, vector<256x128xf32>
    %35 = arith.addf %34, %33 : vector<256x128xf32>
    %c0_50 = arith.constant 0 : index
    %c0_51 = arith.constant 0 : index
    %36 = vector.load %arg11[%c0_50, %c0_51] : memref<256x128xf32, #tpu.memory_space<vmem>>, vector<256x128xf32>
    tpu.vector_store %arg11[%c0_50, %c0_51], %35 {strides = array<i32>} : memref<256x128xf32, #tpu.memory_space<vmem>>, vector<256x128xf32>,
    %c1_52 = arith.constant 1 : index
    %c1_53 = arith.constant 1 : index
    %c0_54 = arith.constant 0 : index
    %37 = vector.load %arg9[%c1_52, %c1_53, %c0_54] : memref<18x18x128xbf16, #tpu.memory_space<vmem>>, vector<16x16x128xbf16>
    %38 = vector.shape_cast %37 : vector<16x16x128xbf16> to vector<256x128xbf16>
    %c4 = arith.constant 4 : index
    %c0_55 = arith.constant 0 : index
    %c0_56 = arith.constant 0 : index
    %39 = vector.load %arg2[%c4, %c0_55, %c0_56] : memref<9x128x128xbf16, #tpu.memory_space<vmem>>, vector<1x128x128xbf16>
    %40 = vector.shape_cast %39 : vector<1x128x128xbf16> to vector<128x128xbf16>
    %cst_57 = arith.constant dense<0.000000e+00> : vector<256x128xf32>
    %41 = tpu.matmul %38, %40, %cst_57 {dimension_numbers = #tpu.dot_dimension_numbers<[1], [0], [0], [1], [0, 0, 1, 1], [], []>} : vector<256x128xbf16>, vector<128x128xbf16>, vector<256x128xf32> -> vector<256x128xf32>
    %c0_58 = arith.constant 0 : index
    %c0_59 = arith.constant 0 : index
    %42 = vector.load %arg11[%c0_58, %c0_59] : memref<256x128xf32, #tpu.memory_space<vmem>>, vector<256x128xf32>
    %43 = arith.addf %42, %41 : vector<256x128xf32>
    %c0_60 = arith.constant 0 : index
    %c0_61 = arith.constant 0 : index
    %44 = vector.load %arg11[%c0_60, %c0_61] : memref<256x128xf32, #tpu.memory_space<vmem>>, vector<256x128xf32>
    tpu.vector_store %arg11[%c0_60, %c0_61], %43 {strides = array<i32>} : memref<256x128xf32, #tpu.memory_space<vmem>>, vector<256x128xf32>,
    %c1_62 = arith.constant 1 : index
    %c2_63 = arith.constant 2 : index
    %c0_64 = arith.constant 0 : index
    %45 = vector.load %arg9[%c1_62, %c2_63, %c0_64] : memref<18x18x128xbf16, #tpu.memory_space<vmem>>, vector<16x16x128xbf16>
    %46 = vector.shape_cast %45 : vector<16x16x128xbf16> to vector<256x128xbf16>
    %c5 = arith.constant 5 : index
    %c0_65 = arith.constant 0 : index
    %c0_66 = arith.constant 0 : index
    %47 = vector.load %arg2[%c5, %c0_65, %c0_66] : memref<9x128x128xbf16, #tpu.memory_space<vmem>>, vector<1x128x128xbf16>
    %48 = vector.shape_cast %47 : vector<1x128x128xbf16> to vector<128x128xbf16>
    %cst_67 = arith.constant dense<0.000000e+00> : vector<256x128xf32>
    %49 = tpu.matmul %46, %48, %cst_67 {dimension_numbers = #tpu.dot_dimension_numbers<[1], [0], [0], [1], [0, 0, 1, 1], [], []>} : vector<256x128xbf16>, vector<128x128xbf16>, vector<256x128xf32> -> vector<256x128xf32>
    %c0_68 = arith.constant 0 : index
    %c0_69 = arith.constant 0 : index
    %50 = vector.load %arg11[%c0_68, %c0_69] : memref<256x128xf32, #tpu.memory_space<vmem>>, vector<256x128xf32>
    %51 = arith.addf %50, %49 : vector<256x128xf32>
    %c0_70 = arith.constant 0 : index
    %c0_71 = arith.constant 0 : index
    %52 = vector.load %arg11[%c0_70, %c0_71] : memref<256x128xf32, #tpu.memory_space<vmem>>, vector<256x128xf32>
    tpu.vector_store %arg11[%c0_70, %c0_71], %51 {strides = array<i32>} : memref<256x128xf32, #tpu.memory_space<vmem>>, vector<256x128xf32>,
    %c2_72 = arith.constant 2 : index
    %c0_73 = arith.constant 0 : index
    %c0_74 = arith.constant 0 : index
    %53 = vector.load %arg9[%c2_72, %c0_73, %c0_74] : memref<18x18x128xbf16, #tpu.memory_space<vmem>>, vector<16x16x128xbf16>
    %54 = vector.shape_cast %53 : vector<16x16x128xbf16> to vector<256x128xbf16>
    %c6 = arith.constant 6 : index
    %c0_75 = arith.constant 0 : index
    %c0_76 = arith.constant 0 : index
    %55 = vector.load %arg2[%c6, %c0_75, %c0_76] : memref<9x128x128xbf16, #tpu.memory_space<vmem>>, vector<1x128x128xbf16>
    %56 = vector.shape_cast %55 : vector<1x128x128xbf16> to vector<128x128xbf16>
    %cst_77 = arith.constant dense<0.000000e+00> : vector<256x128xf32>
    %57 = tpu.matmul %54, %56, %cst_77 {dimension_numbers = #tpu.dot_dimension_numbers<[1], [0], [0], [1], [0, 0, 1, 1], [], []>} : vector<256x128xbf16>, vector<128x128xbf16>, vector<256x128xf32> -> vector<256x128xf32>
    %c0_78 = arith.constant 0 : index
    %c0_79 = arith.constant 0 : index
    %58 = vector.load %arg11[%c0_78, %c0_79] : memref<256x128xf32, #tpu.memory_space<vmem>>, vector<256x128xf32>
    %59 = arith.addf %58, %57 : vector<256x128xf32>
    %c0_80 = arith.constant 0 : index
    %c0_81 = arith.constant 0 : index
    %60 = vector.load %arg11[%c0_80, %c0_81] : memref<256x128xf32, #tpu.memory_space<vmem>>, vector<256x128xf32>
    tpu.vector_store %arg11[%c0_80, %c0_81], %59 {strides = array<i32>} : memref<256x128xf32, #tpu.memory_space<vmem>>, vector<256x128xf32>,
    %c2_82 = arith.constant 2 : index
    %c1_83 = arith.constant 1 : index
    %c0_84 = arith.constant 0 : index
    %61 = vector.load %arg9[%c2_82, %c1_83, %c0_84] : memref<18x18x128xbf16, #tpu.memory_space<vmem>>, vector<16x16x128xbf16>
    %62 = vector.shape_cast %61 : vector<16x16x128xbf16> to vector<256x128xbf16>
    %c7 = arith.constant 7 : index
    %c0_85 = arith.constant 0 : index
    %c0_86 = arith.constant 0 : index
    %63 = vector.load %arg2[%c7, %c0_85, %c0_86] : memref<9x128x128xbf16, #tpu.memory_space<vmem>>, vector<1x128x128xbf16>
    %64 = vector.shape_cast %63 : vector<1x128x128xbf16> to vector<128x128xbf16>
    %cst_87 = arith.constant dense<0.000000e+00> : vector<256x128xf32>
    %65 = tpu.matmul %62, %64, %cst_87 {dimension_numbers = #tpu.dot_dimension_numbers<[1], [0], [0], [1], [0, 0, 1, 1], [], []>} : vector<256x128xbf16>, vector<128x128xbf16>, vector<256x128xf32> -> vector<256x128xf32>
    %c0_88 = arith.constant 0 : index
    %c0_89 = arith.constant 0 : index
    %66 = vector.load %arg11[%c0_88, %c0_89] : memref<256x128xf32, #tpu.memory_space<vmem>>, vector<256x128xf32>
    %67 = arith.addf %66, %65 : vector<256x128xf32>
    %c0_90 = arith.constant 0 : index
    %c0_91 = arith.constant 0 : index
    %68 = vector.load %arg11[%c0_90, %c0_91] : memref<256x128xf32, #tpu.memory_space<vmem>>, vector<256x128xf32>
    tpu.vector_store %arg11[%c0_90, %c0_91], %67 {strides = array<i32>} : memref<256x128xf32, #tpu.memory_space<vmem>>, vector<256x128xf32>,
    %c2_92 = arith.constant 2 : index
    %c2_93 = arith.constant 2 : index
    %c0_94 = arith.constant 0 : index
    %69 = vector.load %arg9[%c2_92, %c2_93, %c0_94] : memref<18x18x128xbf16, #tpu.memory_space<vmem>>, vector<16x16x128xbf16>
    %70 = vector.shape_cast %69 : vector<16x16x128xbf16> to vector<256x128xbf16>
    %c8 = arith.constant 8 : index
    %c0_95 = arith.constant 0 : index
    %c0_96 = arith.constant 0 : index
    %71 = vector.load %arg2[%c8, %c0_95, %c0_96] : memref<9x128x128xbf16, #tpu.memory_space<vmem>>, vector<1x128x128xbf16>
    %72 = vector.shape_cast %71 : vector<1x128x128xbf16> to vector<128x128xbf16>
    %cst_97 = arith.constant dense<0.000000e+00> : vector<256x128xf32>
    %73 = tpu.matmul %70, %72, %cst_97 {dimension_numbers = #tpu.dot_dimension_numbers<[1], [0], [0], [1], [0, 0, 1, 1], [], []>} : vector<256x128xbf16>, vector<128x128xbf16>, vector<256x128xf32> -> vector<256x128xf32>
    %c0_98 = arith.constant 0 : index
    %c0_99 = arith.constant 0 : index
    %74 = vector.load %arg11[%c0_98, %c0_99] : memref<256x128xf32, #tpu.memory_space<vmem>>, vector<256x128xf32>
    %75 = arith.addf %74, %73 : vector<256x128xf32>
    %c0_100 = arith.constant 0 : index
    %c0_101 = arith.constant 0 : index
    %76 = vector.load %arg11[%c0_100, %c0_101] : memref<256x128xf32, #tpu.memory_space<vmem>>, vector<256x128xf32>
    tpu.vector_store %arg11[%c0_100, %c0_101], %75 {strides = array<i32>} : memref<256x128xf32, #tpu.memory_space<vmem>>, vector<256x128xf32>,
    %c0_102 = arith.constant 0 : index
    %c0_103 = arith.constant 0 : index
    %77 = vector.load %arg11[%c0_102, %c0_103] : memref<256x128xf32, #tpu.memory_space<vmem>>, vector<256x128xf32>
    %c0_104 = arith.constant 0 : index
    %c0_105 = arith.constant 0 : index
    %78 = vector.load %arg3[%c0_104, %c0_105] : memref<1x128xf32, #tpu.memory_space<vmem>>, vector<1x128xf32>
    %79 = vector.broadcast %78 : vector<1x128xf32> to vector<256x128xf32>
    %80 = arith.mulf %77, %79 : vector<256x128xf32>
    %c0_106 = arith.constant 0 : index
    %c0_107 = arith.constant 0 : index
    %81 = vector.load %arg4[%c0_106, %c0_107] : memref<1x128xf32, #tpu.memory_space<vmem>>, vector<1x128xf32>
    %82 = vector.broadcast %81 : vector<1x128xf32> to vector<256x128xf32>
    %83 = arith.addf %80, %82 : vector<256x128xf32>
    %cst_108 = arith.constant 0.000000e+00 : f32
    %84 = vector.broadcast %cst_108 : f32 to vector<256x128xf32>
    %85 = arith.maximumf %83, %84 : vector<256x128xf32>
    %86 = vector.shape_cast %85 : vector<256x128xf32> to vector<16x16x128xf32>
    %87 = arith.truncf %86 : vector<16x16x128xf32> to vector<16x16x128xbf16>
    %c1_109 = arith.constant 1 : index
    %c1_110 = arith.constant 1 : index
    %c0_111 = arith.constant 0 : index
    %88 = vector.load %arg10[%c1_109, %c1_110, %c0_111] : memref<18x18x128xbf16, #tpu.memory_space<vmem>>, vector<16x16x128xbf16>
    tpu.vector_store %arg10[%c1_109, %c1_110, %c0_111], %87 {strides = array<i32>} : memref<18x18x128xbf16, #tpu.memory_space<vmem>>, vector<16x16x128xbf16>,
    %c0_112 = arith.constant 0 : index
    %c0_113 = arith.constant 0 : index
    %c0_114 = arith.constant 0 : index
    %89 = vector.load %arg10[%c0_112, %c0_113, %c0_114] : memref<18x18x128xbf16, #tpu.memory_space<vmem>>, vector<16x16x128xbf16>
    %90 = vector.shape_cast %89 : vector<16x16x128xbf16> to vector<256x128xbf16>
    %c0_115 = arith.constant 0 : index
    %c0_116 = arith.constant 0 : index
    %c0_117 = arith.constant 0 : index
    %91 = vector.load %arg5[%c0_115, %c0_116, %c0_117] : memref<9x128x128xbf16, #tpu.memory_space<vmem>>, vector<1x128x128xbf16>
    %92 = vector.shape_cast %91 : vector<1x128x128xbf16> to vector<128x128xbf16>
    %cst_118 = arith.constant dense<0.000000e+00> : vector<256x128xf32>
    %93 = tpu.matmul %90, %92, %cst_118 {dimension_numbers = #tpu.dot_dimension_numbers<[1], [0], [0], [1], [0, 0, 1, 1], [], []>} : vector<256x128xbf16>, vector<128x128xbf16>, vector<256x128xf32> -> vector<256x128xf32>
    %c0_119 = arith.constant 0 : index
    %c0_120 = arith.constant 0 : index
    %94 = vector.load %arg11[%c0_119, %c0_120] : memref<256x128xf32, #tpu.memory_space<vmem>>, vector<256x128xf32>
    tpu.vector_store %arg11[%c0_119, %c0_120], %93 {strides = array<i32>} : memref<256x128xf32, #tpu.memory_space<vmem>>, vector<256x128xf32>,
    %c0_121 = arith.constant 0 : index
    %c1_122 = arith.constant 1 : index
    %c0_123 = arith.constant 0 : index
    %95 = vector.load %arg10[%c0_121, %c1_122, %c0_123] : memref<18x18x128xbf16, #tpu.memory_space<vmem>>, vector<16x16x128xbf16>
    %96 = vector.shape_cast %95 : vector<16x16x128xbf16> to vector<256x128xbf16>
    %c1_124 = arith.constant 1 : index
    %c0_125 = arith.constant 0 : index
    %c0_126 = arith.constant 0 : index
    %97 = vector.load %arg5[%c1_124, %c0_125, %c0_126] : memref<9x128x128xbf16, #tpu.memory_space<vmem>>, vector<1x128x128xbf16>
    %98 = vector.shape_cast %97 : vector<1x128x128xbf16> to vector<128x128xbf16>
    %cst_127 = arith.constant dense<0.000000e+00> : vector<256x128xf32>
    %99 = tpu.matmul %96, %98, %cst_127 {dimension_numbers = #tpu.dot_dimension_numbers<[1], [0], [0], [1], [0, 0, 1, 1], [], []>} : vector<256x128xbf16>, vector<128x128xbf16>, vector<256x128xf32> -> vector<256x128xf32>
    %c0_128 = arith.constant 0 : index
    %c0_129 = arith.constant 0 : index
    %100 = vector.load %arg11[%c0_128, %c0_129] : memref<256x128xf32, #tpu.memory_space<vmem>>, vector<256x128xf32>
    %101 = arith.addf %100, %99 : vector<256x128xf32>
    %c0_130 = arith.constant 0 : index
    %c0_131 = arith.constant 0 : index
    %102 = vector.load %arg11[%c0_130, %c0_131] : memref<256x128xf32, #tpu.memory_space<vmem>>, vector<256x128xf32>
    tpu.vector_store %arg11[%c0_130, %c0_131], %101 {strides = array<i32>} : memref<256x128xf32, #tpu.memory_space<vmem>>, vector<256x128xf32>,
    %c0_132 = arith.constant 0 : index
    %c2_133 = arith.constant 2 : index
    %c0_134 = arith.constant 0 : index
    %103 = vector.load %arg10[%c0_132, %c2_133, %c0_134] : memref<18x18x128xbf16, #tpu.memory_space<vmem>>, vector<16x16x128xbf16>
    %104 = vector.shape_cast %103 : vector<16x16x128xbf16> to vector<256x128xbf16>
    %c2_135 = arith.constant 2 : index
    %c0_136 = arith.constant 0 : index
    %c0_137 = arith.constant 0 : index
    %105 = vector.load %arg5[%c2_135, %c0_136, %c0_137] : memref<9x128x128xbf16, #tpu.memory_space<vmem>>, vector<1x128x128xbf16>
    %106 = vector.shape_cast %105 : vector<1x128x128xbf16> to vector<128x128xbf16>
    %cst_138 = arith.constant dense<0.000000e+00> : vector<256x128xf32>
    %107 = tpu.matmul %104, %106, %cst_138 {dimension_numbers = #tpu.dot_dimension_numbers<[1], [0], [0], [1], [0, 0, 1, 1], [], []>} : vector<256x128xbf16>, vector<128x128xbf16>, vector<256x128xf32> -> vector<256x128xf32>
    %c0_139 = arith.constant 0 : index
    %c0_140 = arith.constant 0 : index
    %108 = vector.load %arg11[%c0_139, %c0_140] : memref<256x128xf32, #tpu.memory_space<vmem>>, vector<256x128xf32>
    %109 = arith.addf %108, %107 : vector<256x128xf32>
    %c0_141 = arith.constant 0 : index
    %c0_142 = arith.constant 0 : index
    %110 = vector.load %arg11[%c0_141, %c0_142] : memref<256x128xf32, #tpu.memory_space<vmem>>, vector<256x128xf32>
    tpu.vector_store %arg11[%c0_141, %c0_142], %109 {strides = array<i32>} : memref<256x128xf32, #tpu.memory_space<vmem>>, vector<256x128xf32>,
    %c1_143 = arith.constant 1 : index
    %c0_144 = arith.constant 0 : index
    %c0_145 = arith.constant 0 : index
    %111 = vector.load %arg10[%c1_143, %c0_144, %c0_145] : memref<18x18x128xbf16, #tpu.memory_space<vmem>>, vector<16x16x128xbf16>
    %112 = vector.shape_cast %111 : vector<16x16x128xbf16> to vector<256x128xbf16>
    %c3_146 = arith.constant 3 : index
    %c0_147 = arith.constant 0 : index
    %c0_148 = arith.constant 0 : index
    %113 = vector.load %arg5[%c3_146, %c0_147, %c0_148] : memref<9x128x128xbf16, #tpu.memory_space<vmem>>, vector<1x128x128xbf16>
    %114 = vector.shape_cast %113 : vector<1x128x128xbf16> to vector<128x128xbf16>
    %cst_149 = arith.constant dense<0.000000e+00> : vector<256x128xf32>
    %115 = tpu.matmul %112, %114, %cst_149 {dimension_numbers = #tpu.dot_dimension_numbers<[1], [0], [0], [1], [0, 0, 1, 1], [], []>} : vector<256x128xbf16>, vector<128x128xbf16>, vector<256x128xf32> -> vector<256x128xf32>
    %c0_150 = arith.constant 0 : index
    %c0_151 = arith.constant 0 : index
    %116 = vector.load %arg11[%c0_150, %c0_151] : memref<256x128xf32, #tpu.memory_space<vmem>>, vector<256x128xf32>
    %117 = arith.addf %116, %115 : vector<256x128xf32>
    %c0_152 = arith.constant 0 : index
    %c0_153 = arith.constant 0 : index
    %118 = vector.load %arg11[%c0_152, %c0_153] : memref<256x128xf32, #tpu.memory_space<vmem>>, vector<256x128xf32>
    tpu.vector_store %arg11[%c0_152, %c0_153], %117 {strides = array<i32>} : memref<256x128xf32, #tpu.memory_space<vmem>>, vector<256x128xf32>,
    %c1_154 = arith.constant 1 : index
    %c1_155 = arith.constant 1 : index
    %c0_156 = arith.constant 0 : index
    %119 = vector.load %arg10[%c1_154, %c1_155, %c0_156] : memref<18x18x128xbf16, #tpu.memory_space<vmem>>, vector<16x16x128xbf16>
    %120 = vector.shape_cast %119 : vector<16x16x128xbf16> to vector<256x128xbf16>
    %c4_157 = arith.constant 4 : index
    %c0_158 = arith.constant 0 : index
    %c0_159 = arith.constant 0 : index
    %121 = vector.load %arg5[%c4_157, %c0_158, %c0_159] : memref<9x128x128xbf16, #tpu.memory_space<vmem>>, vector<1x128x128xbf16>
    %122 = vector.shape_cast %121 : vector<1x128x128xbf16> to vector<128x128xbf16>
    %cst_160 = arith.constant dense<0.000000e+00> : vector<256x128xf32>
    %123 = tpu.matmul %120, %122, %cst_160 {dimension_numbers = #tpu.dot_dimension_numbers<[1], [0], [0], [1], [0, 0, 1, 1], [], []>} : vector<256x128xbf16>, vector<128x128xbf16>, vector<256x128xf32> -> vector<256x128xf32>
    %c0_161 = arith.constant 0 : index
    %c0_162 = arith.constant 0 : index
    %124 = vector.load %arg11[%c0_161, %c0_162] : memref<256x128xf32, #tpu.memory_space<vmem>>, vector<256x128xf32>
    %125 = arith.addf %124, %123 : vector<256x128xf32>
    %c0_163 = arith.constant 0 : index
    %c0_164 = arith.constant 0 : index
    %126 = vector.load %arg11[%c0_163, %c0_164] : memref<256x128xf32, #tpu.memory_space<vmem>>, vector<256x128xf32>
    tpu.vector_store %arg11[%c0_163, %c0_164], %125 {strides = array<i32>} : memref<256x128xf32, #tpu.memory_space<vmem>>, vector<256x128xf32>,
    %c1_165 = arith.constant 1 : index
    %c2_166 = arith.constant 2 : index
    %c0_167 = arith.constant 0 : index
    %127 = vector.load %arg10[%c1_165, %c2_166, %c0_167] : memref<18x18x128xbf16, #tpu.memory_space<vmem>>, vector<16x16x128xbf16>
    %128 = vector.shape_cast %127 : vector<16x16x128xbf16> to vector<256x128xbf16>
    %c5_168 = arith.constant 5 : index
    %c0_169 = arith.constant 0 : index
    %c0_170 = arith.constant 0 : index
    %129 = vector.load %arg5[%c5_168, %c0_169, %c0_170] : memref<9x128x128xbf16, #tpu.memory_space<vmem>>, vector<1x128x128xbf16>
    %130 = vector.shape_cast %129 : vector<1x128x128xbf16> to vector<128x128xbf16>
    %cst_171 = arith.constant dense<0.000000e+00> : vector<256x128xf32>
    %131 = tpu.matmul %128, %130, %cst_171 {dimension_numbers = #tpu.dot_dimension_numbers<[1], [0], [0], [1], [0, 0, 1, 1], [], []>} : vector<256x128xbf16>, vector<128x128xbf16>, vector<256x128xf32> -> vector<256x128xf32>
    %c0_172 = arith.constant 0 : index
    %c0_173 = arith.constant 0 : index
    %132 = vector.load %arg11[%c0_172, %c0_173] : memref<256x128xf32, #tpu.memory_space<vmem>>, vector<256x128xf32>
    %133 = arith.addf %132, %131 : vector<256x128xf32>
    %c0_174 = arith.constant 0 : index
    %c0_175 = arith.constant 0 : index
    %134 = vector.load %arg11[%c0_174, %c0_175] : memref<256x128xf32, #tpu.memory_space<vmem>>, vector<256x128xf32>
    tpu.vector_store %arg11[%c0_174, %c0_175], %133 {strides = array<i32>} : memref<256x128xf32, #tpu.memory_space<vmem>>, vector<256x128xf32>,
    %c2_176 = arith.constant 2 : index
    %c0_177 = arith.constant 0 : index
    %c0_178 = arith.constant 0 : index
    %135 = vector.load %arg10[%c2_176, %c0_177, %c0_178] : memref<18x18x128xbf16, #tpu.memory_space<vmem>>, vector<16x16x128xbf16>
    %136 = vector.shape_cast %135 : vector<16x16x128xbf16> to vector<256x128xbf16>
    %c6_179 = arith.constant 6 : index
    %c0_180 = arith.constant 0 : index
    %c0_181 = arith.constant 0 : index
    %137 = vector.load %arg5[%c6_179, %c0_180, %c0_181] : memref<9x128x128xbf16, #tpu.memory_space<vmem>>, vector<1x128x128xbf16>
    %138 = vector.shape_cast %137 : vector<1x128x128xbf16> to vector<128x128xbf16>
    %cst_182 = arith.constant dense<0.000000e+00> : vector<256x128xf32>
    %139 = tpu.matmul %136, %138, %cst_182 {dimension_numbers = #tpu.dot_dimension_numbers<[1], [0], [0], [1], [0, 0, 1, 1], [], []>} : vector<256x128xbf16>, vector<128x128xbf16>, vector<256x128xf32> -> vector<256x128xf32>
    %c0_183 = arith.constant 0 : index
    %c0_184 = arith.constant 0 : index
    %140 = vector.load %arg11[%c0_183, %c0_184] : memref<256x128xf32, #tpu.memory_space<vmem>>, vector<256x128xf32>
    %141 = arith.addf %140, %139 : vector<256x128xf32>
    %c0_185 = arith.constant 0 : index
    %c0_186 = arith.constant 0 : index
    %142 = vector.load %arg11[%c0_185, %c0_186] : memref<256x128xf32, #tpu.memory_space<vmem>>, vector<256x128xf32>
    tpu.vector_store %arg11[%c0_185, %c0_186], %141 {strides = array<i32>} : memref<256x128xf32, #tpu.memory_space<vmem>>, vector<256x128xf32>,
    %c2_187 = arith.constant 2 : index
    %c1_188 = arith.constant 1 : index
    %c0_189 = arith.constant 0 : index
    %143 = vector.load %arg10[%c2_187, %c1_188, %c0_189] : memref<18x18x128xbf16, #tpu.memory_space<vmem>>, vector<16x16x128xbf16>
    %144 = vector.shape_cast %143 : vector<16x16x128xbf16> to vector<256x128xbf16>
    %c7_190 = arith.constant 7 : index
    %c0_191 = arith.constant 0 : index
    %c0_192 = arith.constant 0 : index
    %145 = vector.load %arg5[%c7_190, %c0_191, %c0_192] : memref<9x128x128xbf16, #tpu.memory_space<vmem>>, vector<1x128x128xbf16>
    %146 = vector.shape_cast %145 : vector<1x128x128xbf16> to vector<128x128xbf16>
    %cst_193 = arith.constant dense<0.000000e+00> : vector<256x128xf32>
    %147 = tpu.matmul %144, %146, %cst_193 {dimension_numbers = #tpu.dot_dimension_numbers<[1], [0], [0], [1], [0, 0, 1, 1], [], []>} : vector<256x128xbf16>, vector<128x128xbf16>, vector<256x128xf32> -> vector<256x128xf32>
    %c0_194 = arith.constant 0 : index
    %c0_195 = arith.constant 0 : index
    %148 = vector.load %arg11[%c0_194, %c0_195] : memref<256x128xf32, #tpu.memory_space<vmem>>, vector<256x128xf32>
    %149 = arith.addf %148, %147 : vector<256x128xf32>
    %c0_196 = arith.constant 0 : index
    %c0_197 = arith.constant 0 : index
    %150 = vector.load %arg11[%c0_196, %c0_197] : memref<256x128xf32, #tpu.memory_space<vmem>>, vector<256x128xf32>
    tpu.vector_store %arg11[%c0_196, %c0_197], %149 {strides = array<i32>} : memref<256x128xf32, #tpu.memory_space<vmem>>, vector<256x128xf32>,
    %c2_198 = arith.constant 2 : index
    %c2_199 = arith.constant 2 : index
    %c0_200 = arith.constant 0 : index
    %151 = vector.load %arg10[%c2_198, %c2_199, %c0_200] : memref<18x18x128xbf16, #tpu.memory_space<vmem>>, vector<16x16x128xbf16>
    %152 = vector.shape_cast %151 : vector<16x16x128xbf16> to vector<256x128xbf16>
    %c8_201 = arith.constant 8 : index
    %c0_202 = arith.constant 0 : index
    %c0_203 = arith.constant 0 : index
    %153 = vector.load %arg5[%c8_201, %c0_202, %c0_203] : memref<9x128x128xbf16, #tpu.memory_space<vmem>>, vector<1x128x128xbf16>
    %154 = vector.shape_cast %153 : vector<1x128x128xbf16> to vector<128x128xbf16>
    %cst_204 = arith.constant dense<0.000000e+00> : vector<256x128xf32>
    %155 = tpu.matmul %152, %154, %cst_204 {dimension_numbers = #tpu.dot_dimension_numbers<[1], [0], [0], [1], [0, 0, 1, 1], [], []>} : vector<256x128xbf16>, vector<128x128xbf16>, vector<256x128xf32> -> vector<256x128xf32>
    %c0_205 = arith.constant 0 : index
    %c0_206 = arith.constant 0 : index
    %156 = vector.load %arg11[%c0_205, %c0_206] : memref<256x128xf32, #tpu.memory_space<vmem>>, vector<256x128xf32>
    %157 = arith.addf %156, %155 : vector<256x128xf32>
    %c0_207 = arith.constant 0 : index
    %c0_208 = arith.constant 0 : index
    %158 = vector.load %arg11[%c0_207, %c0_208] : memref<256x128xf32, #tpu.memory_space<vmem>>, vector<256x128xf32>
    tpu.vector_store %arg11[%c0_207, %c0_208], %157 {strides = array<i32>} : memref<256x128xf32, #tpu.memory_space<vmem>>, vector<256x128xf32>,
    %c0_209 = arith.constant 0 : index
    %c0_210 = arith.constant 0 : index
    %159 = vector.load %arg11[%c0_209, %c0_210] : memref<256x128xf32, #tpu.memory_space<vmem>>, vector<256x128xf32>
    %c0_211 = arith.constant 0 : index
    %c0_212 = arith.constant 0 : index
    %160 = vector.load %arg6[%c0_211, %c0_212] : memref<1x128xf32, #tpu.memory_space<vmem>>, vector<1x128xf32>
    %161 = vector.broadcast %160 : vector<1x128xf32> to vector<256x128xf32>
    %162 = arith.mulf %159, %161 : vector<256x128xf32>
    %c0_213 = arith.constant 0 : index
    %c0_214 = arith.constant 0 : index
    %163 = vector.load %arg7[%c0_213, %c0_214] : memref<1x128xf32, #tpu.memory_space<vmem>>, vector<1x128xf32>
    %164 = vector.broadcast %163 : vector<1x128xf32> to vector<256x128xf32>
    %165 = arith.addf %162, %164 : vector<256x128xf32>
    %c1_215 = arith.constant 1 : index
    %c1_216 = arith.constant 1 : index
    %c0_217 = arith.constant 0 : index
    %166 = vector.load %arg9[%c1_215, %c1_216, %c0_217] : memref<18x18x128xbf16, #tpu.memory_space<vmem>>, vector<16x16x128xbf16>
    %167 = vector.shape_cast %166 : vector<16x16x128xbf16> to vector<256x128xbf16>
    %168 = arith.extf %167 : vector<256x128xbf16> to vector<256x128xf32>
    %169 = arith.addf %165, %168 : vector<256x128xf32>
    %cst_218 = arith.constant 0.000000e+00 : f32
    %170 = vector.broadcast %cst_218 : f32 to vector<256x128xf32>
    %171 = arith.maximumf %169, %170 : vector<256x128xf32>
    %172 = vector.shape_cast %171 : vector<256x128xf32> to vector<1x16x16x128xf32>
    %c0_219 = arith.constant 0 : index
    %c0_220 = arith.constant 0 : index
    %c0_221 = arith.constant 0 : index
    %c0_222 = arith.constant 0 : index
    %173 = vector.load %arg8[%c0_219, %c0_220, %c0_221, %c0_222] : memref<1x16x16x128xf32, #tpu.memory_space<vmem>>, vector<1x16x16x128xf32>
    tpu.vector_store %arg8[%c0_219, %c0_220, %c0_221, %c0_222], %172 {strides = array<i32>} : memref<1x16x16x128xf32, #tpu.memory_space<vmem>>, vector<1x16x16x128xf32>,
    return
  }
  func.func @transform_0(%arg0: i32) -> (i32, i32, i32, i32) {
    %c0_i32 = arith.constant 0 : i32
    %c0_i32_0 = arith.constant 0 : i32
    %c0_i32_1 = arith.constant 0 : i32
    %c0_i32_2 = arith.constant 0 : i32
    return %arg0, %c0_i32, %c0_i32_0, %c0_i32_1 : i32, i32, i32, i32
  }
  func.func @transform_1(%arg0: i32) -> (i32, i32, i32) {
    %c0_i32 = arith.constant 0 : i32
    %c0_i32_0 = arith.constant 0 : i32
    %c0_i32_1 = arith.constant 0 : i32
    %c0_i32_2 = arith.constant 0 : i32
    return %c0_i32, %c0_i32_0, %c0_i32_1 : i32, i32, i32
  }
  func.func @transform_2(%arg0: i32) -> (i32, i32) {
    %c0_i32 = arith.constant 0 : i32
    %c0_i32_0 = arith.constant 0 : i32
    %c0_i32_1 = arith.constant 0 : i32
    return %c0_i32, %c0_i32_0 : i32, i32
  }
  func.func @transform_3(%arg0: i32) -> (i32, i32) {
    %c0_i32 = arith.constant 0 : i32
    %c0_i32_0 = arith.constant 0 : i32
    %c0_i32_1 = arith.constant 0 : i32
    return %c0_i32, %c0_i32_0 : i32, i32
  }
  func.func @transform_4(%arg0: i32) -> (i32, i32, i32) {
    %c0_i32 = arith.constant 0 : i32
    %c0_i32_0 = arith.constant 0 : i32
    %c0_i32_1 = arith.constant 0 : i32
    %c0_i32_2 = arith.constant 0 : i32
    return %c0_i32, %c0_i32_0, %c0_i32_1 : i32, i32, i32
  }
  func.func @transform_5(%arg0: i32) -> (i32, i32) {
    %c0_i32 = arith.constant 0 : i32
    %c0_i32_0 = arith.constant 0 : i32
    %c0_i32_1 = arith.constant 0 : i32
    return %c0_i32, %c0_i32_0 : i32, i32
  }
  func.func @transform_6(%arg0: i32) -> (i32, i32) {
    %c0_i32 = arith.constant 0 : i32
    %c0_i32_0 = arith.constant 0 : i32
    %c0_i32_1 = arith.constant 0 : i32
    return %c0_i32, %c0_i32_0 : i32, i32
  }
  func.func @transform_7(%arg0: i32) -> (i32, i32, i32, i32) {
    %c0_i32 = arith.constant 0 : i32
    %c0_i32_0 = arith.constant 0 : i32
    %c0_i32_1 = arith.constant 0 : i32
    %c0_i32_2 = arith.constant 0 : i32
    return %arg0, %c0_i32, %c0_i32_0, %c0_i32_1 : i32, i32, i32, i32
  }
}

</mosaic_0001>

<bundles_post_ra>
// kernel: tpu_custom_call.1
= control target key start
LH: loop header
LB: loop body
LE: loop exit
PB: predicated region body
PF: predicated region fallthrough
CT: control target
= control target key end

     0   :  { %s19859_s0 = inlined_call_operand.hbm [shape: bf16[2,16,16,128], index: 0, kind: input, shape index: {}]   ;;  %s19860_s1 = inlined_call_operand.hbm [shape: bf16[9,128,128], index: 1, kind: input, shape index: {}]   ;;  %s19861_s2 = inlined_call_operand.vmem [shape: f32[1,128], index: 2, kind: input, shape index: {}]   ;;  %s19862_s3 = inlined_call_operand.vmem [shape: f32[1,128], index: 3, kind: input, shape index: {}]   ;;  %s19863_s4 = inlined_call_operand.hbm [shape: bf16[9,128,128], index: 4, kind: input, shape index: {}]   ;;  %s19864_s5 = inlined_call_operand.vmem [shape: f32[1,128], index: 5, kind: input, shape index: {}]   ;;  %s19865_s6 = inlined_call_operand.vmem [shape: f32[1,128], index: 6, kind: input, shape index: {}]   ;;  %s19866_s7 = inlined_call_operand.hbm [shape: f32[2,16,16,128], index: 7, kind: output, shape index: {}]  }
   0x1   :  { %19884 = sst [smem:[#allocation87_spill]] %s19860_s1 }
   0x2   :  { %12 = vsyncpa [#allocation6], 0 }
   0x3   :  { %14 = vsyncpa [#allocation6 + $0x1], 0 }
   0x4   :  { %15 = vsyncpa [#allocation9], 0 }
   0x5   :  { %16 = vsyncpa [#allocation7], 0 }
   0x6   :  { %18 = vsyncpa [#allocation7 + $0x1], 0  ;;  %s15863_s24 = smov 0   ;;  %s15865_s25 = smov 0  }
   0x7   :  { %s15867_s26 = smov 0   ;;  %s15869_s27 = smov 0  }
   0x8 LB: > { %s15884_s28 = sadd.s32 4294967295, %s15812_s27   ;;  %s13437_s29 = sadd.s32 4294967294, %s15812_s27   ;;  %s15812_s27 = sphi %s15869_s27, %s20256_s27   ;;  %s15808_s26 = sphi %s15867_s26, %s20255_s26   ;;  %s15804_s25 = sphi %s15865_s25, %s20254_s25   ;;  %s15800_s24 = sphi %s15863_s24, %s20253_s24  }
   0x9   : > { %p44_p0 = scmp.ne.s32.totalorder %s15804_s25, %s15800_s24  ;;  %p19868_p1 = scmp.eq.s32.totalorder %s15884_s28, 0 }
   0xa   : > { %p194_p2 = scmp.eq.s32.totalorder %s15884_s28, 1  ;;  %p200_p3 = scmp.eq.s32.totalorder %s13437_s29, 1 }
   0xb   : > { %p15893_p4 = por %p19868_p1, %p44_p0  ;;  %p13438_p5 = scmp.ge.s32.totalorder %s15812_s27, 1 }
   0xc   : > { %p15898_p6 = por %p200_p3, %p44_p0  ;;  %p207_p7 = scmp.lt.s32.totalorder %s15812_s27, 3 }
   0xd   : > { %s19885_s30 = scalar_select %p15893_p4, 1, 0 }
   0xe   : > { %s19886_s8 = scalar_select %p15898_p6, 1, 0 }
   0xf   : > { %p15903_p8 = pnand %p13438_p5, %p207_p7  ;;  %s15814_s10 = smov [#allocation8]  }
  0x10   : > { %s219_s11 = sshll.u32 %s15814_s10, 4  ;;  %s15815_s13 = smov [#allocation10]   ;;  %s220_s11 = int_to_ptr.vmem [resolvable:$true] %s219_s11 }
  0x11   : > { %s19887_s9 = scalar_select %p15903_p8, 1, 0 }
  0x12   : > { %p15361_p9 = pneg %p15903_p8  ;;  %s238_s14 = sshll.u32 %s15815_s13, 4  ;;  %s239_s14 = int_to_ptr.vmem [resolvable:$true] %s238_s14 }
  0x13   : > { %s15675_s15 = scalar_lea.vmem %s220_s11, 9216  ;;  %p15683_p5 = scmp.lt.s32.totalorder %s220_s11, %s220_s11 }
  0x14   : > { %p15912_p11 = pnand %p15361_p9, %p19868_p1  ;;  %p15676_p13 = scmp.ne.s32.totalorder %s220_s11, %s15675_s15 }
  0x15   : > { %p15684_p7 = scmp.lt.s32.totalorder %s15675_s15, %s15675_s15 }
  0x16   : > { %p15666_p12 = pneg %p15912_p11 }
  0x17   : > { %p15685_p10 = por %p15684_p7, %p15683_p5 }
  0x18   : > { %p15678_p0 = pnand %p15676_p13, %p15666_p12 }
  0x1a   : > { %p15679_p3 = pneg %p15678_p0 }
  0x1c   : > { %p15686_p9 = pnand %p15685_p10, %p15679_p3 }
  0x1e   : > { %15689 = shalt.err (!%p15686_p9)
}
  0x1f   : > { %s19867_s16 = smov 64   ;;  %s19869_s17 = smov 4  }
  0x20   : > { %s19889_s1 = sld [smem:[#allocation87_spill]]  ;;  %s15701_s20 = scalar_lea.vmem %s239_s14, 9216 }
  0x21   : > { %p15702_p13 = scmp.ne.s32.totalorder %s239_s14, %s15701_s20  ;;  %p15709_p10 = scmp.lt.s32.totalorder %s239_s14, %s239_s14 }
  0x22   : > { %p15710_p3 = scmp.lt.s32.totalorder %s15701_s20, %s15701_s20 }
  0x23   : > { %p15704_p0 = pnand %p15702_p13, %p15666_p12 }
  0x24   : > { %p15711_p7 = por %p15710_p3, %p15709_p10 }
  0x25   : > { %p15705_p5 = pneg %p15704_p0 }
  0x26   : > { %15364 = dma.hbm_to_vmem [thread:$0]  (!%p15912_p11), %s19889_s1, 9216, %s220_s11, [#allocation9], %s19867_s16, %s19867_s16, %s19869_s17  }
  0x27   : > { %p15712_p9 = pnand %p15711_p7, %p15705_p5 }
  0x29   : > { %15715 = shalt.err (!%p15712_p9)
}
  0x2a   : > { %15367 = dma.hbm_to_vmem [thread:$0]  (!%p15912_p11), %s19863_s4, 9216, %s239_s14, [#allocation9], %s19867_s16, %s19867_s16, %s19869_s17  }
  0x2b   : > { %s15941_s23 = sadd.s32 1, %s15812_s27   ;;  %s31_s29 = sadd.s32 1, %s15808_s26 }
  0x2c   : > { %s28_s10 = ssub.s32 %s15812_s27, %s15941_s23  ;;  %p38_p12 = scmp.ne.s32.totalorder %s15808_s26, %s15804_s25 }
  0x2d   : > { %p29_p13 = scmp.eq.s32.totalorder %s28_s10, 0  ;;  %p39_p0 = scmp.eq.s32.totalorder %s15812_s27, 0 }
  0x2e   : > { %p15951_p5 = por %p194_p2, %p38_p12  ;;  %p15378_p10 = scmp.lt.s32.totalorder %s15812_s27, 2 }
  0x2f   : > { %s15957_s12 = scalar_select %p29_p13, %s15808_s26, %s31_s29  }
  0x30   : > { %s19890_s11 = scalar_select %p15951_p5, 1, 0 }
  0x31   : > { %p40_p3 = por %p39_p0, %p38_p12  ;;  %s258_s13 = sand.u32 1, %s15808_s26  }
  0x32   : > { %s13442_s15 = sshll.u32 %s258_s13, 7  ;;  %s14019_s14 = sshll.u32 %s15812_s27, 11 }
  0x33   : > { %s15964_s20 = scalar_lea.hbm %s19859_s0, %s14019_s14  ;;  %s262_s21 = scalar_lea.vmem [#allocation5], %s13442_s15 }
  0x34   : > { %s269_s22 = sshll.u32 %s262_s21, 4  ;;  %p15968_p2 = pnand %p15378_p10, %p40_p3  ;;  %s15966_s22 = int_to_ptr.vmem [resolvable:$true] %s269_s22 }
  0x35   : > { %s15972_s29 = scalar_lea.sflag [#allocation6], %s258_s13  ;;  %s15716_s16 = scalar_lea.hbm %s15964_s20, 2048 }
  0x36   : > { %p15717_p11 = scmp.ne.s32.totalorder %s15964_s20, %s15716_s16  ;;  %p15718_p7 = pneg %p15968_p2 }
  0x37   : > { %s15721_s15 = scalar_lea.hbm %s19859_s0, 4096  ;;  %p15722_p13 = scmp.lt.s32.totalorder %s15964_s20, %s19859_s0 }
  0x38   : > { %p15719_p9 = pnand %p15718_p7, %p15717_p11  ;;  %p15723_p0 = scmp.lt.s32.totalorder %s15721_s15, %s15716_s16 }
  0x3a   : > { %p15720_p12 = pneg %p15719_p9  ;;  %p15724_p10 = por %p15723_p0, %p15722_p13 }
  0x3c   : > { %p15725_p3 = pnand %p15724_p10, %p15720_p12 }
  0x3e   : > { %15728 = shalt.err (!%p15725_p3)
}
  0x3f   : > { %s15729_s13 = scalar_lea.vmem %s15966_s22, 2048  ;;  %s15818_s17 = smov [#allocation5]  }
  0x40   : > { %p15730_p1 = scmp.ne.s32.totalorder %s15966_s22, %s15729_s13  ;;  %s15734_s1 = sshll.u32 %s15818_s17, 4  ;;  %s15735_s1 = int_to_ptr.vmem [resolvable:$false] %s15734_s1 }
  0x41   : > { %s15736_s14 = scalar_lea.vmem %s15735_s1, 4096  ;;  %p15737_p9 = scmp.lt.s32.totalorder %s15966_s22, %s15735_s1 }
  0x42   : > { %p15732_p6 = pnand %p15730_p1, %p15718_p7  ;;  %p15738_p5 = scmp.lt.s32.totalorder %s15736_s14, %s15729_s13 }
  0x44   : > { %p15733_p11 = pneg %p15732_p6  ;;  %p15739_p4 = por %p15738_p5, %p15737_p9 }
  0x46   : > { %p15740_p8 = pnand %p15739_p4, %p15733_p11 }
  0x48   : > { %15743 = shalt.err (!%p15740_p8)
}
  0x49   : > { %s19892_s16 = smov 4   ;;  %s19893_s18 = smov 64  }
  0x4a   : > { %15371 = dma.hbm_to_vmem [thread:$0]  (!%p15968_p2), %s15964_s20, 2048, %s15966_s22, %s15972_s29, %s19893_s18, %s19893_s18, %s19892_s16  }
  0x4b   : > { %p19894_p1 = scmp.ne.s32.totalorder %s19887_s9, 0 }
  0x4d   : > { %281 = sbr.rel (%p19894_p1) target bundleno = 1324 (0x52c), region = 48 }
  0x52   : > { %s15999_s17 = sand.u32 1, %s15804_s25   ;;  %p19895_p4 = scmp.ne.s32.totalorder %s19885_s30, 0 }
  0x53   : > { %s13446_s1 = sshll.u32 %s15999_s17, 7  ;;  %s284_s15 = scalar_lea.sflag [#allocation6], %s15999_s17 }
  0x54   : > { %s16003_s19 = scalar_lea.vmem [#allocation5], %s13446_s1 }
  0x55   : > { %15787 = dma.done.wait (%p19895_p4), %s284_s15, 2048  }
  0x56   : > { %15789 = vsyncadd (%p19895_p4), %s284_s15, 4294965248  ;;  %p19896_p6 = scmp.eq.s32.totalorder %s15884_s28, 0 }
  0x58   : > { %15791 = dma.done.wait (%p19896_p6), [#allocation9], 18432   ;;  %p19897_p8 = pmov %p19896_p6 }
  0x59   : > { %v15819_v0 = vmov 0   ;;  %v15421_v1 = vld [vmem:[#allocation8 + $0x38] sm:$0xff]   ;;  %v15423_v3 = vld [vmem:[#allocation8 + $0x30] sm:$0xff]   ;;  %v15425_v5 = vld [vmem:[#allocation8 + $0x28] sm:$0xff]   ;;  %vm1341_vm0 = vsmask.f32 3328 }
  0x5a   : > { %15793 = vsyncadd (%p19897_p8), [#allocation9], 4294948864  ;;  %327 = vst [vmem:[#allocation2] sm:$0xf] %v15819_v0  ;;  %v15422_v2 = vld [vmem:[#allocation8 + $0x78] sm:$0xff]   ;;  %14485 = vmatprep.subr.bf16.mxu0 %v15421_v1  ;;  %v15424_v4 = vld [vmem:[#allocation8 + $0x70] sm:$0xff]  }
  0x5b   : > { %328 = vst [vmem:[#allocation2 + $0x4] sm:$0xf] %v15819_v0  ;;  %329 = vst [vmem:[#allocation2 + $0x8] sm:$0x1] %v15819_v0  ;;  %14533 = vmatprep.subr.bf16.mxu1 %v15422_v2  ;;  %14486 = vmatpush3.bf16.msra.mxu0 %v15421_v1  ;;  %v15426_v6 = vld [vmem:[#allocation8 + $0x68] sm:$0xff]   ;;  %v15427_v7 = vld [vmem:[#allocation8 + $0x20] sm:$0xff]  }
  0x5c   : > { %330 = vst [vmem:[#allocation2 + $0xc] sm:$0xf] %v15819_v0  ;;  %331 = vst [vmem:[#allocation2 + $0x10] sm:$0xf] %v15819_v0  ;;  %14534 = vmatpush3.bf16.msra.mxu1 %v15422_v2  ;;  %14487 = vmatprep.subr.bf16.mxu0 %v15423_v3  ;;  %v15428_v8 = vld [vmem:[#allocation8 + $0x60] sm:$0xff]   ;;  %v15429_v9 = vld [vmem:[#allocation8 + $0x18] sm:$0xff]  }
  0x5d   : > { %332 = vst [vmem:[#allocation2 + $0x14] sm:$0x1] %v15819_v0  ;;  %333 = vst [vmem:[#allocation2 + $0x18] sm:$0xf] %v15819_v0  ;;  %14535 = vmatprep.subr.bf16.mxu1 %v15424_v4  ;;  %vm1342_vm1 = vsmask.f32 7440 }
  0x5e   : > { %334 = vst [vmem:[#allocation2 + $0x1c] sm:$0xf] %v15819_v0  ;;  %335 = vst [vmem:[#allocation2 + $0x20] sm:$0x1] %v15819_v0  ;;  %vm792_vm2 = vsmask.f32 7938 }
  0x5f   : > { %336 = vst [vmem:[#allocation2 + $0x24] sm:$0xf] %v15819_v0  ;;  %337 = vst [vmem:[#allocation2 + $0x28] sm:$0xf] %v15819_v0  ;;  %14488 = vmatpush3.bf16.msra.mxu0 %v15423_v3  ;;  %vm467_vm3 = vsmask.f32 256 }
  0x60   : > { %338 = vst [vmem:[#allocation2 + $0x2c] sm:$0x1] %v15819_v0  ;;  %339 = vst [vmem:[#allocation2 + $0x30] sm:$0xf] %v15819_v0  ;;  %14536 = vmatpush3.bf16.msra.mxu1 %v15424_v4  ;;  %14489 = vmatprep.subr.bf16.mxu0 %v15425_v5  ;;  %vm468_vm4 = vsmask.f32 4368 }
  0x61   : > { %340 = vst [vmem:[#allocation2 + $0x34] sm:$0xf] %v15819_v0  ;;  %341 = vst [vmem:[#allocation2 + $0x38] sm:$0x1] %v15819_v0  ;;  %14537 = vmatprep.subr.bf16.mxu1 %v15426_v6  ;;  %v15430_v10 = vld [vmem:[#allocation8 + $0x58] sm:$0xff]   ;;  %v15431_v11 = vld [vmem:[#allocation8 + $0x10] sm:$0xff]  }
  0x62   : > { %342 = vst [vmem:[#allocation2 + $0x3c] sm:$0xf] %v15819_v0  ;;  %343 = vst [vmem:[#allocation2 + $0x40] sm:$0xf] %v15819_v0  ;;  %v15432_v12 = vld [vmem:[#allocation8 + $0x50] sm:$0xff]   ;;  %vm791_vm5 = vcmask 1043456  }
  0x63   : > { %344 = vst [vmem:[#allocation2 + $0x44] sm:$0x1] %v15819_v0  ;;  %345 = vst [vmem:[#allocation2 + $0x48] sm:$0xf] %v15819_v0  ;;  %14490 = vmatpush3.bf16.msra.mxu0 %v15425_v5  ;;  %v15437_v13 = vld [vmem:[#allocation2] sm:$0xff]   ;;  %vm798_vm6 = vcmask 1040384  }
  0x64   : > { %346 = vst [vmem:[#allocation2 + $0x4c] sm:$0xf] %v15819_v0  ;;  %347 = vst [vmem:[#allocation2 + $0x50] sm:$0x1] %v15819_v0  ;;  %14538 = vmatpush3.bf16.msra.mxu1 %v15426_v6  ;;  %14491 = vmatprep.subr.bf16.mxu0 %v15427_v7  ;;  %v1293_v14 = vld [vmem:[#allocation2] sm:$0xf] }
  0x65   : > { %348 = vst [vmem:[#allocation2 + $0x54] sm:$0xf] %v15819_v0  ;;  %349 = vst [vmem:[#allocation2 + $0x58] sm:$0xf] %v15819_v0  ;;  %14539 = vmatprep.subr.bf16.mxu1 %v15428_v8  ;;  %v1294_v15 = vld [vmem:[#allocation2 + $0x4] sm:$0xf]  ;;  %14501 = vmatprep.mubr.bf16.mxu0 %v15437_v13 }
  0x66   : > { %350 = vst [vmem:[#allocation2 + $0x5c] sm:$0x1] %v15819_v0  ;;  %351 = vst [vmem:[#allocation2 + $0x60] sm:$0xf] %v15819_v0  ;;  %v1295_v16 = vld [vmem:[#allocation2 + $0x8] sm:$0x1] }
  0x67   : > { %352 = vst [vmem:[#allocation2 + $0x64] sm:$0xf] %v15819_v0  ;;  %353 = vst [vmem:[#allocation2 + $0x68] sm:$0x1] %v15819_v0  ;;  %14492 = vmatpush3.bf16.msra.mxu0 %v15427_v7  ;;  %v1345_v17 = vshrl.u32 %v1293_v14, 16  ;;  %v1348_v18 = vshll.u32 %v1293_v14, 16 }
  0x68   : > { %354 = vst [vmem:[#allocation2 + $0x6c] sm:$0xf] %v15819_v0  ;;  %355 = vst [vmem:[#allocation2 + $0x70] sm:$0xf] %v15819_v0  ;;  %14540 = vmatpush3.bf16.msra.mxu1 %v15428_v8  ;;  %14493 = vmatprep.subr.bf16.mxu0 %v15429_v9  ;;  %v1354_v19 = vshll.u32 %v1294_v15, 16  ;;  %v1358_v20 = vshrl.u32 %v1294_v15, 16 }
  0x69   : > { %356 = vst [vmem:[#allocation2 + $0x74] sm:$0x1] %v15819_v0  ;;  %357 = vst [vmem:[#allocation2 + $0x78] sm:$0xf] %v15819_v0  ;;  %14541 = vmatprep.subr.bf16.mxu1 %v15430_v10  ;;  %v435_v21 = vld [vmem:[%s16003_s19] sm:$0xf] }
  0x6a   : > { %358 = vst [vmem:[#allocation2 + $0x7c] sm:$0xf] %v15819_v0  ;;  %359 = vst [vmem:[#allocation2 + $0x80] sm:$0x1] %v15819_v0  ;;  %v1364_v22 = vshll.u32 %v1295_v16, 16  ;;  %v471_v24 = vshrl.u32 %v435_v21, 16 }
  0x6b   : > { %360 = vst [vmem:[#allocation2 + $0x84] sm:$0xf] %v15819_v0  ;;  %361 = vst [vmem:[#allocation2 + $0x88] sm:$0xf] %v15819_v0  ;;  %14494 = vmatpush3.bf16.msra.mxu0 %v15429_v9  ;;  %v436_v23 = vld [vmem:[%s16003_s19 + $0x4] sm:$0xf] }
  0x6c   : > { %362 = vst [vmem:[#allocation2 + $0x8c] sm:$0x1] %v15819_v0  ;;  %363 = vst [vmem:[#allocation2 + $0x90] sm:$0xf] %v15819_v0  ;;  %v474_v25 = vshll.u32 %v435_v21, 16  ;;  %14542 = vmatpush3.bf16.msra.mxu1 %v15430_v10  ;;  %14495 = vmatprep.subr.bf16.mxu0 %v15431_v11  ;;  %v15433_v26 = vld [vmem:[#allocation8 + $0x8] sm:$0xff]  }
  0x6d   : > { %364 = vst [vmem:[#allocation2 + $0x94] sm:$0xf] %v15819_v0  ;;  %365 = vst [vmem:[#allocation2 + $0x98] sm:$0x1] %v15819_v0  ;;  %v15434_v27 = vld [vmem:[#allocation8 + $0x48] sm:$0xff]   ;;  %v19898_v28 = vmov 0  ;;  %14543 = vmatprep.subr.bf16.mxu1 %v15432_v12 }
  0x6e   : > { %366 = vst [vmem:[#allocation2 + $0x9c] sm:$0xf] %v15819_v0  ;;  %367 = vst [vmem:[#allocation2 + $0xa0] sm:$0xf] %v15819_v0  ;;  %v1347_v29 = vrot.slane %v1345_v17, 4  ;;  %v1350_v30 = vrot.slane %v1348_v18, 5 }
  0x6f   : > { %368 = vst [vmem:[#allocation2 + $0xa4] sm:$0x1] %v15819_v0  ;;  %369 = vst [vmem:[#allocation2 + $0xa8] sm:$0xf] %v15819_v0  ;;  %v1356_v31 = vrot.slane %v1354_v19, 5  ;;  %v1360_v32 = vrot.slane %v1358_v20, 4  ;;  %14496 = vmatpush3.bf16.msra.mxu0 %v15431_v11 }
  0x70   : > { %370 = vst [vmem:[#allocation2 + $0xac] sm:$0xf] %v15819_v0  ;;  %371 = vst [vmem:[#allocation2 + $0xb0] sm:$0x1] %v15819_v0  ;;  %v1366_v33 = vrot.slane %v1364_v22, 5  ;;  %v473_v34 = vrot.slane %v471_v24, 7  ;;  %v1351_v39 = vor.u32 %v1350_v30, %v1347_v29  ;;  %14544 = vmatpush3.bf16.msra.mxu1 %v15432_v12  ;;  %14497 = vmatprep.subr.bf16.mxu0 %v15433_v26 }
  0x71   : > { %372 = vst [vmem:[#allocation2 + $0xb4] sm:$0xf] %v15819_v0  ;;  %373 = vst [vmem:[#allocation2 + $0xb8] sm:$0xf] %v15819_v0  ;;  %v479_v35 = vshrl.u32 %v436_v23, 16  ;;  %v482_v36 = vshll.u32 %v436_v23, 16  ;;  %v1361_v40 = vor.u32 %v1360_v32, %v1356_v31  ;;  %14545 = vmatprep.subr.bf16.mxu1 %v15434_v27 }
  0x72   : > { %374 = vst [vmem:[#allocation2 + $0xbc] sm:$0x1] %v15819_v0  ;;  %375 = vst [vmem:[#allocation2 + $0xc0] sm:$0xf] %v15819_v0  ;;  %v19901_v37 = vmov 0  ;;  %v15435_v42 = vld [vmem:[#allocation8] sm:$0xff]   ;;  %v476_v44 = vor.u32 %v474_v25, %v473_v34 }
  0x73   : > { %376 = vst [vmem:[#allocation2 + $0xc4] sm:$0xf] %v15819_v0  ;;  %377 = vst [vmem:[#allocation2 + $0xc8] sm:$0x1] %v15819_v0  ;;  %v794_v38 = vld [vmem:[#allocation2 + $0xc] sm:$0xf]  ;;  %14498 = vmatpush3.bf16.msra.mxu0 %v15433_v26 }
  0x74   : > { %378 = vst [vmem:[#allocation2 + $0xcc] sm:$0xf] %v15819_v0  ;;  %379 = vst [vmem:[#allocation2 + $0xd0] sm:$0xf] %v15819_v0  ;;  %v437_v41 = vld [vmem:[%s16003_s19 + $0x8] sm:$0xf]  ;;  %14546 = vmatpush3.bf16.msra.mxu1 %v15434_v27  ;;  %14499 = vmatprep.subr.bf16.mxu0 %v15435_v42 }
  0x75   : > { %380 = vst [vmem:[#allocation2 + $0xd4] sm:$0x1] %v15819_v0  ;;  %381 = vst [vmem:[#allocation3] sm:$0xf] %v15819_v0  ;;  %v19904_v43 = vmov 0  ;;  %v477_v45 = vrot.slane %v473_v34, 4 }
  0x76   : > { %382 = vst [vmem:[#allocation3 + $0x4] sm:$0xf] %v15819_v0  ;;  %383 = vst [vmem:[#allocation3 + $0x8] sm:$0x1] %v15819_v0  ;;  %v481_v46 = vrot.slane %v479_v35, 7  ;;  %v488_v48 = vshrl.u32 %v437_v41, 16 }
  0x77   : > { %384 = vst [vmem:[#allocation3 + $0xc] sm:$0xf] %v15819_v0  ;;  %385 = vst [vmem:[#allocation3 + $0x10] sm:$0xf] %v15819_v0  ;;  %v438_v47 = vld [vmem:[%s16003_s19 + $0xc] sm:$0xf]  ;;  %14500 = vmatpush3.bf16.msra.mxu0 %v15435_v42 }
  0x78   : > { %386 = vst [vmem:[#allocation3 + $0x14] sm:$0x1] %v15819_v0  ;;  %387 = vst [vmem:[#allocation3 + $0x18] sm:$0xf] %v15819_v0  ;;  %v1352_v49 = vrot.slane %v1351_v39, 4  ;;  %v1362_v50 = vrot.slane %v1361_v40, 4  ;;  %v484_v56 = vor.u32 %v482_v36, %v481_v46 }
  0x79   : > { %388 = vst [vmem:[#allocation3 + $0x1c] sm:$0xf] %v15819_v0  ;;  %389 = vst [vmem:[#allocation3 + $0x20] sm:$0x1] %v15819_v0  ;;  %v19907_v51 = vmov 0  ;;  %v491_v53 = vshll.u32 %v437_v41, 16 }
  0x7a   : > { %390 = vst [vmem:[#allocation3 + $0x24] sm:$0xf] %v15819_v0  ;;  %391 = vst [vmem:[#allocation3 + $0x28] sm:$0xf] %v15819_v0  ;;  %v800_v52 = vld [vmem:[#allocation2 + $0x14] sm:$0x1] }
  0x7b   : > { %392 = vst [vmem:[#allocation3 + $0x2c] sm:$0x1] %v15819_v0  ;;  %393 = vst [vmem:[#allocation3 + $0x30] sm:$0xf] %v15819_v0  ;;  %v496_v54 = vshrl.u32 %v438_v47, 16  ;;  %v15436_v55 = vld [vmem:[#allocation8 + $0x40] sm:$0xff]  }
  0x7c   : > { %394 = vst [vmem:[#allocation3 + $0x34] sm:$0xf] %v15819_v0  ;;  %395 = vst [vmem:[#allocation3 + $0x38] sm:$0x1] %v15819_v0  ;;  %v486_v57 = vrot.slane %v481_v46, 4  ;;  %v490_v59 = vrot.slane %v488_v48, 7  ;;  %14547 = vmatprep.subr.bf16.mxu1 %v15436_v55 }
  0x7d   : > { %396 = vst [vmem:[#allocation3 + $0x3c] sm:$0xf] %v15819_v0  ;;  %397 = vst [vmem:[#allocation3 + $0x40] sm:$0xf] %v15819_v0  ;;  %v439_v60 = vld [vmem:[%s16003_s19 + $0x10] sm:$0xf]  ;;  %14548 = vmatpush3.bf16.msra.mxu1 %v15436_v55 }
  0x7e   : > { %398 = vst [vmem:[#allocation3 + $0x44] sm:$0x1] %v15819_v0  ;;  %399 = vst [vmem:[#allocation3 + $0x48] sm:$0xf] %v15819_v0  ;;  %v498_v63 = vrot.slane %v496_v54, 7  ;;  %v493_v6 = vor.u32 %v491_v53, %v490_v59  ;;  %v16161_v8 = vld [vmem:[#allocation8 + $0xb8] sm:$0xff]  }
  0x7f   : > { %400 = vst [vmem:[#allocation3 + $0x4c] sm:$0xf] %v15819_v0  ;;  %401 = vst [vmem:[#allocation3 + $0x50] sm:$0x1] %v15819_v0  ;;  %v803_v1 = vld [vmem:[#allocation2 + $0x18] sm:$0xf]  ;;  %14581 = vmatprep.subr.bf16.mxu0 %v16161_v8 }
  0x80   : > { %402 = vst [vmem:[#allocation3 + $0x54] sm:$0xf] %v15819_v0  ;;  %403 = vst [vmem:[#allocation3 + $0x58] sm:$0xf] %v15819_v0  ;;  %v440_v2 = vld [vmem:[%s16003_s19 + $0x14] sm:$0xf] }
  0x81   : > { %404 = vst [vmem:[#allocation3 + $0x5c] sm:$0x1] %v15819_v0  ;;  %405 = vst [vmem:[#allocation3 + $0x60] sm:$0xf] %v15819_v0  ;;  %v807_v7 = vld [vmem:[#allocation2 + $0x20] sm:$0x1] }
  0x82   : > { %406 = vst [vmem:[#allocation3 + $0x64] sm:$0xf] %v15819_v0  ;;  %407 = vst [vmem:[#allocation3 + $0x68] sm:$0x1] %v15819_v0  ;;  %v494_v9 = vrot.slane %v490_v59, 4  ;;  %v503_v11 = vrot.slane %v498_v63, 4 }
  0x83   : > { %408 = vst [vmem:[#allocation3 + $0x6c] sm:$0xf] %v15819_v0  ;;  %409 = vst [vmem:[#allocation3 + $0x70] sm:$0xf] %v15819_v0  ;;  %v505_v12 = vshrl.u32 %v439_v60, 16  ;;  %v508_v15 = vshll.u32 %v439_v60, 16 }
  0x84   : > { %410 = vst [vmem:[#allocation3 + $0x74] sm:$0x1] %v15819_v0  ;;  %411 = vst [vmem:[#allocation3 + $0x78] sm:$0xf] %v15819_v0  ;;  %v441_v13 = vld [vmem:[%s16003_s19 + $0x18] sm:$0xf] }
  0x85   : > { %412 = vst [vmem:[#allocation3 + $0x7c] sm:$0xf] %v15819_v0  ;;  %413 = vst [vmem:[#allocation3 + $0x80] sm:$0x1] %v15819_v0  ;;  %v513_v16 = vshrl.u32 %v440_v2, 16  ;;  %v516_v17 = vshll.u32 %v440_v2, 16 }
  0x86   : > { %414 = vst [vmem:[#allocation3 + $0x84] sm:$0xf] %v15819_v0  ;;  %415 = vst [vmem:[#allocation3 + $0x88] sm:$0xf] %v15819_v0  ;;  %v442_v18 = vld [vmem:[%s16003_s19 + $0x1c] sm:$0xf] }
  0x87   : > { %416 = vst [vmem:[#allocation3 + $0x8c] sm:$0x1] %v15819_v0  ;;  %417 = vst [vmem:[#allocation3 + $0x90] sm:$0xf] %v15819_v0  ;;  %v507_v21 = vrot.slane %v505_v12, 7  ;;  %v522_v23 = vshrl.u32 %v441_v13, 16 }
  0x88   : > { %418 = vst [vmem:[#allocation3 + $0x94] sm:$0xf] %v15819_v0  ;;  %419 = vst [vmem:[#allocation3 + $0x98] sm:$0x1] %v15819_v0  ;;  %v810_v22 = vld [vmem:[#allocation2 + $0x24] sm:$0xf] }
  0x89   : > { %420 = vst [vmem:[#allocation3 + $0x9c] sm:$0xf] %v15819_v0  ;;  %421 = vst [vmem:[#allocation3 + $0xa0] sm:$0xf] %v15819_v0  ;;  %v515_v24 = vrot.slane %v513_v16, 7  ;;  %v525_v25 = vshll.u32 %v441_v13, 16  ;;  %v510_v30 = vor.u32 %v508_v15, %v507_v21 }
  0x8a   : > { %422 = vst [vmem:[#allocation3 + $0xa4] sm:$0x1] %v15819_v0  ;;  %423 = vst [vmem:[#allocation3 + $0xa8] sm:$0xf] %v15819_v0  ;;  %v530_v26 = vshrl.u32 %v442_v18, 16  ;;  %v533_v27 = vshll.u32 %v442_v18, 16 }
  0x8b   : > { %424 = vst [vmem:[#allocation3 + $0xac] sm:$0xf] %v15819_v0  ;;  %425 = vst [vmem:[#allocation3 + $0xb0] sm:$0x1] %v15819_v0  ;;  %v16172_v29 = vld [vmem:[%s16003_s19 + $0x20] sm:$0xf]  ;;  %v518_v36 = vor.u32 %v516_v17, %v515_v24 }
  0x8c   : > { %426 = vst [vmem:[#allocation3 + $0xb4] sm:$0xf] %v15819_v0  ;;  %427 = vst [vmem:[#allocation3 + $0xb8] sm:$0xf] %v15819_v0  ;;  %v814_v32 = vld [vmem:[#allocation2 + $0x2c] sm:$0x1] }
  0x8d   : > { %428 = vst [vmem:[#allocation3 + $0xbc] sm:$0x1] %v15819_v0  ;;  %429 = vst [vmem:[#allocation3 + $0xc0] sm:$0xf] %v15819_v0  ;;  %v539_v34 = vshrl.u32 %v16172_v29, 16  ;;  %v15442_v39 = vld [vmem:[#allocation8 + $0xb0] sm:$0xff]  }
  0x8e   : > { %430 = vst [vmem:[#allocation3 + $0xc4] sm:$0xf] %v15819_v0  ;;  %431 = vst [vmem:[#allocation3 + $0xc8] sm:$0x1] %v15819_v0  ;;  %v532_v40 = vrot.slane %v530_v26, 7  ;;  %v15452_v17 = vld [vmem:[#allocation8 + $0xf8] sm:$0xff]  }
  0x8f   : > { %432 = vst [vmem:[#allocation3 + $0xcc] sm:$0xf] %v15819_v0  ;;  %433 = vst [vmem:[#allocation3 + $0xd0] sm:$0xf] %v15819_v0  ;;  %v817_v46 = vld [vmem:[#allocation2 + $0x30] sm:$0xf]  ;;  %14629 = vmatprep.subr.bf16.mxu1 %v15452_v17 }
  0x90   : > { %434 = vst [vmem:[#allocation3 + $0xd4] sm:$0x1] %v15819_v0  ;;  %vm16125_vm7 = vmor %vm1341_vm0, %vm1342_vm1  ;;  %v499_v0 = vshll.u32 %v438_v47, 16  ;;  %v821_v47 = vld [vmem:[#allocation2 + $0x38] sm:$0x1]  ;;  %v535_v54 = vor.u32 %v533_v27, %v532_v40  ;;  %vm2210_vm11 = vcmask 1042432  }
  0x91   : > { %v19899_v28 = vsel %vm16125_vm7, 4294967295, %v19898_v28  ;;  %vm16131_vm8 = vmand %vm791_vm5, %vm792_vm2  ;;  %v1357_v61 = vsel %vm16125_vm7, %v1352_v49, %v1356_v31  ;;  %v1367_v62 = vsel %vm16125_vm7, %v1362_v50, %v1366_v33  ;;  %v511_v31 = vrot.slane %v507_v21, 4  ;;  %v15448_v21 = vld [vmem:[#allocation8 + $0xa0] sm:$0xff]   ;;  %s13449_s15 = sshll.u32 %s15999_s17, 8  ;;  %s14052_s30 = sshll.u32 %s15884_s28, 12 }
  0x92   : > { %19900 = vst [vmem:[#allocation15_spill] sm:$0xff] %v19899_v28  ;;  %v19902_v37 = vsel %vm16131_vm8, 4294967295, %v19901_v37  ;;  %vm16138_vm9 = vmor %vm467_vm3, %vm468_vm4  ;;  %v795_v58 = vsel %vm16131_vm8, %v476_v44, %v794_v38  ;;  %v13474_v3 = vcombine.low %v1357_v61, %v1367_v62  ;;  %v501_v10 = vor.u32 %v499_v0, %v498_v63  ;;  %s19812_s10 = scalar_lea.hbm %s19866_s7, %s14052_s30  ;;  %s13332_s29 = scalar_lea.sflag [#allocation7], %s15999_s17 }
  0x93   : > { %19903 = vst [vmem:[#allocation16_spill] sm:$0xff] %v19902_v37  ;;  %v19905_v43 = vsel %vm16138_vm9, 4294967295, %v19904_v43  ;;  %vm16145_vm10 = vmand %vm798_vm6, %vm467_vm3  ;;  %v485_v4 = vsel %vm16138_vm9, %v477_v45, %v484_v56  ;;  %v804_v14 = vsel %vm16131_vm8, %v493_v6, %v803_v1  ;;  %v524_v33 = vrot.slane %v522_v23, 7  ;;  %v15445_v1 = vld [vmem:[#allocation8 + $0xa8] sm:$0xff]   ;;  %p20250_p2 = scmp.ne.s32.totalorder %s19890_s11, 0  ;;  %s15820_s21 = smov [#allocation11]  }
  0x94   : > { %19906 = vst [vmem:[#allocation17_spill] sm:$0xff] %v19905_v43  ;;  %v19908_v51 = vsel %vm16145_vm10, 4294967295, %v19907_v51  ;;  %796 = vst [vmem:[#allocation2 + $0xc] sm:$0xf] %v795_v58  ;;  %v801_v5 = vsel %vm16145_vm10, %v486_v57, %v800_v52  ;;  %14549 = vmatprep.mubr.bf16.mxu1 %v13474_v3  ;;  %v502_v19 = vsel %vm16138_vm9, %v494_v9, %v501_v10  ;;  %v520_v38 = vrot.slane %v515_v24, 4  ;;  %s15748_s13 = sshll.u32 %s15820_s21, 4  ;;  %s15749_s13 = int_to_ptr.vmem [resolvable:$false] %s15748_s13 }
  0x95   : > { %19909 = vst [vmem:[#allocation18_spill] sm:$0xff] %v19908_v51  ;;  %797 = vst [vmem:[#allocation2 + $0x10] sm:$0xf] %v485_v4  ;;  %v808_v20 = vsel %vm16145_vm10, %v503_v11, %v807_v7  ;;  %v811_v44 = vsel %vm16131_vm8, %v510_v30, %v810_v22  ;;  %v527_v45 = vor.u32 %v525_v25, %v524_v33  ;;  %v528_v53 = vrot.slane %v524_v33, 4  ;;  %s15750_s14 = scalar_lea.vmem %s15749_s13, 8192 }
  0x96   : > { %802 = vst [vmem:[#allocation2 + $0x14] sm:$0x1] %v801_v5  ;;  %805 = vst [vmem:[#allocation2 + $0x18] sm:$0xf] %v804_v14  ;;  %v519_v50 = vsel %vm16138_vm9, %v511_v31, %v518_v36  ;;  %v815_v52 = vsel %vm16145_vm10, %v520_v38, %v814_v32  ;;  %v537_v63 = vrot.slane %v532_v40, 4  ;;  %v542_v38 = vshll.u32 %v16172_v29, 16 }
  0x97   : > { %806 = vst [vmem:[#allocation2 + $0x1c] sm:$0xf] %v502_v19  ;;  %809 = vst [vmem:[#allocation2 + $0x20] sm:$0x1] %v808_v20  ;;  %v536_v62 = vsel %vm16138_vm9, %v528_v53, %v535_v54  ;;  %v818_v0 = vsel %vm16131_vm8, %v527_v45, %v817_v46  ;;  %v16189_v20 = vrot.slane %v539_v34, 7  ;;  %vm2211_vm12 = vcmask 1046532  }
  0x98   : > { %812 = vst [vmem:[#allocation2 + $0x24] sm:$0xf] %v811_v44  ;;  %813 = vst [vmem:[#allocation2 + $0x28] sm:$0xf] %v519_v50  ;;  %v822_v12 = vsel %vm16145_vm10, %v537_v63, %v821_v47  ;;  %v15451_v44 = vld [vmem:[#allocation8 + $0x98] sm:$0xff]   ;;  %v15453_v50 = vld [vmem:[#allocation8 + $0xf0] sm:$0xff]  }
  0x99   : > { %816 = vst [vmem:[#allocation2 + $0x2c] sm:$0x1] %v815_v52  ;;  %819 = vst [vmem:[#allocation2 + $0x30] sm:$0xf] %v818_v0 }
  0x9a   : > { %820 = vst [vmem:[#allocation2 + $0x34] sm:$0xf] %v536_v62  ;;  %823 = vst [vmem:[#allocation2 + $0x38] sm:$0x1] %v822_v12 }
  0x9b   : > { %v1296_v35 = vld [vmem:[#allocation2 + $0xc] sm:$0xf]  ;;  %vm16346_vm13 = vmor %vm2210_vm11, %vm2211_vm12 }
  0x9c   : > { %v1369_v41 = vshrl.u32 %v1296_v35, 16  ;;  %v1372_v42 = vshll.u32 %v1296_v35, 16  ;;  %v15438_v48 = vld [vmem:[#allocation2 + $0xc] sm:$0xff]  }
  0x9d   : > { %v1297_v49 = vld [vmem:[#allocation2 + $0x10] sm:$0xf]  ;;  %v1298_v55 = vld [vmem:[#allocation2 + $0x14] sm:$0x1]  ;;  %14502 = vmatmul.mubr.bf16.vlgmr.msra.gmra.mxu0 %v15438_v48  ;;  %v1299_v61 = vld [vmem:[#allocation2 + $0x18] sm:$0xf] }
  0x9e   : > { %v1371_v56 = vrot.slane %v1369_v41, 4  ;;  %v1374_v57 = vrot.slane %v1372_v42, 5  ;;  %v1378_v58 = vshll.u32 %v1297_v49, 16  ;;  %v1382_v59 = vshrl.u32 %v1297_v49, 16  ;;  %14582 = vmatpush3.bf16.msra.mxu0 %v16161_v8  ;;  %v15440_v5 = vld [vmem:[#allocation2 + $0x18] sm:$0xff]  }
  0x9f   : > { %v1388_v60 = vshll.u32 %v1298_v55, 16  ;;  %v1393_v6 = vshrl.u32 %v1299_v61, 16  ;;  %v1300_v9 = vld [vmem:[#allocation2 + $0x1c] sm:$0xf]  ;;  %v1301_v10 = vld [vmem:[#allocation2 + $0x20] sm:$0x1]  ;;  %14583 = vmatprep.subr.bf16.mxu0 %v15442_v39  ;;  %14505 = vmatprep.mubr.bf16.mxu0 %v15440_v5  ;;  %v544_v55 = vor.u32 %v542_v38, %v16189_v20 }
  0xa0   : > { %v1375_v2 = vor.u32 %v1374_v57, %v1371_v56  ;;  %v1380_v3 = vrot.slane %v1378_v58, 5  ;;  %v1384_v4 = vrot.slane %v1382_v59, 4  ;;  %v1396_v11 = vshll.u32 %v1299_v61, 16  ;;  %v1302_v25 = vld [vmem:[#allocation2 + $0x24] sm:$0xf] }
  0xa1   : > { %v1390_v7 = vrot.slane %v1388_v60, 5  ;;  %v1395_v15 = vrot.slane %v1393_v6, 4  ;;  %v1402_v16 = vshll.u32 %v1300_v9, 16  ;;  %v1406_v18 = vshrl.u32 %v1300_v9, 16  ;;  %v15441_v31 = vld [vmem:[#allocation2 + $0x24] sm:$0xff]   ;;  %v15443_v49 = vld [vmem:[#allocation2 + $0x30] sm:$0xff]  }
  0xa2   : > { %v1376_v13 = vrot.slane %v1375_v2, 4  ;;  %v1385_v14 = vor.u32 %v1384_v4, %v1380_v3  ;;  %v1398_v8 = vrot.slane %v1396_v11, 5  ;;  %v1412_v19 = vshll.u32 %v1301_v10, 16  ;;  %14584 = vmatpush3.bf16.msra.mxu0 %v15442_v39  ;;  %v1303_v34 = vld [vmem:[#allocation2 + $0x28] sm:$0xf]  ;;  %v15456_v10 = vld [vmem:[#allocation8 + $0x90] sm:$0xff]  }
  0xa3   : > { %v1404_v24 = vrot.slane %v1402_v16, 5  ;;  %v1408_v27 = vrot.slane %v1406_v18, 4  ;;  %v1417_v32 = vshrl.u32 %v1302_v25, 16  ;;  %14585 = vmatprep.subr.bf16.mxu0 %v15445_v1  ;;  %v1304_v35 = vld [vmem:[#allocation2 + $0x2c] sm:$0x1]  ;;  %v1420_v36 = vshll.u32 %v1302_v25, 16 }
  0xa4   : > { %v1381_v22 = vsel %vm16125_vm7, %v1376_v13, %v1380_v3  ;;  %v1386_v23 = vrot.slane %v1385_v14, 4  ;;  %v1399_v26 = vor.u32 %v1398_v8, %v1395_v15  ;;  %v1414_v30 = vrot.slane %v1412_v19, 5  ;;  %v1305_v54 = vld [vmem:[#allocation2 + $0x30] sm:$0xf]  ;;  %v1306_v29 = vld [vmem:[#allocation2 + $0x34] sm:$0xf] }
  0xa5   : > { %v1409_v42 = vor.u32 %v1408_v27, %v1404_v24  ;;  %14506 = vmatmul.mubr.bf16.gmra.mxu0 %v15441_v31  ;;  %v1419_v39 = vrot.slane %v1417_v32, 4  ;;  %v1422_v45 = vrot.slane %v1420_v36, 5  ;;  %v1426_v46 = vshll.u32 %v1303_v34, 16  ;;  %v1307_v61 = vld [vmem:[#allocation2 + $0x38] sm:$0x1] }
  0xa6   : > { %v1391_v33 = vsel %vm16125_vm7, %v1386_v23, %v1390_v7  ;;  %v1400_v41 = vrot.slane %v1399_v26, 4  ;;  %v1430_v47 = vshrl.u32 %v1303_v34, 16  ;;  %v1436_v48 = vshll.u32 %v1304_v35, 16  ;;  %14586 = vmatpush3.bf16.msra.mxu0 %v15445_v1  ;;  %14509 = vmatprep.mubr.bf16.mxu0 %v15443_v49  ;;  %v444_v2 = vld [vmem:[%s16003_s19 + $0x24] sm:$0xf]  ;;  %v15457_v3 = vld [vmem:[#allocation8 + $0xe8] sm:$0xff]  }
  0xa7   : > { %v13475_v40 = vcombine.low %v1381_v22, %v1391_v33  ;;  %v1410_v53 = vrot.slane %v1409_v42, 4  ;;  %v545_v56 = vrot.slane %v16189_v20, 4  ;;  %14587 = vmatprep.subr.bf16.mxu0 %v15448_v21  ;;  %v1423_v57 = vor.u32 %v1422_v45, %v1419_v39  ;;  %v824_v9 = vld [vmem:[#allocation2 + $0x3c] sm:$0xf]  ;;  %v445_v15 = vld [vmem:[%s16003_s19 + $0x28] sm:$0xf] }
  0xa8   : > { %v1405_v52 = vsel %vm16125_vm7, %v1400_v41, %v1404_v24  ;;  %v1428_v58 = vrot.slane %v1426_v46, 5  ;;  %v1432_v59 = vrot.slane %v1430_v47, 4  ;;  %v1438_v60 = vrot.slane %v1436_v48, 5  ;;  %v446_v19 = vld [vmem:[%s16003_s19 + $0x2c] sm:$0xf]  ;;  %v15458_v26 = vld [vmem:[#allocation8 + $0xe0] sm:$0xff]  }
  0xa9   : > { %14550 = vmatmul.mubr.bf16.vlgmr.msra.gmra.mxu1 %v13475_v40  ;;  %v1415_v62 = vsel %vm16125_vm7, %v1410_v53, %v1414_v30  ;;  %v1441_v63 = vshrl.u32 %v1305_v54, 16  ;;  %v1444_v0 = vshll.u32 %v1305_v54, 16  ;;  %v1450_v1 = vshll.u32 %v1306_v29, 16  ;;  %v828_v25 = vld [vmem:[#allocation2 + $0x44] sm:$0x1]  ;;  %v15461_v40 = vld [vmem:[#allocation8 + $0x88] sm:$0xff]  }
  0xaa   : > { %14630 = vmatpush3.bf16.msra.mxu1 %v15452_v17  ;;  %v13476_v4 = vcombine.low %v1405_v52, %v1415_v62  ;;  %v1424_v5 = vrot.slane %v1423_v57, 4  ;;  %v1433_v6 = vor.u32 %v1432_v59, %v1428_v58  ;;  %v1454_v7 = vshrl.u32 %v1306_v29, 16  ;;  %14588 = vmatpush3.bf16.msra.mxu0 %v15448_v21  ;;  %v447_v33 = vld [vmem:[%s16003_s19 + $0x30] sm:$0xf]  ;;  %v831_v46 = vld [vmem:[#allocation2 + $0x48] sm:$0xf] }
  0xab   : > { %14631 = vmatprep.subr.bf16.mxu1 %v15453_v50  ;;  %v1443_v11 = vrot.slane %v1441_v63, 4  ;;  %v1446_v12 = vrot.slane %v1444_v0, 5  ;;  %v1452_v13 = vrot.slane %v1450_v1, 5  ;;  %v1460_v14 = vshll.u32 %v1307_v61, 16  ;;  %14589 = vmatprep.subr.bf16.mxu0 %v15451_v44  ;;  %v448_v49 = vld [vmem:[%s16003_s19 + $0x34] sm:$0xf] }
  0xac   : > { %14553 = vmatprep.mubr.bf16.mxu1 %v13476_v4  ;;  %v1429_v16 = vsel %vm16125_vm7, %v1424_v5, %v1428_v58  ;;  %v1434_v17 = vrot.slane %v1433_v6, 4  ;;  %v1456_v8 = vrot.slane %v1454_v7, 4  ;;  %v547_v18 = vshrl.u32 %v444_v2, 16  ;;  %v15462_v52 = vld [vmem:[#allocation8 + $0xd8] sm:$0xff]   ;;  %v835_v57 = vld [vmem:[#allocation2 + $0x50] sm:$0x1] }
  0xad   : > { %v1447_v22 = vor.u32 %v1446_v12, %v1443_v11  ;;  %v1462_v23 = vrot.slane %v1460_v14, 5  ;;  %v550_v21 = vshll.u32 %v444_v2, 16  ;;  %v825_v24 = vsel %vm16131_vm8, %v544_v55, %v824_v9  ;;  %v449_v58 = vld [vmem:[%s16003_s19 + $0x38] sm:$0xf]  ;;  %v838_v63 = vld [vmem:[#allocation2 + $0x54] sm:$0xf] }
  0xae   : > { %14632 = vmatpush3.bf16.msra.mxu1 %v15453_v50  ;;  %v1439_v27 = vsel %vm16125_vm7, %v1434_v17, %v1438_v60  ;;  %v1457_v30 = vor.u32 %v1456_v8, %v1452_v13  ;;  %v549_v31 = vrot.slane %v547_v18, 7  ;;  %826 = vst [vmem:[#allocation2 + $0x3c] sm:$0xf] %v825_v24  ;;  %v556_v32 = vshrl.u32 %v445_v15, 16  ;;  %14590 = vmatpush3.bf16.msra.mxu0 %v15451_v44  ;;  %v450_v0 = vld [vmem:[%s16003_s19 + $0x3c] sm:$0xf] }
  0xaf   : > { %14633 = vmatprep.subr.bf16.mxu1 %v15457_v3  ;;  %v13477_v34 = vcombine.low %v1429_v16, %v1439_v27  ;;  %v1448_v35 = vrot.slane %v1447_v22, 4  ;;  %v559_v36 = vshll.u32 %v445_v15, 16  ;;  %v564_v38 = vshrl.u32 %v446_v19, 16  ;;  %14591 = vmatprep.subr.bf16.mxu0 %v15456_v10  ;;  %v15466_v4 = vld [vmem:[#allocation8 + $0x80] sm:$0xff]   ;;  %v842_v15 = vld [vmem:[#allocation2 + $0x5c] sm:$0x1] }
  0xb0   : > { %v1458_v41 = vrot.slane %v1457_v30, 4  ;;  %v552_v42 = vor.u32 %v550_v21, %v549_v31  ;;  %v554_v39 = vrot.slane %v549_v31, 4  ;;  %v558_v45 = vrot.slane %v556_v32, 7 }
  0xb1   : > { %14554 = vmatmul.mubr.bf16.gmra.mxu1 %v13477_v34  ;;  %v1453_v47 = vsel %vm16125_vm7, %v1448_v35, %v1452_v13  ;;  %v566_v48 = vrot.slane %v564_v38, 7  ;;  %v567_v44 = vshll.u32 %v446_v19, 16  ;;  %v573_v50 = vshrl.u32 %v447_v33, 16  ;;  %v845_v19 = vld [vmem:[#allocation2 + $0x60] sm:$0xf] }
  0xb2   : > { %14634 = vmatpush3.bf16.msra.mxu1 %v15457_v3  ;;  %v1463_v53 = vsel %vm16125_vm7, %v1458_v41, %v1462_v23  ;;  %v553_v54 = vsel %vm16138_vm9, %v545_v56, %v552_v42  ;;  %v829_v29 = vsel %vm16145_vm10, %v554_v39, %v828_v25  ;;  %v561_v55 = vor.u32 %v559_v36, %v558_v45  ;;  %v15463_v3 = vld [vmem:[#allocation8 + $0xd0] sm:$0xff]   ;;  %v15467_v25 = vld [vmem:[#allocation8 + $0xc8] sm:$0xff]   ;;  %v15468_v39 = vld [vmem:[#allocation8 + $0xc0] sm:$0xff]  }
  0xb3   : > { %14635 = vmatprep.subr.bf16.mxu1 %v15458_v26  ;;  %14592 = vmatpush3.bf16.msra.mxu0 %v15456_v10  ;;  %v13478_v59 = vcombine.low %v1453_v47, %v1463_v53  ;;  %827 = vst [vmem:[#allocation2 + $0x40] sm:$0xf] %v553_v54  ;;  %830 = vst [vmem:[#allocation2 + $0x44] sm:$0x1] %v829_v29  ;;  %v562_v60 = vrot.slane %v558_v45, 4  ;;  %v569_v61 = vor.u32 %v567_v44, %v566_v48 }
  0xb4   : > { %v571_v62 = vrot.slane %v566_v48, 4  ;;  %14593 = vmatprep.subr.bf16.mxu0 %v15461_v40  ;;  %v832_v20 = vsel %vm16131_vm8, %v561_v55, %v831_v46  ;;  %v575_v56 = vrot.slane %v573_v50, 7  ;;  %v576_v1 = vshll.u32 %v447_v33, 16 }
  0xb5   : > { %v581_v2 = vshrl.u32 %v448_v49, 16  ;;  %14557 = vmatprep.mubr.bf16.mxu1 %v13478_v59  ;;  %v1308_v5 = vld [vmem:[#allocation2 + $0x3c] sm:$0xf]  ;;  %v570_v6 = vsel %vm16138_vm9, %v562_v60, %v569_v61  ;;  %833 = vst [vmem:[#allocation2 + $0x48] sm:$0xf] %v832_v20  ;;  %v584_v9 = vshll.u32 %v448_v49, 16 }
  0xb6   : > { %14636 = vmatpush3.bf16.msra.mxu1 %v15458_v26  ;;  %v836_v7 = vsel %vm16145_vm10, %v571_v62, %v835_v57  ;;  %v590_v10 = vshrl.u32 %v449_v58, 16  ;;  %v1465_v11 = vshrl.u32 %v1308_v5, 16  ;;  %v1468_v12 = vshll.u32 %v1308_v5, 16  ;;  %834 = vst [vmem:[#allocation2 + $0x4c] sm:$0xf] %v570_v6 }
  0xb7   : > { %14637 = vmatprep.subr.bf16.mxu1 %v15462_v52  ;;  %837 = vst [vmem:[#allocation2 + $0x50] sm:$0x1] %v836_v7  ;;  %v578_v13 = vor.u32 %v576_v1, %v575_v56  ;;  %v579_v14 = vrot.slane %v575_v56, 4  ;;  %14594 = vmatpush3.bf16.msra.mxu0 %v15461_v40  ;;  %v583_v16 = vrot.slane %v581_v2, 7  ;;  %v593_v8 = vshll.u32 %v449_v58, 16 }
  0xb8   : > { %v592_v17 = vrot.slane %v590_v10, 7  ;;  %v598_v18 = vshrl.u32 %v450_v0, 16  ;;  %14595 = vmatprep.subr.bf16.mxu0 %v15466_v4  ;;  %v1467_v22 = vrot.slane %v1465_v11, 4  ;;  %v1470_v23 = vrot.slane %v1468_v12, 5  ;;  %v16240_v49 = vld [vmem:[%s16003_s19 + $0x40] sm:$0xf] }
  0xb9   : > { %v839_v21 = vsel %vm16131_vm8, %v578_v13, %v838_v63  ;;  %v601_v24 = vshll.u32 %v450_v0, 16  ;;  %v586_v26 = vor.u32 %v584_v9, %v583_v16  ;;  %v588_v27 = vrot.slane %v583_v16, 4  ;;  %v849_v0 = vld [vmem:[#allocation2 + $0x68] sm:$0x1] }
  0xba   : > { %14638 = vmatpush3.bf16.msra.mxu1 %v15462_v52  ;;  %840 = vst [vmem:[#allocation2 + $0x54] sm:$0xf] %v839_v21  ;;  %v595_v30 = vor.u32 %v593_v8, %v592_v17  ;;  %v596_v31 = vrot.slane %v592_v17, 4  ;;  %v15444_v32 = vld [vmem:[#allocation2 + $0x3c] sm:$0xff]   ;;  %v1471_v34 = vor.u32 %v1470_v23, %v1467_v22  ;;  %v600_v35 = vrot.slane %v598_v18, 7  ;;  %v16248_v13 = vld [vmem:[#allocation8 + $0x138] sm:$0xff]  }
  0xbb   : > { %14639 = vmatprep.subr.bf16.mxu1 %v15463_v3  ;;  %v1309_v33 = vld [vmem:[#allocation2 + $0x40] sm:$0xf]  ;;  %14596 = vmatpush3.bf16.msra.mxu0 %v15466_v4  ;;  %v1310_v36 = vld [vmem:[#allocation2 + $0x44] sm:$0x1]  ;;  %v587_v41 = vsel %vm16138_vm9, %v579_v14, %v586_v26  ;;  %v843_v42 = vsel %vm16145_vm10, %v588_v27, %v842_v15  ;;  %v607_v6 = vshrl.u32 %v16240_v49, 16  ;;  %v610_v7 = vshll.u32 %v16240_v49, 16 }
  0xbc   : > { %v1474_v38 = vshll.u32 %v1309_v33, 16  ;;  %v1478_v40 = vshrl.u32 %v1309_v33, 16  ;;  %14510 = vmatmul.mubr.bf16.gmra.mxu0 %v15444_v32  ;;  %v1472_v45 = vrot.slane %v1471_v34, 4  ;;  %v1484_v46 = vshll.u32 %v1310_v36, 16  ;;  %v1311_v47 = vld [vmem:[#allocation2 + $0x48] sm:$0xf]  ;;  %14677 = vmatprep.subr.bf16.mxu0 %v16248_v13 }
  0xbd   : > { %841 = vst [vmem:[#allocation2 + $0x58] sm:$0xf] %v587_v41  ;;  %844 = vst [vmem:[#allocation2 + $0x5c] sm:$0x1] %v843_v42  ;;  %v603_v48 = vor.u32 %v601_v24, %v600_v35  ;;  %v846_v44 = vsel %vm16131_vm8, %v595_v30, %v845_v19  ;;  %v15446_v53 = vld [vmem:[#allocation2 + $0x48] sm:$0xff]   ;;  %v1489_v54 = vshrl.u32 %v1311_v47, 16 }
  0xbe   : > { %14640 = vmatpush3.bf16.msra.mxu1 %v15463_v3  ;;  %v1476_v50 = vrot.slane %v1474_v38, 5  ;;  %v1480_v52 = vrot.slane %v1478_v40, 4  ;;  %847 = vst [vmem:[#allocation2 + $0x60] sm:$0xf] %v846_v44  ;;  %v1486_v29 = vrot.slane %v1484_v46, 5  ;;  %v1492_v58 = vshll.u32 %v1311_v47, 16  ;;  %14513 = vmatprep.mubr.bf16.mxu0 %v15446_v53 }
  0xbf   : > { %14641 = vmatprep.subr.bf16.mxu1 %v15467_v25  ;;  %v1312_v55 = vld [vmem:[#allocation2 + $0x4c] sm:$0xf]  ;;  %v1313_v57 = vld [vmem:[#allocation2 + $0x50] sm:$0x1]  ;;  %v604_v59 = vsel %vm16138_vm9, %v596_v31, %v603_v48  ;;  %v1491_v62 = vrot.slane %v1489_v54, 4  ;;  %v605_v2 = vrot.slane %v600_v35, 4 }
  0xc0   : > { %v1477_v60 = vsel %vm16125_vm7, %v1472_v45, %v1476_v50  ;;  %v1481_v61 = vor.u32 %v1480_v52, %v1476_v50  ;;  %v1498_v63 = vshll.u32 %v1312_v55, 16  ;;  %848 = vst [vmem:[#allocation2 + $0x64] sm:$0xf] %v604_v59  ;;  %v1494_v20 = vrot.slane %v1492_v58, 5  ;;  %v452_v46 = vld [vmem:[%s16003_s19 + $0x44] sm:$0xf] }
  0xc1   : > { %v1502_v56 = vshrl.u32 %v1312_v55, 16  ;;  %v1508_v1 = vshll.u32 %v1313_v57, 16  ;;  %v1314_v5 = vld [vmem:[#allocation2 + $0x54] sm:$0xf]  ;;  %v850_v8 = vsel %vm16145_vm10, %v605_v2, %v849_v0  ;;  %v852_v50 = vld [vmem:[#allocation2 + $0x6c] sm:$0xf] }
  0xc2   : > { %14642 = vmatpush3.bf16.msra.mxu1 %v15467_v25  ;;  %v1482_v3 = vrot.slane %v1481_v61, 4  ;;  %v1500_v4 = vrot.slane %v1498_v63, 5  ;;  %v1495_v9 = vor.u32 %v1494_v20, %v1491_v62  ;;  %v1513_v12 = vshrl.u32 %v1314_v5, 16  ;;  %851 = vst [vmem:[#allocation2 + $0x68] sm:$0x1] %v850_v8 }
  0xc3   : > { %14643 = vmatprep.subr.bf16.mxu1 %v15468_v39  ;;  %v1504_v10 = vrot.slane %v1502_v56, 4  ;;  %v1510_v11 = vrot.slane %v1508_v1, 5  ;;  %v1516_v17 = vshll.u32 %v1314_v5, 16  ;;  %v453_v55 = vld [vmem:[%s16003_s19 + $0x48] sm:$0xf]  ;;  %v615_v61 = vshrl.u32 %v452_v46, 16 }
  0xc4   : > { %v1487_v14 = vsel %vm16125_vm7, %v1482_v3, %v1486_v29  ;;  %v15447_v15 = vld [vmem:[#allocation2 + $0x54] sm:$0xff]   ;;  %v1496_v19 = vrot.slane %v1495_v9, 4  ;;  %v1316_v23 = vld [vmem:[#allocation2 + $0x5c] sm:$0x1]  ;;  %v1515_v21 = vrot.slane %v1513_v12, 4  ;;  %v609_v29 = vrot.slane %v607_v6, 7 }
  0xc5   : > { %v1315_v16 = vld [vmem:[#allocation2 + $0x58] sm:$0xf]  ;;  %v13479_v18 = vcombine.low %v1477_v60, %v1487_v14  ;;  %v1505_v22 = vor.u32 %v1504_v10, %v1500_v4  ;;  %14514 = vmatmul.mubr.bf16.gmra.mxu0 %v15447_v15  ;;  %v1518_v24 = vrot.slane %v1516_v17, 5  ;;  %v1532_v27 = vshll.u32 %v1316_v23, 16  ;;  %v1317_v30 = vld [vmem:[#allocation2 + $0x60] sm:$0xf] }
  0xc6   : > { %14644 = vmatpush3.bf16.msra.mxu1 %v15468_v39  ;;  %v1522_v25 = vshll.u32 %v1315_v16, 16  ;;  %v1526_v26 = vshrl.u32 %v1315_v16, 16  ;;  %v1501_v31 = vsel %vm16125_vm7, %v1496_v19, %v1500_v4  ;;  %v1537_v42 = vshrl.u32 %v1317_v30, 16  ;;  %v454_v62 = vld [vmem:[%s16003_s19 + $0x4c] sm:$0xf] }
  0xc7   : > { %14558 = vmatmul.mubr.bf16.gmra.mxu1 %v13479_v18  ;;  %v1506_v32 = vrot.slane %v1505_v22, 4  ;;  %v15449_v33 = vld [vmem:[#allocation2 + $0x60] sm:$0xff]   ;;  %v1519_v35 = vor.u32 %v1518_v24, %v1515_v21  ;;  %v1534_v40 = vrot.slane %v1532_v27, 5  ;;  %v1540_v39 = vshll.u32 %v1317_v30, 16  ;;  %v856_v1 = vld [vmem:[#allocation2 + $0x74] sm:$0x1] }
  0xc8   : > { %v1318_v34 = vld [vmem:[#allocation2 + $0x64] sm:$0xf]  ;;  %v1524_v36 = vrot.slane %v1522_v25, 5  ;;  %v1528_v38 = vrot.slane %v1526_v26, 4  ;;  %14517 = vmatprep.mubr.bf16.mxu0 %v15449_v33  ;;  %v1539_v52 = vrot.slane %v1537_v42, 4  ;;  %v612_v20 = vor.u32 %v610_v7, %v609_v29 }
  0xc9   : > { %v1511_v41 = vsel %vm16125_vm7, %v1506_v32, %v1510_v11  ;;  %v1546_v45 = vshll.u32 %v1318_v34, 16  ;;  %v1520_v48 = vrot.slane %v1519_v35, 4  ;;  %v1550_v49 = vshrl.u32 %v1318_v34, 16  ;;  %v1319_v59 = vld [vmem:[#allocation2 + $0x68] sm:$0x1] }
  0xca   : > { %v13480_v47 = vcombine.low %v1501_v31, %v1511_v41  ;;  %v1529_v44 = vor.u32 %v1528_v38, %v1524_v36  ;;  %v1542_v53 = vrot.slane %v1540_v39, 5  ;;  %v1556_v0 = vshll.u32 %v1319_v59, 16  ;;  %v455_v16 = vld [vmem:[%s16003_s19 + $0x50] sm:$0xf]  ;;  %v456_v22 = vld [vmem:[%s16003_s19 + $0x54] sm:$0xf] }
  0xcb   : > { %v1548_v54 = vrot.slane %v1546_v45, 5  ;;  %v1525_v57 = vsel %vm16125_vm7, %v1520_v48, %v1524_v36  ;;  %v1552_v60 = vrot.slane %v1550_v49, 4  ;;  %v613_v56 = vrot.slane %v609_v29, 4  ;;  %v859_v26 = vld [vmem:[#allocation2 + $0x78] sm:$0xf] }
  0xcc   : > { %14561 = vmatprep.mubr.bf16.mxu1 %v13480_v47  ;;  %v1530_v58 = vrot.slane %v1529_v44, 4  ;;  %v1543_v63 = vor.u32 %v1542_v53, %v1539_v52  ;;  %v617_v4 = vrot.slane %v615_v61, 7  ;;  %v618_v5 = vshll.u32 %v452_v46, 16  ;;  %v457_v27 = vld [vmem:[%s16003_s19 + $0x58] sm:$0xf] }
  0xcd   : > { %v1553_v3 = vor.u32 %v1552_v60, %v1548_v54  ;;  %v1558_v10 = vrot.slane %v1556_v0, 5  ;;  %v853_v11 = vsel %vm16131_vm8, %v612_v20, %v852_v50  ;;  %v624_v15 = vshrl.u32 %v453_v55, 16  ;;  %v458_v34 = vld [vmem:[%s16003_s19 + $0x5c] sm:$0xf]  ;;  %v863_v38 = vld [vmem:[#allocation2 + $0x80] sm:$0x1] }
  0xce   : > { %v1535_v2 = vsel %vm16125_vm7, %v1530_v58, %v1534_v40  ;;  %v1544_v9 = vrot.slane %v1543_v63, 4  ;;  %v620_v14 = vor.u32 %v618_v5, %v617_v4  ;;  %v622_v7 = vrot.slane %v617_v4, 4  ;;  %854 = vst [vmem:[#allocation2 + $0x6c] sm:$0xf] %v853_v11  ;;  %v866_v46 = vld [vmem:[#allocation2 + $0x84] sm:$0xf] }
  0xcf   : > { %v13481_v6 = vcombine.low %v1525_v57, %v1535_v2  ;;  %v1554_v12 = vrot.slane %v1553_v3, 4  ;;  %v627_v8 = vshll.u32 %v453_v55, 16  ;;  %v632_v18 = vshrl.u32 %v454_v62, 16  ;;  %v870_v49 = vld [vmem:[#allocation2 + $0x8c] sm:$0x1] }
  0xd0   : > { %v1549_v17 = vsel %vm16125_vm7, %v1544_v9, %v1548_v54  ;;  %v635_v19 = vshll.u32 %v454_v62, 16  ;;  %v621_v21 = vsel %vm16138_vm9, %v613_v56, %v620_v14  ;;  %v857_v24 = vsel %vm16145_vm10, %v622_v7, %v856_v1  ;;  %v873_v62 = vld [vmem:[#allocation2 + $0x90] sm:$0xf]  ;;  %v877_v1 = vld [vmem:[#allocation2 + $0x98] sm:$0x1]  ;;  %v16291_v3 = vld [vmem:[#allocation8 + $0x178] sm:$0xff]  }
  0xd1   : > { %14562 = vmatmul.mubr.bf16.gmra.mxu1 %v13481_v6  ;;  %v1559_v23 = vsel %vm16125_vm7, %v1554_v12, %v1558_v10  ;;  %v626_v25 = vrot.slane %v624_v15, 7  ;;  %855 = vst [vmem:[#allocation2 + $0x70] sm:$0xf] %v621_v21  ;;  %858 = vst [vmem:[#allocation2 + $0x74] sm:$0x1] %v857_v24  ;;  %v634_v31 = vrot.slane %v632_v18, 7  ;;  %14725 = vmatprep.subr.bf16.mxu1 %v16291_v3 }
  0xd2   : > { %v13482_v30 = vcombine.low %v1549_v17, %v1559_v23  ;;  %v641_v32 = vshrl.u32 %v455_v16, 16  ;;  %v644_v33 = vshll.u32 %v455_v16, 16  ;;  %v649_v40 = vshrl.u32 %v456_v22, 16  ;;  %v16289_v2 = vld [vmem:[%s16003_s19 + $0x60] sm:$0xf] }
  0xd3   : > { %v629_v35 = vor.u32 %v627_v8, %v626_v25  ;;  %v630_v36 = vrot.slane %v626_v25, 4  ;;  %v652_v41 = vshll.u32 %v456_v22, 16  ;;  %v637_v42 = vor.u32 %v635_v19, %v634_v31 }
  0xd4   : > { %14565 = vmatprep.mubr.bf16.mxu1 %v13482_v30  ;;  %v639_v39 = vrot.slane %v634_v31, 4  ;;  %v643_v45 = vrot.slane %v641_v32, 7  ;;  %v658_v47 = vshrl.u32 %v457_v27, 16  ;;  %v651_v44 = vrot.slane %v649_v40, 7 }
  0xd5   : > { %v860_v48 = vsel %vm16131_vm8, %v629_v35, %v859_v26  ;;  %v661_v50 = vshll.u32 %v457_v27, 16  ;;  %v666_v52 = vshrl.u32 %v458_v34, 16  ;;  %v1320_v53 = vld [vmem:[#allocation2 + $0x6c] sm:$0xf]  ;;  %v638_v54 = vsel %vm16138_vm9, %v630_v36, %v637_v42 }
  0xd6   : > { %861 = vst [vmem:[#allocation2 + $0x78] sm:$0xf] %v860_v48  ;;  %v864_v29 = vsel %vm16145_vm10, %v639_v39, %v863_v38  ;;  %v646_v55 = vor.u32 %v644_v33, %v643_v45  ;;  %v647_v57 = vrot.slane %v643_v45, 4  ;;  %v1561_v58 = vshrl.u32 %v1320_v53, 16  ;;  %862 = vst [vmem:[#allocation2 + $0x7c] sm:$0xf] %v638_v54 }
  0xd7   : > { %v1564_v59 = vshll.u32 %v1320_v53, 16  ;;  %865 = vst [vmem:[#allocation2 + $0x80] sm:$0x1] %v864_v29  ;;  %v654_v60 = vor.u32 %v652_v41, %v651_v44  ;;  %v656_v61 = vrot.slane %v651_v44, 4  ;;  %v660_v0 = vrot.slane %v658_v47, 7 }
  0xd8   : > { %v867_v63 = vsel %vm16131_vm8, %v646_v55, %v866_v46  ;;  %v668_v20 = vrot.slane %v666_v52, 7  ;;  %v669_v56 = vshll.u32 %v458_v34, 16  ;;  %v15450_v4 = vld [vmem:[#allocation2 + $0x6c] sm:$0xff]   ;;  %v1563_v6 = vrot.slane %v1561_v58, 4  ;;  %v1322_v11 = vld [vmem:[#allocation2 + $0x74] sm:$0x1] }
  0xd9   : > { %v1321_v5 = vld [vmem:[#allocation2 + $0x70] sm:$0xf]  ;;  %v655_v9 = vsel %vm16138_vm9, %v647_v57, %v654_v60  ;;  %868 = vst [vmem:[#allocation2 + $0x84] sm:$0xf] %v867_v63  ;;  %v871_v10 = vsel %vm16145_vm10, %v656_v61, %v870_v49  ;;  %v1566_v12 = vrot.slane %v1564_v59, 5  ;;  %v663_v15 = vor.u32 %v661_v50, %v660_v0  ;;  %14518 = vmatmul.mubr.bf16.gmra.mxu0 %v15450_v4 }
  0xda   : > { %v1570_v14 = vshll.u32 %v1321_v5, 16  ;;  %v1574_v7 = vshrl.u32 %v1321_v5, 16  ;;  %869 = vst [vmem:[#allocation2 + $0x88] sm:$0xf] %v655_v9  ;;  %872 = vst [vmem:[#allocation2 + $0x8c] sm:$0x1] %v871_v10  ;;  %v671_v8 = vor.u32 %v669_v56, %v668_v20 }
  0xdb   : > { %v1580_v16 = vshll.u32 %v1322_v11, 16  ;;  %v664_v17 = vrot.slane %v660_v0, 4  ;;  %v673_v18 = vrot.slane %v668_v20, 4  ;;  %v1567_v19 = vor.u32 %v1566_v12, %v1563_v6 }
  0xdc   : > { %v1572_v22 = vrot.slane %v1570_v14, 5  ;;  %v1576_v23 = vrot.slane %v1574_v7, 4  ;;  %v874_v21 = vsel %vm16131_vm8, %v663_v15, %v873_v62  ;;  %v675_v30 = vshrl.u32 %v16289_v2, 16 }
  0xdd   : > { %v1582_v24 = vrot.slane %v1580_v16, 5  ;;  %v1323_v25 = vld [vmem:[#allocation2 + $0x78] sm:$0xf]  ;;  %v672_v26 = vsel %vm16138_vm9, %v664_v17, %v671_v8  ;;  %875 = vst [vmem:[#allocation2 + $0x90] sm:$0xf] %v874_v21  ;;  %v878_v27 = vsel %vm16145_vm10, %v673_v18, %v877_v1  ;;  %v1568_v31 = vrot.slane %v1567_v19, 4 }
  0xde   : > { %v1577_v32 = vor.u32 %v1576_v23, %v1572_v22  ;;  %v15454_v33 = vld [vmem:[#allocation2 + $0x78] sm:$0xff]   ;;  %876 = vst [vmem:[#allocation2 + $0x94] sm:$0xf] %v672_v26  ;;  %879 = vst [vmem:[#allocation2 + $0x98] sm:$0x1] %v878_v27  ;;  %v1585_v36 = vshrl.u32 %v1323_v25, 16 }
  0xdf   : > { %v1324_v34 = vld [vmem:[#allocation2 + $0x7c] sm:$0xf]  ;;  %v1325_v35 = vld [vmem:[#allocation2 + $0x80] sm:$0x1]  ;;  %v1588_v38 = vshll.u32 %v1323_v25, 16  ;;  %v1573_v42 = vsel %vm16125_vm7, %v1568_v31, %v1572_v22  ;;  %14521 = vmatprep.mubr.bf16.mxu0 %v15454_v33 }
  0xe0   : > { %v1594_v40 = vshll.u32 %v1324_v34, 16  ;;  %v1598_v41 = vshrl.u32 %v1324_v34, 16  ;;  %v1578_v39 = vrot.slane %v1577_v32, 4  ;;  %v1604_v45 = vshll.u32 %v1325_v35, 16  ;;  %v1326_v46 = vld [vmem:[#allocation2 + $0x84] sm:$0xf] }
  0xe1   : > { %v1587_v47 = vrot.slane %v1585_v36, 4  ;;  %v1590_v48 = vrot.slane %v1588_v38, 5  ;;  %v15455_v53 = vld [vmem:[#allocation2 + $0x84] sm:$0xff]   ;;  %v1328_v29 = vld [vmem:[#allocation2 + $0x8c] sm:$0x1]  ;;  %v1609_v59 = vshrl.u32 %v1326_v46, 16 }
  0xe2   : > { %v1596_v44 = vrot.slane %v1594_v40, 5  ;;  %v1600_v49 = vrot.slane %v1598_v41, 4  ;;  %v1583_v50 = vsel %vm16125_vm7, %v1578_v39, %v1582_v24  ;;  %v1606_v52 = vrot.slane %v1604_v45, 5  ;;  %v1327_v54 = vld [vmem:[#allocation2 + $0x88] sm:$0xf]  ;;  %14522 = vmatmul.mubr.bf16.gmra.mxu0 %v15455_v53 }
  0xe3   : > { %v13483_v55 = vcombine.low %v1573_v42, %v1583_v50  ;;  %v1591_v57 = vor.u32 %v1590_v48, %v1587_v47  ;;  %v1612_v60 = vshll.u32 %v1326_v46, 16  ;;  %v1618_v61 = vshll.u32 %v1327_v54, 16  ;;  %v460_v25 = vld [vmem:[%s16003_s19 + $0x64] sm:$0xf]  ;;  %v880_v33 = vld [vmem:[#allocation2 + $0x9c] sm:$0xf] }
  0xe4   : > { %v1601_v58 = vor.u32 %v1600_v49, %v1596_v44  ;;  %v1622_v62 = vshrl.u32 %v1327_v54, 16  ;;  %v1628_v63 = vshll.u32 %v1328_v29, 16  ;;  %v1611_v56 = vrot.slane %v1609_v59, 4  ;;  %v1329_v10 = vld [vmem:[#allocation2 + $0x90] sm:$0xf] }
  0xe5   : > { %14566 = vmatmul.mubr.bf16.gmra.mxu1 %v13483_v55  ;;  %v1592_v0 = vrot.slane %v1591_v57, 4  ;;  %v15459_v1 = vld [vmem:[#allocation2 + $0x90] sm:$0xff]   ;;  %v1614_v4 = vrot.slane %v1612_v60, 5  ;;  %v1620_v5 = vrot.slane %v1618_v61, 5  ;;  %v1331_v7 = vld [vmem:[#allocation2 + $0x98] sm:$0x1] }
  0xe6   : > { %v1602_v20 = vrot.slane %v1601_v58, 4  ;;  %v1624_v6 = vrot.slane %v1622_v62, 4  ;;  %v1630_v9 = vrot.slane %v1628_v63, 5  ;;  %14525 = vmatprep.mubr.bf16.mxu0 %v15459_v1  ;;  %v1330_v14 = vld [vmem:[#allocation2 + $0x94] sm:$0xf]  ;;  %v1633_v15 = vshrl.u32 %v1329_v10, 16 }
  0xe7   : > { %v1597_v11 = vsel %vm16125_vm7, %v1592_v0, %v1596_v44  ;;  %v1636_v16 = vshll.u32 %v1329_v10, 16  ;;  %v1615_v8 = vor.u32 %v1614_v4, %v1611_v56  ;;  %v1642_v19 = vshll.u32 %v1330_v14, 16  ;;  %v461_v40 = vld [vmem:[%s16003_s19 + $0x68] sm:$0xf]  ;;  %v462_v46 = vld [vmem:[%s16003_s19 + $0x6c] sm:$0xf] }
  0xe8   : > { %v1607_v12 = vsel %vm16125_vm7, %v1602_v20, %v1606_v52  ;;  %v1625_v18 = vor.u32 %v1624_v6, %v1620_v5  ;;  %v1635_v22 = vrot.slane %v1633_v15, 4  ;;  %v1646_v21 = vshrl.u32 %v1330_v14, 16  ;;  %v463_v47 = vld [vmem:[%s16003_s19 + $0x70] sm:$0xf]  ;;  %v884_v50 = vld [vmem:[#allocation2 + $0xa4] sm:$0x1] }
  0xe9   : > { %v13484_v17 = vcombine.low %v1597_v11, %v1607_v12  ;;  %v1638_v23 = vrot.slane %v1636_v16, 5  ;;  %v1652_v24 = vshll.u32 %v1331_v7, 16  ;;  %v1616_v26 = vrot.slane %v1615_v8, 4  ;;  %v887_v59 = vld [vmem:[#allocation2 + $0xa8] sm:$0xf] }
  0xea   : > { %v1626_v27 = vrot.slane %v1625_v18, 4  ;;  %v1644_v31 = vrot.slane %v1642_v19, 5  ;;  %v677_v32 = vrot.slane %v675_v30, 7  ;;  %v1648_v35 = vrot.slane %v1646_v21, 4  ;;  %v891_v0 = vld [vmem:[#allocation2 + $0xb0] sm:$0x1] }
  0xeb   : > { %14569 = vmatprep.mubr.bf16.mxu1 %v13484_v17  ;;  %v1639_v34 = vor.u32 %v1638_v23, %v1635_v22  ;;  %v1654_v36 = vrot.slane %v1652_v24, 5  ;;  %v678_v38 = vshll.u32 %v16289_v2, 16  ;;  %v1621_v41 = vsel %vm16125_vm7, %v1616_v26, %v1620_v5  ;;  %v464_v1 = vld [vmem:[%s16003_s19 + $0x74] sm:$0xf]  ;;  %v894_v12 = vld [vmem:[#allocation2 + $0xb4] sm:$0xf] }
  0xec   : > { %v1631_v42 = vsel %vm16125_vm7, %v1626_v27, %v1630_v9  ;;  %v681_v39 = vrot.slane %v677_v32, 4  ;;  %v683_v45 = vshrl.u32 %v460_v25, 16  ;;  %v1649_v30 = vor.u32 %v1648_v35, %v1644_v31  ;;  %v2114_v14 = vld [vmem:[#allocation2] sm:$0xe]  ;;  %v2115_v7 = vld [vmem:[#allocation2 + $0x4] sm:$0xf] }
  0xed   : > { %v13485_v48 = vcombine.low %v1621_v41, %v1631_v42  ;;  %v1640_v44 = vrot.slane %v1639_v34, 4  ;;  %v680_v49 = vor.u32 %v678_v38, %v677_v32  ;;  %v686_v53 = vshll.u32 %v460_v25, 16  ;;  %v2116_v18 = vld [vmem:[#allocation2 + $0x8] sm:$0x1]  ;;  %v2117_v21 = vld [vmem:[#allocation2 + $0xc] sm:$0xe] }
  0xee   : > { %v685_v52 = vrot.slane %v683_v45, 7  ;;  %v692_v54 = vshrl.u32 %v461_v40, 16  ;;  %v695_v2 = vshll.u32 %v461_v40, 16  ;;  %v1650_v55 = vrot.slane %v1649_v30, 4  ;;  %v2118_v24 = vld [vmem:[#allocation2 + $0x10] sm:$0xf] }
  0xef   : > { %14570 = vmatmul.mubr.bf16.gmra.mxu1 %v13485_v48  ;;  %v1645_v29 = vsel %vm16125_vm7, %v1640_v44, %v1644_v31  ;;  %v881_v57 = vsel %vm16131_vm8, %v680_v49, %v880_v33  ;;  %v700_v58 = vshrl.u32 %v462_v46, 16  ;;  %v703_v63 = vshll.u32 %v462_v46, 16  ;;  %v16337_v25 = vld [vmem:[#allocation2 + $0x14] sm:$0x1]  ;;  %v898_v33 = vld [vmem:[#allocation2 + $0xbc] sm:$0x1] }
  0xf0   : > { %v688_v60 = vor.u32 %v686_v53, %v685_v52  ;;  %v690_v61 = vrot.slane %v685_v52, 4  ;;  %882 = vst [vmem:[#allocation2 + $0x9c] sm:$0xf] %v881_v57  ;;  %v694_v62 = vrot.slane %v692_v54, 7  ;;  %v1655_v20 = vsel %vm16125_vm7, %v1650_v55, %v1654_v36 }
  0xf1   : > { %v702_v56 = vrot.slane %v700_v58, 7  ;;  %v709_v4 = vshrl.u32 %v463_v47, 16  ;;  %v712_v5 = vshll.u32 %v463_v47, 16  ;;  %v13486_v6 = vcombine.low %v1645_v29, %v1655_v20 }
  0xf2   : > { %v689_v9 = vsel %vm16138_vm9, %v681_v39, %v688_v60  ;;  %v885_v10 = vsel %vm16145_vm10, %v690_v61, %v884_v50  ;;  %v697_v11 = vor.u32 %v695_v2, %v694_v62  ;;  %v698_v15 = vrot.slane %v694_v62, 4 }
  0xf3   : > { %883 = vst [vmem:[#allocation2 + $0xa0] sm:$0xf] %v689_v9  ;;  %886 = vst [vmem:[#allocation2 + $0xa4] sm:$0x1] %v885_v10  ;;  %v705_v16 = vor.u32 %v703_v63, %v702_v56  ;;  %v707_v17 = vrot.slane %v702_v56, 4  ;;  %v711_v8 = vrot.slane %v709_v4, 7  ;;  %14573 = vmatprep.mubr.bf16.mxu1 %v13486_v6 }
  0xf4   : > { %v888_v19 = vsel %vm16131_vm8, %v697_v11, %v887_v59  ;;  %v717_v22 = vshrl.u32 %v464_v1, 16  ;;  %v720_v23 = vshll.u32 %v464_v1, 16  ;;  %v13498_v35 = vrot.slane %v2114_v14, 9 }
  0xf5   : > { %v706_v26 = vsel %vm16138_vm9, %v698_v15, %v705_v16  ;;  %889 = vst [vmem:[#allocation2 + $0xa8] sm:$0xf] %v888_v19  ;;  %v892_v27 = vsel %vm16145_vm10, %v707_v17, %v891_v0  ;;  %v714_v31 = vor.u32 %v712_v5, %v711_v8  ;;  %v715_v32 = vrot.slane %v711_v8, 4 }
  0xf6   : > { %890 = vst [vmem:[#allocation2 + $0xac] sm:$0xf] %v706_v26  ;;  %893 = vst [vmem:[#allocation2 + $0xb0] sm:$0x1] %v892_v27  ;;  %v719_v34 = vrot.slane %v717_v22, 7  ;;  %v2215_v36 = vrot.slane %v2115_v7, 5 }
  0xf7   : > { %v1332_v38 = vld [vmem:[#allocation2 + $0x9c] sm:$0xf]  ;;  %v895_v40 = vsel %vm16131_vm8, %v714_v31, %v894_v12  ;;  %v19910_v41 = vmov 0  ;;  %v2218_v42 = vrot.slane %v2116_v18, 5  ;;  %v13499_v44 = vrot.slane %v2117_v21, 9 }
  0xf8   : > { %v19911_v41 = vsel %vm16346_vm13, 4294967295, %v19910_v41  ;;  %v1657_v39 = vshrl.u32 %v1332_v38, 16  ;;  %v1660_v45 = vshll.u32 %v1332_v38, 16  ;;  %v722_v46 = vor.u32 %v720_v23, %v719_v34  ;;  %896 = vst [vmem:[#allocation2 + $0xb4] sm:$0xf] %v895_v40 }
  0xf9   : > { %19912 = vst [vmem:[#allocation19_spill] sm:$0xff] %v19911_v41  ;;  %v724_v47 = vrot.slane %v719_v34, 4  ;;  %v2217_v48 = vrot.slane %v2215_v36, 4  ;;  %v2222_v30 = vrot.slane %v2118_v24, 5  ;;  %v2225_v49 = vrot.slane %v16337_v25, 5 }
  0xfa   : > { %v15460_v50 = vld [vmem:[#allocation2 + $0x9c] sm:$0xff]   ;;  %v1659_v53 = vrot.slane %v1657_v39, 4  ;;  %v723_v54 = vsel %vm16138_vm9, %v715_v32, %v722_v46  ;;  %v2216_v29 = vsel %vm16346_vm13, %v13498_v35, %v2215_v36  ;;  %v1334_v55 = vld [vmem:[#allocation2 + $0xa4] sm:$0x1]  ;;  %v1662_v57 = vrot.slane %v1660_v45, 5 }
  0xfb   : > { %v1333_v52 = vld [vmem:[#allocation2 + $0xa0] sm:$0xf]  ;;  %v899_v2 = vsel %vm16145_vm10, %v724_v47, %v898_v33  ;;  %897 = vst [vmem:[#allocation2 + $0xb8] sm:$0xf] %v723_v54  ;;  %v2219_v60 = vsel %vm16346_vm13, %v2217_v48, %v2218_v42  ;;  %14526 = vmatmul.mubr.bf16.gmra.mxu0 %v15460_v50  ;;  %v1676_v61 = vshll.u32 %v1334_v55, 16  ;;  %v2224_v63 = vrot.slane %v2222_v30, 4 }
  0xfc   : > { %v1666_v58 = vshll.u32 %v1333_v52, 16  ;;  %v1670_v59 = vshrl.u32 %v1333_v52, 16  ;;  %900 = vst [vmem:[#allocation2 + $0xbc] sm:$0x1] %v899_v2  ;;  %v1335_v62 = vld [vmem:[#allocation2 + $0xa8] sm:$0xf]  ;;  %v1663_v0 = vor.u32 %v1662_v57, %v1659_v53  ;;  %v13514_v11 = vcombine.low %v2216_v29, %v2219_v60 }
  0xfd   : > { %v15464_v1 = vld [vmem:[#allocation2 + $0xa8] sm:$0xff]   ;;  %v1681_v4 = vshrl.u32 %v1335_v62, 16  ;;  %v1678_v5 = vrot.slane %v1676_v61, 5  ;;  %v1337_v9 = vld [vmem:[#allocation2 + $0xb0] sm:$0x1]  ;;  %v1684_v10 = vshll.u32 %v1335_v62, 16  ;;  %v16361_v12 = vsel %vm16346_vm13, %v13499_v44, %v2222_v30 }
  0xfe   : > { %v1668_v20 = vrot.slane %v1666_v58, 5  ;;  %v1672_v56 = vrot.slane %v1670_v59, 4  ;;  %v1336_v6 = vld [vmem:[#allocation2 + $0xac] sm:$0xf]  ;;  %v1664_v14 = vrot.slane %v1663_v0, 4  ;;  %14529 = vmatprep.mubr.bf16.mxu0 %v15464_v1  ;;  %v1700_v18 = vshll.u32 %v1337_v9, 16 }
  0xff   : > { %v1683_v15 = vrot.slane %v1681_v4, 4  ;;  %v1690_v16 = vshll.u32 %v1336_v6, 16  ;;  %v1686_v17 = vrot.slane %v1684_v10, 5  ;;  %v1694_v8 = vshrl.u32 %v1336_v6, 16  ;;  %v1338_v19 = vld [vmem:[#allocation2 + $0xb4] sm:$0xf] }
 0x100   : > { %v1673_v7 = vor.u32 %v1672_v56, %v1668_v20  ;;  %v2226_v22 = vsel %vm16346_vm13, %v2224_v63, %v2225_v49  ;;  %v1669_v23 = vsel %vm16125_vm7, %v1664_v14, %v1668_v20  ;;  %v1705_v25 = vshrl.u32 %v1338_v19, 16  ;;  %v2120_v47 = vld [vmem:[#allocation2 + $0x18] sm:$0xe]  ;;  %v2121_v48 = vld [vmem:[#allocation2 + $0x1c] sm:$0xf] }
 0x101   : > { %v1692_v24 = vrot.slane %v1690_v16, 5  ;;  %v1687_v26 = vor.u32 %v1686_v17, %v1683_v15  ;;  %v1696_v27 = vrot.slane %v1694_v8, 4  ;;  %v1708_v32 = vshll.u32 %v1338_v19, 16  ;;  %v2122_v50 = vld [vmem:[#allocation2 + $0x20] sm:$0x1] }
 0x102   : > { %v1674_v21 = vrot.slane %v1673_v7, 4  ;;  %v15465_v31 = vld [vmem:[#allocation2 + $0xb4] sm:$0xff]   ;;  %v1702_v34 = vrot.slane %v1700_v18, 5  ;;  %v1707_v38 = vrot.slane %v1705_v25, 4  ;;  %v13515_v40 = vcombine.low %v16361_v12, %v2226_v22  ;;  %v2123_v55 = vld [vmem:[#allocation2 + $0x24] sm:$0xe] }
 0x103   : > { %v1339_v35 = vld [vmem:[#allocation2 + $0xb8] sm:$0xf]  ;;  %v1340_v36 = vld [vmem:[#allocation2 + $0xbc] sm:$0x1]  ;;  %v1688_v39 = vrot.slane %v1687_v26, 4  ;;  %v1697_v45 = vor.u32 %v1696_v27, %v1692_v24  ;;  %14530 = vmatmul.mubr.bf16.gmra.mxu0 %v15465_v31  ;;  %v1710_v46 = vrot.slane %v1708_v32, 5 }
 0x104   : > { %v1679_v33 = vsel %vm16125_vm7, %v1674_v21, %v1678_v5  ;;  %v1714_v44 = vshll.u32 %v1339_v35, 16  ;;  %v1718_v30 = vshrl.u32 %v1339_v35, 16  ;;  %v1724_v49 = vshll.u32 %v1340_v36, 16  ;;  %14597 = vmatprep.mubr.bf16.mxu0 %v13514_v11  ;;  %v2124_v57 = vld [vmem:[#allocation2 + $0x28] sm:$0xf]  ;;  %v15472_v11 = vld [vmem:[#allocation8 + $0x130] sm:$0xff]  }
 0x105   : > { %v13487_v42 = vcombine.low %v1669_v23, %v1679_v33  ;;  %v13500_v52 = vrot.slane %v2120_v47, 9  ;;  %v1693_v53 = vsel %vm16125_vm7, %v1688_v39, %v1692_v24  ;;  %v1698_v54 = vrot.slane %v1697_v45, 4  ;;  %v2125_v62 = vld [vmem:[#allocation2 + $0x2c] sm:$0x1]  ;;  %v2126_v16 = vld [vmem:[#allocation2 + $0x30] sm:$0xe] }
 0x106   : > { %v1711_v2 = vor.u32 %v1710_v46, %v1707_v38  ;;  %v2229_v29 = vrot.slane %v2121_v48, 5  ;;  %v1716_v58 = vrot.slane %v1714_v44, 5  ;;  %v1720_v59 = vrot.slane %v1718_v30, 4  ;;  %v2127_v17 = vld [vmem:[#allocation2 + $0x34] sm:$0xf]  ;;  %v15470_v21 = vld [vmem:[#allocation2 + $0xc] sm:$0xff]  }
 0x107   : > { %14574 = vmatmul.mubr.bf16.gmra.mxu1 %v13487_v42  ;;  %v1726_v60 = vrot.slane %v1724_v49, 5  ;;  %v2232_v61 = vrot.slane %v2122_v50, 5  ;;  %v1703_v63 = vsel %vm16125_vm7, %v1698_v54, %v1702_v34  ;;  %v13501_v5 = vrot.slane %v2123_v55, 9  ;;  %v2128_v8 = vld [vmem:[#allocation2 + $0x38] sm:$0x1]  ;;  %v15473_v54 = vld [vmem:[#allocation2 + $0x24] sm:$0xff]  }
 0x108   : > { %v1712_v0 = vrot.slane %v1711_v2, 4  ;;  %v2230_v20 = vsel %vm16346_vm13, %v13500_v52, %v2229_v29  ;;  %v2231_v56 = vrot.slane %v2229_v29, 4  ;;  %v13488_v1 = vcombine.low %v1693_v53, %v1703_v63  ;;  %v2129_v22 = vld [vmem:[#allocation2 + $0x3c] sm:$0xe]  ;;  %v2130_v27 = vld [vmem:[#allocation2 + $0x40] sm:$0xf] }
 0x109   : > { %v1721_v4 = vor.u32 %v1720_v59, %v1716_v58  ;;  %v2236_v6 = vrot.slane %v2124_v57, 5  ;;  %v2239_v10 = vrot.slane %v2125_v62, 5  ;;  %v13502_v18 = vrot.slane %v2126_v16, 9  ;;  %v2131_v31 = vld [vmem:[#allocation2 + $0x44] sm:$0x1]  ;;  %v15475_v35 = vld [vmem:[#allocation8 + $0x128] sm:$0xff]  }
 0x10a   : > { %v2233_v9 = vsel %vm16346_vm13, %v2231_v56, %v2232_v61  ;;  %14577 = vmatprep.mubr.bf16.mxu1 %v13488_v1  ;;  %v1717_v12 = vsel %vm16125_vm7, %v1712_v0, %v1716_v58  ;;  %v2243_v19 = vrot.slane %v2127_v17, 5  ;;  %v2246_v26 = vrot.slane %v2128_v8, 5  ;;  %v2132_v42 = vld [vmem:[#allocation2 + $0x48] sm:$0xe]  ;;  %v2133_v47 = vld [vmem:[#allocation2 + $0x4c] sm:$0xf] }
 0x10b   : > { %v1722_v14 = vrot.slane %v1721_v4, 4  ;;  %v13516_v7 = vcombine.low %v2230_v20, %v2233_v9  ;;  %v2238_v15 = vrot.slane %v2236_v6, 4  ;;  %14598 = vmatmul.mubr.bf16.vlgmr.msra.gmra.mxu0 %v13515_v40  ;;  %v2237_v24 = vsel %vm16346_vm13, %v13501_v5, %v2236_v6  ;;  %v2134_v48 = vld [vmem:[#allocation2 + $0x50] sm:$0x1]  ;;  %v15471_v44 = vld [vmem:[#allocation2 + $0x18] sm:$0xff]   ;;  %v15481_v57 = vld [vmem:[#allocation8 + $0x118] sm:$0xff]  }
 0x10c   : > { %14678 = vmatpush3.bf16.msra.mxu0 %v16248_v13  ;;  %v2244_v33 = vsel %vm16346_vm13, %v13502_v18, %v2243_v19  ;;  %v2245_v34 = vrot.slane %v2243_v19, 4  ;;  %v13503_v36 = vrot.slane %v2129_v22, 9  ;;  %v2250_v38 = vrot.slane %v2130_v27, 5  ;;  %v2136_v52 = vld [vmem:[#allocation2 + $0x58] sm:$0xf]  ;;  %v15478_v53 = vld [vmem:[#allocation8 + $0x120] sm:$0xff]  }
 0x10d   : > { %v1727_v23 = vsel %vm16125_vm7, %v1722_v14, %v1726_v60  ;;  %14601 = vmatprep.mubr.bf16.mxu0 %v13516_v7  ;;  %v2240_v25 = vsel %vm16346_vm13, %v2238_v15, %v2239_v10  ;;  %14679 = vmatprep.subr.bf16.mxu0 %v15472_v11  ;;  %v2253_v46 = vrot.slane %v2131_v31, 5  ;;  %v13504_v30 = vrot.slane %v2132_v42, 9  ;;  %v2135_v2 = vld [vmem:[#allocation2 + $0x54] sm:$0xe]  ;;  %v2137_v60 = vld [vmem:[#allocation2 + $0x5c] sm:$0x1] }
 0x10e   : > { %v13489_v32 = vcombine.low %v1717_v12, %v1727_v23  ;;  %v13517_v13 = vcombine.low %v2237_v24, %v2240_v25  ;;  %v2247_v40 = vsel %vm16346_vm13, %v2245_v34, %v2246_v26  ;;  %v2252_v45 = vrot.slane %v2250_v38, 4  ;;  %v2138_v63 = vld [vmem:[#allocation2 + $0x60] sm:$0xe]  ;;  %v2139_v0 = vld [vmem:[#allocation2 + $0x64] sm:$0xf]  ;;  %v15474_v16 = vld [vmem:[#allocation2 + $0x30] sm:$0xff]  }
 0x10f   : > { %v13518_v39 = vcombine.low %v2244_v33, %v2247_v40  ;;  %v2257_v49 = vrot.slane %v2133_v47, 5  ;;  %v2260_v50 = vrot.slane %v2134_v48, 5  ;;  %v2264_v55 = vrot.slane %v2136_v52, 5  ;;  %v2140_v20 = vld [vmem:[#allocation2 + $0x68] sm:$0x1]  ;;  %v15485_v1 = vld [vmem:[#allocation8 + $0x170] sm:$0xff]  }
 0x110   : > { %14578 = vmatmul.mubr.bf16.gmra.mxu1 %v13489_v32  ;;  %14680 = vmatpush3.bf16.msra.mxu0 %v15472_v11  ;;  %v2251_v58 = vsel %vm16346_vm13, %v13503_v36, %v2250_v38  ;;  %v2254_v59 = vsel %vm16346_vm13, %v2252_v45, %v2253_v46  ;;  %v2271_v56 = vrot.slane %v2139_v0, 5  ;;  %v13505_v5 = vrot.slane %v2135_v2, 9  ;;  %v16399_v10 = vld [vmem:[#allocation2 + $0x70] sm:$0xf]  ;;  %v15486_v15 = vld [vmem:[#allocation8 + $0x110] sm:$0xff]   ;;  %v15489_v22 = vld [vmem:[#allocation8 + $0x168] sm:$0xff]  }
 0x111   : > { %14645 = vmatprep.mubr.bf16.mxu1 %v15470_v21  ;;  %14681 = vmatprep.subr.bf16.mxu0 %v15475_v35  ;;  %v2259_v29 = vrot.slane %v2257_v49, 4  ;;  %v2258_v61 = vsel %vm16346_vm13, %v13504_v30, %v2257_v49  ;;  %v13519_v4 = vcombine.low %v2251_v58, %v2254_v59  ;;  %v2266_v6 = vrot.slane %v2264_v55, 4  ;;  %v2141_v17 = vld [vmem:[#allocation2 + $0x6c] sm:$0xe]  ;;  %v2143_v8 = vld [vmem:[#allocation2 + $0x74] sm:$0x1] }
 0x112   : > { %v2267_v9 = vrot.slane %v2137_v60, 5  ;;  %v13506_v12 = vrot.slane %v2138_v63, 9  ;;  %v2273_v14 = vrot.slane %v2271_v56, 4  ;;  %v2274_v7 = vrot.slane %v2140_v20, 5  ;;  %v15476_v18 = vld [vmem:[#allocation2 + $0x3c] sm:$0xff]   ;;  %v15490_v26 = vld [vmem:[#allocation8 + $0x160] sm:$0xff]  }
 0x113   : > { %14602 = vmatmul.mubr.bf16.gmra.mxu0 %v13517_v13  ;;  %v2261_v62 = vsel %vm16346_vm13, %v2259_v29, %v2260_v50  ;;  %v2278_v19 = vrot.slane %v16399_v10, 5  ;;  %v2265_v23 = vsel %vm16346_vm13, %v13505_v5, %v2264_v55  ;;  %v2144_v24 = vld [vmem:[#allocation2 + $0x78] sm:$0xe]  ;;  %v2145_v25 = vld [vmem:[#allocation2 + $0x7c] sm:$0xf]  ;;  %v2281_v38 = vrot.slane %v2143_v8, 5 }
 0x114   : > { %14605 = vmatprep.mubr.bf16.mxu0 %v13518_v39  ;;  %14682 = vmatpush3.bf16.msra.mxu0 %v15475_v35  ;;  %v13520_v11 = vcombine.low %v2258_v61, %v2261_v62  ;;  %v2268_v21 = vsel %vm16346_vm13, %v2266_v6, %v2267_v9  ;;  %v2275_v27 = vsel %vm16346_vm13, %v2273_v14, %v2274_v7  ;;  %v2146_v31 = vld [vmem:[#allocation2 + $0x80] sm:$0x1]  ;;  %v2285_v32 = vrot.slane %v2145_v25, 5  ;;  %v16411_v33 = vld [vmem:[#allocation2 + $0x84] sm:$0xe]  ;;  %v15491_v34 = vld [vmem:[#allocation8 + $0x108] sm:$0xff]  }
 0x115   : > { %14683 = vmatprep.subr.bf16.mxu0 %v15478_v53  ;;  %v13507_v35 = vrot.slane %v2141_v17, 9  ;;  %v2280_v36 = vrot.slane %v2278_v19, 4  ;;  %v13508_v13 = vrot.slane %v2144_v24, 9  ;;  %v16413_v40 = vld [vmem:[#allocation2 + $0x88] sm:$0xf]  ;;  %v13521_v42 = vcombine.low %v2265_v23, %v2268_v21  ;;  %v15496_v47 = vld [vmem:[#allocation8 + $0x100] sm:$0xff]  }
 0x116   : > { %v2288_v39 = vrot.slane %v2146_v31, 5  ;;  %v2149_v45 = vld [vmem:[#allocation2 + $0x8c] sm:$0x1]  ;;  %v13509_v46 = vrot.slane %v16411_v33, 9  ;;  %v2287_v49 = vrot.slane %v2285_v32, 4  ;;  %v2292_v50 = vrot.slane %v16413_v40, 5 }
 0x117   : > { %v15477_v30 = vld [vmem:[#allocation2 + $0x48] sm:$0xff]   ;;  %v15479_v52 = vld [vmem:[#allocation2 + $0x54] sm:$0xff]   ;;  %v2279_v29 = vsel %vm16346_vm13, %v13507_v35, %v2278_v19  ;;  %v2282_v55 = vsel %vm16346_vm13, %v2280_v36, %v2281_v38  ;;  %v2153_v60 = vld [vmem:[#allocation2 + $0x9c] sm:$0xe]  ;;  %v2286_v62 = vsel %vm16346_vm13, %v13508_v13, %v2285_v32 }
 0x118   : > { %14646 = vmatmul.mubr.bf16.vlgmr.msra.gmra.mxu1 %v15471_v44  ;;  %14684 = vmatpush3.bf16.msra.mxu0 %v15478_v53  ;;  %v15494_v44 = vld [vmem:[#allocation8 + $0x158] sm:$0xff]   ;;  %v2150_v53 = vld [vmem:[#allocation2 + $0x90] sm:$0xe]  ;;  %v2152_v58 = vld [vmem:[#allocation2 + $0x98] sm:$0x1]  ;;  %v2289_v63 = vsel %vm16346_vm13, %v2287_v49, %v2288_v39  ;;  %v2294_v0 = vrot.slane %v2292_v50, 4  ;;  %v13523_v10 = vcombine.low %v2279_v29, %v2282_v55 }
 0x119   : > { %14649 = vmatprep.mubr.bf16.mxu1 %v15473_v54  ;;  %14685 = vmatprep.subr.bf16.mxu0 %v15481_v57  ;;  %v2151_v54 = vld [vmem:[#allocation2 + $0x94] sm:$0xf]  ;;  %v16417_v2 = vld [vmem:[#allocation8 + $0x1b8] sm:$0xff]   ;;  %v15495_v61 = vld [vmem:[#allocation8 + $0x150] sm:$0xff]   ;;  %v13510_v20 = vrot.slane %v2150_v53, 9  ;;  %v2302_v5 = vrot.slane %v2152_v58, 5 }
 0x11a   : > { %14726 = vmatpush3.bf16.msra.mxu1 %v16291_v3  ;;  %v2272_v3 = vsel %vm16346_vm13, %v13506_v12, %v2271_v56  ;;  %v2299_v59 = vrot.slane %v2151_v54, 5  ;;  %v2154_v56 = vld [vmem:[#allocation2 + $0xa0] sm:$0xf]  ;;  %v13511_v6 = vrot.slane %v2153_v60, 9  ;;  %v15499_v7 = vld [vmem:[#allocation8 + $0x148] sm:$0xff]   ;;  %v15500_v32 = vld [vmem:[#allocation8 + $0x140] sm:$0xff]  }
 0x11b   : > { %14727 = vmatprep.subr.bf16.mxu1 %v15485_v1  ;;  %14606 = vmatmul.mubr.bf16.gmra.mxu0 %v13519_v4  ;;  %v13522_v48 = vcombine.low %v2272_v3, %v2275_v27  ;;  %v2306_v9 = vrot.slane %v2154_v56, 5  ;;  %v2156_v17 = vld [vmem:[#allocation2 + $0xa8] sm:$0xe]  ;;  %v2157_v8 = vld [vmem:[#allocation2 + $0xac] sm:$0xf] }
 0x11c   : > { %14609 = vmatprep.mubr.bf16.mxu0 %v13520_v11  ;;  %14686 = vmatpush3.bf16.msra.mxu0 %v15481_v57  ;;  %v2295_v57 = vrot.slane %v2149_v45, 5  ;;  %v2301_v4 = vrot.slane %v2299_v59, 4  ;;  %v13524_v11 = vcombine.low %v2286_v62, %v2289_v63  ;;  %v13512_v23 = vrot.slane %v2156_v17, 9  ;;  %v2159_v24 = vld [vmem:[#allocation2 + $0xb4] sm:$0xe]  ;;  %v16462_v55 = vld [vmem:[#allocation8 + $0x1f8] sm:$0xff]  }
 0x11d   : > { %14687 = vmatprep.subr.bf16.mxu0 %v15486_v15  ;;  %v2308_v12 = vrot.slane %v2306_v9, 4  ;;  %v2313_v21 = vrot.slane %v2157_v8, 5  ;;  %v2300_v25 = vsel %vm16346_vm13, %v13510_v20, %v2299_v59  ;;  %v2160_v27 = vld [vmem:[#allocation2 + $0xb8] sm:$0xf]  ;;  %v2161_v31 = vld [vmem:[#allocation2 + $0xbc] sm:$0x1]  ;;  %v16438_v13 = vsel %vm16346_vm13, %v13511_v6, %v2306_v9 }
 0x11e   : > { %14728 = vmatpush3.bf16.msra.mxu1 %v15485_v1  ;;  %v2155_v1 = vld [vmem:[#allocation2 + $0xa4] sm:$0x1]  ;;  %v2296_v19 = vsel %vm16346_vm13, %v2294_v0, %v2295_v57  ;;  %v2320_v35 = vrot.slane %v2160_v27, 5  ;;  %v2323_v36 = vrot.slane %v2161_v31, 5  ;;  %v901_v29 = vld [vmem:[#allocation2 + $0xc0] sm:$0xf] }
 0x11f   : > { %14729 = vmatprep.subr.bf16.mxu1 %v15489_v22  ;;  %v2309_v14 = vrot.slane %v2155_v1, 5  ;;  %v2315_v33 = vrot.slane %v2313_v21, 4  ;;  %v16446_v39 = vsel %vm16346_vm13, %v13512_v23, %v2313_v21  ;;  %v3162_v62 = vld [vmem:[#allocation2 + $0x10] sm:$0xf]  ;;  %v3163_v63 = vld [vmem:[#allocation2 + $0x14] sm:$0x1] }
 0x120   : > { %14650 = vmatmul.mubr.bf16.gmra.mxu1 %v15474_v16  ;;  %14688 = vmatpush3.bf16.msra.mxu0 %v15486_v15  ;;  %v15480_v15 = vld [vmem:[#allocation2 + $0x60] sm:$0xff]   ;;  %v15482_v16 = vld [vmem:[#allocation2 + $0x6c] sm:$0xff]   ;;  %v2322_v45 = vrot.slane %v2320_v35, 4  ;;  %v3165_v6 = vld [vmem:[#allocation2 + $0x1c] sm:$0xf] }
 0x121   : > { %14653 = vmatprep.mubr.bf16.mxu1 %v15476_v18  ;;  %14689 = vmatprep.subr.bf16.mxu0 %v15491_v34  ;;  %v2293_v18 = vsel %vm16346_vm13, %v13509_v46, %v2292_v50  ;;  %v465_v46 = vld [vmem:[%s16003_s19 + $0x78] sm:$0xf]  ;;  %v15483_v50 = vld [vmem:[#allocation2 + $0x78] sm:$0xff]   ;;  %v3979_v23 = vld [vmem:[#allocation2 + $0xc] sm:$0xe] }
 0x122   : > { %14730 = vmatpush3.bf16.msra.mxu1 %v15489_v22  ;;  %v2158_v22 = vld [vmem:[#allocation2 + $0xb0] sm:$0x1]  ;;  %v13525_v38 = vcombine.low %v2293_v18, %v2296_v19  ;;  %v16460_v53 = vsel %vm16346_vm13, %v2322_v45, %v2323_v36  ;;  %v15487_v0 = vld [vmem:[#allocation2 + $0x84] sm:$0xff]  }
 0x123   : > { %14731 = vmatprep.subr.bf16.mxu1 %v15490_v26  ;;  %14610 = vmatmul.mubr.bf16.gmra.mxu0 %v13521_v42  ;;  %v2316_v3 = vrot.slane %v2158_v22, 5  ;;  %v16442_v42 = vsel %vm16346_vm13, %v2308_v12, %v2309_v14  ;;  %v3223_v12 = vshrl.u32 %v3162_v62, 16  ;;  %v3166_v14 = vld [vmem:[#allocation2 + $0x20] sm:$0x1] }
 0x124   : > { %14613 = vmatprep.mubr.bf16.mxu0 %v13522_v48  ;;  %14690 = vmatpush3.bf16.msra.mxu0 %v15491_v34  ;;  %v13513_v34 = vrot.slane %v2159_v24, 9  ;;  %v13527_v59 = vcombine.low %v16438_v13, %v16442_v42  ;;  %v15488_v42 = vld [vmem:[#allocation2 + $0x90] sm:$0xff]  }
 0x125   : > { %14691 = vmatprep.subr.bf16.mxu0 %v15496_v47  ;;  %v16452_v48 = vsel %vm16346_vm13, %v2315_v33, %v2316_v3  ;;  %v3225_v22 = vrot.slane %v3223_v12, 4  ;;  %v3980_v3 = vld [vmem:[#allocation2 + $0x10] sm:$0xf]  ;;  %v3253_v33 = vshll.u32 %v3166_v14, 16 }
 0x126   : > { %14732 = vmatpush3.bf16.msra.mxu1 %v15490_v26  ;;  %v2303_v26 = vsel %vm16346_vm13, %v2301_v4, %v2302_v5  ;;  %v13528_v60 = vcombine.low %v16446_v39, %v16452_v48  ;;  %v3164_v5 = vld [vmem:[#allocation2 + $0x18] sm:$0xf]  ;;  %v4077_v13 = vrot.slane %v3980_v3, 5  ;;  %v15492_v39 = vld [vmem:[#allocation2 + $0x9c] sm:$0xff]   ;;  %v3170_v12 = vld [vmem:[#allocation2 + $0x30] sm:$0xf] }
 0x127   : > { %14733 = vmatprep.subr.bf16.mxu1 %v15494_v44  ;;  %v13526_v40 = vcombine.low %v2300_v25, %v2303_v26  ;;  %v3234_v17 = vshrl.u32 %v3164_v5, 16  ;;  %v3237_v25 = vshll.u32 %v3164_v5, 16  ;;  %v3243_v26 = vshll.u32 %v3165_v6, 16  ;;  %v3169_v5 = vld [vmem:[#allocation2 + $0x2c] sm:$0x1]  ;;  %v15497_v3 = vld [vmem:[#allocation2 + $0xb4] sm:$0xff]  }
 0x128   : > { %14654 = vmatmul.mubr.bf16.gmra.mxu1 %v15477_v30  ;;  %14692 = vmatpush3.bf16.msra.mxu0 %v15496_v47  ;;  %v466_v47 = vld [vmem:[%s16003_s19 + $0x7c] sm:$0xf]  ;;  %v729_v30 = vshll.u32 %v465_v46, 16  ;;  %v3255_v48 = vrot.slane %v3253_v33, 5  ;;  %v3172_v33 = vld [vmem:[#allocation2 + $0x38] sm:$0x1] }
 0x129   : > { %14657 = vmatprep.mubr.bf16.mxu1 %v15479_v52  ;;  %14773 = vmatprep.subr.bf16.mxu0 %v16417_v2  ;;  %v734_v49 = vshrl.u32 %v466_v47, 16  ;;  %v16456_v52 = vsel %vm16346_vm13, %v13513_v34, %v2320_v35  ;;  %v737_v54 = vshll.u32 %v466_v47, 16  ;;  %v3236_v24 = vrot.slane %v3234_v17, 4  ;;  %v3981_v34 = vld [vmem:[#allocation2 + $0x14] sm:$0x1]  ;;  %s19544_s19 = scalar_lea.vmem [#allocation11], %s13449_s15 }
 0x12a   : > { %14734 = vmatpush3.bf16.msra.mxu1 %v15494_v44  ;;  %v726_v44 = vshrl.u32 %v465_v46, 16  ;;  %v13529_v20 = vcombine.low %v16456_v52, %v16460_v53  ;;  %v3239_v35 = vrot.slane %v3237_v25, 5  ;;  %v3245_v36 = vrot.slane %v3243_v26, 5  ;;  %v3171_v17 = vld [vmem:[#allocation2 + $0x34] sm:$0xf]  ;;  %s13345_s9 = sshll.u32 %s19544_s19, 4  ;;  %s19814_s9 = int_to_ptr.vmem [resolvable:$true] %s13345_s9 }
 0x12b   : > { %14735 = vmatprep.subr.bf16.mxu1 %v15495_v61  ;;  %14614 = vmatmul.mubr.bf16.gmra.mxu0 %v13523_v10  ;;  %v16464_v58 = vrot.slane %v734_v49, 7  ;;  %v4079_v49 = vrot.slane %v4077_v13, 4  ;;  %s15744_s28 = scalar_lea.vmem %s19814_s9, 4096  ;;  %p15751_p13 = scmp.lt.s32.totalorder %s19814_s9, %s15749_s13 }
 0x12c   : > { %14617 = vmatprep.mubr.bf16.mxu0 %v13524_v11  ;;  %v728_v57 = vrot.slane %v726_v44, 7  ;;  %v3219_v11 = vshll.u32 %v3162_v62, 16  ;;  %v3240_v44 = vor.u32 %v3239_v35, %v3236_v24  ;;  %p15745_p5 = scmp.ne.s32.totalorder %s19814_s9, %s15744_s28  ;;  %p15752_p0 = scmp.lt.s32.totalorder %s15750_s14, %s15744_s28 }
 0x12d   : > { %v739_v4 = vor.u32 %v737_v54, %v16464_v58  ;;  %v3983_v54 = vld [vmem:[#allocation2 + $0x1c] sm:$0xf] }
 0x12e   : > { %14736 = vmatpush3.bf16.msra.mxu1 %v15495_v61  ;;  %v3161_v61 = vld [vmem:[#allocation2 + $0xc] sm:$0xf]  ;;  %v731_v56 = vor.u32 %v729_v30, %v728_v57  ;;  %v732_v1 = vrot.slane %v728_v57, 4  ;;  %v3221_v19 = vrot.slane %v3219_v11, 5  ;;  %p15746_p7 = pnand %p15745_p5, %p20250_p2  ;;  %p15753_p10 = por %p15752_p0, %p15751_p13 }
 0x12f   : > { %14737 = vmatprep.subr.bf16.mxu1 %v15499_v7  ;;  %v3210_v9 = vshrl.u32 %v3161_v61, 16  ;;  %v3213_v10 = vshll.u32 %v3161_v61, 16 }
 0x130   : > { %14658 = vmatmul.mubr.bf16.gmra.mxu1 %v15480_v15  ;;  %v902_v15 = vsel %vm16131_vm8, %v731_v56, %v901_v29  ;;  %v3226_v31 = vor.u32 %v3225_v22, %v3221_v19  ;;  %v3984_v29 = vld [vmem:[#allocation2 + $0x20] sm:$0x1]  ;;  %p15747_p12 = pneg %p15746_p7 }
 0x131   : > { %14661 = vmatprep.mubr.bf16.mxu1 %v15482_v16  ;;  %v3229_v16 = vshll.u32 %v3163_v63, 16  ;;  %903 = vst [vmem:[#allocation2 + $0xc0] sm:$0xf] %v902_v15  ;;  %v3212_v8 = vrot.slane %v3210_v9, 4  ;;  %v3215_v18 = vrot.slane %v3213_v10, 5  ;;  %v4084_v10 = vrot.slane %v3983_v54, 5 }
 0x132   : > { %14738 = vmatpush3.bf16.msra.mxu1 %v15499_v7  ;;  %v740_v7 = vsel %vm16138_vm9, %v732_v1, %v739_v4  ;;  %v3227_v46 = vrot.slane %v3226_v31, 4  ;;  %v3167_v63 = vld [vmem:[#allocation2 + $0x24] sm:$0xf]  ;;  %v3241_v1 = vrot.slane %v3240_v44, 4  ;;  %v4087_v11 = vrot.slane %v3984_v29, 5  ;;  %p15754_p3 = pnand %p15753_p10, %p15747_p12 }
 0x133   : > { %14739 = vmatprep.subr.bf16.mxu1 %v15500_v32  ;;  %14618 = vmatmul.mubr.bf16.gmra.mxu0 %v13525_v38  ;;  %904 = vst [vmem:[#allocation2 + $0xc4] sm:$0xf] %v740_v7  ;;  %v3231_v21 = vrot.slane %v3229_v16, 5  ;;  %v3216_v27 = vor.u32 %v3215_v18, %v3212_v8  ;;  %v13586_v38 = vrot.slane %v3979_v23, 9  ;;  %v3258_v7 = vshrl.u32 %v3167_v63, 16  ;;  %v15493_v23 = vld [vmem:[#allocation2 + $0xa8] sm:$0xff]  }
 0x134   : > { %14621 = vmatprep.mubr.bf16.mxu0 %v13526_v40  ;;  %v3982_v40 = vld [vmem:[#allocation2 + $0x18] sm:$0xe]  ;;  %v3246_v14 = vsel %vm16125_vm7, %v3241_v1, %v3245_v36  ;;  %v3261_v15 = vshll.u32 %v3167_v63, 16  ;;  %v3301_v44 = vshll.u32 %v3172_v33, 16  ;;  %v3173_v1 = vld [vmem:[#allocation2 + $0x3c] sm:$0xf] }
 0x135   : > { %v3217_v45 = vrot.slane %v3216_v27, 4  ;;  %v16480_v30 = vsel %vm16346_vm13, %v13586_v38, %v4077_v13  ;;  %v13587_v62 = vrot.slane %v3982_v40, 9  ;;  %v3260_v24 = vrot.slane %v3258_v7, 4  ;;  %v3985_v40 = vld [vmem:[#allocation2 + $0x24] sm:$0xe] }
 0x136   : > { %14740 = vmatpush3.bf16.msra.mxu1 %v15500_v32  ;;  %v3247_v32 = vshrl.u32 %v3165_v6, 16  ;;  %v3263_v25 = vrot.slane %v3261_v15, 5  ;;  %v3285_v38 = vshll.u32 %v3170_v12, 16  ;;  %v3291_v13 = vshll.u32 %v3171_v17, 16 }
 0x137   : > { %14821 = vmatprep.subr.bf16.mxu1 %v16462_v55  ;;  %v3222_v57 = vsel %vm16125_vm7, %v3217_v45, %v3221_v19  ;;  %v16499_v18 = vsel %vm16346_vm13, %v13587_v62, %v4084_v10  ;;  %v4086_v19 = vrot.slane %v4084_v10, 4  ;;  %v3987_v45 = vld [vmem:[#allocation2 + $0x2c] sm:$0x1]  ;;  %v13588_v29 = vrot.slane %v3985_v40, 9  ;;  %v15502_v10 = vld [vmem:[#allocation8 + $0x1b0] sm:$0xff]  }
 0x138   : > { %14662 = vmatmul.mubr.bf16.gmra.mxu1 %v15483_v50  ;;  %v3249_v47 = vrot.slane %v3247_v32, 4  ;;  %v4080_v50 = vrot.slane %v3981_v34, 5  ;;  %v3277_v32 = vshll.u32 %v3169_v5, 16  ;;  %v3282_v34 = vshrl.u32 %v3170_v12, 16 }
 0x139   : > { %14665 = vmatprep.mubr.bf16.mxu1 %v15487_v0  ;;  %v3168_v0 = vld [vmem:[#allocation2 + $0x28] sm:$0xf]  ;;  %v16506_v27 = vsel %vm16346_vm13, %v4086_v19, %v4087_v11  ;;  %v3303_v63 = vrot.slane %v3301_v44, 5  ;;  %v3992_v44 = vld [vmem:[#allocation2 + $0x40] sm:$0xf] }
 0x13a   : > { %v3250_v61 = vor.u32 %v3249_v47, %v3245_v36  ;;  %v16489_v4 = vsel %vm16346_vm13, %v4079_v49, %v4080_v50  ;;  %v3267_v16 = vshll.u32 %v3168_v0, 16  ;;  %v3271_v22 = vshrl.u32 %v3168_v0, 16  ;;  %v3988_v49 = vld [vmem:[#allocation2 + $0x30] sm:$0xe]  ;;  %v15498_v19 = vld [vmem:[#allocation2 + $0xc0] sm:$0xff]  }
 0x13b   : > { %14622 = vmatmul.mubr.bf16.gmra.mxu0 %v13527_v59  ;;  %v3232_v59 = vsel %vm16125_vm7, %v3227_v46, %v3231_v21  ;;  %v13602_v9 = vcombine.low %v16480_v30, %v16489_v4  ;;  %v13603_v35 = vcombine.low %v16499_v18, %v16506_v27  ;;  %v3264_v36 = vor.u32 %v3263_v25, %v3260_v24 }
 0x13c   : > { %14625 = vmatprep.mubr.bf16.mxu0 %v13528_v60  ;;  %v741_v60 = vrot.slane %v16464_v58, 4  ;;  %v13562_v56 = vcombine.low %v3222_v57, %v3232_v59  ;;  %v3251_v6 = vrot.slane %v3250_v61, 4  ;;  %v3269_v26 = vrot.slane %v3267_v16, 5  ;;  %v3989_v59 = vld [vmem:[#allocation2 + $0x34] sm:$0xf] }
 0x13d   : > { %v3273_v31 = vrot.slane %v3271_v22, 4  ;;  %v3279_v53 = vrot.slane %v3277_v32, 5  ;;  %v3265_v46 = vrot.slane %v3264_v36, 4  ;;  %v3287_v47 = vrot.slane %v3285_v38, 5  ;;  %v3176_v32 = vld [vmem:[#allocation2 + $0x48] sm:$0xf] }
 0x13e   : > { %v3256_v8 = vsel %vm16125_vm7, %v3251_v6, %v3255_v48  ;;  %v3293_v48 = vrot.slane %v3291_v13, 5  ;;  %v4094_v0 = vrot.slane %v3987_v45, 5  ;;  %v13589_v16 = vrot.slane %v3988_v49, 9  ;;  %v3177_v38 = vld [vmem:[#allocation2 + $0x4c] sm:$0xf]  ;;  %v15503_v13 = vld [vmem:[#allocation8 + $0x1a8] sm:$0xff]  }
 0x13f   : > { %v13563_v21 = vcombine.low %v3246_v14, %v3256_v8  ;;  %v3274_v52 = vor.u32 %v3273_v31, %v3269_v26  ;;  %v3270_v61 = vsel %vm16125_vm7, %v3265_v46, %v3269_v26  ;;  %v3174_v14 = vld [vmem:[#allocation2 + $0x40] sm:$0xf]  ;;  %v3175_v8 = vld [vmem:[#allocation2 + $0x44] sm:$0x1]  ;;  %v3306_v25 = vshrl.u32 %v3173_v1, 16 }
 0x140   : > { %14666 = vmatmul.mubr.bf16.gmra.mxu1 %v15488_v42  ;;  %v3986_v42 = vld [vmem:[#allocation2 + $0x28] sm:$0xf]  ;;  %v3309_v36 = vshll.u32 %v3173_v1, 16 }
 0x141   : > { %14669 = vmatprep.mubr.bf16.mxu1 %v15492_v39  ;;  %v3295_v39 = vshrl.u32 %v3171_v17, 16  ;;  %v3275_v50 = vrot.slane %v3274_v52, 4  ;;  %v4091_v57 = vrot.slane %v3986_v42, 5  ;;  %v4098_v17 = vrot.slane %v3989_v59, 5 }
 0x142   : > { %v3319_v52 = vshrl.u32 %v3174_v14, 16  ;;  %v3311_v46 = vrot.slane %v3309_v36, 5 }
 0x143   : > { %14626 = vmatmul.mubr.bf16.gmra.mxu0 %v13529_v20  ;;  %v3284_v20 = vrot.slane %v3282_v34, 4  ;;  %v3297_v54 = vrot.slane %v3295_v39, 4  ;;  %v3280_v5 = vsel %vm16125_vm7, %v3275_v50, %v3279_v53  ;;  %v16516_v11 = vsel %vm16346_vm13, %v13588_v29, %v4091_v57  ;;  %v3991_v39 = vld [vmem:[#allocation2 + $0x3c] sm:$0xe] }
 0x144   : > { %14693 = vmatprep.mubr.bf16.mxu0 %v13562_v56  ;;  %v3990_v56 = vld [vmem:[#allocation2 + $0x38] sm:$0x1]  ;;  %v4093_v12 = vrot.slane %v4091_v57, 4  ;;  %v13564_v7 = vcombine.low %v3270_v61, %v3280_v5  ;;  %v16529_v31 = vsel %vm16346_vm13, %v13589_v16, %v4098_v17  ;;  %v3308_v34 = vrot.slane %v3306_v25, 4  ;;  %v3993_v57 = vld [vmem:[#allocation2 + $0x44] sm:$0x1] }
 0x145   : > { %v3288_v62 = vor.u32 %v3287_v47, %v3284_v20  ;;  %v3298_v6 = vor.u32 %v3297_v54, %v3293_v48  ;;  %v4101_v24 = vrot.slane %v3990_v56, 5  ;;  %v3325_v53 = vshll.u32 %v3175_v8, 16  ;;  %v3178_v20 = vld [vmem:[#allocation2 + $0x50] sm:$0x1] }
 0x146   : > { %v3321_v49 = vrot.slane %v3319_v52, 4  ;;  %v3333_v54 = vshll.u32 %v3176_v32, 16  ;;  %v3339_v29 = vshll.u32 %v3177_v38, 16  ;;  %v3312_v59 = vor.u32 %v3311_v46, %v3308_v34  ;;  %v15504_v56 = vld [vmem:[#allocation8 + $0x1a0] sm:$0xff]  }
 0x147   : > { %v3289_v15 = vrot.slane %v3288_v62, 4  ;;  %v3299_v22 = vrot.slane %v3298_v6, 4  ;;  %v3327_v50 = vrot.slane %v3325_v53, 5  ;;  %v3343_v62 = vshrl.u32 %v3177_v38, 16  ;;  %v15507_v38 = vld [vmem:[#allocation8 + $0x1f0] sm:$0xff]  }
 0x148   : > { %14670 = vmatmul.mubr.bf16.gmra.mxu1 %v15493_v23  ;;  %v16520_v23 = vsel %vm16346_vm13, %v4093_v12, %v4094_v0  ;;  %v3994_v0 = vld [vmem:[#allocation2 + $0x48] sm:$0xe]  ;;  %v3335_v5 = vrot.slane %v3333_v54, 5  ;;  %v3341_v6 = vrot.slane %v3339_v29, 5  ;;  %v13590_v12 = vrot.slane %v3991_v39, 9 }
 0x149   : > { %14673 = vmatprep.mubr.bf16.mxu1 %v15497_v3  ;;  %v3294_v26 = vsel %vm16125_vm7, %v3289_v15, %v3293_v48  ;;  %v13604_v3 = vcombine.low %v16516_v11, %v16520_v23  ;;  %v3304_v33 = vsel %vm16125_vm7, %v3299_v22, %v3303_v63  ;;  %v3330_v48 = vshrl.u32 %v3176_v32, 16  ;;  %v15505_v32 = vld [vmem:[#allocation8 + $0x198] sm:$0xff]   ;;  %v3181_v53 = vld [vmem:[#allocation2 + $0x5c] sm:$0x1]  ;;  %v3183_v23 = vld [vmem:[#allocation2 + $0x64] sm:$0xf] }
 0x14a   : > { %v13565_v40 = vcombine.low %v3294_v26, %v3304_v33  ;;  %v3349_v63 = vshll.u32 %v3178_v20, 16  ;;  %v3313_v30 = vrot.slane %v3312_v59, 4  ;;  %v3345_v4 = vrot.slane %v3343_v62, 4  ;;  %v3997_v59 = vld [vmem:[#allocation2 + $0x54] sm:$0xe] }
 0x14b   : > { %14694 = vmatmul.mubr.bf16.vlgmr.msra.gmra.mxu0 %v13563_v21  ;;  %v4100_v21 = vrot.slane %v4098_v17, 4  ;;  %v3332_v61 = vrot.slane %v3330_v48, 4  ;;  %v4108_v17 = vrot.slane %v3993_v57, 5  ;;  %v13591_v8 = vrot.slane %v3994_v0, 9  ;;  %v3184_v57 = vld [vmem:[#allocation2 + $0x68] sm:$0x1] }
 0x14c   : > { %14774 = vmatpush3.bf16.msra.mxu0 %v16417_v2  ;;  %14697 = vmatprep.mubr.bf16.mxu0 %v13564_v7  ;;  %v3315_v2 = vshll.u32 %v3174_v14, 16  ;;  %v3995_v14 = vld [vmem:[#allocation2 + $0x4c] sm:$0xf]  ;;  %v3996_v7 = vld [vmem:[#allocation2 + $0x50] sm:$0x1]  ;;  %v3373_v29 = vshll.u32 %v3181_v53, 16 }
 0x14d   : > { %14775 = vmatprep.subr.bf16.mxu0 %v15502_v10  ;;  %v16535_v42 = vsel %vm16346_vm13, %v4100_v21, %v4101_v24  ;;  %v3336_v16 = vor.u32 %v3335_v5, %v3332_v61  ;;  %v3346_v24 = vor.u32 %v3345_v4, %v3341_v6  ;;  %v3180_v21 = vld [vmem:[#allocation2 + $0x58] sm:$0xf]  ;;  %v4112_v36 = vrot.slane %v3995_v14, 5 }
 0x14e   : > { %v13605_v45 = vcombine.low %v16529_v31, %v16535_v42  ;;  %v3317_v47 = vrot.slane %v3315_v2, 5  ;;  %v4115_v2 = vrot.slane %v3996_v7, 5  ;;  %v3363_v11 = vshll.u32 %v3180_v21, 16 }
 0x14f   : > { %v3337_v34 = vrot.slane %v3336_v16, 4  ;;  %v16563_v18 = vsel %vm16346_vm13, %v13591_v8, %v4112_v36  ;;  %v4114_v27 = vrot.slane %v4112_v36, 4  ;;  %v3367_v54 = vshrl.u32 %v3180_v21, 16  ;;  %v16576_v16 = vld [vmem:[#allocation8 + $0x1e0] sm:$0xff]   ;;  %v4002_v36 = vld [vmem:[#allocation2 + $0x68] sm:$0x1] }
 0x150   : > { %14674 = vmatmul.mubr.bf16.gmra.mxu1 %v15498_v19  ;;  %14776 = vmatpush3.bf16.msra.mxu0 %v15502_v10  ;;  %v3322_v1 = vor.u32 %v3321_v49, %v3317_v47  ;;  %v4105_v10 = vrot.slane %v3992_v44, 5  ;;  %v3179_v19 = vld [vmem:[#allocation2 + $0x54] sm:$0xf]  ;;  %v3318_v22 = vsel %vm16125_vm7, %v3313_v30, %v3317_v47  ;;  %v3387_v14 = vshll.u32 %v3183_v23, 16  ;;  %v3999_v30 = vld [vmem:[#allocation2 + $0x5c] sm:$0x1] }
 0x151   : > { %14741 = vmatprep.mubr.bf16.mxu1 %v13602_v9  ;;  %14777 = vmatprep.subr.bf16.mxu0 %v15503_v13  ;;  %v3351_v9 = vrot.slane %v3349_v63, 5  ;;  %v3354_v20 = vshrl.u32 %v3179_v19, 16  ;;  %v3342_v39 = vsel %vm16125_vm7, %v3337_v34, %v3341_v6  ;;  %v3357_v44 = vshll.u32 %v3179_v19, 16 }
 0x152   : > { %v3323_v15 = vrot.slane %v3322_v1, 4  ;;  %v16546_v25 = vsel %vm16346_vm13, %v13590_v12, %v4105_v10  ;;  %v4107_v26 = vrot.slane %v4105_v10, 4  ;;  %v3365_v63 = vrot.slane %v3363_v11, 5  ;;  %v15509_v1 = vld [vmem:[#allocation8 + $0x1e8] sm:$0xff]  }
 0x153   : > { %14698 = vmatmul.mubr.bf16.gmra.mxu0 %v13565_v40  ;;  %v3347_v40 = vrot.slane %v3346_v24, 4  ;;  %v3356_v48 = vrot.slane %v3354_v20, 4  ;;  %v3359_v62 = vrot.slane %v3357_v44, 5  ;;  %v3369_v5 = vrot.slane %v3367_v54, 4  ;;  %v4001_v24 = vld [vmem:[#allocation2 + $0x64] sm:$0xf] }
 0x154   : > { %14778 = vmatpush3.bf16.msra.mxu0 %v15503_v13  ;;  %v3328_v33 = vsel %vm16125_vm7, %v3323_v15, %v3327_v50  ;;  %v4109_v52 = vsel %vm16346_vm13, %v4107_v26, %v4108_v17  ;;  %v16569_v50 = vsel %vm16346_vm13, %v4114_v27, %v4115_v2  ;;  %v3375_v6 = vrot.slane %v3373_v29, 5  ;;  %v4000_v15 = vld [vmem:[#allocation2 + $0x60] sm:$0xe] }
 0x155   : > { %14779 = vmatprep.subr.bf16.mxu0 %v15504_v56  ;;  %v13566_v13 = vcombine.low %v3318_v22, %v3328_v33  ;;  %v13606_v46 = vcombine.low %v16546_v25, %v4109_v52  ;;  %v3352_v47 = vsel %vm16125_vm7, %v3347_v40, %v3351_v9  ;;  %v13607_v61 = vcombine.low %v16563_v18, %v16569_v50  ;;  %v15511_v25 = vld [vmem:[#allocation8 + $0x188] sm:$0xff]  }
 0x156   : > { %v13567_v49 = vcombine.low %v3342_v39, %v3352_v47  ;;  %v3360_v9 = vor.u32 %v3359_v62, %v3356_v48  ;;  %v3397_v7 = vshll.u32 %v3184_v57, 16  ;;  %v3370_v17 = vor.u32 %v3369_v5, %v3365_v63  ;;  %v3186_v47 = vld [vmem:[#allocation2 + $0x70] sm:$0xf] }
 0x157   : > { %14701 = vmatprep.mubr.bf16.mxu0 %v13566_v13  ;;  %v3389_v19 = vrot.slane %v3387_v14, 5  ;;  %v13592_v22 = vrot.slane %v3997_v59, 9  ;;  %v4122_v40 = vrot.slane %v3999_v30, 5  ;;  %v13593_v52 = vrot.slane %v4000_v15, 9  ;;  %v15514_v48 = vld [vmem:[#allocation8 + $0x180] sm:$0xff]   ;;  %v16604_v30 = vld [vmem:[#allocation8 + $0x238] sm:$0xff]  }
 0x158   : > { %14742 = vmatmul.mubr.bf16.vlgmr.msra.gmra.mxu1 %v13603_v35  ;;  %v3182_v35 = vld [vmem:[#allocation2 + $0x60] sm:$0xf]  ;;  %14780 = vmatpush3.bf16.msra.mxu0 %v15504_v56  ;;  %v3998_v56 = vld [vmem:[#allocation2 + $0x58] sm:$0xf]  ;;  %v3361_v26 = vrot.slane %v3360_v9, 4  ;;  %v3399_v33 = vrot.slane %v3397_v7, 5 }
 0x159   : > { %14745 = vmatprep.mubr.bf16.mxu1 %v13604_v3  ;;  %14781 = vmatprep.subr.bf16.mxu0 %v15505_v32  ;;  %v15508_v3 = vld [vmem:[#allocation8 + $0x190] sm:$0xff]   ;;  %v3378_v0 = vshrl.u32 %v3182_v35, 16  ;;  %v3381_v12 = vshll.u32 %v3182_v35, 16  ;;  %v4119_v34 = vrot.slane %v3998_v56, 5  ;;  %v3371_v2 = vrot.slane %v3370_v17, 4 }
 0x15a   : > { %14822 = vmatpush3.bf16.msra.mxu1 %v16462_v55  ;;  %v3391_v55 = vshrl.u32 %v3183_v23, 16  ;;  %v3366_v53 = vsel %vm16125_vm7, %v3361_v26, %v3365_v63  ;;  %v4126_v27 = vrot.slane %v4001_v24, 5  ;;  %v4129_v35 = vrot.slane %v4002_v36, 5  ;;  %v3190_v56 = vld [vmem:[#allocation2 + $0x80] sm:$0x1] }
 0x15b   : > { %14823 = vmatprep.subr.bf16.mxu1 %v15507_v38  ;;  %14702 = vmatmul.mubr.bf16.gmra.mxu0 %v13567_v49  ;;  %v3380_v10 = vrot.slane %v3378_v0, 4  ;;  %v3383_v8 = vrot.slane %v3381_v12, 5  ;;  %v4120_v31 = vsel %vm16346_vm13, %v13592_v22, %v4119_v34  ;;  %v4121_v42 = vrot.slane %v4119_v34, 4  ;;  %v3187_v49 = vld [vmem:[#allocation2 + $0x74] sm:$0x1]  ;;  %v15513_v26 = vld [vmem:[#allocation8 + $0x1d0] sm:$0xff]  }
 0x15c   : > { %14782 = vmatpush3.bf16.msra.mxu0 %v15505_v32  ;;  %v3393_v21 = vrot.slane %v3391_v55, 4  ;;  %v3376_v39 = vsel %vm16125_vm7, %v3371_v2, %v3375_v6  ;;  %v16600_v62 = vsel %vm16346_vm13, %v13593_v52, %v4126_v27  ;;  %v4128_v63 = vrot.slane %v4126_v27, 4  ;;  %v3189_v0 = vld [vmem:[#allocation2 + $0x7c] sm:$0xf]  ;;  %v4003_v14 = vld [vmem:[#allocation2 + $0x6c] sm:$0xe] }
 0x15d   : > { %v16574_v4 = vpop.f32.mrf.mxu0  ;;  %14783 = vmatprep.subr.bf16.mxu0 %v15508_v3  ;;  %v3384_v13 = vor.u32 %v3383_v8, %v3380_v10  ;;  %v13568_v44 = vcombine.low %v3366_v53, %v3376_v39  ;;  %v4123_v23 = vsel %vm16346_vm13, %v4121_v42, %v4122_v40  ;;  %v3411_v12 = vshll.u32 %v3186_v47, 16  ;;  %v4004_v15 = vld [vmem:[#allocation2 + $0x70] sm:$0xf]  ;;  %v15515_v42 = vld [vmem:[#allocation8 + $0x1c8] sm:$0xff]  }
 0x15e   : > { %14824 = vmatpush3.bf16.msra.mxu1 %v15507_v38  ;;  %v3185_v38 = vld [vmem:[#allocation2 + $0x6c] sm:$0xf]  ;;  %v3394_v20 = vor.u32 %v3393_v21, %v3389_v19  ;;  %v13608_v59 = vcombine.low %v4120_v31, %v4123_v23  ;;  %v4130_v10 = vsel %vm16346_vm13, %v4128_v63, %v4129_v35  ;;  %v3415_v55 = vshrl.u32 %v3186_v47, 16  ;;  %v4007_v31 = vld [vmem:[#allocation2 + $0x7c] sm:$0xf] }
 0x15f   : > { %14825 = vmatprep.subr.bf16.mxu1 %v15509_v1  ;;  %v16581_v32 = vpop.f32.mrf.mxu0  ;;  %v3402_v54 = vshrl.u32 %v3185_v38, 16  ;;  %14705 = vmatprep.mubr.bf16.mxu0 %v13568_v44  ;;  %v3405_v6 = vshll.u32 %v3185_v38, 16  ;;  %v3421_v7 = vshll.u32 %v3187_v49, 16  ;;  %v13609_v8 = vcombine.low %v16600_v62, %v4130_v10  ;;  %v4008_v47 = vld [vmem:[#allocation2 + $0x80] sm:$0x1] }
 0x160   : > { %14746 = vmatmul.mubr.bf16.gmra.mxu1 %v13605_v45  ;;  %14784 = vmatpush3.bf16.msra.mxu0 %v15508_v3  ;;  %v16587_v45 = vld [vmem:[#allocation8 + $0x1d8] sm:$0xff]   ;;  %v3395_v11 = vrot.slane %v3394_v20, 4  ;;  %v3188_v3 = vld [vmem:[#allocation2 + $0x78] sm:$0xf]  ;;  %v3413_v22 = vrot.slane %v3411_v12, 5  ;;  %v3435_v36 = vshll.u32 %v3189_v0, 16 }
 0x161   : > { %14749 = vmatprep.mubr.bf16.mxu1 %v13606_v46  ;;  %v3385_v46 = vrot.slane %v3384_v13, 4  ;;  %14785 = vmatprep.subr.bf16.mxu0 %v15511_v25  ;;  %v16594_v29 = vpop.f32.mrf.mxu0  ;;  %v3404_v5 = vrot.slane %v3402_v54, 4  ;;  %v3426_v24 = vshrl.u32 %v3188_v3, 16  ;;  %v3429_v34 = vshll.u32 %v3188_v3, 16  ;;  %v4006_v13 = vld [vmem:[#allocation2 + $0x78] sm:$0xe] }
 0x162   : > { %14826 = vmatpush3.bf16.msra.mxu1 %v15509_v1  ;;  %v3400_v1 = vsel %vm16125_vm7, %v3395_v11, %v3399_v33  ;;  %v3423_v33 = vrot.slane %v3421_v7, 5  ;;  %v3439_v50 = vshrl.u32 %v3189_v0, 16  ;;  %v3437_v53 = vrot.slane %v3435_v36, 5  ;;  %v3191_v54 = vld [vmem:[#allocation2 + $0x84] sm:$0xf] }
 0x163   : > { %14827 = vmatprep.subr.bf16.mxu1 %v16576_v16  ;;  %v3390_v57 = vsel %vm16125_vm7, %v3385_v46, %v3389_v19  ;;  %v3407_v19 = vrot.slane %v3405_v6, 5  ;;  %v16616_v21 = vpop.f32.mrf.mxu0  ;;  %v3428_v18 = vrot.slane %v3426_v24, 4  ;;  %v3431_v38 = vrot.slane %v3429_v34, 5  ;;  %v3192_v62 = vld [vmem:[#allocation2 + $0x88] sm:$0xf]  ;;  %v15516_v6 = vld [vmem:[#allocation8 + $0x1c0] sm:$0xff]  }
 0x164   : > { %14786 = vmatpush3.bf16.msra.mxu0 %v15511_v25  ;;  %v13569_v9 = vcombine.low %v3390_v57, %v3400_v1  ;;  %v4005_v25 = vld [vmem:[#allocation2 + $0x74] sm:$0x1]  ;;  %19913 = vst [vmem:[#allocation20_spill] sm:$0xff] %v16616_v21  ;;  %v13594_v20 = vrot.slane %v4003_v14, 9  ;;  %v3441_v46 = vrot.slane %v3439_v50, 4  ;;  %v4133_v35 = vrot.slane %v4004_v15, 5 }
 0x165   : > { %14787 = vmatprep.subr.bf16.mxu0 %v15514_v48  ;;  %v3408_v2 = vor.u32 %v3407_v19, %v3404_v5  ;;  %v16622_v44 = vpop.f32.mrf.mxu0  ;;  %v3432_v11 = vor.u32 %v3431_v38, %v3428_v18  ;;  %v4136_v23 = vrot.slane %v4005_v25, 5  ;;  %v13595_v49 = vrot.slane %v4006_v13, 9  ;;  %v3193_v10 = vld [vmem:[#allocation2 + $0x8c] sm:$0x1]  ;;  %v3194_v25 = vld [vmem:[#allocation2 + $0x90] sm:$0xf] }
 0x166   : > { %14828 = vmatpush3.bf16.msra.mxu1 %v16576_v16  ;;  %14706 = vmatmul.mubr.bf16.gmra.mxu0 %v13569_v9  ;;  %v3417_v16 = vrot.slane %v3415_v55, 4  ;;  %v4134_v57 = vsel %vm16346_vm13, %v13594_v20, %v4133_v35  ;;  %v4140_v1 = vrot.slane %v4007_v31, 5  ;;  %v4143_v5 = vrot.slane %v4008_v47, 5  ;;  %v3196_v36 = vld [vmem:[#allocation2 + $0x98] sm:$0x1] }
 0x167   : > { %14829 = vmatprep.subr.bf16.mxu1 %v16587_v45  ;;  %v3409_v39 = vrot.slane %v3408_v2, 4  ;;  %v3450_v55 = vshrl.u32 %v3191_v54, 16  ;;  %v16634_v7 = vpop.f32.mrf.mxu0  ;;  %v3459_v34 = vshll.u32 %v3192_v62, 16  ;;  %v3469_v13 = vshll.u32 %v3193_v10, 16  ;;  %v4010_v38 = vld [vmem:[#allocation2 + $0x88] sm:$0xf] }
 0x168   : > { %14750 = vmatmul.mubr.bf16.gmra.mxu1 %v13607_v61  ;;  %v3445_v61 = vshll.u32 %v3190_v56, 16  ;;  %14788 = vmatpush3.bf16.msra.mxu0 %v15514_v48  ;;  %v3418_v52 = vor.u32 %v3417_v16, %v3413_v22  ;;  %v3433_v56 = vrot.slane %v3432_v11, 4  ;;  %v4142_v24 = vrot.slane %v4140_v1, 4 }
 0x169   : > { %v16609_v17 = vpop.f32.mrf.mxu1  ;;  %14753 = vmatprep.mubr.bf16.mxu1 %v13608_v59  ;;  %14869 = vmatprep.subr.bf16.mxu0 %v16604_v30  ;;  %v3414_v3 = vsel %vm16125_vm7, %v3409_v39, %v3413_v22  ;;  %v4135_v59 = vrot.slane %v4133_v35, 4  ;;  %v4141_v22 = vsel %vm16346_vm13, %v13595_v49, %v4140_v1  ;;  %v3452_v16 = vrot.slane %v3450_v55, 4  ;;  %v16646_v35 = vpop.f32.mrf.mxu0 }
 0x16a   : > { %14830 = vmatpush3.bf16.msra.mxu1 %v16587_v45  ;;  %v3447_v27 = vrot.slane %v3445_v61, 5  ;;  %v3419_v48 = vrot.slane %v3418_v52, 4  ;;  %v3442_v45 = vor.u32 %v3441_v46, %v3437_v53  ;;  %v3438_v15 = vsel %vm16125_vm7, %v3433_v56, %v3437_v53  ;;  %v4009_v52 = vld [vmem:[#allocation2 + $0x84] sm:$0xe]  ;;  %v4011_v46 = vld [vmem:[#allocation2 + $0x8c] sm:$0x1] }
 0x16b   : > { %v16618_v40 = vpop.f32.mrf.mxu1  ;;  %14831 = vmatprep.subr.bf16.mxu1 %v15513_v26  ;;  %v4137_v9 = vsel %vm16346_vm13, %v4135_v59, %v4136_v23  ;;  %v4144_v50 = vsel %vm16346_vm13, %v4142_v24, %v4143_v5  ;;  %v3463_v61 = vshrl.u32 %v3192_v62, 16  ;;  %v3461_v31 = vrot.slane %v3459_v34, 5  ;;  %v16650_v10 = vpop.f32.mrf.mxu0  ;;  %v3197_v24 = vld [vmem:[#allocation2 + $0x9c] sm:$0xf] }
 0x16c   : > { %v3424_v0 = vsel %vm16125_vm7, %v3419_v48, %v3423_v33  ;;  %v3443_v14 = vrot.slane %v3442_v45, 4  ;;  %v13610_v19 = vcombine.low %v4134_v57, %v4137_v9  ;;  %v3453_v33 = vshll.u32 %v3191_v54, 16  ;;  %v4013_v57 = vld [vmem:[#allocation2 + $0x94] sm:$0xf]  ;;  %v4014_v9 = vld [vmem:[#allocation2 + $0x98] sm:$0x1] }
 0x16d   : > { %v16628_v63 = vpop.f32.mrf.mxu1  ;;  %v13570_v12 = vcombine.low %v3414_v3, %v3424_v0  ;;  %v13611_v53 = vcombine.low %v4141_v22, %v4144_v50  ;;  %v3474_v39 = vshrl.u32 %v3194_v25, 16  ;;  %v3465_v47 = vrot.slane %v3463_v61, 4  ;;  %19915 = vst [vmem:[#allocation22_spill] sm:$0xff] %v16650_v10  ;;  %v3199_v61 = vld [vmem:[#allocation2 + $0xa4] sm:$0x1] }
 0x16e   : > { %14832 = vmatpush3.bf16.msra.mxu1 %v15513_v26  ;;  %v3448_v26 = vsel %vm16125_vm7, %v3443_v14, %v3447_v27  ;;  %v3455_v20 = vrot.slane %v3453_v33, 5  ;;  %v4012_v27 = vld [vmem:[#allocation2 + $0x90] sm:$0xe]  ;;  %v3471_v48 = vrot.slane %v3469_v13, 5  ;;  %v3477_v11 = vshll.u32 %v3194_v25, 16 }
 0x16f   : > { %14833 = vmatprep.subr.bf16.mxu1 %v15515_v42  ;;  %14709 = vmatprep.mubr.bf16.mxu0 %v13570_v12  ;;  %v16642_v2 = vpop.f32.mrf.mxu1  ;;  %v13571_v18 = vcombine.low %v3438_v15, %v3448_v26  ;;  %v3476_v54 = vrot.slane %v3474_v39, 4  ;;  %v3493_v45 = vshll.u32 %v3196_v36, 16  ;;  %v3466_v59 = vor.u32 %v3465_v47, %v3461_v31 }
 0x170   : > { %14754 = vmatmul.mubr.bf16.gmra.mxu1 %v13609_v8  ;;  %v3195_v8 = vld [vmem:[#allocation2 + $0x94] sm:$0xf]  ;;  %19914 = vst [vmem:[#allocation21_spill] sm:$0xff] %v16642_v2  ;;  %v3456_v49 = vor.u32 %v3455_v20, %v3452_v16  ;;  %v3479_v62 = vrot.slane %v3477_v11, 5  ;;  %v13596_v56 = vrot.slane %v4009_v52, 9  ;;  %v4147_v14 = vrot.slane %v4010_v38, 5 }
 0x171   : > { %14757 = vmatprep.mubr.bf16.mxu1 %v13610_v19  ;;  %14710 = vmatmul.mubr.bf16.gmra.mxu0 %v13571_v18  ;;  %v3483_v23 = vshll.u32 %v3195_v8, 16  ;;  %v3487_v3 = vshrl.u32 %v3195_v8, 16  ;;  %v3495_v12 = vrot.slane %v3493_v45, 5  ;;  %v3467_v55 = vrot.slane %v3466_v59, 4  ;;  %v3198_v16 = vld [vmem:[#allocation2 + $0xa0] sm:$0xf] }
 0x172   : > { %14834 = vmatpush3.bf16.msra.mxu1 %v15515_v42  ;;  %v16648_v42 = vpop.f32.mrf.mxu1  ;;  %v3457_v1 = vrot.slane %v3456_v49, 4  ;;  %v3480_v15 = vor.u32 %v3479_v62, %v3476_v54  ;;  %v4150_v19 = vrot.slane %v4011_v46, 5  ;;  %v13597_v22 = vrot.slane %v4012_v27, 9  ;;  %v3200_v20 = vld [vmem:[#allocation2 + $0xa8] sm:$0xf] }
 0x173   : > { %14835 = vmatprep.subr.bf16.mxu1 %v15516_v6  ;;  %v3485_v0 = vrot.slane %v3483_v23, 5  ;;  %v3489_v5 = vrot.slane %v3487_v3, 4  ;;  %v4149_v26 = vrot.slane %v4147_v14, 4  ;;  %v3472_v34 = vsel %vm16125_vm7, %v3467_v55, %v3471_v48  ;;  %v3201_v48 = vld [vmem:[#allocation2 + $0xac] sm:$0xf] }
 0x174   : > { %v3462_v25 = vsel %vm16125_vm7, %v3457_v1, %v3461_v31  ;;  %v16656_v33 = vpop.f32.mrf.mxu1  ;;  %v3481_v36 = vrot.slane %v3480_v15, 4  ;;  %v4154_v18 = vrot.slane %v4013_v57, 5  ;;  %v4157_v50 = vrot.slane %v4014_v9, 5  ;;  %v3202_v3 = vld [vmem:[#allocation2 + $0xb0] sm:$0x1] }
 0x175   : > { %v3490_v8 = vor.u32 %v3489_v5, %v3485_v0  ;;  %v13572_v13 = vcombine.low %v3462_v25, %v3472_v34  ;;  %v4151_v38 = vsel %vm16346_vm13, %v4149_v26, %v4150_v19  ;;  %v3501_v49 = vshll.u32 %v3197_v24, 16  ;;  %v4016_v1 = vld [vmem:[#allocation2 + $0xa0] sm:$0xf]  ;;  %v5843_v2 = vld [vmem:[#allocation2 + $0x1c] sm:$0xf] }
 0x176   : > { %14836 = vmatpush3.bf16.msra.mxu1 %v15516_v6  ;;  %v4148_v6 = vsel %vm16346_vm13, %v13596_v56, %v4147_v14  ;;  %v3486_v39 = vsel %vm16125_vm7, %v3481_v36, %v3485_v0  ;;  %v4155_v27 = vsel %vm16346_vm13, %v13597_v22, %v4154_v18  ;;  %v4156_v47 = vrot.slane %v4154_v18, 4  ;;  %v16670_v45 = vpop.f32.mrf.mxu1  ;;  %v4015_v56 = vld [vmem:[#allocation2 + $0x9c] sm:$0xe]  ;;  %v4019_v36 = vld [vmem:[#allocation2 + $0xac] sm:$0xf] }
 0x177   : > { %v3491_v52 = vrot.slane %v3490_v8, 4  ;;  %v13612_v46 = vcombine.low %v4148_v6, %v4151_v38  ;;  %14713 = vmatprep.mubr.bf16.mxu0 %v13572_v13  ;;  %v3507_v54 = vshll.u32 %v3198_v16, 16  ;;  %v3511_v62 = vshrl.u32 %v3198_v16, 16  ;;  %v4018_v8 = vld [vmem:[#allocation2 + $0xa8] sm:$0xe] }
 0x178   : > { %14758 = vmatmul.mubr.bf16.gmra.mxu1 %v13611_v53  ;;  %v3498_v53 = vshrl.u32 %v3197_v24, 16  ;;  %v4158_v59 = vsel %vm16346_vm13, %v4156_v47, %v4157_v50  ;;  %v3517_v0 = vshll.u32 %v3199_v61, 16  ;;  %v3503_v14 = vrot.slane %v3501_v49, 5  ;;  %v4020_v18 = vld [vmem:[#allocation2 + $0xb0] sm:$0x1]  ;;  %v16676_v50 = vpop.f32.mrf.mxu1 }
 0x179   : > { %v3496_v11 = vsel %vm16125_vm7, %v3491_v52, %v3495_v12  ;;  %14761 = vmatprep.mubr.bf16.mxu1 %v13612_v46  ;;  %v13613_v5 = vcombine.low %v4155_v27, %v4158_v59  ;;  %v3509_v9 = vrot.slane %v3507_v54, 5  ;;  %v3522_v55 = vshrl.u32 %v3200_v20, 16  ;;  %v4017_v12 = vld [vmem:[#allocation2 + $0xa4] sm:$0x1]  ;;  %19916 = vst [vmem:[#allocation23_spill] sm:$0xff] %v16676_v50 }
 0x17a   : > { %v3500_v23 = vrot.slane %v3498_v53, 4  ;;  %v13573_v57 = vcombine.low %v3486_v39, %v3496_v11  ;;  %v3513_v19 = vrot.slane %v3511_v62, 4  ;;  %v3519_v22 = vrot.slane %v3517_v0, 5  ;;  %v3203_v59 = vld [vmem:[#allocation2 + $0xb4] sm:$0xf] }
 0x17b   : > { %v3525_v24 = vshll.u32 %v3200_v20, 16  ;;  %v3531_v25 = vshll.u32 %v3201_v48, 16  ;;  %v3524_v26 = vrot.slane %v3522_v55, 4  ;;  %v3535_v16 = vshrl.u32 %v3201_v48, 16 }
 0x17c   : > { %v16662_v31 = vpop.f32.mrf.mxu0  ;;  %14714 = vmatmul.mubr.bf16.gmra.mxu0 %v13573_v57  ;;  %v3504_v6 = vor.u32 %v3503_v14, %v3500_v23  ;;  %v3541_v34 = vshll.u32 %v3202_v3, 16  ;;  %v3514_v61 = vor.u32 %v3513_v19, %v3509_v9  ;;  %v13598_v38 = vrot.slane %v4015_v56, 9  ;;  %v3204_v14 = vld [vmem:[#allocation2 + $0xb8] sm:$0xf]  ;;  %v3205_v19 = vld [vmem:[#allocation2 + $0xbc] sm:$0x1] }
 0x17d   : > { %v3527_v13 = vrot.slane %v3525_v24, 5  ;;  %v3533_v52 = vrot.slane %v3531_v25, 5  ;;  %v3537_v39 = vrot.slane %v3535_v16, 4  ;;  %v4161_v27 = vrot.slane %v4016_v1, 5  ;;  %v905_v25 = vld [vmem:[#allocation2 + $0xc8] sm:$0x1] }
 0x17e   : > { %v16674_v15 = vpop.f32.mrf.mxu0  ;;  %v3505_v53 = vrot.slane %v3504_v6, 4  ;;  %v3543_v46 = vrot.slane %v3541_v34, 5  ;;  %v3515_v47 = vrot.slane %v3514_v61, 4  ;;  %v4164_v23 = vrot.slane %v4017_v12, 5  ;;  %v3206_v34 = vld [vmem:[#allocation2 + $0xc0] sm:$0xf] }
 0x17f   : > { %v3528_v11 = vor.u32 %v3527_v13, %v3524_v26  ;;  %v13599_v49 = vrot.slane %v4018_v8, 9  ;;  %v3538_v54 = vor.u32 %v3537_v39, %v3533_v52  ;;  %v4162_v3 = vsel %vm16346_vm13, %v13598_v38, %v4161_v27 }
 0x180   : > { %14762 = vmatmul.mubr.bf16.gmra.mxu1 %v13613_v5  ;;  %v16678_v20 = vpop.f32.mrf.mxu0  ;;  %v3510_v48 = vsel %vm16125_vm7, %v3505_v53, %v3509_v9  ;;  %v4163_v57 = vrot.slane %v4161_v27, 4  ;;  %v3520_v0 = vsel %vm16125_vm7, %v3515_v47, %v3519_v22  ;;  %v4168_v1 = vrot.slane %v4019_v36, 5  ;;  %v3207_v47 = vld [vmem:[#allocation2 + $0xc4] sm:$0xf] }
 0x181   : > { %v3529_v56 = vrot.slane %v3528_v11, 4  ;;  %v4171_v5 = vrot.slane %v4020_v18, 5  ;;  %v13574_v55 = vcombine.low %v3510_v48, %v3520_v0  ;;  %v3539_v12 = vrot.slane %v3538_v54, 4  ;;  %v4021_v11 = vld [vmem:[#allocation2 + $0xb4] sm:$0xe] }
 0x182   : > { %v4165_v9 = vsel %vm16346_vm13, %v4163_v57, %v4164_v23  ;;  %v3546_v24 = vshrl.u32 %v3203_v59, 16  ;;  %v16690_v8 = vpop.f32.mrf.mxu0  ;;  %v4169_v22 = vsel %vm16346_vm13, %v13599_v49, %v4168_v1  ;;  %v4170_v16 = vrot.slane %v4168_v1, 4  ;;  %v4022_v54 = vld [vmem:[#allocation2 + $0xb8] sm:$0xf] }
 0x183   : > { %19917 = vst [vmem:[#allocation24_spill] sm:$0xff] %v16690_v8  ;;  %v3534_v6 = vsel %vm16125_vm7, %v3529_v56, %v3533_v52  ;;  %v13614_v26 = vcombine.low %v4162_v3, %v4165_v9  ;;  %14717 = vmatprep.mubr.bf16.mxu0 %v13574_v55  ;;  %v3544_v36 = vsel %vm16125_vm7, %v3539_v12, %v3543_v46  ;;  %v3549_v61 = vshll.u32 %v3203_v59, 16  ;;  %v4023_v3 = vld [vmem:[#allocation2 + $0xbc] sm:$0x1] }
 0x184   : > { %v3548_v18 = vrot.slane %v3546_v24, 4  ;;  %v3555_v13 = vshll.u32 %v3204_v14, 16  ;;  %v13575_v53 = vcombine.low %v3534_v6, %v3544_v36  ;;  %v4172_v52 = vsel %vm16346_vm13, %v4170_v16, %v4171_v5  ;;  %v4024_v5 = vld [vmem:[#allocation2 + $0xc0] sm:$0xe] }
 0x185   : > { %14765 = vmatprep.mubr.bf16.mxu1 %v13614_v26  ;;  %v3559_v39 = vshrl.u32 %v3204_v14, 16  ;;  %v3565_v27 = vshll.u32 %v3205_v19, 16  ;;  %v13615_v23 = vcombine.low %v4169_v22, %v4172_v52  ;;  %v3551_v49 = vrot.slane %v3549_v61, 5  ;;  %v16706_v57 = vpop.f32.mrf.mxu0  ;;  %v4025_v14 = vld [vmem:[#allocation2 + $0xc4] sm:$0xf] }
 0x186   : > { %v3557_v48 = vrot.slane %v3555_v13, 5  ;;  %v906_v46 = vsel %vm16145_vm10, %v741_v60, %v905_v25  ;;  %14718 = vmatmul.mubr.bf16.gmra.mxu0 %v13575_v53  ;;  %v3570_v56 = vshrl.u32 %v3206_v34, 16  ;;  %v3573_v1 = vshll.u32 %v3206_v34, 16 }
 0x187   : > { %v16684_v62 = vpop.f32.mrf.mxu1  ;;  %v3561_v59 = vrot.slane %v3559_v39, 4  ;;  %v3567_v0 = vrot.slane %v3565_v27, 5  ;;  %907 = vst [vmem:[#allocation2 + $0xc8] sm:$0x1] %v906_v46  ;;  %v3552_v55 = vor.u32 %v3551_v49, %v3548_v18  ;;  %v3579_v12 = vshll.u32 %v3207_v47, 16  ;;  %v16710_v61 = vpop.f32.mrf.mxu0 }
 0x188   : > { %14766 = vmatmul.mubr.bf16.gmra.mxu1 %v13615_v23  ;;  %v3583_v9 = vshrl.u32 %v3207_v47, 16  ;;  %v13600_v58 = vrot.slane %v4021_v11, 9  ;;  %v3572_v24 = vrot.slane %v3570_v56, 4  ;;  %v3575_v25 = vrot.slane %v3573_v1, 5 }
 0x189   : > { %v16698_v38 = vpop.f32.mrf.mxu1  ;;  %v3562_v60 = vor.u32 %v3561_v59, %v3557_v48  ;;  %v4175_v6 = vrot.slane %v4022_v54, 5  ;;  %v3553_v26 = vrot.slane %v3552_v55, 4  ;;  %v3581_v22 = vrot.slane %v3579_v12, 5 }
 0x18a   : > { %v3585_v16 = vrot.slane %v3583_v9, 4  ;;  %v4178_v36 = vrot.slane %v4023_v3, 5  ;;  %v3576_v13 = vor.u32 %v3575_v25, %v3572_v24  ;;  %v13601_v27 = vrot.slane %v4024_v5, 9  ;;  %v16726_v5 = vpop.f32.mrf.mxu0 }
 0x18b   : > { %v16708_v19 = vpop.f32.mrf.mxu1  ;;  %v3563_v34 = vrot.slane %v3562_v60, 4  ;;  %v4176_v18 = vsel %vm16346_vm13, %v13600_v58, %v4175_v6  ;;  %v4177_v53 = vrot.slane %v4175_v6, 4  ;;  %v3558_v52 = vsel %vm16125_vm7, %v3553_v26, %v3557_v48  ;;  %v5026_v58 = vld [vmem:[#allocation2 + $0x20] sm:$0x1] }
 0x18c   : > { %v3586_v39 = vor.u32 %v3585_v16, %v3581_v22  ;;  %v4182_v47 = vrot.slane %v4025_v14, 5  ;;  %v3577_v49 = vrot.slane %v3576_v13, 4  ;;  %v16724_v54 = vadd.f32 %v16609_v17, %v16574_v4  ;;  %v5024_v4 = vld [vmem:[#allocation2 + $0x18] sm:$0xf]  ;;  %v5025_v17 = vld [vmem:[#allocation2 + $0x1c] sm:$0xf] }
 0x18d   : > { %v16716_v11 = vpop.f32.mrf.mxu1  ;;  %v3568_v23 = vsel %vm16125_vm7, %v3563_v34, %v3567_v0  ;;  %v4179_v46 = vsel %vm16346_vm13, %v4177_v53, %v4178_v36  ;;  %v16734_v60 = vadd.f32 %v16618_v40, %v16581_v32  ;;  %v16738_v24 = vadd.f32 %v16628_v63, %v16594_v29  ;;  %v5027_v36 = vld [vmem:[#allocation2 + $0x24] sm:$0xf]  ;;  %v16744_v32 = vpop.f32.mrf.mxu0  ;;  %v15517_v40 = vld [vmem:[#allocation2 + $0x18] sm:$0xff]  }
 0x18e   : > { %19918 = vst [vmem:[#allocation25_spill] sm:$0xff] %v16716_v11  ;;  %v13576_v3 = vcombine.low %v3558_v52, %v3568_v23  ;;  %v3208_v59 = vld [vmem:[#allocation2 + $0xc8] sm:$0x1]  ;;  %v3587_v56 = vrot.slane %v3586_v39, 4  ;;  %v13616_v48 = vcombine.low %v4176_v18, %v4179_v46  ;;  %v4183_v55 = vsel %vm16346_vm13, %v13601_v27, %v4182_v47  ;;  %19919 = vst [vmem:[#allocation26_spill] sm:$0xff] %v16744_v32 }
 0x18f   : > { %v4026_v1 = vld [vmem:[#allocation2 + $0xc8] sm:$0x1]  ;;  %v3589_v14 = vshll.u32 %v3208_v59, 16  ;;  %v4184_v0 = vrot.slane %v4182_v47, 4  ;;  %v3582_v9 = vsel %vm16125_vm7, %v3577_v49, %v3581_v22  ;;  %v5073_v16 = vshrl.u32 %v5024_v4, 16 }
 0x190   : > { %v4185_v12 = vrot.slane %v4026_v1, 5  ;;  %14721 = vmatprep.mubr.bf16.mxu0 %v13576_v3  ;;  %14769 = vmatprep.mubr.bf16.mxu1 %v13616_v48  ;;  %v5076_v22 = vshll.u32 %v5024_v4, 16  ;;  %v5082_v13 = vshll.u32 %v5025_v17, 16  ;;  %v5086_v18 = vshrl.u32 %v5025_v17, 16  ;;  %v5028_v52 = vld [vmem:[#allocation2 + $0x28] sm:$0xf] }
 0x191   : > { %v16740_v25 = vpop.f32.mrf.mxu1  ;;  %v3591_v6 = vrot.slane %v3589_v14, 5  ;;  %v5092_v53 = vshll.u32 %v5026_v58, 16  ;;  %v5075_v63 = vrot.slane %v5073_v16, 4  ;;  %v5029_v27 = vld [vmem:[#allocation2 + $0x2c] sm:$0x1]  ;;  %v5097_v47 = vshrl.u32 %v5027_v36, 16 }
 0x192   : > { %v4186_v26 = vsel %vm16346_vm13, %v4184_v0, %v4185_v12  ;;  %v5078_v39 = vrot.slane %v5076_v22, 5  ;;  %v5084_v49 = vrot.slane %v5082_v13, 5  ;;  %v5088_v46 = vrot.slane %v5086_v18, 4  ;;  %v15518_v16 = vld [vmem:[#allocation2 + $0x24] sm:$0xff]  }
 0x193   : > { %v13617_v34 = vcombine.low %v4183_v55, %v4186_v26  ;;  %v3592_v29 = vsel %vm16125_vm7, %v3587_v56, %v3591_v6  ;;  %v5094_v3 = vrot.slane %v5092_v53, 5  ;;  %v16748_v59 = vpop.f32.mrf.mxu1  ;;  %v5099_v1 = vrot.slane %v5097_v47, 4  ;;  %v15520_v53 = vld [vmem:[#allocation2 + $0x30] sm:$0xff]  }
 0x194   : > { %v13577_v23 = vcombine.low %v3582_v9, %v3592_v29  ;;  %v5079_v48 = vor.u32 %v5078_v39, %v5075_v63  ;;  %v5100_v14 = vshll.u32 %v5027_v36, 16  ;;  %v5106_v55 = vshll.u32 %v5028_v52, 16  ;;  %v5031_v29 = vld [vmem:[#allocation2 + $0x34] sm:$0xf]  ;;  %v5033_v39 = vld [vmem:[#allocation2 + $0x3c] sm:$0xf] }
 0x195   : > { %14770 = vmatmul.mubr.bf16.gmra.mxu1 %v13617_v34  ;;  %v5089_v0 = vor.u32 %v5088_v46, %v5084_v49  ;;  %v5110_v12 = vshrl.u32 %v5028_v52, 16  ;;  %v5116_v56 = vshll.u32 %v5029_v27, 16  ;;  %v16752_v4 = vadd.f32 %v16648_v42, %v16622_v44  ;;  %v16764_v44 = vpop.f32.mrf.mxu1  ;;  %v5030_v52 = vld [vmem:[#allocation2 + $0x30] sm:$0xf]  ;;  %v5034_v27 = vld [vmem:[#allocation2 + $0x40] sm:$0xf] }
 0x196   : > { %14722 = vmatmul.mubr.bf16.gmra.mxu0 %v13577_v23  ;;  %v5080_v9 = vrot.slane %v5079_v48, 4  ;;  %v5102_v58 = vrot.slane %v5100_v14, 5  ;;  %v5108_v6 = vrot.slane %v5106_v55, 5  ;;  %v16758_v26 = vadd.f32 %v16656_v33, %v16634_v7  ;;  %v15522_v46 = vld [vmem:[#allocation8 + $0x230] sm:$0xff]  }
 0x197   : > { %14789 = vmatprep.mubr.bf16.mxu0 %v15517_v40  ;;  %v5090_v22 = vrot.slane %v5089_v0, 4  ;;  %v5112_v36 = vrot.slane %v5110_v12, 4  ;;  %v5118_v34 = vrot.slane %v5116_v56, 5  ;;  %v16762_v13 = vadd.f32 %v16670_v45, %v16646_v35  ;;  %v5032_v40 = vld [vmem:[#allocation2 + $0x38] sm:$0x1]  ;;  %v16776_v12 = vpop.f32.mrf.mxu1 }
 0x198   : > { %v5085_v42 = vsel %vm16125_vm7, %v5080_v9, %v5084_v49  ;;  %v5103_v18 = vor.u32 %v5102_v58, %v5099_v1  ;;  %v16770_v7 = vadd.f32 %v16684_v62, %v16662_v31  ;;  %v5121_v35 = vshrl.u32 %v5030_v52, 16  ;;  %v5035_v14 = vld [vmem:[#allocation2 + $0x44] sm:$0x1]  ;;  %19920 = vst [vmem:[#allocation27_spill] sm:$0xff] %v16776_v12 }
 0x199   : > { %v16754_v17 = vpop.f32.mrf.mxu0  ;;  %v5095_v33 = vsel %vm16125_vm7, %v5090_v22, %v5094_v3  ;;  %v5113_v63 = vor.u32 %v5112_v36, %v5108_v6  ;;  %v5124_v45 = vshll.u32 %v5030_v52, 16  ;;  %v5130_v48 = vshll.u32 %v5031_v29, 16  ;;  %v15525_v52 = vld [vmem:[#allocation8 + $0x228] sm:$0xff]  }
 0x19a   : > { %v13650_v23 = vcombine.low %v5085_v42, %v5095_v33  ;;  %v5104_v49 = vrot.slane %v5103_v18, 4  ;;  %v5134_v1 = vshrl.u32 %v5031_v29, 16  ;;  %v5123_v0 = vrot.slane %v5121_v35, 4 }
 0x19b   : > { %v16774_v47 = vpop.f32.mrf.mxu0  ;;  %v5114_v55 = vrot.slane %v5113_v63, 4  ;;  %v5126_v31 = vrot.slane %v5124_v45, 5  ;;  %v5140_v62 = vshll.u32 %v5032_v40, 16  ;;  %v5132_v56 = vrot.slane %v5130_v48, 5 }
 0x19c   : > { %14837 = vmatprep.mubr.bf16.mxu1 %v13650_v23  ;;  %v5109_v3 = vsel %vm16125_vm7, %v5104_v49, %v5108_v6  ;;  %v5136_v9 = vrot.slane %v5134_v1, 4  ;;  %v5145_v58 = vshrl.u32 %v5033_v39, 16  ;;  %v5148_v18 = vshll.u32 %v5033_v39, 16  ;;  %v5036_v49 = vld [vmem:[#allocation2 + $0x48] sm:$0xf]  ;;  %v15521_v39 = vld [vmem:[#allocation2 + $0x3c] sm:$0xff]  }
 0x19d   : > { %v5119_v22 = vsel %vm16125_vm7, %v5114_v55, %v5118_v34  ;;  %v5127_v36 = vor.u32 %v5126_v31, %v5123_v0  ;;  %v5142_v42 = vrot.slane %v5140_v62, 5  ;;  %v16782_v29 = vpop.f32.mrf.mxu0  ;;  %v5154_v6 = vshll.u32 %v5034_v27, 16  ;;  %v15523_v55 = vld [vmem:[#allocation2 + $0x48] sm:$0xff]  }
 0x19e   : > { %14790 = vmatmul.mubr.bf16.vlgmr.msra.gmra.mxu0 %v15518_v16  ;;  %v13651_v40 = vcombine.low %v5109_v3, %v5119_v22  ;;  %v5137_v33 = vor.u32 %v5136_v9, %v5132_v56  ;;  %v5147_v63 = vrot.slane %v5145_v58, 4  ;;  %v5150_v45 = vrot.slane %v5148_v18, 5  ;;  %v5037_v0 = vld [vmem:[#allocation2 + $0x4c] sm:$0xf]  ;;  %v5038_v3 = vld [vmem:[#allocation2 + $0x50] sm:$0x1] }
 0x19f   : > { %14870 = vmatpush3.bf16.msra.mxu0 %v16604_v30  ;;  %14793 = vmatprep.mubr.bf16.mxu0 %v15520_v53  ;;  %v5128_v35 = vrot.slane %v5127_v36, 4  ;;  %v5158_v16 = vshrl.u32 %v5034_v27, 16  ;;  %v5164_v23 = vshll.u32 %v5035_v14, 16  ;;  %v5156_v1 = vrot.slane %v5154_v6, 5  ;;  %v5039_v9 = vld [vmem:[#allocation2 + $0x54] sm:$0xf]  ;;  %v16797_v58 = vpop.f32.mrf.mxu0 }
 0x1a0   : > { %14871 = vmatprep.subr.bf16.mxu0 %v15522_v46  ;;  %14838 = vmatmul.mubr.bf16.vlgmr.msra.gmra.mxu1 %v13651_v40  ;;  %v5138_v48 = vrot.slane %v5137_v33, 4  ;;  %v16789_v30 = vadd.f32 %v16698_v38, %v16674_v15  ;;  %v16793_v53 = vadd.f32 %v16708_v19, %v16678_v20  ;;  %v5151_v14 = vor.u32 %v5150_v45, %v5147_v63  ;;  %v5040_v18 = vld [vmem:[#allocation2 + $0x58] sm:$0xf]  ;;  %v15528_v20 = vld [vmem:[#allocation8 + $0x220] sm:$0xff]  }
 0x1a1   : > { %v5133_v27 = vsel %vm16125_vm7, %v5128_v35, %v5132_v56  ;;  %v5160_v31 = vrot.slane %v5158_v16, 4  ;;  %v5166_v62 = vrot.slane %v5164_v23, 5  ;;  %19921 = vst [vmem:[#allocation28_spill] sm:$0xff] %v16797_v58  ;;  %v5169_v15 = vshrl.u32 %v5036_v49, 16  ;;  %v5041_v23 = vld [vmem:[#allocation2 + $0x5c] sm:$0x1] }
 0x1a2   : > { %v5143_v22 = vsel %vm16125_vm7, %v5138_v48, %v5142_v42  ;;  %v5172_v38 = vshll.u32 %v5036_v49, 16  ;;  %v5178_v36 = vshll.u32 %v5037_v0, 16  ;;  %v5152_v40 = vrot.slane %v5151_v14, 4 }
 0x1a3   : > { %14872 = vmatpush3.bf16.msra.mxu0 %v15522_v46  ;;  %v13652_v19 = vcombine.low %v5133_v27, %v5143_v22  ;;  %v5161_v33 = vor.u32 %v5160_v31, %v5156_v1  ;;  %v5182_v56 = vshrl.u32 %v5037_v0, 16  ;;  %v5171_v6 = vrot.slane %v5169_v15, 4  ;;  %v16805_v27 = vpop.f32.mrf.mxu0  ;;  %v15531_v15 = vld [vmem:[#allocation8 + $0x218] sm:$0xff]  }
 0x1a4   : > { %14873 = vmatprep.subr.bf16.mxu0 %v15525_v52  ;;  %v5174_v35 = vrot.slane %v5172_v38, 5  ;;  %v5180_v45 = vrot.slane %v5178_v36, 5  ;;  %v5188_v16 = vshll.u32 %v5038_v3, 16  ;;  %v5157_v46 = vsel %vm16125_vm7, %v5152_v40, %v5156_v1  ;;  %v5042_v1 = vld [vmem:[#allocation2 + $0x60] sm:$0xf] }
 0x1a5   : > { %v16785_v34 = vpop.f32.mrf.mxu1  ;;  %14841 = vmatprep.mubr.bf16.mxu1 %v13652_v19  ;;  %v5162_v42 = vrot.slane %v5161_v33, 4  ;;  %v5184_v49 = vrot.slane %v5182_v56, 4  ;;  %v5193_v48 = vshrl.u32 %v5039_v9, 16  ;;  %v5196_v31 = vshll.u32 %v5039_v9, 16  ;;  %v16811_v51 = vpop.f32.mrf.mxu0 }
 0x1a6   : > { %14794 = vmatmul.mubr.bf16.gmra.mxu0 %v15521_v39  ;;  %v5175_v14 = vor.u32 %v5174_v35, %v5171_v6  ;;  %v5190_v0 = vrot.slane %v5188_v16, 5  ;;  %v5202_v22 = vshll.u32 %v5040_v18, 16  ;;  %v5206_v36 = vshrl.u32 %v5040_v18, 16  ;;  %v15524_v6 = vld [vmem:[#allocation2 + $0x54] sm:$0xff]   ;;  %v5043_v16 = vld [vmem:[#allocation2 + $0x64] sm:$0xf] }
 0x1a7   : > { %v16801_v63 = vpop.f32.mrf.mxu1  ;;  %14797 = vmatprep.mubr.bf16.mxu0 %v15523_v55  ;;  %14874 = vmatpush3.bf16.msra.mxu0 %v15525_v52  ;;  %v5167_v3 = vsel %vm16125_vm7, %v5162_v42, %v5166_v62  ;;  %v5185_v39 = vor.u32 %v5184_v49, %v5180_v45  ;;  %v5195_v38 = vrot.slane %v5193_v48, 4  ;;  %v5198_v56 = vrot.slane %v5196_v31, 5  ;;  %v15526_v42 = vld [vmem:[#allocation2 + $0x60] sm:$0xff]   ;;  %v16823_v58 = vpop.f32.mrf.mxu0 }
 0x1a8   : > { %14875 = vmatprep.subr.bf16.mxu0 %v15528_v20  ;;  %v13653_v40 = vcombine.low %v5157_v46, %v5167_v3  ;;  %v5176_v33 = vrot.slane %v5175_v14, 4  ;;  %v5204_v55 = vrot.slane %v5202_v22, 5  ;;  %v5208_v52 = vrot.slane %v5206_v36, 4  ;;  %v5044_v46 = vld [vmem:[#allocation2 + $0x68] sm:$0x1] }
 0x1a9   : > { %v16809_v19 = vpop.f32.mrf.mxu1  ;;  %v5186_v35 = vrot.slane %v5185_v39, 4  ;;  %v5212_v9 = vshll.u32 %v5041_v23, 16  ;;  %v5199_v18 = vor.u32 %v5198_v56, %v5195_v38  ;;  %v16817_v49 = vadd.f32 %v16740_v25, %v16706_v57  ;;  %v5045_v14 = vld [vmem:[#allocation2 + $0x6c] sm:$0xf]  ;;  %v5046_v39 = vld [vmem:[#allocation2 + $0x70] sm:$0xf] }
 0x1aa   : > { %14842 = vmatmul.mubr.bf16.gmra.mxu1 %v13653_v40  ;;  %v5181_v62 = vsel %vm16125_vm7, %v5176_v33, %v5180_v45  ;;  %v5217_v48 = vshrl.u32 %v5042_v1, 16  ;;  %v5209_v31 = vor.u32 %v5208_v52, %v5204_v55  ;;  %v5220_v3 = vshll.u32 %v5042_v1, 16  ;;  %v5047_v57 = vld [vmem:[#allocation2 + $0x74] sm:$0x1]  ;;  %v15534_v25 = vld [vmem:[#allocation8 + $0x210] sm:$0xff]  }
 0x1ab   : > { %14876 = vmatpush3.bf16.msra.mxu0 %v15528_v20  ;;  %v5191_v23 = vsel %vm16125_vm7, %v5186_v35, %v5190_v0  ;;  %v5214_v22 = vrot.slane %v5212_v9, 5  ;;  %v16821_v36 = vpop.f32.mrf.mxu1  ;;  %v5200_v38 = vrot.slane %v5199_v18, 4  ;;  %v5226_v33 = vshll.u32 %v5043_v16, 16 }
 0x1ac   : > { %14877 = vmatprep.subr.bf16.mxu0 %v15531_v15  ;;  %19922 = vst [vmem:[#allocation29_spill] sm:$0xff] %v16821_v36  ;;  %v13654_v45 = vcombine.low %v5181_v62, %v5191_v23  ;;  %v5219_v40 = vrot.slane %v5217_v48, 4  ;;  %v5210_v56 = vrot.slane %v5209_v31, 4  ;;  %v5222_v20 = vrot.slane %v5220_v3, 5  ;;  %v15527_v48 = vld [vmem:[#allocation2 + $0x6c] sm:$0xff]   ;;  %v15537_v31 = vld [vmem:[#allocation8 + $0x208] sm:$0xff]  }
 0x1ad   : > { %v5230_v43 = vshrl.u32 %v5043_v16, 16  ;;  %v5236_v37 = vshll.u32 %v5044_v46, 16  ;;  %v5205_v0 = vsel %vm16125_vm7, %v5200_v38, %v5204_v55  ;;  %v5228_v1 = vrot.slane %v5226_v33, 5  ;;  %v15529_v38 = vld [vmem:[#allocation2 + $0x78] sm:$0xff]  }
 0x1ae   : > { %14798 = vmatmul.mubr.bf16.gmra.mxu0 %v15524_v6  ;;  %14845 = vmatprep.mubr.bf16.mxu1 %v13654_v45  ;;  %v16829_v35 = vadd.f32 %v16748_v59, %v16710_v61  ;;  %v5241_v52 = vshrl.u32 %v5045_v14, 16  ;;  %v5215_v6 = vsel %vm16125_vm7, %v5210_v56, %v5214_v22  ;;  %v5223_v9 = vor.u32 %v5222_v20, %v5219_v40  ;;  %v5048_v33 = vld [vmem:[#allocation2 + $0x78] sm:$0xf]  ;;  %v16835_v22 = vpop.f32.mrf.mxu0  ;;  %v5049_v40 = vld [vmem:[#allocation2 + $0x7c] sm:$0xf] }
 0x1af   : > { %14801 = vmatprep.mubr.bf16.mxu0 %v15526_v42  ;;  %v5232_v62 = vrot.slane %v5230_v43, 4  ;;  %v5238_v16 = vrot.slane %v5236_v37, 5  ;;  %14878 = vmatpush3.bf16.msra.mxu0 %v15531_v15  ;;  %v16833_v18 = vpop.f32.mrf.mxu1  ;;  %v13655_v46 = vcombine.low %v5205_v0, %v5215_v6  ;;  %v5244_v55 = vshll.u32 %v5045_v14, 16  ;;  %19923 = vst [vmem:[#allocation30_spill] sm:$0xff] %v16835_v22  ;;  %v5050_v14 = vld [vmem:[#allocation2 + $0x80] sm:$0x1] }
 0x1b0   : > { %v5243_v23 = vrot.slane %v5241_v52, 4  ;;  %v5250_v42 = vshll.u32 %v5046_v39, 16  ;;  %14879 = vmatprep.subr.bf16.mxu0 %v15534_v25  ;;  %v5224_v3 = vrot.slane %v5223_v9, 4  ;;  %v5254_v59 = vshrl.u32 %v5046_v39, 16  ;;  %v15540_v6 = vld [vmem:[#allocation8 + $0x200] sm:$0xff]  }
 0x1b1   : > { %v5233_v61 = vor.u32 %v5232_v62, %v5228_v1  ;;  %v5260_v45 = vshll.u32 %v5047_v57, 16  ;;  %v5246_v37 = vrot.slane %v5244_v55, 5  ;;  %v16839_v15 = vadd.f32 %v16764_v44, %v16726_v5  ;;  %v5051_v57 = vld [vmem:[#allocation2 + $0x84] sm:$0xf]  ;;  %v16843_v52 = vpop.f32.mrf.mxu1  ;;  %v5056_v36 = vld [vmem:[#allocation2 + $0x98] sm:$0x1] }
 0x1b2   : > { %14846 = vmatmul.mubr.bf16.gmra.mxu1 %v13655_v46  ;;  %v5252_v43 = vrot.slane %v5250_v42, 5  ;;  %v5229_v56 = vsel %vm16125_vm7, %v5224_v3, %v5228_v1  ;;  %v5256_v0 = vrot.slane %v5254_v59, 4  ;;  %v16847_v62 = vadd.f32 %v16785_v34, %v16754_v17  ;;  %v5052_v3 = vld [vmem:[#allocation2 + $0x88] sm:$0xf] }
 0x1b3   : > { %v5234_v20 = vrot.slane %v5233_v61, 4  ;;  %v5262_v39 = vrot.slane %v5260_v45, 5  ;;  %14880 = vmatpush3.bf16.msra.mxu0 %v15534_v25  ;;  %v5247_v9 = vor.u32 %v5246_v37, %v5243_v23  ;;  %v5265_v5 = vshrl.u32 %v5048_v33, 16  ;;  %v16853_v22 = vpop.f32.mrf.mxu1 }
 0x1b4   : > { %v5268_v44 = vshll.u32 %v5048_v33, 16  ;;  %14881 = vmatprep.subr.bf16.mxu0 %v15537_v31  ;;  %v5257_v46 = vor.u32 %v5256_v0, %v5252_v43  ;;  %v5274_v55 = vshll.u32 %v5049_v40, 16  ;;  %v5278_v42 = vshrl.u32 %v5049_v40, 16  ;;  %v15530_v0 = vld [vmem:[#allocation2 + $0x84] sm:$0xff]  }
 0x1b5   : > { %v5239_v1 = vsel %vm16125_vm7, %v5234_v20, %v5238_v16  ;;  %v5248_v59 = vrot.slane %v5247_v9, 4  ;;  %v5267_v23 = vrot.slane %v5265_v5, 4  ;;  %v5284_v33 = vshll.u32 %v5050_v14, 16  ;;  %v16867_v12 = vpop.f32.mrf.mxu1 }
 0x1b6   : > { %14802 = vmatmul.mubr.bf16.gmra.mxu0 %v15527_v48  ;;  %v13656_v61 = vcombine.low %v5229_v56, %v5239_v1  ;;  %v5270_v45 = vrot.slane %v5268_v44, 5  ;;  %v5258_v17 = vrot.slane %v5257_v46, 4  ;;  %v5276_v34 = vrot.slane %v5274_v55, 5  ;;  %v5054_v44 = vld [vmem:[#allocation2 + $0x90] sm:$0xf]  ;;  %19924 = vst [vmem:[#allocation31_spill] sm:$0xff] %v16867_v12 }
 0x1b7   : > { %14805 = vmatprep.mubr.bf16.mxu0 %v15529_v38  ;;  %v5280_v37 = vrot.slane %v5278_v42, 4  ;;  %14882 = vmatpush3.bf16.msra.mxu0 %v15537_v31  ;;  %v5253_v16 = vsel %vm16125_vm7, %v5248_v59, %v5252_v43  ;;  %v16861_v56 = vadd.f32 %v16801_v63, %v16774_v47  ;;  %v5053_v38 = vld [vmem:[#allocation2 + $0x8c] sm:$0x1]  ;;  %v5289_v20 = vshrl.u32 %v5051_v57, 16  ;;  %v5055_v47 = vld [vmem:[#allocation2 + $0x94] sm:$0xf] }
 0x1b8   : > { %14849 = vmatprep.mubr.bf16.mxu1 %v13656_v61  ;;  %v5271_v40 = vor.u32 %v5270_v45, %v5267_v23  ;;  %14883 = vmatprep.subr.bf16.mxu0 %v15540_v6  ;;  %v5263_v14 = vsel %vm16125_vm7, %v5258_v17, %v5262_v39  ;;  %v5286_v31 = vrot.slane %v5284_v33, 5  ;;  %v5292_v5 = vshll.u32 %v5051_v57, 16  ;;  %v15532_v61 = vld [vmem:[#allocation2 + $0x90] sm:$0xff]  }
 0x1b9   : > { %v5281_v9 = vor.u32 %v5280_v37, %v5276_v34  ;;  %v13657_v46 = vcombine.low %v5253_v16, %v5263_v14  ;;  %v5291_v55 = vrot.slane %v5289_v20, 4  ;;  %v5298_v42 = vshll.u32 %v5052_v3, 16 }
 0x1ba   : > { %v5272_v43 = vrot.slane %v5271_v40, 4  ;;  %v5294_v59 = vrot.slane %v5292_v5, 5  ;;  %v5302_v23 = vshrl.u32 %v5052_v3, 16  ;;  %v5308_v45 = vshll.u32 %v5053_v38, 16  ;;  %v5057_v5 = vld [vmem:[#allocation2 + $0x9c] sm:$0xf] }
 0x1bb   : > { %v16851_v25 = vpop.f32.mrf.mxu0  ;;  %v5282_v63 = vrot.slane %v5281_v9, 4  ;;  %14884 = vmatpush3.bf16.msra.mxu0 %v15540_v6  ;;  %14850 = vmatmul.mubr.bf16.gmra.mxu1 %v13657_v46  ;;  %v5300_v17 = vrot.slane %v5298_v42, 5  ;;  %v16875_v37 = vadd.f32 %v16809_v19, %v16782_v29  ;;  %v16883_v6 = vadd.f32 %v16833_v18, %v16805_v27  ;;  %v5058_v27 = vld [vmem:[#allocation2 + $0xa0] sm:$0xf] }
 0x1bc   : > { %v5277_v57 = vsel %vm16125_vm7, %v5272_v43, %v5276_v34  ;;  %v5295_v33 = vor.u32 %v5294_v59, %v5291_v55  ;;  %v5304_v16 = vrot.slane %v5302_v23, 4  ;;  %v5310_v40 = vrot.slane %v5308_v45, 5 }
 0x1bd   : > { %v16855_v48 = vpop.f32.mrf.mxu0  ;;  %v5287_v3 = vsel %vm16125_vm7, %v5282_v63, %v5286_v31  ;;  %v5313_v34 = vshrl.u32 %v5054_v44, 16  ;;  %v5316_v14 = vshll.u32 %v5054_v44, 16  ;;  %v5322_v19 = vshll.u32 %v5055_v47, 16  ;;  %v15533_v63 = vld [vmem:[#allocation2 + $0x9c] sm:$0xff]  }
 0x1be   : > { %14806 = vmatmul.mubr.bf16.gmra.mxu0 %v15530_v0  ;;  %v13658_v20 = vcombine.low %v5277_v57, %v5287_v3  ;;  %v5296_v9 = vrot.slane %v5295_v33, 4  ;;  %v5305_v29 = vor.u32 %v5304_v16, %v5300_v17  ;;  %v5326_v0 = vshrl.u32 %v5055_v47, 16  ;;  %v5059_v33 = vld [vmem:[#allocation2 + $0xa4] sm:$0x1] }
 0x1bf   : > { %v16865_v1 = vpop.f32.mrf.mxu0  ;;  %14809 = vmatprep.mubr.bf16.mxu0 %v15532_v61  ;;  %v5315_v43 = vrot.slane %v5313_v34, 4  ;;  %v5318_v55 = vrot.slane %v5316_v14, 5  ;;  %v5332_v42 = vshll.u32 %v5056_v36, 16  ;;  %v16889_v61 = vadd.f32 %v16843_v52, %v16811_v51  ;;  %v15535_v14 = vld [vmem:[#allocation2 + $0xa8] sm:$0xff]  }
 0x1c0   : > { %14853 = vmatprep.mubr.bf16.mxu1 %v13658_v20  ;;  %v5301_v18 = vsel %vm16125_vm7, %v5296_v9, %v5300_v17  ;;  %v5306_v44 = vrot.slane %v5305_v29, 4  ;;  %v5324_v59 = vrot.slane %v5322_v19, 5  ;;  %v5328_v47 = vrot.slane %v5326_v0, 4  ;;  %v5060_v17 = vld [vmem:[#allocation2 + $0xa8] sm:$0xf] }
 0x1c1   : > { %v16869_v39 = vpop.f32.mrf.mxu0  ;;  %v5319_v57 = vor.u32 %v5318_v55, %v5315_v43  ;;  %v5334_v3 = vrot.slane %v5332_v42, 5  ;;  %v5337_v16 = vshrl.u32 %v5057_v5, 16  ;;  %v5340_v36 = vshll.u32 %v5057_v5, 16  ;;  %v5061_v55 = vld [vmem:[#allocation2 + $0xac] sm:$0xf] }
 0x1c2   : > { %19925 = vst [vmem:[#allocation32_spill] sm:$0xff] %v16869_v39  ;;  %v5311_v51 = vsel %vm16125_vm7, %v5306_v44, %v5310_v40  ;;  %v5329_v52 = vor.u32 %v5328_v47, %v5324_v59  ;;  %v5346_v20 = vshll.u32 %v5058_v27, 16  ;;  %v5350_v34 = vshrl.u32 %v5058_v27, 16  ;;  %v5062_v42 = vld [vmem:[#allocation2 + $0xb0] sm:$0x1] }
 0x1c3   : > { %v16879_v38 = vpop.f32.mrf.mxu0  ;;  %v13659_v19 = vcombine.low %v5301_v18, %v5311_v51  ;;  %v5320_v0 = vrot.slane %v5319_v57, 4  ;;  %v5339_v39 = vrot.slane %v5337_v16, 4  ;;  %v5342_v43 = vrot.slane %v5340_v36, 5 }
 0x1c4   : > { %v5330_v5 = vrot.slane %v5329_v52, 4  ;;  %v5348_v12 = vrot.slane %v5346_v20, 5  ;;  %v5352_v32 = vrot.slane %v5350_v34, 4  ;;  %v5356_v40 = vshll.u32 %v5059_v33, 16  ;;  %v15536_v20 = vld [vmem:[#allocation2 + $0xb4] sm:$0xff]   ;;  %v15538_v34 = vld [vmem:[#allocation2 + $0xc0] sm:$0xff]  }
 0x1c5   : > { %v16885_v31 = vpop.f32.mrf.mxu0  ;;  %14854 = vmatmul.mubr.bf16.gmra.mxu1 %v13659_v19  ;;  %v5325_v47 = vsel %vm16125_vm7, %v5320_v0, %v5324_v59  ;;  %v16909_v18 = vadd.f32 %v16853_v22, %v16823_v58  ;;  %v5361_v59 = vshrl.u32 %v5060_v17, 16  ;;  %v5370_v58 = vshll.u32 %v5061_v55, 16 }
 0x1c6   : > { %14810 = vmatmul.mubr.bf16.gmra.mxu0 %v15533_v63  ;;  %v5335_v63 = vsel %vm16125_vm7, %v5330_v5, %v5334_v3  ;;  %v5353_v57 = vor.u32 %v5352_v32, %v5348_v12  ;;  %v5358_v16 = vrot.slane %v5356_v40, 5  ;;  %v5374_v22 = vshrl.u32 %v5061_v55, 16  ;;  %v5064_v5 = vld [vmem:[#allocation2 + $0xb8] sm:$0xf] }
 0x1c7   : > { %v14575_v46 = vpop.f32.mrf.mxu1  ;;  %v16893_v45 = vpop.f32.mrf.mxu0  ;;  %14813 = vmatprep.mubr.bf16.mxu0 %v15535_v14  ;;  %v13660_v51 = vcombine.low %v5325_v47, %v5335_v63  ;;  %v5380_v0 = vshll.u32 %v5062_v42, 16  ;;  %v5372_v55 = vrot.slane %v5370_v58, 5 }
 0x1c8   : > { %v16914_v33 = vadd.f32 %v14575_v46, %v16851_v25  ;;  %v5354_v19 = vrot.slane %v5353_v57, 4  ;;  %v5363_v46 = vrot.slane %v5361_v59, 4  ;;  %v5376_v42 = vrot.slane %v5374_v22, 4 }
 0x1c9   : > { %v1987_v23 = vpop.f32.mrf.mxu1  ;;  %v16899_v29 = vpop.f32.mrf.mxu0  ;;  %14857 = vmatprep.mubr.bf16.mxu1 %v13660_v51  ;;  %v5382_v47 = vrot.slane %v5380_v0, 5  ;;  %v5394_v59 = vshll.u32 %v5064_v5, 16  ;;  %v5066_v0 = vld [vmem:[#allocation2 + $0xc0] sm:$0xf] }
 0x1ca   : > { %19926 = vst [vmem:[#allocation33_spill] sm:$0xff] %v16899_v29  ;;  %v5343_v29 = vor.u32 %v5342_v43, %v5339_v39  ;;  %v5364_v39 = vshll.u32 %v5060_v17, 16  ;;  %v5063_v43 = vld [vmem:[#allocation2 + $0xb4] sm:$0xf]  ;;  %v5065_v17 = vld [vmem:[#allocation2 + $0xbc] sm:$0x1]  ;;  %v5359_v40 = vsel %vm16125_vm7, %v5354_v19, %v5358_v16 }
 0x1cb   : > { %v16897_v9 = vpop.f32.mrf.mxu1  ;;  %v16903_v27 = vpop.f32.mrf.mxu0  ;;  %v5385_v11 = vshrl.u32 %v5063_v43, 16 }
 0x1cc   : > { %v5344_v52 = vrot.slane %v5343_v29, 4  ;;  %v5366_v14 = vrot.slane %v5364_v39, 5  ;;  %v16923_v29 = vadd.f32 %v1987_v23, %v16855_v48  ;;  %v5398_v48 = vshrl.u32 %v5064_v5, 16 }
 0x1cd   : > { %v16901_v44 = vpop.f32.mrf.mxu1  ;;  %v16916_v36 = vpop.f32.mrf.mxu0  ;;  %v5404_v23 = vshll.u32 %v5065_v17, 16  ;;  %v5387_v19 = vrot.slane %v5385_v11, 4  ;;  %v16935_v22 = vadd.f32 %v16897_v9, %v16865_v1  ;;  %v5068_v1 = vld [vmem:[#allocation2 + $0xc8] sm:$0x1] }
 0x1ce   : > { %19927 = vst [vmem:[#allocation34_spill] sm:$0xff] %v16901_v44  ;;  %v5349_v25 = vsel %vm16125_vm7, %v5344_v52, %v5348_v12  ;;  %v5367_v44 = vor.u32 %v5366_v14, %v5363_v46  ;;  %v5388_v12 = vshll.u32 %v5063_v43, 16  ;;  %14814 = vmatmul.mubr.bf16.gmra.mxu0 %v15536_v20  ;;  %v5377_v52 = vor.u32 %v5376_v42, %v5372_v55  ;;  %v5067_v46 = vld [vmem:[#allocation2 + $0xc4] sm:$0xf]  ;;  %v15539_v42 = vld [vmem:[#allocation2 + $0xcc] sm:$0xff]  }
 0x1cf   : > { %v16918_v32 = vpop.f32.mrf.mxu0  ;;  %v13661_v51 = vcombine.low %v5349_v25, %v5359_v40  ;;  %14817 = vmatprep.mubr.bf16.mxu0 %v15538_v34  ;;  %v5396_v20 = vrot.slane %v5394_v59, 5  ;;  %v5400_v25 = vrot.slane %v5398_v48, 4  ;;  %v5406_v11 = vrot.slane %v5404_v23, 5  ;;  %v5069_v23 = vld [vmem:[#allocation2 + $0xcc] sm:$0xf] }
 0x1d0   : > { %v14579_v3 = vpop.f32.mrf.mxu1  ;;  %v5368_v16 = vrot.slane %v5367_v44, 4  ;;  %v5390_v58 = vrot.slane %v5388_v12, 5  ;;  %v5378_v43 = vrot.slane %v5377_v52, 4  ;;  %v5412_v12 = vshll.u32 %v5066_v0, 16 }
 0x1d1   : > { %v16927_v57 = vpop.f32.mrf.mxu0  ;;  %14858 = vmatmul.mubr.bf16.gmra.mxu1 %v13661_v51  ;;  %v16944_v40 = vadd.f32 %v14579_v3, %v16879_v38  ;;  %v5401_v34 = vor.u32 %v5400_v25, %v5396_v20  ;;  %v5409_v51 = vshrl.u32 %v5066_v0, 16 }
 0x1d2   : > { %v2003_v63 = vpop.f32.mrf.mxu1  ;;  %19928 = vst [vmem:[#allocation35_spill] sm:$0xff] %v16927_v57  ;;  %v5373_v17 = vsel %vm16125_vm7, %v5368_v16, %v5372_v55  ;;  %v5391_v44 = vor.u32 %v5390_v58, %v5387_v19  ;;  %v5383_v9 = vsel %vm16125_vm7, %v5378_v43, %v5382_v47  ;;  %v5418_v55 = vshll.u32 %v5067_v46, 16  ;;  %v5070_v57 = vld [vmem:[#allocation2 + $0xd0] sm:$0xf] }
 0x1d3   : > { %v16931_v8 = vpop.f32.mrf.mxu0  ;;  %v13662_v48 = vcombine.low %v5373_v17, %v5383_v9  ;;  %v5422_v16 = vshrl.u32 %v5067_v46, 16  ;;  %v5402_v19 = vrot.slane %v5401_v34, 4  ;;  %v5411_v38 = vrot.slane %v5409_v51, 4  ;;  %v5071_v46 = vld [vmem:[#allocation2 + $0xd4] sm:$0x1] }
 0x1d4   : > { %v16929_v39 = vpop.f32.mrf.mxu1  ;;  %v5414_v3 = vrot.slane %v5412_v12, 5  ;;  %v5428_v58 = vshll.u32 %v5068_v1, 16  ;;  %v5420_v43 = vrot.slane %v5418_v55, 5  ;;  %v16959_v17 = vadd.f32 %v2003_v63, %v16885_v31  ;;  %v5842_v55 = vld [vmem:[#allocation2 + $0x18] sm:$0xe] }
 0x1d5   : > { %v16939_v5 = vpop.f32.mrf.mxu0  ;;  %14861 = vmatprep.mubr.bf16.mxu1 %v13662_v48  ;;  %v5424_v25 = vrot.slane %v5422_v16, 4  ;;  %v5433_v34 = vshrl.u32 %v5069_v23, 16  ;;  %v5446_v63 = vshrl.u32 %v5070_v57, 16  ;;  %v5452_v10 = vshll.u32 %v5071_v46, 16 }
 0x1d6   : > { %v16937_v14 = vpop.f32.mrf.mxu1  ;;  %14818 = vmatmul.mubr.bf16.gmra.mxu0 %v15539_v42  ;;  %v5415_v1 = vor.u32 %v5414_v3, %v5411_v38  ;;  %v5430_v9 = vrot.slane %v5428_v58, 5  ;;  %v16973_v3 = vadd.f32 %v16929_v39, %v16893_v45  ;;  %v5847_v45 = vld [vmem:[#allocation2 + $0x2c] sm:$0x1] }
 0x1d7   : > { %19929 = vst [vmem:[#allocation36_spill] sm:$0xff] %v16937_v14  ;;  %v16950_v59 = vpop.f32.mrf.mxu0  ;;  %v5392_v14 = vrot.slane %v5391_v44, 4  ;;  %v5407_v44 = vsel %vm16125_vm7, %v5402_v19, %v5406_v11  ;;  %v5435_v31 = vrot.slane %v5433_v34, 4  ;;  %v13674_v34 = vrot.slane %v5842_v55, 9 }
 0x1d8   : > { %v16948_v52 = vpop.f32.mrf.mxu1  ;;  %v5416_v16 = vrot.slane %v5415_v1, 4  ;;  %19932 = vst [vmem:[#allocation39_spill] sm:$0xff] %v16973_v3 }
 0x1d9   : > { %v16954_v47 = vpop.f32.mrf.mxu0  ;;  %v5397_v0 = vsel %vm16125_vm7, %v5392_v14, %v5396_v20  ;;  %v5436_v20 = vshll.u32 %v5069_v23, 16  ;;  %v5442_v14 = vshll.u32 %v5070_v57, 16  ;;  %v5844_v23 = vld [vmem:[#allocation2 + $0x20] sm:$0x1]  ;;  %v5454_v57 = vrot.slane %v5452_v10, 5 }
 0x1da   : > { %v16952_v50 = vpop.f32.mrf.mxu1  ;;  %19930 = vst [vmem:[#allocation37_spill] sm:$0xff] %v16954_v47  ;;  %v13663_v48 = vcombine.low %v5397_v0, %v5407_v44  ;;  %v5425_v47 = vor.u32 %v5424_v25, %v5420_v43  ;;  %v5421_v58 = vsel %vm16125_vm7, %v5416_v16, %v5420_v43  ;;  %v5448_v0 = vrot.slane %v5446_v63, 4  ;;  %v5845_v25 = vld [vmem:[#allocation2 + $0x24] sm:$0xe] }
 0x1db   : > { %v16965_v12 = vpop.f32.mrf.mxu0  ;;  %v5438_v19 = vrot.slane %v5436_v20, 5  ;;  %v5444_v38 = vrot.slane %v5442_v14, 5  ;;  %v5846_v20 = vld [vmem:[#allocation2 + $0x28] sm:$0xf]  ;;  %v2649_v43 = vadd.f32 %v16903_v27, %v16724_v54 }
 0x1dc   : > { %v16963_v51 = vpop.f32.mrf.mxu1  ;;  %14862 = vmatmul.mubr.bf16.gmra.mxu1 %v13663_v48  ;;  %v5426_v42 = vrot.slane %v5425_v47, 4  ;;  %v5940_v48 = vrot.slane %v5843_v2, 5  ;;  %v5947_v55 = vrot.slane %v5846_v20, 5  ;;  %v5851_v20 = vld [vmem:[#allocation2 + $0x3c] sm:$0xe] }
 0x1dd   : > { %v16969_v11 = vpop.f32.mrf.mxu0  ;;  %v5439_v1 = vor.u32 %v5438_v19, %v5435_v31  ;;  %v5449_v14 = vor.u32 %v5448_v0, %v5444_v38  ;;  %v13675_v31 = vrot.slane %v5845_v25, 9  ;;  %v2647_v19 = vadd.f32 %v16916_v36, %v16734_v60 }
 0x1de   : > { %v16967_v21 = vpop.f32.mrf.mxu1  ;;  %v5431_v47 = vsel %vm16125_vm7, %v5426_v42, %v5430_v9  ;;  %v5941_v3 = vsel %vm16346_vm13, %v13674_v34, %v5940_v48  ;;  %v5942_v9 = vrot.slane %v5940_v48, 4  ;;  %v5950_v42 = vrot.slane %v5847_v45, 5  ;;  %v5850_v34 = vld [vmem:[#allocation2 + $0x38] sm:$0x1] }
 0x1df   : > { %19931 = vst [vmem:[#allocation38_spill] sm:$0xff] %v16967_v21  ;;  %v16979_v44 = vpop.f32.mrf.mxu0  ;;  %v13664_v39 = vcombine.low %v5421_v58, %v5431_v47  ;;  %v5943_v21 = vrot.slane %v5844_v23, 5  ;;  %v5440_v63 = vrot.slane %v5439_v1, 4  ;;  %v5450_v2 = vrot.slane %v5449_v14, 4  ;;  %v5848_v47 = vld [vmem:[#allocation2 + $0x30] sm:$0xe] }
 0x1e0   : > { %v16977_v46 = vpop.f32.mrf.mxu1  ;;  %v17000_v0 = vadd.f32 %v16948_v52, %v2649_v43  ;;  %v2650_v25 = vadd.f32 %v16918_v32, %v16738_v24  ;;  %v5849_v1 = vld [vmem:[#allocation2 + $0x34] sm:$0xf]  ;;  %v5948_v48 = vsel %vm16346_vm13, %v13675_v31, %v5947_v55  ;;  %v5852_v32 = vld [vmem:[#allocation2 + $0x40] sm:$0xf]  ;;  %v5853_v14 = vld [vmem:[#allocation2 + $0x44] sm:$0x1] }
 0x1e1   : > { %v16987_v16 = vpop.f32.mrf.mxu0  ;;  %14865 = vmatprep.mubr.bf16.mxu1 %v13664_v39  ;;  %v5445_v54 = vsel %vm16125_vm7, %v5440_v63, %v5444_v38  ;;  %v5944_v27 = vsel %vm16346_vm13, %v5942_v9, %v5943_v21  ;;  %v5455_v60 = vsel %vm16125_vm7, %v5450_v2, %v5454_v57  ;;  %v5949_v38 = vrot.slane %v5947_v55, 4 }
 0x1e2   : > { %v16985_v10 = vpop.f32.mrf.mxu1  ;;  %v13690_v36 = vcombine.low %v5941_v3, %v5944_v27  ;;  %v13665_v52 = vcombine.low %v5445_v54, %v5455_v60  ;;  %v17013_v39 = vadd.f32 %v16952_v50, %v2647_v19  ;;  %v17016_v24 = vadd.f32 %v16963_v51, %v2650_v25  ;;  %v5854_v51 = vld [vmem:[#allocation2 + $0x48] sm:$0xe] }
 0x1e3   : > { %v16993_v58 = vpop.f32.mrf.mxu0  ;;  %v5951_v3 = vsel %vm16346_vm13, %v5949_v38, %v5950_v42  ;;  %v13676_v57 = vrot.slane %v5848_v47, 9  ;;  %v5954_v43 = vrot.slane %v5849_v1, 5  ;;  %v5957_v63 = vrot.slane %v5850_v34, 5  ;;  %v5855_v42 = vld [vmem:[#allocation2 + $0x4c] sm:$0xf] }
 0x1e4   : > { %v14652_v23 = vpop.f32.mrf.mxu1  ;;  %14885 = vmatprep.mubr.bf16.mxu0 %v13690_v36  ;;  %14866 = vmatmul.mubr.bf16.gmra.mxu1 %v13665_v52  ;;  %v13691_v2 = vcombine.low %v5948_v48, %v5951_v3  ;;  %v2653_v50 = vadd.f32 %v16931_v8, %v16752_v4  ;;  %v13677_v55 = vrot.slane %v5851_v20, 9  ;;  %v5961_v27 = vrot.slane %v5852_v32, 5  ;;  %v5856_v4 = vld [vmem:[#allocation2 + $0x50] sm:$0x1]  ;;  %v5857_v52 = vld [vmem:[#allocation2 + $0x54] sm:$0xe] }
 0x1e5   : > { %v17010_v21 = vpop.f32.mrf.mxu0  ;;  %v5955_v19 = vsel %vm16346_vm13, %v13676_v57, %v5954_v43  ;;  %v5956_v54 = vrot.slane %v5954_v43, 4  ;;  %v5964_v25 = vrot.slane %v5853_v14, 5  ;;  %v2651_v34 = vadd.f32 %v16939_v5, %v16758_v26  ;;  %v5858_v32 = vld [vmem:[#allocation2 + $0x58] sm:$0xf]  ;;  %v5860_v57 = vld [vmem:[#allocation2 + $0x60] sm:$0xe] }
 0x1e6   : > { %v17008_v45 = vpop.f32.mrf.mxu1  ;;  %14886 = vmatmul.mubr.bf16.vlgmr.msra.gmra.mxu0 %v13691_v2  ;;  %v17031_v60 = vadd.f32 %v16977_v46, %v2653_v50  ;;  %v2654_v8 = vadd.f32 %v16950_v59, %v16762_v13  ;;  %v5962_v48 = vsel %vm16346_vm13, %v13677_v55, %v5961_v27  ;;  %v5963_v38 = vrot.slane %v5961_v27, 4  ;;  %v5859_v59 = vld [vmem:[#allocation2 + $0x5c] sm:$0x1]  ;;  %v5861_v50 = vld [vmem:[#allocation2 + $0x64] sm:$0xf] }
 0x1e7   : > { %19933 = vst [vmem:[#allocation40_spill] sm:$0xff] %v17008_v45  ;;  %v17020_v31 = vpop.f32.mrf.mxu0  ;;  %v5958_v36 = vsel %vm16346_vm13, %v5956_v54, %v5957_v63  ;;  %v13678_v20 = vrot.slane %v5854_v51, 9  ;;  %v17042_v5 = vadd.f32 %v16985_v10, %v2651_v34  ;;  %v5968_v13 = vrot.slane %v5855_v42, 5  ;;  %v5862_v55 = vld [vmem:[#allocation2 + $0x68] sm:$0x1] }
 0x1e8   : > { %v14655_v9 = vpop.f32.mrf.mxu1  ;;  %v13692_v26 = vcombine.low %v5955_v19, %v5958_v36  ;;  %v17044_v46 = vadd.f32 %v14652_v23, %v2654_v8  ;;  %v5965_v43 = vsel %vm16346_vm13, %v5963_v38, %v5964_v25  ;;  %v5971_v63 = vrot.slane %v5856_v4, 5  ;;  %v17056_v42 = vld [vmem:[#allocation2 + $0x70] sm:$0xf] }
 0x1e9   : > { %v17026_v1 = vpop.f32.mrf.mxu0  ;;  %v2657_v2 = vadd.f32 %v16965_v12, %v16770_v7  ;;  %v13693_v10 = vcombine.low %v5962_v48, %v5965_v43  ;;  %v5969_v23 = vsel %vm16346_vm13, %v13678_v20, %v5968_v13  ;;  %v5970_v54 = vrot.slane %v5968_v13, 4  ;;  %v5863_v20 = vld [vmem:[#allocation2 + $0x6c] sm:$0xe] }
 0x1ea   : > { %v2970_v47 = vpop.f32.mrf.mxu1  ;;  %14889 = vmatprep.mubr.bf16.mxu0 %v13692_v26  ;;  %v13679_v27 = vrot.slane %v5857_v52, 9  ;;  %v5975_v25 = vrot.slane %v5858_v32, 5  ;;  %v5978_v34 = vrot.slane %v5859_v59, 5  ;;  %v2655_v7 = vadd.f32 %v16969_v11, %v16789_v30  ;;  %v5865_v32 = vld [vmem:[#allocation2 + $0x74] sm:$0x1] }
 0x1eb   : > { %v17039_v3 = vpop.f32.mrf.mxu0  ;;  %v17060_v12 = vadd.f32 %v14655_v9, %v2657_v2  ;;  %v5972_v36 = vsel %vm16346_vm13, %v5970_v54, %v5971_v63  ;;  %v2658_v48 = vadd.f32 %v16979_v44, %v16793_v53  ;;  %v13680_v38 = vrot.slane %v5860_v57, 9  ;;  %v5867_v2 = vld [vmem:[#allocation2 + $0x7c] sm:$0xf] }
 0x1ec   : > { %v14656_v14 = vpop.f32.mrf.mxu1  ;;  %v13694_v52 = vcombine.low %v5969_v23, %v5972_v36  ;;  %v5977_v26 = vrot.slane %v5975_v25, 4  ;;  %v17066_v13 = vadd.f32 %v2970_v47, %v2655_v7  ;;  %v5982_v11 = vrot.slane %v5861_v50, 5  ;;  %v5866_v23 = vld [vmem:[#allocation2 + $0x78] sm:$0xe] }
 0x1ed   : > { %v17052_v19 = vpop.f32.mrf.mxu0  ;;  %v17070_v30 = vadd.f32 %v14656_v14, %v2658_v48  ;;  %v5985_v9 = vrot.slane %v5862_v55, 5  ;;  %v2661_v63 = vadd.f32 %v16993_v58, %v16817_v49  ;;  %v5976_v53 = vsel %vm16346_vm13, %v13679_v27, %v5975_v25  ;;  %v17087_v25 = vld [vmem:[#allocation2 + $0x88] sm:$0xf] }
 0x1ee   : > { %v17050_v51 = vpop.f32.mrf.mxu1  ;;  %14890 = vmatmul.mubr.bf16.gmra.mxu0 %v13693_v10  ;;  %v5979_v44 = vsel %vm16346_vm13, %v5977_v26, %v5978_v34  ;;  %v5989_v47 = vrot.slane %v17056_v42, 5  ;;  %v5868_v10 = vld [vmem:[#allocation2 + $0x80] sm:$0x1]  ;;  %v5983_v50 = vsel %vm16346_vm13, %v13680_v38, %v5982_v11  ;;  %v5984_v55 = vrot.slane %v5982_v11, 4 }
 0x1ef   : > { %19934 = vst [vmem:[#allocation41_spill] sm:$0xff] %v17050_v51  ;;  %v14616_v4 = vpop.f32.mrf.mxu0  ;;  %14893 = vmatprep.mubr.bf16.mxu0 %v13694_v52  ;;  %v13681_v54 = vrot.slane %v5863_v20, 9  ;;  %v2659_v49 = vadd.f32 %v17010_v21, %v16829_v35  ;;  %v13695_v42 = vcombine.low %v5976_v53, %v5979_v44  ;;  %v5992_v36 = vrot.slane %v5865_v32, 5  ;;  %v5869_v21 = vld [vmem:[#allocation2 + $0x84] sm:$0xe] }
 0x1f0   : > { %v14659_v8 = vpop.f32.mrf.mxu1  ;;  %v5986_v7 = vsel %vm16346_vm13, %v5984_v55, %v5985_v9  ;;  %v2662_v48 = vadd.f32 %v17020_v31, %v16839_v15  ;;  %v5991_v20 = vrot.slane %v5989_v47, 4  ;;  %v5996_v35 = vrot.slane %v5867_v2, 5  ;;  %v5871_v9 = vld [vmem:[#allocation2 + $0x8c] sm:$0x1]  ;;  %v5873_v32 = vld [vmem:[#allocation2 + $0x94] sm:$0xf] }
 0x1f1   : > { %v17068_v43 = vpop.f32.mrf.mxu0  ;;  %v17083_v58 = vadd.f32 %v14659_v8, %v2661_v63  ;;  %v13696_v38 = vcombine.low %v5983_v50, %v5986_v7  ;;  %v13682_v63 = vrot.slane %v5866_v23, 9  ;;  %v2665_v53 = vadd.f32 %v17039_v3, %v16847_v62  ;;  %v5872_v15 = vld [vmem:[#allocation2 + $0x90] sm:$0xe]  ;;  %v5874_v50 = vld [vmem:[#allocation2 + $0x98] sm:$0x1] }
 0x1f2   : > { %v2986_v59 = vpop.f32.mrf.mxu1  ;;  %v5998_v44 = vrot.slane %v5996_v35, 4  ;;  %v2663_v2 = vadd.f32 %v17052_v19, %v16861_v56  ;;  %v5990_v23 = vsel %vm16346_vm13, %v13681_v54, %v5989_v47  ;;  %v5993_v62 = vsel %vm16346_vm13, %v5991_v20, %v5992_v36 }
 0x1f3   : > { %v14619_v14 = vpop.f32.mrf.mxu0  ;;  %v17093_v52 = vadd.f32 %v2986_v59, %v2659_v49  ;;  %v6003_v59 = vrot.slane %v17087_v25, 5  ;;  %v2666_v3 = vadd.f32 %v14616_v4, %v16875_v37  ;;  %v5997_v25 = vsel %vm16346_vm13, %v13682_v63, %v5996_v35  ;;  %v17122_v37 = vld [vmem:[#allocation2 + $0xa0] sm:$0xf] }
 0x1f4   : > { %v14660_v57 = vpop.f32.mrf.mxu1  ;;  %v13683_v19 = vrot.slane %v5869_v21, 9  ;;  %v6006_v7 = vrot.slane %v5871_v9, 5  ;;  %v6010_v47 = vrot.slane %v5873_v32, 5  ;;  %v2669_v54 = vadd.f32 %v14619_v14, %v16883_v6  ;;  %v17126_v9 = vld [vmem:[#allocation2 + $0xa4] sm:$0x1] }
 0x1f5   : > { %v2568_v34 = vpop.f32.mrf.mxu0  ;;  %v17095_v11 = vadd.f32 %v14660_v57, %v2662_v48  ;;  %v6005_v20 = vrot.slane %v6003_v59, 4  ;;  %v13684_v35 = vrot.slane %v5872_v15, 9  ;;  %v17131_v14 = vld [vmem:[#allocation2 + $0xac] sm:$0xf]  ;;  %v17136_v15 = vld [vmem:[#allocation2 + $0xb8] sm:$0xf] }
 0x1f6   : > { %v17085_v27 = vpop.f32.mrf.mxu1  ;;  %14894 = vmatmul.mubr.bf16.gmra.mxu0 %v13695_v42  ;;  %v6012_v63 = vrot.slane %v6010_v47, 4  ;;  %v2667_v32 = vadd.f32 %v2568_v34, %v16889_v61  ;;  %v6017_v34 = vrot.slane %v17122_v37, 5 }
 0x1f7   : > { %19935 = vst [vmem:[#allocation42_spill] sm:$0xff] %v17085_v27  ;;  %v14620_v26 = vpop.f32.mrf.mxu0  ;;  %v5999_v27 = vrot.slane %v5868_v10, 5  ;;  %14897 = vmatprep.mubr.bf16.mxu0 %v13696_v38  ;;  %v13697_v38 = vcombine.low %v5990_v23, %v5993_v62  ;;  %v17134_v23 = vld [vmem:[#allocation2 + $0xa8] sm:$0xe]  ;;  %v6007_v61 = vsel %vm16346_vm13, %v6005_v20, %v6006_v7  ;;  %v17175_v20 = vld [vmem:[#allocation2 + $0xd0] sm:$0xf] }
 0x1f8   : > { %v14663_v8 = vpop.f32.mrf.mxu1  ;;  %v6045_v45 = vrot.slane %v17175_v20, 5 }
 0x1f9   : > { %v17099_v31 = vpop.f32.mrf.mxu0  ;;  %v17104_v57 = vadd.f32 %v14663_v8, %v2665_v53  ;;  %v6000_v56 = vsel %vm16346_vm13, %v5998_v44, %v5999_v27  ;;  %v6013_v27 = vrot.slane %v5874_v50, 5  ;;  %v17124_v44 = vld [vmem:[#allocation2 + $0x9c] sm:$0xe]  ;;  %v5880_v50 = vld [vmem:[#allocation2 + $0xb0] sm:$0x1] }
 0x1fa   : > { %v3002_v55 = vpop.f32.mrf.mxu1  ;;  %v13698_v8 = vcombine.low %v5997_v25, %v6000_v56  ;;  %v6011_v25 = vsel %vm16346_vm13, %v13684_v35, %v6010_v47  ;;  %v13685_v47 = vrot.slane %v17124_v44, 9  ;;  %v6020_v35 = vrot.slane %v17126_v9, 5 }
 0x1fb   : > { %v14623_v49 = vpop.f32.mrf.mxu0  ;;  %v17115_v42 = vadd.f32 %v3002_v55, %v2663_v2  ;;  %v2670_v55 = vadd.f32 %v14620_v26, %v16909_v18  ;;  %v17147_v18 = vld [vmem:[#allocation2 + $0xb4] sm:$0xe]  ;;  %v17149_v26 = vld [vmem:[#allocation2 + $0xc4] sm:$0xf]  ;;  %v6014_v56 = vsel %vm16346_vm13, %v6012_v63, %v6013_v27  ;;  %v6027_v44 = vrot.slane %v5880_v50, 5 }
 0x1fc   : > { %v14664_v10 = vpop.f32.mrf.mxu1  ;;  %v2673_v7 = vadd.f32 %v14623_v49, %v16914_v33  ;;  %v17172_v49 = vld [vmem:[#allocation2 + $0xcc] sm:$0xe]  ;;  %v13687_v9 = vrot.slane %v17147_v18, 9 }
 0x1fd   : > { %v17117_v48 = vadd.f32 %v14664_v10, %v2666_v3  ;;  %v2584_v4 = vpop.f32.mrf.mxu0  ;;  %v6004_v3 = vsel %vm16346_vm13, %v13683_v19, %v6003_v59  ;;  %v6024_v19 = vrot.slane %v17131_v14, 5 }
 0x1fe   : > { %v17120_v36 = vpop.f32.mrf.mxu1  ;;  %14898 = vmatmul.mubr.bf16.gmra.mxu0 %v13697_v38  ;;  %v2671_v27 = vadd.f32 %v2584_v4, %v16923_v29  ;;  %v13699_v14 = vcombine.low %v6004_v3, %v6007_v61 }
 0x1ff   : > { %19936 = vst [vmem:[#allocation43_spill] sm:$0xff] %v17120_v36  ;;  %v14624_v53 = vpop.f32.mrf.mxu0  ;;  %14901 = vmatprep.mubr.bf16.mxu0 %v13698_v8  ;;  %v17164_v8 = vld [vmem:[#allocation2 + $0xc8] sm:$0x1]  ;;  %v6026_v36 = vrot.slane %v6024_v19, 4 }
 0x200   : > { %v14667_v21 = vpop.f32.mrf.mxu1  ;;  %v2674_v33 = vadd.f32 %v14624_v53, %v16935_v22  ;;  %v19938_v22 = vrot.slane %v17136_v15, 5  ;;  %v6041_v18 = vrot.slane %v17164_v8, 5 }
 0x201   : > { %v17129_v6 = vadd.f32 %v14667_v21, %v2669_v54  ;;  %v17138_v62 = vpop.f32.mrf.mxu0  ;;  %v17157_v54 = vld [vmem:[#allocation2 + $0xbc] sm:$0x1]  ;;  %v17162_v21 = vld [vmem:[#allocation2 + $0xc0] sm:$0xe] }
 0x202   : > { %v3018_v2 = vpop.f32.mrf.mxu1  ;;  %v6033_v4 = vrot.slane %v19938_v22, 4  ;;  %v6034_v53 = vrot.slane %v17157_v54, 5  ;;  %v13688_v50 = vrot.slane %v17162_v21, 9  ;;  %v13689_v22 = vrot.slane %v17172_v49, 9 }
 0x203   : > { %v17145_v10 = vadd.f32 %v3018_v2, %v2667_v32  ;;  %v14627_v37 = vpop.f32.mrf.mxu0  ;;  %v6019_v2 = vrot.slane %v6017_v34, 4 }
 0x204   : > { %v14668_v59 = vpop.f32.mrf.mxu1  ;;  %v2677_v61 = vadd.f32 %v14627_v37, %v16944_v40  ;;  %v6018_v40 = vsel %vm16346_vm13, %v13685_v47, %v6017_v34 }
 0x205   : > { %v17159_v38 = vadd.f32 %v14668_v59, %v2670_v55  ;;  %v2600_v32 = vpop.f32.mrf.mxu0  ;;  %v13700_v55 = vcombine.low %v6011_v25, %v6014_v56  ;;  %v13686_v59 = vrot.slane %v17134_v23, 9  ;;  %v17185_v23 = vld [vmem:[#allocation2 + $0xd4] sm:$0x1]  ;;  %v6021_v37 = vsel %vm16346_vm13, %v6019_v2, %v6020_v35 }
 0x206   : > { %v17168_v63 = vpop.f32.mrf.mxu1  ;;  %14902 = vmatmul.mubr.bf16.gmra.mxu0 %v13699_v14  ;;  %v2675_v54 = vadd.f32 %v2600_v32, %v16959_v17  ;;  %v6028_v17 = vsel %vm16346_vm13, %v6026_v36, %v6027_v44  ;;  %v6048_v47 = vrot.slane %v17185_v23, 5  ;;  %v13701_v2 = vcombine.low %v6018_v40, %v6021_v37 }
 0x207   : > { %19937 = vst [vmem:[#allocation44_spill] sm:$0xff] %v17168_v63  ;;  %v6038_v63 = vrot.slane %v17149_v26, 5  ;;  %v14628_v29 = vpop.f32.mrf.mxu0  ;;  %14905 = vmatprep.mubr.bf16.mxu0 %v13700_v55  ;;  %v15541_v55 = vld [vmem:[#allocation10 + $0x38] sm:$0xff]  }
 0x208   : > { %v14671_v51 = vpop.f32.mrf.mxu1  ;;  %14917 = vmatprep.subr.bf16.mxu1 %v15541_v55 }
 0x209   : > { %v17182_v3 = vadd.f32 %v14671_v51, %v2673_v7  ;;  %v17189_v56 = vpop.f32.mrf.mxu0  ;;  %v19939_v51 = vld [vmem:[#allocation39_spill] sm:$0xff]  ;;  %v6040_v8 = vrot.slane %v6038_v63, 4  ;;  %14918 = vmatpush3.bf16.msra.mxu1 %v15541_v55 }
 0x20a   : > { %v3034_v25 = vpop.f32.mrf.mxu1  ;;  %v2678_v7 = vadd.f32 %v14628_v29, %v19939_v51 }
 0x20b   : > { %v17191_v26 = vadd.f32 %v3034_v25, %v2671_v27  ;;  %v14695_v14 = vpop.f32.mrf.mxu0  ;;  %v6025_v27 = vsel %vm16346_vm13, %v13686_v59, %v6024_v19  ;;  %v6042_v37 = vsel %vm16346_vm13, %v6040_v8, %v6041_v18 }
 0x20c   : > { %v14672_v21 = vpop.f32.mrf.mxu1  ;;  %v17208_v32 = vadd.f32 %v14695_v14, %v17000_v0  ;;  %v13702_v29 = vcombine.low %v6025_v27, %v6028_v17  ;;  %v15542_v27 = vld [vmem:[#allocation10 + $0x30] sm:$0xff]  }
 0x20d   : > { %v17205_v49 = vadd.f32 %v14672_v21, %v2674_v33  ;;  %v3756_v35 = vpop.f32.mrf.mxu0  ;;  %14919 = vmatprep.subr.bf16.mxu1 %v15542_v27 }
 0x20e   : > { %v17210_v34 = vpop.f32.mrf.mxu1  ;;  %v17214_v20 = vadd.f32 %v3756_v35, %v17013_v39  ;;  %14906 = vmatmul.mubr.bf16.gmra.mxu0 %v13701_v2  ;;  %v19940_v39 = vrot.slane %v17136_v15, 5  ;;  %v6047_v15 = vrot.slane %v6045_v45, 4  ;;  %14920 = vmatpush3.bf16.msra.mxu1 %v15542_v27 }
 0x20f   : > { %v14696_v59 = vpop.f32.mrf.mxu0  ;;  %14909 = vmatprep.mubr.bf16.mxu0 %v13702_v29 }
 0x210   : > { %v14675_v19 = vpop.f32.mrf.mxu1  ;;  %v17219_v33 = vadd.f32 %v14696_v59, %v17016_v24  ;;  %v6032_v25 = vsel %vm16346_vm13, %v13687_v9, %v19940_v39  ;;  %v6039_v24 = vsel %vm16346_vm13, %v13688_v50, %v6038_v63  ;;  %v15543_v39 = vld [vmem:[#allocation10 + $0x28] sm:$0xff]  }
 0x211   : > { %v17216_v36 = vadd.f32 %v14675_v19, %v2677_v61  ;;  %v17221_v44 = vpop.f32.mrf.mxu0  ;;  %v6035_v61 = vsel %vm16346_vm13, %v6033_v4, %v6034_v53  ;;  %v13704_v53 = vcombine.low %v6039_v24, %v6042_v37  ;;  %14921 = vmatprep.subr.bf16.mxu1 %v15543_v39 }
 0x212   : > { %v3050_v0 = vpop.f32.mrf.mxu1  ;;  %v13703_v17 = vcombine.low %v6032_v25, %v6035_v61  ;;  %14922 = vmatpush3.bf16.msra.mxu1 %v15543_v39 }
 0x213   : > { %v17223_v23 = vadd.f32 %v3050_v0, %v2675_v54  ;;  %v14699_v40 = vpop.f32.mrf.mxu0 }
 0x214   : > { %v14676_v51 = vpop.f32.mrf.mxu1  ;;  %v17238_v54 = vadd.f32 %v14699_v40, %v17031_v60 }
 0x215   : > { %v17235_v21 = vadd.f32 %v14676_v51, %v2678_v7  ;;  %v3772_v9 = vpop.f32.mrf.mxu0  ;;  %v6046_v7 = vsel %vm16346_vm13, %v13689_v22, %v6045_v45 }
 0x216   : > { %v17240_v14 = vpop.f32.mrf.mxu1  ;;  %v17243_v4 = vadd.f32 %v3772_v9, %v17042_v5  ;;  %14910 = vmatmul.mubr.bf16.gmra.mxu0 %v13703_v17  ;;  %v6049_v5 = vsel %vm16346_vm13, %v6047_v15, %v6048_v47  ;;  %v15544_v9 = vld [vmem:[#allocation10 + $0x20] sm:$0xff]  }
 0x217   : > { %v14700_v63 = vpop.f32.mrf.mxu0  ;;  %14913 = vmatprep.mubr.bf16.mxu0 %v13704_v53  ;;  %v13705_v29 = vcombine.low %v6046_v7, %v6049_v5  ;;  %14923 = vmatprep.subr.bf16.mxu1 %v15544_v9 }
 0x218   : > { %v17245_v35 = vpop.f32.mrf.mxu1  ;;  %v3922_v50 = vadd.f32 %v14700_v63, %v17044_v46  ;;  %14924 = vmatpush3.bf16.msra.mxu1 %v15544_v9 }
 0x219   : > { %v17250_v60 = vpop.f32.mrf.mxu0 }
 0x21a   : > { %v17248_v18 = vpop.f32.mrf.mxu1 }
 0x21b   : > { %v14703_v55 = vpop.f32.mrf.mxu0 }
 0x21c   : > { %v17256_v8 = vpop.f32.mrf.mxu1  ;;  %v3925_v46 = vadd.f32 %v14703_v55, %v17060_v12 }
 0x21d   : > { %v3788_v19 = vpop.f32.mrf.mxu0 }
 0x21e   : > { %v17258_v2 = vpop.f32.mrf.mxu1  ;;  %v3923_v0 = vadd.f32 %v3788_v19, %v17066_v13  ;;  %14914 = vmatmul.mubr.bf16.gmra.mxu0 %v13705_v29 }
 0x21f   : > { %v14704_v25 = vpop.f32.mrf.mxu0 }
 0x220   : > { %v17261_v59 = vpop.f32.mrf.mxu1  ;;  %v3926_v45 = vadd.f32 %v14704_v25, %v17070_v30 }
 0x221   : > { %v17269_v51 = vpop.f32.mrf.mxu0 }
 0x222   : > { %v17264_v61 = vpop.f32.mrf.mxu1 }
 0x224   : > { %v14748_v22 = vpop.f32.mrf.mxu1 }
 0x225   : > { %v17267_v47 = vadd.f32 %v14748_v22, %v3922_v50 }
 0x226   : > { %v17271_v12 = vpop.f32.mrf.mxu1  ;;  %v14707_v13 = vpop.f32.mrf.mxu0 }
 0x227   : > { %19941 = vst [vmem:[#allocation39_spill] sm:$0xff] %v17271_v12  ;;  %v3929_v15 = vadd.f32 %v14707_v13, %v17083_v58  ;;  %v15547_v13 = vld [vmem:[#allocation10 + $0x78] sm:$0xff]  }
 0x228   : > { %v14751_v40 = vpop.f32.mrf.mxu1  ;;  %v3804_v30 = vpop.f32.mrf.mxu0  ;;  %14965 = vmatprep.subr.bf16.mxu0 %v15547_v13 }
 0x229   : > { %v17273_v24 = vadd.f32 %v14751_v40, %v3925_v46  ;;  %v3927_v53 = vadd.f32 %v3804_v30, %v17093_v52  ;;  %14966 = vmatpush3.bf16.msra.mxu0 %v15547_v13  ;;  %v15550_v13 = vld [vmem:[#allocation10 + $0x68] sm:$0xff]  }
 0x22a   : > { %v4382_v37 = vpop.f32.mrf.mxu1  ;;  %v14708_v50 = vpop.f32.mrf.mxu0 }
 0x22b   : > { %v17276_v27 = vadd.f32 %v4382_v37, %v3923_v0  ;;  %v3930_v5 = vadd.f32 %v14708_v50, %v17095_v11 }
 0x22c   : > { %v14752_v17 = vpop.f32.mrf.mxu1  ;;  %v17286_v58 = vpop.f32.mrf.mxu0 }
 0x22d   : > { %v17279_v63 = vadd.f32 %v14752_v17, %v3926_v45  ;;  %19943 = vst [vmem:[#allocation46_spill] sm:$0xff] %v17286_v58 }
 0x22e   : > { %v17281_v7 = vpop.f32.mrf.mxu1 }
 0x22f   : > { %19942 = vst [vmem:[#allocation45_spill] sm:$0xff] %v17281_v7 }
 0x230   : > { %v14755_v55 = vpop.f32.mrf.mxu1 }
 0x231   : > { %v17284_v46 = vadd.f32 %v14755_v55, %v3929_v15  ;;  %v14711_v52 = vpop.f32.mrf.mxu0  ;;  %v15548_v55 = vld [vmem:[#allocation10 + $0x70] sm:$0xff]  }
 0x232   : > { %v4398_v29 = vpop.f32.mrf.mxu1  ;;  %v3933_v25 = vadd.f32 %v14711_v52, %v17104_v57  ;;  %14967 = vmatprep.subr.bf16.mxu0 %v15548_v55  ;;  %v15546_v52 = vld [vmem:[#allocation10 + $0x10] sm:$0xff]  }
 0x233   : > { %v17288_v19 = vadd.f32 %v4398_v29, %v3927_v53  ;;  %v3820_v22 = vpop.f32.mrf.mxu0  ;;  %14968 = vmatpush3.bf16.msra.mxu0 %v15548_v55 }
 0x234   : > { %v14756_v0 = vpop.f32.mrf.mxu1  ;;  %v3931_v40 = vadd.f32 %v3820_v22, %v17115_v42  ;;  %v15545_v42 = vld [vmem:[#allocation10 + $0x18] sm:$0xff]   ;;  %14969 = vmatprep.subr.bf16.mxu0 %v15550_v13 }
 0x235   : > { %v17290_v39 = vadd.f32 %v14756_v0, %v3930_v5  ;;  %v14712_v15 = vpop.f32.mrf.mxu0  ;;  %14925 = vmatprep.subr.bf16.mxu1 %v15545_v42 }
 0x236   : > { %v17293_v45 = vpop.f32.mrf.mxu1  ;;  %v3934_v9 = vadd.f32 %v14712_v15, %v17117_v48  ;;  %14926 = vmatpush3.bf16.msra.mxu1 %v15545_v42  ;;  %v15551_v42 = vld [vmem:[#allocation10 + $0x60] sm:$0xff]  }
 0x237   : > { %19944 = vst [vmem:[#allocation47_spill] sm:$0xff] %v17293_v45  ;;  %v17301_v50 = vpop.f32.mrf.mxu0  ;;  %14927 = vmatprep.subr.bf16.mxu1 %v15546_v52  ;;  %14970 = vmatpush3.bf16.msra.mxu0 %v15550_v13  ;;  %v15553_v13 = vld [vmem:[#allocation10 + $0x58] sm:$0xff]  }
 0x238   : > { %v14759_v11 = vpop.f32.mrf.mxu1  ;;  %19945 = vst [vmem:[#allocation48_spill] sm:$0xff] %v17301_v50  ;;  %14971 = vmatprep.subr.bf16.mxu0 %v15551_v42  ;;  %v7494_v50 = vld [vmem:[#allocation3 + $0x8] sm:$0x1] }
 0x239   : > { %v17296_v37 = vadd.f32 %v14759_v11, %v3933_v25 }
 0x23a   : > { %v4414_v30 = vpop.f32.mrf.mxu1  ;;  %14928 = vmatpush3.bf16.msra.mxu1 %v15546_v52 }
 0x23b   : > { %v17299_v17 = vadd.f32 %v4414_v30, %v3931_v40  ;;  %14972 = vmatpush3.bf16.msra.mxu0 %v15551_v42  ;;  %v15552_v42 = vld [vmem:[#allocation10] sm:$0xff]  }
 0x23c   : > { %v14760_v53 = vpop.f32.mrf.mxu1  ;;  %v14715_v29 = vpop.f32.mrf.mxu0  ;;  %14973 = vmatprep.subr.bf16.mxu0 %v15553_v13 }
 0x23d   : > { %v17303_v57 = vadd.f32 %v14760_v53, %v3934_v9  ;;  %v3937_v48 = vadd.f32 %v14715_v29, %v17129_v6  ;;  %v15549_v29 = vld [vmem:[#allocation10 + $0x8] sm:$0xff]  }
 0x23e   : > { %v17305_v5 = vpop.f32.mrf.mxu1  ;;  %v3836_v25 = vpop.f32.mrf.mxu0  ;;  %14929 = vmatprep.subr.bf16.mxu1 %v15549_v29 }
 0x23f   : > { %19946 = vst [vmem:[#allocation49_spill] sm:$0xff] %v17305_v5  ;;  %v3935_v22 = vadd.f32 %v3836_v25, %v17145_v10  ;;  %14930 = vmatpush3.bf16.msra.mxu1 %v15549_v29  ;;  %14974 = vmatpush3.bf16.msra.mxu0 %v15553_v13 }
 0x240   : > { %v14763_v0 = vpop.f32.mrf.mxu1  ;;  %v14716_v15 = vpop.f32.mrf.mxu0  ;;  %14931 = vmatprep.subr.bf16.mxu1 %v15552_v42 }
 0x241   : > { %v17309_v40 = vadd.f32 %v14763_v0, %v3937_v48  ;;  %v3938_v9 = vadd.f32 %v14716_v15, %v17159_v38 }
 0x242   : > { %v4430_v11 = vpop.f32.mrf.mxu1  ;;  %v17316_v55 = vpop.f32.mrf.mxu0 }
 0x243   : > { %v17312_v30 = vadd.f32 %v4430_v11, %v3935_v22  ;;  %19947 = vst [vmem:[#allocation50_spill] sm:$0xff] %v17316_v55  ;;  %14932 = vmatpush3.bf16.msra.mxu1 %v15552_v42 }
 0x244   : > { %v14764_v53 = vpop.f32.mrf.mxu1 }
 0x245   : > { %v17314_v6 = vadd.f32 %v14764_v53, %v3938_v9 }
 0x246   : > { %v17318_v10 = vpop.f32.mrf.mxu1  ;;  %v14719_v48 = vpop.f32.mrf.mxu0 }
 0x247   : > { %19948 = vst [vmem:[#allocation51_spill] sm:$0xff] %v17318_v10  ;;  %v3941_v38 = vadd.f32 %v14719_v48, %v17182_v3 }
 0x248   : > { %v14767_v0 = vpop.f32.mrf.mxu1  ;;  %v3852_v52 = vpop.f32.mrf.mxu0 }
 0x249   : > { %v3939_v25 = vadd.f32 %v3852_v52, %v17191_v26  ;;  %v17322_v22 = vadd.f32 %v14767_v0, %v3941_v38  ;;  %v15554_v26 = vld [vmem:[#allocation10 + $0x50] sm:$0xff]   ;;  %v15555_v38 = vld [vmem:[#allocation3] sm:$0xff]  }
 0x24a   : > { %v4446_v11 = vpop.f32.mrf.mxu1  ;;  %v14720_v15 = vpop.f32.mrf.mxu0  ;;  %14975 = vmatprep.subr.bf16.mxu0 %v15554_v26  ;;  %14933 = vmatprep.mubr.bf16.mxu1 %v15555_v38  ;;  %v15560_v38 = vld [vmem:[#allocation10 + $0x40] sm:$0xff]  }
 0x24b   : > { %v3942_v9 = vadd.f32 %v14720_v15, %v17205_v49  ;;  %v17325_v53 = vadd.f32 %v4446_v11, %v3939_v25  ;;  %14976 = vmatpush3.bf16.msra.mxu0 %v15554_v26  ;;  %v15559_v49 = vld [vmem:[#allocation10 + $0x48] sm:$0xff]  }
 0x24c   : > { %v14768_v41 = vpop.f32.mrf.mxu1  ;;  %v17331_v48 = vpop.f32.mrf.mxu0  ;;  %v7492_v11 = vld [vmem:[#allocation3] sm:$0xf]  ;;  %v7493_v15 = vld [vmem:[#allocation3 + $0x4] sm:$0xf]  ;;  %14977 = vmatprep.subr.bf16.mxu0 %v15559_v49 }
 0x24d   : > { %v17327_v29 = vadd.f32 %v14768_v41, %v3942_v9  ;;  %19950 = vst [vmem:[#allocation53_spill] sm:$0xff] %v17331_v48  ;;  %v7541_v13 = vshrl.u32 %v7492_v11, 16  ;;  %v7544_v9 = vshll.u32 %v7492_v11, 16  ;;  %v7550_v42 = vshll.u32 %v7493_v15, 16 }
 0x24e   : > { %v17329_v3 = vpop.f32.mrf.mxu1  ;;  %v7554_v10 = vshrl.u32 %v7493_v15, 16 }
 0x24f   : > { %19949 = vst [vmem:[#allocation52_spill] sm:$0xff] %v17329_v3  ;;  %14978 = vmatpush3.bf16.msra.mxu0 %v15559_v49  ;;  %v7543_v7 = vrot.slane %v7541_v13, 4  ;;  %v7546_v48 = vrot.slane %v7544_v9, 5  ;;  %v7552_v12 = vrot.slane %v7550_v42, 5  ;;  %v7560_v49 = vshll.u32 %v7494_v50, 16  ;;  %v17362_v42 = vld [vmem:[#allocation10 + $0xb8] sm:$0xff]  }
 0x250   : > { %v7556_v58 = vrot.slane %v7554_v10, 4  ;;  %14979 = vmatprep.subr.bf16.mxu0 %v15560_v38  ;;  %19951 = vst [vmem:[#allocation54_spill] sm:$0xff] %v17362_v42  ;;  %15013 = vmatprep.subr.bf16.mxu1 %v17362_v42 }
 0x251   : > { %v7547_v11 = vor.u32 %v7546_v48, %v7543_v7  ;;  %v7562_v13 = vrot.slane %v7560_v49, 5 }
 0x253   : > { %14980 = vmatpush3.bf16.msra.mxu0 %v15560_v38 }
 0x255   : > { %v14771_v0 = vpop.f32.mrf.mxu1 }
 0x256   : > { %v14723_v52 = vpop.f32.mrf.mxu0 }
 0x257   : > { %v4462_v25 = vpop.f32.mrf.mxu1  ;;  %v3945_v41 = vadd.f32 %v14723_v52, %v17216_v36 }
 0x258   : > { %v3868_v3 = vpop.f32.mrf.mxu0 }
 0x259   : > { %v3943_v5 = vadd.f32 %v3868_v3, %v17223_v23  ;;  %v17335_v45 = vadd.f32 %v14771_v0, %v3945_v41  ;;  %v14772_v26 = vpop.f32.mrf.mxu1  ;;  %v7557_v23 = vor.u32 %v7556_v58, %v7552_v12  ;;  %v7548_v41 = vrot.slane %v7547_v11, 4 }
 0x25a   : > { %v14724_v55 = vpop.f32.mrf.mxu0 }
 0x25b   : > { %v3946_v36 = vadd.f32 %v14724_v55, %v17235_v21  ;;  %v17338_v52 = vadd.f32 %v4462_v25, %v3943_v5  ;;  %v17344_v0 = vpop.f32.mrf.mxu1  ;;  %v7558_v10 = vrot.slane %v7557_v23, 4  ;;  %v7553_v21 = vsel %vm16125_vm7, %v7548_v41, %v7552_v12 }
 0x25c   : > { %v17340_v15 = vpop.f32.mrf.mxu0 }
 0x25d   : > { %v17342_v3 = vadd.f32 %v14772_v26, %v3946_v36  ;;  %v7563_v7 = vsel %vm16125_vm7, %v7558_v10, %v7562_v13 }
 0x25e   : > { %v17346_v9 = vpop.f32.mrf.mxu0  ;;  %v13772_v58 = vcombine.low %v7553_v21, %v7563_v7 }
 0x260   : > { %v17350_v5 = vpop.f32.mrf.mxu0  ;;  %v17354_v50 = vpop.f32.mrf.mxu1  ;;  %14981 = vmatprep.mubr.bf16.mxu0 %v13772_v58 }
 0x262   : > { %v17356_v55 = vpop.f32.mrf.mxu0  ;;  %v17358_v48 = vpop.f32.mrf.mxu1 }
 0x264   : > { %v17360_v25 = vpop.f32.mrf.mxu0  ;;  %v17364_v26 = vpop.f32.mrf.mxu1 }
 0x266   : > { %v17366_v12 = vpop.f32.mrf.mxu0  ;;  %v17369_v38 = vpop.f32.mrf.mxu1 }
 0x267   : > { %19952 = vst [vmem:[#allocation55_spill] sm:$0xff] %v17369_v38 }
 0x268   : > { %v17371_v36 = vpop.f32.mrf.mxu0 }
 0x26a   : > { %v14796_v11 = vpop.f32.mrf.mxu0  ;;  %v17373_v49 = vpop.f32.mrf.mxu1 }
 0x26b   : > { %19953 = vst [vmem:[#allocation56_spill] sm:$0xff] %v17373_v49  ;;  %v17376_v23 = vadd.f32 %v14796_v11, %v17267_v47 }
 0x26c   : > { %v17378_v41 = vpop.f32.mrf.mxu0  ;;  %v17380_v13 = vpop.f32.mrf.mxu1 }
 0x26d   : > { %19954 = vst [vmem:[#allocation57_spill] sm:$0xff] %v17376_v23  ;;  %19955 = vst [vmem:[#allocation58_spill] sm:$0xff] %v17380_v13 }
 0x26e   : > { %v14799_v10 = vpop.f32.mrf.mxu0  ;;  %v17382_v21 = vpop.f32.mrf.mxu1 }
 0x26f   : > { %19956 = vst [vmem:[#allocation59_spill] sm:$0xff] %v17382_v21  ;;  %v17385_v7 = vadd.f32 %v14799_v10, %v17273_v24 }
 0x270   : > { %v4833_v58 = vpop.f32.mrf.mxu0  ;;  %v17387_v28 = vpop.f32.mrf.mxu1 }
 0x271   : > { %19957 = vst [vmem:[#allocation60_spill] sm:$0xff] %v17385_v7  ;;  %v17390_v42 = vadd.f32 %v4833_v58, %v17276_v27 }
 0x272   : > { %v14800_v49 = vpop.f32.mrf.mxu0  ;;  %v17392_v38 = vpop.f32.mrf.mxu1 }
 0x273   : > { %19958 = vst [vmem:[#allocation61_spill] sm:$0xff] %v17390_v42  ;;  %v17395_v47 = vadd.f32 %v14800_v49, %v17279_v63 }
 0x274   : > { %v17397_v11 = vpop.f32.mrf.mxu0  ;;  %v17399_v23 = vpop.f32.mrf.mxu1 }
 0x275   : > { %19959 = vst [vmem:[#allocation62_spill] sm:$0xff] %v17395_v47  ;;  %19960 = vst [vmem:[#allocation63_spill] sm:$0xff] %v17399_v23 }
 0x276   : > { %v14803_v21 = vpop.f32.mrf.mxu0  ;;  %v17401_v13 = vpop.f32.mrf.mxu1 }
 0x277   : > { %19961 = vst [vmem:[#allocation64_spill] sm:$0xff] %v17401_v13  ;;  %v17404_v24 = vadd.f32 %v14803_v21, %v17284_v46  ;;  %v20003_v13 = vld [vmem:[#allocation34_spill] sm:$0xff] }
 0x278   : > { %v4849_v10 = vpop.f32.mrf.mxu0  ;;  %v17406_v7 = vpop.f32.mrf.mxu1 }
 0x279   : > { %19962 = vst [vmem:[#allocation65_spill] sm:$0xff] %v17404_v24  ;;  %19963 = vst [vmem:[#allocation66_spill] sm:$0xff] %v17406_v7  ;;  %v17409_v27 = vadd.f32 %v4849_v10, %v17288_v19 }
 0x27a   : > { %v14804_v58 = vpop.f32.mrf.mxu0 }
 0x27b   : > { %19964 = vst [vmem:[#allocation67_spill] sm:$0xff] %v17409_v27  ;;  %v17412_v63 = vadd.f32 %v14804_v58, %v17290_v39  ;;  %v17416_v47 = vpop.f32.mrf.mxu1 }
 0x27c   : > { %v17414_v49 = vpop.f32.mrf.mxu0  ;;  %19966 = vst [vmem:[#allocation69_spill] sm:$0xff] %v17416_v47 }
 0x27d   : > { %19965 = vst [vmem:[#allocation68_spill] sm:$0xff] %v17412_v63  ;;  %v17418_v42 = vpop.f32.mrf.mxu1 }
 0x27e   : > { %v14807_v23 = vpop.f32.mrf.mxu0  ;;  %19967 = vst [vmem:[#allocation70_spill] sm:$0xff] %v17418_v42  ;;  %v19997_v42 = vld [vmem:[#allocation28_spill] sm:$0xff] }
 0x27f   : > { %v17421_v46 = vadd.f32 %v14807_v23, %v17296_v37  ;;  %v17423_v24 = vpop.f32.mrf.mxu1 }
 0x280   : > { %v4865_v21 = vpop.f32.mrf.mxu0  ;;  %19969 = vst [vmem:[#allocation72_spill] sm:$0xff] %v17423_v24 }
 0x281   : > { %19968 = vst [vmem:[#allocation71_spill] sm:$0xff] %v17421_v46  ;;  %v17426_v19 = vadd.f32 %v4865_v21, %v17299_v17  ;;  %v17428_v27 = vpop.f32.mrf.mxu1 }
 0x282   : > { %v14808_v10 = vpop.f32.mrf.mxu0  ;;  %19971 = vst [vmem:[#allocation74_spill] sm:$0xff] %v17428_v27 }
 0x283   : > { %19970 = vst [vmem:[#allocation73_spill] sm:$0xff] %v17426_v19  ;;  %v17431_v39 = vadd.f32 %v14808_v10, %v17303_v57 }
 0x284   : > { %v17433_v58 = vpop.f32.mrf.mxu0 }
 0x285   : > { %19972 = vst [vmem:[#allocation75_spill] sm:$0xff] %v17431_v39  ;;  %19973 = vst [vmem:[#allocation76_spill] sm:$0xff] %v17433_v58  ;;  %v17435_v47 = vpop.f32.mrf.mxu1 }
 0x286   : > { %v14811_v63 = vpop.f32.mrf.mxu0  ;;  %19974 = vst [vmem:[#allocation77_spill] sm:$0xff] %v17435_v47 }
 0x287   : > { %v17438_v37 = vadd.f32 %v14811_v63, %v17309_v40  ;;  %v17440_v46 = vpop.f32.mrf.mxu1  ;;  %v19984_v63 = vld [vmem:[#allocation20_spill] sm:$0xff] }
 0x288   : > { %v4881_v23 = vpop.f32.mrf.mxu0  ;;  %19976 = vst [vmem:[#allocation79_spill] sm:$0xff] %v17440_v46  ;;  %v19990_v46 = vld [vmem:[#allocation35_spill] sm:$0xff] }
 0x289   : > { %19975 = vst [vmem:[#allocation78_spill] sm:$0xff] %v17438_v37  ;;  %v17443_v17 = vadd.f32 %v4881_v23, %v17312_v30  ;;  %v17445_v19 = vpop.f32.mrf.mxu1  ;;  %v19985_v37 = vld [vmem:[#allocation21_spill] sm:$0xff] }
 0x28a   : > { %v14812_v21 = vpop.f32.mrf.mxu0  ;;  %19978 = vst [vmem:[#allocation81_spill] sm:$0xff] %v17445_v19  ;;  %v2051_v30 = vadd.f32 %v19985_v37, %v19984_v63  ;;  %v19995_v63 = vld [vmem:[#allocation26_spill] sm:$0xff] }
 0x28b   : > { %19977 = vst [vmem:[#allocation80_spill] sm:$0xff] %v17443_v17  ;;  %v17448_v57 = vadd.f32 %v14812_v21, %v17314_v6  ;;  %v17452_v39 = vpop.f32.mrf.mxu1  ;;  %v19988_v6 = vld [vmem:[#allocation22_spill] sm:$0xff]  ;;  %v19989_v21 = vld [vmem:[#allocation23_spill] sm:$0xff] }
 0x28c   : > { %v17450_v10 = vpop.f32.mrf.mxu0  ;;  %19981 = vst [vmem:[#allocation84_spill] sm:$0xff] %v17452_v39  ;;  %v2648_v39 = vadd.f32 %v19990_v46, %v2051_v30  ;;  %v20000_v46 = vld [vmem:[#allocation30_spill] sm:$0xff]  ;;  %v20001_v30 = vld [vmem:[#allocation31_spill] sm:$0xff] }
 0x28d   : > { %19979 = vst [vmem:[#allocation82_spill] sm:$0xff] %v17448_v57  ;;  %19980 = vst [vmem:[#allocation83_spill] sm:$0xff] %v17450_v10  ;;  %v2055_v57 = vadd.f32 %v19989_v21, %v19988_v6  ;;  %v2071_v21 = vadd.f32 %v20001_v30, %v20000_v46 }
 0x28e   : > { %v14815_v47 = vpop.f32.mrf.mxu0 }
 0x28f   : > { %v17457_v40 = vadd.f32 %v14815_v47, %v17322_v22  ;;  %v19993_v47 = vld [vmem:[#allocation24_spill] sm:$0xff] }
 0x290   : > { %v4897_v23 = vpop.f32.mrf.mxu0 }
 0x291   : > { %v17454_v27 = vpop.f32.mrf.mxu1  ;;  %19983 = vst [vmem:[#allocation86_spill] sm:$0xff] %v17457_v40  ;;  %v17464_v19 = vadd.f32 %v4897_v23, %v17325_v53  ;;  %v19994_v40 = vld [vmem:[#allocation25_spill] sm:$0xff] }
 0x292   : > { %19982 = vst [vmem:[#allocation85_spill] sm:$0xff] %v17454_v27  ;;  %v14816_v10 = vpop.f32.mrf.mxu0  ;;  %v2059_v37 = vadd.f32 %v19994_v40, %v19993_v47  ;;  %v19996_v27 = vld [vmem:[#allocation27_spill] sm:$0xff]  ;;  %v19998_v53 = vld [vmem:[#allocation29_spill] sm:$0xff]  ;;  %v20006_v47 = vld [vmem:[#allocation38_spill] sm:$0xff] }
 0x293   : > { %v17461_v17 = vpop.f32.mrf.mxu1  ;;  %19987 = vst [vmem:[#allocation21_spill] sm:$0xff] %v17464_v19  ;;  %v17472_v22 = vadd.f32 %v14816_v10, %v17327_v29  ;;  %v2067_v23 = vadd.f32 %v19998_v53, %v19997_v42  ;;  %v19999_v19 = vld [vmem:[#allocation37_spill] sm:$0xff]  ;;  %v2668_v53 = vadd.f32 %v17099_v31, %v2071_v21  ;;  %v20009_v31 = vld [vmem:[#allocation42_spill] sm:$0xff] }
 0x294   : > { %19986 = vst [vmem:[#allocation20_spill] sm:$0xff] %v17461_v17  ;;  %v2063_v17 = vadd.f32 %v19996_v27, %v19995_v63  ;;  %v2652_v7 = vadd.f32 %v19999_v19, %v2055_v57  ;;  %v17481_v6 = vpop.f32.mrf.mxu0  ;;  %v20004_v10 = vld [vmem:[#allocation33_spill] sm:$0xff]  ;;  %v3098_v27 = vadd.f32 %v20006_v47, %v2648_v39  ;;  %v2656_v63 = vadd.f32 %v16987_v16, %v2059_v37 }
 0x295   : > { %v17469_v24 = vpop.f32.mrf.mxu1  ;;  %19992 = vst [vmem:[#allocation23_spill] sm:$0xff] %v17472_v22  ;;  %v20005_v22 = vld [vmem:[#allocation36_spill] sm:$0xff]  ;;  %v2664_v19 = vadd.f32 %v17068_v43, %v2067_v23  ;;  %v20008_v43 = vld [vmem:[#allocation41_spill] sm:$0xff]  ;;  %v4511_v47 = vadd.f32 %v17245_v35, %v17208_v32  ;;  %v20013_v32 = vld [vmem:[#allocation39_spill] sm:$0xff] }
 0x296   : > { %19991 = vst [vmem:[#allocation22_spill] sm:$0xff] %v17469_v24  ;;  %v20002_v24 = vld [vmem:[#allocation32_spill] sm:$0xff]  ;;  %v2079_v58 = vadd.f32 %v20005_v22, %v20004_v10  ;;  %v2660_v42 = vadd.f32 %v17026_v1, %v2063_v17  ;;  %v14819_v57 = vpop.f32.mrf.mxu0  ;;  %v3916_v39 = vadd.f32 %v17221_v44, %v3098_v27  ;;  %v3106_v17 = vadd.f32 %v20008_v43, %v2656_v63 }
 0x297   : > { %v2075_v29 = vadd.f32 %v20003_v13, %v20002_v24  ;;  %v17489_v40 = vpop.f32.mrf.mxu1  ;;  %v17499_v24 = vadd.f32 %v14819_v57, %v17335_v45  ;;  %v20007_v22 = vld [vmem:[#allocation40_spill] sm:$0xff]  ;;  %v4509_v27 = vadd.f32 %v17248_v18, %v17214_v20 }
 0x298   : > { %v2676_v13 = vadd.f32 %v17189_v56, %v2079_v58  ;;  %v3102_v30 = vadd.f32 %v20007_v22, %v2652_v7  ;;  %v4913_v10 = vpop.f32.mrf.mxu0  ;;  %v3110_v37 = vadd.f32 %v20009_v31, %v2660_v42  ;;  %v20011_v58 = vld [vmem:[#allocation44_spill] sm:$0xff]  ;;  %v3924_v63 = vadd.f32 %v17269_v51, %v3106_v17  ;;  %v20012_v42 = vld [vmem:[#allocation46_spill] sm:$0xff] }
 0x299   : > { %v2672_v46 = vadd.f32 %v17138_v62, %v2075_v29  ;;  %v17506_v1 = vadd.f32 %v4913_v10, %v17338_v52  ;;  %v20010_v62 = vld [vmem:[#allocation43_spill] sm:$0xff]  ;;  %v3118_v21 = vadd.f32 %v20011_v58, %v2668_v53  ;;  %v20014_v20 = vld [vmem:[#allocation48_spill] sm:$0xff]  ;;  %v20015_v53 = vld [vmem:[#allocation50_spill] sm:$0xff] }
 0x29a   : > { %v3114_v23 = vadd.f32 %v20010_v62, %v2664_v19  ;;  %v3920_v56 = vadd.f32 %v17250_v60, %v3102_v30  ;;  %v14820_v45 = vpop.f32.mrf.mxu0  ;;  %v3126_v44 = vadd.f32 %v17240_v14, %v2676_v13  ;;  %v4512_v60 = vadd.f32 %v17256_v8, %v17219_v33  ;;  %v20016_v8 = vld [vmem:[#allocation53_spill] sm:$0xff]  ;;  %v20022_v58 = vld [vmem:[#allocation55_spill] sm:$0xff] }
 0x29b   : > { %v3122_v7 = vadd.f32 %v17210_v34, %v2672_v46  ;;  %v17518_v52 = vadd.f32 %v14820_v45, %v17342_v3  ;;  %v4510_v34 = vadd.f32 %v17258_v2, %v3916_v39  ;;  %v4515_v14 = vadd.f32 %v17261_v59, %v17238_v54  ;;  %v20018_v39 = vld [vmem:[#allocation47_spill] sm:$0xff] }
 0x29c   : > { %v17503_v16 = vpop.f32.mrf.mxu1  ;;  %v4513_v3 = vadd.f32 %v17264_v61, %v17243_v4  ;;  %v3928_v19 = vadd.f32 %v20012_v42, %v3110_v37  ;;  %v4514_v35 = vadd.f32 %v20013_v32, %v3920_v56  ;;  %v3932_v18 = vadd.f32 %v20014_v20, %v3114_v23  ;;  %v20017_v61 = vld [vmem:[#allocation45_spill] sm:$0xff]  ;;  %v4916_v17 = vpop.f32.mrf.mxu0 }
 0x29d   : > { %v3936_v33 = vadd.f32 %v20015_v53, %v3118_v21  ;;  %v3940_v51 = vadd.f32 %v20016_v8, %v3122_v7  ;;  %v3944_v2 = vadd.f32 %v17340_v15, %v3126_v44  ;;  %v4962_v46 = vadd.f32 %v17346_v9, %v4511_v47  ;;  %v20019_v9 = vld [vmem:[#allocation49_spill] sm:$0xff]  ;;  %v20023_v21 = vld [vmem:[#allocation56_spill] sm:$0xff]  ;;  %v20024_v44 = vld [vmem:[#allocation58_spill] sm:$0xff] }
 0x29e   : > { %v17515_v29 = vpop.f32.mrf.mxu1  ;;  %v4960_v54 = vadd.f32 %v17350_v5, %v4509_v27  ;;  %v4963_v4 = vadd.f32 %v17356_v55, %v4512_v60  ;;  %v4518_v13 = vadd.f32 %v20017_v61, %v3924_v63  ;;  %v4961_v22 = vadd.f32 %v17360_v25, %v4510_v34  ;;  %v20020_v5 = vld [vmem:[#allocation51_spill] sm:$0xff]  ;;  %v20021_v55 = vld [vmem:[#allocation52_spill] sm:$0xff]  ;;  %v20025_v60 = vld [vmem:[#allocation57_spill] sm:$0xff] }
 0x29f   : > { %v4966_v30 = vadd.f32 %v17366_v12, %v4515_v14  ;;  %v4964_v10 = vadd.f32 %v17371_v36, %v4513_v3  ;;  %v4522_v43 = vadd.f32 %v20018_v39, %v3928_v19  ;;  %v4965_v15 = vadd.f32 %v17378_v41, %v4514_v35  ;;  %v17580_v42 = vld [vmem:[%s19861_s2] ss:$0 sm:$0xff]  ;;  %v20030_v19 = vld [vmem:[#allocation63_spill] sm:$0xff]  ;;  %v20031_v35 = vld [vmem:[#allocation62_spill] sm:$0xff] }
 0x2a0   : > { %v17533_v57 = vpop.f32.mrf.mxu1  ;;  %v4526_v31 = vadd.f32 %v20019_v9, %v3932_v18  ;;  %v4530_v37 = vadd.f32 %v20020_v5, %v3936_v33  ;;  %v4534_v62 = vadd.f32 %v20021_v55, %v3940_v51  ;;  %v4969_v23 = vadd.f32 %v17397_v11, %v4518_v13  ;;  %v20026_v11 = vld [vmem:[#allocation59_spill] sm:$0xff]  ;;  %v20033_v18 = vld [vmem:[#allocation66_spill] sm:$0xff]  ;;  %v20034_v33 = vld [vmem:[#allocation65_spill] sm:$0xff] }
 0x2a1   : > { %v4538_v56 = vadd.f32 %v17344_v0, %v3944_v2  ;;  %v5780_v25 = vadd.f32 %v17354_v50, %v4962_v46  ;;  %v5778_v12 = vadd.f32 %v17358_v48, %v4960_v54  ;;  %v5781_v36 = vadd.f32 %v17364_v26, %v4963_v4  ;;  %v20027_v50 = vld [vmem:[#allocation60_spill] sm:$0xff]  ;;  %v20035_v8 = vld [vmem:[#allocation69_spill] sm:$0xff]  ;;  %v20036_v2 = vld [vmem:[#allocation67_spill] sm:$0xff] }
 0x2a2   : > { %v17543_v59 = vpop.f32.mrf.mxu1  ;;  %v5779_v41 = vadd.f32 %v20022_v58, %v4961_v22  ;;  %v5784_v7 = vadd.f32 %v20023_v21, %v4966_v30  ;;  %v17562_v47 = vadd.f32 %v20024_v44, %v4964_v10  ;;  %v4973_v27 = vadd.f32 %v17414_v49, %v4522_v43  ;;  %v20028_v26 = vld [vmem:[#allocation76_spill] sm:$0xff]  ;;  %v20029_v49 = vld [vmem:[#allocation61_spill] sm:$0xff]  ;;  %v20037_v46 = vld [vmem:[#allocation70_spill] sm:$0xff] }
 0x2a3   : > { %v17567_v63 = vadd.f32 %v20026_v11, %v20025_v60  ;;  %v17570_v0 = vadd.f32 %v17387_v28, %v4965_v15  ;;  %v17574_v48 = vadd.f32 %v17392_v38, %v20027_v50  ;;  %v4977_v34 = vadd.f32 %v20028_v26, %v4526_v31  ;;  %v20032_v28 = vld [vmem:[#allocation64_spill] sm:$0xff]  ;;  %v20040_v22 = vld [vmem:[#allocation83_spill] sm:$0xff]  ;;  %v17609_v10 = vld [vmem:[%s19862_s3] ss:$0 sm:$0xff] }
 0x2a4   : > { %v14867_v45 = vpop.f32.mrf.mxu1  ;;  %v17584_v32 = vadd.f32 %v20030_v19, %v20029_v49  ;;  %v17588_v20 = vadd.f32 %v20032_v28, %v20031_v35  ;;  %v17591_v38 = vadd.f32 %v20033_v18, %v4969_v23  ;;  %v17595_v51 = vadd.f32 %v20035_v8, %v20034_v33  ;;  %v20038_v4 = vld [vmem:[#allocation68_spill] sm:$0xff]  ;;  %v20041_v43 = vld [vmem:[#allocation74_spill] sm:$0xff]  ;;  %v20042_v9 = vld [vmem:[#allocation71_spill] sm:$0xff] }
 0x2a5   : > { %v17599_v54 = vadd.f32 %v20037_v46, %v20036_v2  ;;  %v20039_v61 = vld [vmem:[#allocation72_spill] sm:$0xff]  ;;  %v4981_v30 = vadd.f32 %v20040_v22, %v4530_v37  ;;  %v17612_v15 = vadd.f32 %v20041_v43, %v4973_v27  ;;  %v20043_v31 = vld [vmem:[#allocation77_spill] sm:$0xff]  ;;  %v20045_v58 = vld [vmem:[#allocation79_spill] sm:$0xff]  ;;  %v4985_v27 = vadd.f32 %v17481_v6, %v4534_v62 }
 0x2a6   : > { %v5731_v14 = vpop.f32.mrf.mxu1  ;;  %v14887_v3 = vpop.f32.mrf.mxu0  ;;  %v17603_v13 = vadd.f32 %v20039_v61, %v20038_v4  ;;  %v17616_v5 = vadd.f32 %v20043_v31, %v20042_v9  ;;  %v20046_v37 = vld [vmem:[#allocation75_spill] sm:$0xff]  ;;  %v20047_v44 = vld [vmem:[#allocation81_spill] sm:$0xff]  ;;  %v20048_v11 = vld [vmem:[#allocation84_spill] sm:$0xff]  ;;  %v4989_v62 = vadd.f32 %v4916_v17, %v4538_v56 }
 0x2a7   : > { %v6374_v53 = vadd.f32 %v14887_v3, %v5780_v25  ;;  %v20044_v25 = vld [vmem:[#allocation73_spill] sm:$0xff]  ;;  %v17625_v60 = vadd.f32 %v20047_v44, %v20046_v37  ;;  %v17628_v50 = vadd.f32 %v20048_v11, %v4977_v34  ;;  %v20049_v49 = vld [vmem:[#allocation78_spill] sm:$0xff]  ;;  %v20052_v33 = vld [vmem:[#allocation20_spill] sm:$0xff]  ;;  %v17646_v6 = vadd.f32 %v17489_v40, %v4981_v30 }
 0x2a8   : > { %v6213_v39 = vpop.f32.mrf.mxu0  ;;  %v17621_v21 = vadd.f32 %v20045_v58, %v20044_v25  ;;  %v14868_v26 = vpop.f32.mrf.mxu1  ;;  %v20050_v19 = vld [vmem:[#allocation85_spill] sm:$0xff]  ;;  %v20053_v2 = vld [vmem:[#allocation82_spill] sm:$0xff]  ;;  %v17663_v17 = vadd.f32 %v17543_v59, %v4985_v27  ;;  %v17668_v37 = vadd.f32 %v14867_v45, %v17499_v24 }
 0x2a9   : > { %v6477_v55 = vmul.f32 %v17580_v42, %v6374_v53  ;;  %v6372_v23 = vadd.f32 %v6213_v39, %v5778_v12  ;;  %v17633_v35 = vadd.f32 %v20050_v19, %v20049_v49  ;;  %v20051_v53 = vld [vmem:[#allocation80_spill] sm:$0xff]  ;;  %v20054_v34 = vld [vmem:[#allocation22_spill] sm:$0xff]  ;;  %v20056_v31 = vld [vmem:[#allocation21_spill] sm:$0xff] }
 0x2aa   : > { %v14888_v3 = vpop.f32.mrf.mxu0  ;;  %v17639_v8 = vadd.f32 %v20052_v33, %v20051_v53  ;;  %v17643_v46 = vadd.f32 %v20054_v34, %v20053_v2  ;;  %v5734_v56 = vpop.f32.mrf.mxu1 }
 0x2ab   : > { %v6516_v12 = vadd.f32 %v17609_v10, %v6477_v55  ;;  %v6475_v28 = vmul.f32 %v17580_v42, %v6372_v23  ;;  %v6375_v18 = vadd.f32 %v14888_v3, %v5781_v36  ;;  %v20055_v36 = vld [vmem:[#allocation86_spill] sm:$0xff]  ;;  %v17656_v55 = vadd.f32 %v17515_v29, %v20056_v31  ;;  %v20057_v23 = vld [vmem:[#allocation23_spill] sm:$0xff] }
 0x2ac   : > { %v6216_v4 = vpop.f32.mrf.mxu0  ;;  %v17652_v9 = vadd.f32 %v17503_v16, %v20055_v36  ;;  %v17660_v40 = vadd.f32 %v17533_v57, %v20057_v23  ;;  %v17671_v29 = vadd.f32 %v5731_v14, %v17506_v1  ;;  %v17674_v57 = vadd.f32 %v14868_v26, %v17518_v52  ;;  %v7002_v26 = vld [vmem:[#allocation3 + $0x18] sm:$0xf] }
 0x2ad   : > { %v6548_v61 = vmax.f32 %v6516_v12, 0.0  ;;  %v6514_v22 = vadd.f32 %v17609_v10, %v6475_v28  ;;  %v6478_v39 = vmul.f32 %v17580_v42, %v6375_v18  ;;  %v6373_v43 = vadd.f32 %v6216_v4, %v5779_v41 }
 0x2ae   : > { %v14891_v30 = vpop.f32.mrf.mxu0  ;;  %v17676_v11 = vadd.f32 %v5734_v56, %v4989_v62  ;;  %v17685_v56 = vld [vmem:[#allocation10 + $0xf8] sm:$0xff]  }
 0x2af   : > { %v14022_v25 = vpack.c.bf16 %v6548_v61, %v6548_v61  ;;  %v6546_v58 = vmax.f32 %v6514_v22, 0.0  ;;  %v6517_v41 = vadd.f32 %v17609_v10, %v6478_v39  ;;  %v6476_v16 = vmul.f32 %v17580_v42, %v6373_v43  ;;  %v6995_v39 = vld [vmem:[#allocation3 + $0xc] sm:$0xf]  ;;  %15061 = vmatprep.subr.bf16.mxu0 %v17685_v56 }
 0x2b0   : > { %v6378_v44 = vadd.f32 %v14891_v30, %v5784_v7  ;;  %v6229_v59 = vpop.f32.mrf.mxu0 }
 0x2b1   : > { %v6692_v27 = vshrl.u32 %v14022_v25, 16  ;;  %v14020_v3 = vpack.c.bf16 %v6546_v58, %v6546_v58  ;;  %v6549_v49 = vmax.f32 %v6517_v41, 0.0  ;;  %v6695_v19 = vshll.u32 %v14022_v25, 16 }
 0x2b2   : > { %v6515_v12 = vadd.f32 %v17609_v10, %v6476_v16  ;;  %v6481_v28 = vmul.f32 %v17580_v42, %v6378_v44  ;;  %v6376_v24 = vadd.f32 %v6229_v59, %v17562_v47  ;;  %v14892_v45 = vpop.f32.mrf.mxu0  ;;  %v7006_v16 = vld [vmem:[#allocation3 + $0x20] sm:$0x1] }
 0x2b3   : > { %v6694_v1 = vrot.slane %v6692_v27, 7  ;;  %v6675_v14 = vshrl.u32 %v14020_v3, 16  ;;  %v6678_v18 = vshll.u32 %v14020_v3, 16  ;;  %v14023_v52 = vpack.c.bf16 %v6549_v49, %v6549_v49 }
 0x2b4   : > { %v6547_v7 = vmax.f32 %v6515_v12, 0.0  ;;  %v6520_v53 = vadd.f32 %v17609_v10, %v6481_v28  ;;  %v6479_v33 = vmul.f32 %v17580_v42, %v6376_v24  ;;  %v6379_v2 = vadd.f32 %v14892_v45, %v17567_v63  ;;  %v6232_v34 = vpop.f32.mrf.mxu0 }
 0x2b5   : > { %v6697_v62 = vor.u32 %v6695_v19, %v6694_v1  ;;  %v6698_v4 = vrot.slane %v6694_v1, 4  ;;  %v6677_v61 = vrot.slane %v6675_v14, 7  ;;  %v6700_v22 = vshrl.u32 %v14023_v52, 16 }
 0x2b6   : > { %v6703_v47 = vshll.u32 %v14023_v52, 16  ;;  %v14021_v43 = vpack.c.bf16 %v6547_v7, %v6547_v7  ;;  %v6552_v36 = vmax.f32 %v6520_v53, 0.0  ;;  %v6518_v31 = vadd.f32 %v17609_v10, %v6479_v33  ;;  %v14895_v23 = vpop.f32.mrf.mxu0 }
 0x2b7   : > { %v7003_v25 = vsel %vm16131_vm8, %v6697_v62, %v7002_v26  ;;  %v6680_v58 = vor.u32 %v6678_v18, %v6677_v61  ;;  %v6681_v41 = vrot.slane %v6677_v61, 4  ;;  %v6702_v63 = vrot.slane %v6700_v22, 7  ;;  %v6999_v62 = vld [vmem:[#allocation3 + $0x14] sm:$0x1] }
 0x2b8   : > { %7004 = vst [vmem:[#allocation3 + $0x18] sm:$0xf] %v7003_v25  ;;  %v6683_v44 = vshrl.u32 %v14021_v43, 16  ;;  %v6686_v59 = vshll.u32 %v14021_v43, 16  ;;  %v14026_v27 = vpack.c.bf16 %v6552_v36, %v6552_v36  ;;  %v6550_v3 = vmax.f32 %v6518_v31, 0.0  ;;  %v6245_v49 = vpop.f32.mrf.mxu0 }
 0x2b9   : > { %v6996_v19 = vsel %vm16131_vm8, %v6680_v58, %v6995_v39  ;;  %v6705_v12 = vor.u32 %v6703_v47, %v6702_v63  ;;  %v6707_v28 = vrot.slane %v6702_v63, 4  ;;  %v6482_v24 = vmul.f32 %v17580_v42, %v6379_v2  ;;  %v7016_v31 = vld [vmem:[#allocation3 + $0x30] sm:$0xf] }
 0x2ba   : > { %6997 = vst [vmem:[#allocation3 + $0xc] sm:$0xf] %v6996_v19  ;;  %v6685_v45 = vrot.slane %v6683_v44, 7  ;;  %v6726_v1 = vshrl.u32 %v14026_v27, 16  ;;  %v6729_v14 = vshll.u32 %v14026_v27, 16  ;;  %v14024_v18 = vpack.c.bf16 %v6550_v3, %v6550_v3  ;;  %v14896_v52 = vpop.f32.mrf.mxu0 }
 0x2bb   : > { %v6706_v7 = vsel %vm16138_vm9, %v6698_v4, %v6705_v12  ;;  %v7007_v33 = vsel %vm16145_vm10, %v6707_v28, %v7006_v16  ;;  %v6521_v61 = vadd.f32 %v17609_v10, %v6482_v24  ;;  %v6377_v22 = vadd.f32 %v6232_v34, %v17570_v0 }
 0x2bc   : > { %7005 = vst [vmem:[#allocation3 + $0x1c] sm:$0xf] %v6706_v7  ;;  %7008 = vst [vmem:[#allocation3 + $0x20] sm:$0x1] %v7007_v33  ;;  %v6688_v2 = vor.u32 %v6686_v59, %v6685_v45  ;;  %v6690_v39 = vrot.slane %v6685_v45, 4  ;;  %v6728_v47 = vrot.slane %v6726_v1, 7  ;;  %v6248_v36 = vpop.f32.mrf.mxu0  ;;  %v6382_v63 = vadd.f32 %v14895_v23, %v17574_v48 }
 0x2bd   : > { %v6709_v43 = vshrl.u32 %v14024_v18, 16  ;;  %v6712_v25 = vshll.u32 %v14024_v18, 16  ;;  %v6553_v58 = vmax.f32 %v6521_v61, 0.0  ;;  %v6480_v4 = vmul.f32 %v17580_v42, %v6377_v22  ;;  %v7009_v23 = vld [vmem:[#allocation3 + $0x24] sm:$0xf] }
 0x2be   : > { %v6689_v16 = vsel %vm16138_vm9, %v6681_v41, %v6688_v2  ;;  %v7000_v0 = vsel %vm16145_vm10, %v6690_v39, %v6999_v62  ;;  %v6731_v34 = vor.u32 %v6729_v14, %v6728_v47  ;;  %v6732_v44 = vrot.slane %v6728_v47, 4  ;;  %v14899_v59 = vpop.f32.mrf.mxu0  ;;  %v7020_v2 = vld [vmem:[#allocation3 + $0x38] sm:$0x1] }
 0x2bf   : > { %6998 = vst [vmem:[#allocation3 + $0x10] sm:$0xf] %v6689_v16  ;;  %7001 = vst [vmem:[#allocation3 + $0x14] sm:$0x1] %v7000_v0  ;;  %v17705_v27 = vrot.slane %v6709_v43, 7  ;;  %v14027_v3 = vpack.c.bf16 %v6553_v58, %v6553_v58  ;;  %v6519_v19 = vadd.f32 %v17609_v10, %v6480_v4  ;;  %v6485_v12 = vmul.f32 %v17580_v42, %v6382_v63 }
 0x2c0   : > { %v7017_v48 = vsel %vm16131_vm8, %v6731_v34, %v7016_v31  ;;  %v6380_v41 = vadd.f32 %v6245_v49, %v17584_v32  ;;  %v6383_v28 = vadd.f32 %v14896_v52, %v17588_v20  ;;  %v6381_v24 = vadd.f32 %v6248_v36, %v17591_v38  ;;  %v6261_v45 = vpop.f32.mrf.mxu0 }
 0x2c1   : > { %7018 = vst [vmem:[#allocation3 + $0x30] sm:$0xf] %v7017_v48  ;;  %v6714_v1 = vor.u32 %v6712_v25, %v17705_v27  ;;  %v6715_v14 = vrot.slane %v17705_v27, 4  ;;  %v6734_v18 = vshrl.u32 %v14027_v3, 16  ;;  %v6737_v7 = vshll.u32 %v14027_v3, 16 }
 0x2c2   : > { %v6551_v33 = vmax.f32 %v6519_v19, 0.0  ;;  %v6524_v62 = vadd.f32 %v17609_v10, %v6485_v12  ;;  %v6483_v61 = vmul.f32 %v17580_v42, %v6380_v41  ;;  %v6486_v22 = vmul.f32 %v17580_v42, %v6383_v28  ;;  %v17719_v32 = vpop.f32.mrf.mxu0  ;;  %v15562_v41 = vld [vmem:[#allocation10 + $0xb0] sm:$0xff]  }
 0x2c3   : > { %v7010_v20 = vsel %vm16131_vm8, %v6714_v1, %v7009_v23  ;;  %v6736_v38 = vrot.slane %v6734_v18, 7  ;;  %v6484_v49 = vmul.f32 %v17580_v42, %v6381_v24  ;;  %v6386_v52 = vadd.f32 %v14899_v59, %v17595_v51  ;;  %v15558_v23 = vld [vmem:[#allocation3 + $0x18] sm:$0xff]  }
 0x2c4   : > { %7011 = vst [vmem:[#allocation3 + $0x24] sm:$0xf] %v7010_v20  ;;  %v14025_v39 = vpack.c.bf16 %v6551_v33, %v6551_v33  ;;  %v6556_v47 = vmax.f32 %v6524_v62, 0.0  ;;  %v6522_v43 = vadd.f32 %v17609_v10, %v6483_v61  ;;  %v6525_v36 = vadd.f32 %v17609_v10, %v6486_v22  ;;  %v17727_v31 = vpop.f32.mrf.mxu0  ;;  %v7030_v33 = vld [vmem:[#allocation3 + $0x48] sm:$0xf] }
 0x2c5   : > { %v6739_v25 = vor.u32 %v6737_v7, %v6736_v38  ;;  %v6741_v58 = vrot.slane %v6736_v38, 4  ;;  %v6523_v4 = vadd.f32 %v17609_v10, %v6484_v49  ;;  %v6489_v63 = vmul.f32 %v17580_v42, %v6386_v52  ;;  %v7013_v7 = vld [vmem:[#allocation3 + $0x2c] sm:$0x1] }
 0x2c6   : > { %v6717_v16 = vshrl.u32 %v14025_v39, 16  ;;  %v6720_v0 = vshll.u32 %v14025_v39, 16  ;;  %v14030_v34 = vpack.c.bf16 %v6556_v47, %v6556_v47  ;;  %v6554_v51 = vmax.f32 %v6522_v43, 0.0  ;;  %v17731_v59 = vpop.f32.mrf.mxu0  ;;  %v15556_v27 = vld [vmem:[#allocation3 + $0xc] sm:$0xff]   ;;  %v15565_v47 = vld [vmem:[#allocation10 + $0xa8] sm:$0xff]  }
 0x2c7   : > { %v6740_v3 = vsel %vm16138_vm9, %v6732_v44, %v6739_v25  ;;  %v7021_v19 = vsel %vm16145_vm10, %v6741_v58, %v7020_v2  ;;  %v6557_v12 = vmax.f32 %v6525_v36, 0.0  ;;  %v6555_v48 = vmax.f32 %v6523_v4, 0.0  ;;  %14934 = vmatmul.mubr.bf16.vlgmr.msra.gmra.mxu1 %v15556_v27  ;;  %v20061_v39 = vld [vmem:[#allocation54_spill] sm:$0xff] }
 0x2c8   : > { %7019 = vst [vmem:[#allocation3 + $0x34] sm:$0xf] %v6740_v3  ;;  %7022 = vst [vmem:[#allocation3 + $0x38] sm:$0x1] %v7021_v19  ;;  %v6719_v28 = vrot.slane %v6717_v16, 7  ;;  %v6760_v24 = vshrl.u32 %v14030_v34, 16  ;;  %v14028_v18 = vpack.c.bf16 %v6554_v51, %v6554_v51  ;;  %v6528_v44 = vadd.f32 %v17609_v10, %v6489_v63  ;;  %v17739_v20 = vpop.f32.mrf.mxu0  ;;  %14937 = vmatprep.mubr.bf16.mxu1 %v15558_v23 }
 0x2c9   : > { %v6763_v1 = vshll.u32 %v14030_v34, 16  ;;  %v14031_v62 = vpack.c.bf16 %v6557_v12, %v6557_v12  ;;  %v14029_v61 = vpack.c.bf16 %v6555_v48, %v6555_v48  ;;  %v6384_v22 = vadd.f32 %v6261_v45, %v17599_v54  ;;  %15014 = vmatpush3.bf16.msra.mxu1 %v20061_v39  ;;  %v7023_v16 = vld [vmem:[#allocation3 + $0x3c] sm:$0xf]  ;;  %v7034_v51 = vld [vmem:[#allocation3 + $0x50] sm:$0x1] }
 0x2ca   : > { %v6722_v38 = vor.u32 %v6720_v0, %v6719_v28  ;;  %v6724_v49 = vrot.slane %v6719_v28, 4  ;;  %v6762_v52 = vrot.slane %v6760_v24, 7  ;;  %v6743_v2 = vshrl.u32 %v14028_v18, 16  ;;  %15015 = vmatprep.subr.bf16.mxu1 %v15562_v41  ;;  %v14904_v19 = vpop.f32.mrf.mxu0  ;;  %v7027_v48 = vld [vmem:[#allocation3 + $0x44] sm:$0x1] }
 0x2cb   : > { %v6746_v43 = vshll.u32 %v14028_v18, 16  ;;  %v6768_v36 = vshrl.u32 %v14031_v62, 16  ;;  %v6771_v25 = vshll.u32 %v14031_v62, 16  ;;  %v6751_v58 = vshrl.u32 %v14029_v61, 16  ;;  %v15568_v62 = vld [vmem:[#allocation10 + $0xa0] sm:$0xff]  }
 0x2cc   : > { %v6723_v4 = vsel %vm16138_vm9, %v6715_v14, %v6722_v38  ;;  %v7014_v54 = vsel %vm16145_vm10, %v6724_v49, %v7013_v7  ;;  %v6765_v45 = vor.u32 %v6763_v1, %v6762_v52  ;;  %v6766_v63 = vrot.slane %v6762_v52, 4 }
 0x2cd   : > { %7012 = vst [vmem:[#allocation3 + $0x28] sm:$0xf] %v6723_v4  ;;  %7015 = vst [vmem:[#allocation3 + $0x2c] sm:$0x1] %v7014_v54  ;;  %v6745_v0 = vrot.slane %v6743_v2, 7  ;;  %v6770_v34 = vrot.slane %v6768_v36, 7  ;;  %v6487_v14 = vmul.f32 %v17580_v42, %v6384_v22  ;;  %v6387_v28 = vadd.f32 %v17719_v32, %v17603_v13  ;;  %15016 = vmatpush3.bf16.msra.mxu1 %v15562_v41  ;;  %v6280_v41 = vpop.f32.mrf.mxu0 }
 0x2ce   : > { %v6753_v27 = vrot.slane %v6751_v58, 7  ;;  %v6754_v3 = vshll.u32 %v14029_v61, 16  ;;  %v7031_v12 = vsel %vm16131_vm8, %v6765_v45, %v7030_v33  ;;  %v6560_v23 = vmax.f32 %v6528_v44, 0.0  ;;  %15017 = vmatprep.subr.bf16.mxu1 %v15565_v47 }
 0x2cf   : > { %7032 = vst [vmem:[#allocation3 + $0x48] sm:$0xf] %v7031_v12  ;;  %v6748_v24 = vor.u32 %v6746_v43, %v6745_v0  ;;  %v6749_v1 = vrot.slane %v6745_v0, 4  ;;  %v6773_v18 = vor.u32 %v6771_v25, %v6770_v34  ;;  %v6775_v7 = vrot.slane %v6770_v34, 4  ;;  %v15571_v0 = vld [vmem:[#allocation10 + $0x98] sm:$0xff]  }
 0x2d0   : > { %v6756_v61 = vor.u32 %v6754_v3, %v6753_v27  ;;  %v6758_v38 = vrot.slane %v6753_v27, 4  ;;  %v14034_v49 = vpack.c.bf16 %v6560_v23, %v6560_v23  ;;  %v6526_v33 = vadd.f32 %v17609_v10, %v6487_v14  ;;  %v7044_v34 = vld [vmem:[#allocation3 + $0x60] sm:$0xf]  ;;  %v7037_v23 = vld [vmem:[#allocation3 + $0x54] sm:$0xf] }
 0x2d1   : > { %v7024_v44 = vsel %vm16131_vm8, %v6748_v24, %v7023_v16  ;;  %v6774_v22 = vsel %vm16138_vm9, %v6766_v63, %v6773_v18  ;;  %v7035_v13 = vsel %vm16145_vm10, %v6775_v7, %v7034_v51  ;;  %v6490_v32 = vmul.f32 %v17580_v42, %v6387_v28  ;;  %15018 = vmatpush3.bf16.msra.mxu1 %v15565_v47 }
 0x2d2   : > { %7025 = vst [vmem:[#allocation3 + $0x3c] sm:$0xf] %v7024_v44  ;;  %7033 = vst [vmem:[#allocation3 + $0x4c] sm:$0xf] %v6774_v22  ;;  %v6757_v52 = vsel %vm16138_vm9, %v6749_v1, %v6756_v61  ;;  %v7028_v2 = vsel %vm16145_vm10, %v6758_v38, %v7027_v48  ;;  %v6794_v39 = vshrl.u32 %v14034_v49, 16  ;;  %v6797_v43 = vshll.u32 %v14034_v49, 16  ;;  %15019 = vmatprep.subr.bf16.mxu1 %v15568_v62 }
 0x2d3   : > { %7036 = vst [vmem:[#allocation3 + $0x50] sm:$0x1] %v7035_v13  ;;  %7026 = vst [vmem:[#allocation3 + $0x40] sm:$0xf] %v6757_v52  ;;  %v6558_v36 = vmax.f32 %v6526_v33, 0.0  ;;  %v6529_v25 = vadd.f32 %v17609_v10, %v6490_v32  ;;  %v6385_v58 = vadd.f32 %v17727_v31, %v17612_v15  ;;  %v6390_v4 = vadd.f32 %v17731_v59, %v17616_v5  ;;  %v15563_v5 = vld [vmem:[#allocation3 + $0x30] sm:$0xff]  }
 0x2d4   : > { %7029 = vst [vmem:[#allocation3 + $0x44] sm:$0x1] %v7028_v2  ;;  %v17768_v54 = vrot.slane %v6794_v39, 7  ;;  %v6388_v45 = vadd.f32 %v17739_v20, %v17621_v21  ;;  %v6391_v63 = vadd.f32 %v14904_v19, %v17625_v60  ;;  %v6389_v47 = vadd.f32 %v6280_v41, %v17628_v50  ;;  %v15561_v16 = vld [vmem:[#allocation3 + $0x24] sm:$0xff]  }
 0x2d5   : > { %v14032_v51 = vpack.c.bf16 %v6558_v36, %v6558_v36  ;;  %v6561_v27 = vmax.f32 %v6529_v25, 0.0  ;;  %v6488_v15 = vmul.f32 %v17580_v42, %v6385_v58  ;;  %v6493_v31 = vmul.f32 %v17580_v42, %v6390_v4  ;;  %14938 = vmatmul.mubr.bf16.gmra.mxu1 %v15561_v16  ;;  %v15574_v1 = vld [vmem:[#allocation10 + $0x90] sm:$0xff]   ;;  %v15579_v58 = vld [vmem:[#allocation10 + $0x88] sm:$0xff]  }
 0x2d6   : > { %v6799_v59 = vor.u32 %v6797_v43, %v17768_v54  ;;  %v6800_v3 = vrot.slane %v17768_v54, 4  ;;  %v6491_v21 = vmul.f32 %v17580_v42, %v6388_v45  ;;  %v6494_v60 = vmul.f32 %v17580_v42, %v6391_v63  ;;  %14941 = vmatprep.mubr.bf16.mxu1 %v15563_v5  ;;  %15020 = vmatpush3.bf16.msra.mxu1 %v15568_v62  ;;  %v7048_v2 = vld [vmem:[#allocation3 + $0x68] sm:$0x1] }
 0x2d7   : > { %v6777_v50 = vshrl.u32 %v14032_v51, 16  ;;  %v6780_v20 = vshll.u32 %v14032_v51, 16  ;;  %v14035_v19 = vpack.c.bf16 %v6561_v27, %v6561_v27  ;;  %v6527_v12 = vadd.f32 %v17609_v10, %v6488_v15  ;;  %15021 = vmatprep.subr.bf16.mxu1 %v15571_v0 }
 0x2d8   : > { %v7045_v48 = vsel %vm16131_vm8, %v6799_v59, %v7044_v34  ;;  %v6532_v14 = vadd.f32 %v17609_v10, %v6493_v31  ;;  %v6530_v28 = vadd.f32 %v17609_v10, %v6491_v21  ;;  %v6533_v24 = vadd.f32 %v17609_v10, %v6494_v60  ;;  %v7041_v59 = vld [vmem:[#allocation3 + $0x5c] sm:$0x1] }
 0x2d9   : > { %7046 = vst [vmem:[#allocation3 + $0x60] sm:$0xf] %v7045_v48  ;;  %v17786_v18 = vrot.slane %v6777_v50, 7  ;;  %v6802_v7 = vshrl.u32 %v14035_v19, 16  ;;  %v6805_v61 = vshll.u32 %v14035_v19, 16  ;;  %v6559_v38 = vmax.f32 %v6527_v12, 0.0 }
 0x2da   : > { %v6564_v49 = vmax.f32 %v6532_v14, 0.0  ;;  %v6562_v62 = vmax.f32 %v6530_v28, 0.0  ;;  %v6565_v33 = vmax.f32 %v6533_v24, 0.0  ;;  %v6492_v44 = vmul.f32 %v17580_v42, %v6389_v47  ;;  %v15564_v22 = vld [vmem:[#allocation3 + $0x3c] sm:$0xff]   ;;  %15022 = vmatpush3.bf16.msra.mxu1 %v15571_v0  ;;  %v14907_v47 = vpop.f32.mrf.mxu0  ;;  %v15566_v16 = vld [vmem:[#allocation3 + $0x48] sm:$0xff]  }
 0x2db   : > { %v6782_v13 = vor.u32 %v6780_v20, %v17786_v18  ;;  %v6783_v32 = vrot.slane %v17786_v18, 4  ;;  %v6804_v41 = vrot.slane %v6802_v7, 7  ;;  %v14033_v52 = vpack.c.bf16 %v6559_v38, %v6559_v38  ;;  %15023 = vmatprep.subr.bf16.mxu1 %v15574_v1  ;;  %v15584_v60 = vld [vmem:[#allocation10 + $0x80] sm:$0xff]   ;;  %v7051_v14 = vld [vmem:[#allocation3 + $0x6c] sm:$0xf] }
 0x2dc   : > { %v14038_v39 = vpack.c.bf16 %v6564_v49, %v6564_v49  ;;  %v14036_v43 = vpack.c.bf16 %v6562_v62, %v6562_v62  ;;  %v14039_v36 = vpack.c.bf16 %v6565_v33, %v6565_v33  ;;  %v6531_v25 = vadd.f32 %v17609_v10, %v6492_v44  ;;  %v6293_v18 = vpop.f32.mrf.mxu0  ;;  %v7062_v49 = vld [vmem:[#allocation3 + $0x80] sm:$0x1]  ;;  %v7495_v62 = vld [vmem:[#allocation3 + $0xc] sm:$0xf] }
 0x2dd   : > { %v7038_v4 = vsel %vm16131_vm8, %v6782_v13, %v7037_v23  ;;  %v6807_v54 = vor.u32 %v6805_v61, %v6804_v41  ;;  %v6809_v45 = vrot.slane %v6804_v41, 4  ;;  %v6785_v63 = vshrl.u32 %v14033_v52, 16  ;;  %14942 = vmatmul.mubr.bf16.gmra.mxu1 %v15564_v22  ;;  %v7496_v41 = vld [vmem:[#allocation3 + $0x10] sm:$0xf] }
 0x2de   : > { %7039 = vst [vmem:[#allocation3 + $0x54] sm:$0xf] %v7038_v4  ;;  %v6788_v34 = vshll.u32 %v14033_v52, 16  ;;  %v6828_v51 = vshrl.u32 %v14038_v39, 16  ;;  %v6831_v0 = vshll.u32 %v14038_v39, 16  ;;  %v6811_v27 = vshrl.u32 %v14036_v43, 16  ;;  %14945 = vmatprep.mubr.bf16.mxu1 %v15566_v16  ;;  %15024 = vmatpush3.bf16.msra.mxu1 %v15574_v1 }
 0x2df   : > { %v6808_v15 = vsel %vm16138_vm9, %v6800_v3, %v6807_v54  ;;  %v7049_v31 = vsel %vm16145_vm10, %v6809_v45, %v7048_v2  ;;  %v6787_v5 = vrot.slane %v6785_v63, 7  ;;  %v6814_v21 = vshll.u32 %v14036_v43, 16  ;;  %15025 = vmatprep.subr.bf16.mxu1 %v15579_v58  ;;  %v7058_v3 = vld [vmem:[#allocation3 + $0x78] sm:$0xf] }
 0x2e0   : > { %7047 = vst [vmem:[#allocation3 + $0x64] sm:$0xf] %v6808_v15  ;;  %7050 = vst [vmem:[#allocation3 + $0x68] sm:$0x1] %v7049_v31  ;;  %v6830_v50 = vrot.slane %v6828_v51, 7  ;;  %v17798_v20 = vrot.slane %v6811_v27, 7  ;;  %v6394_v24 = vadd.f32 %v14907_v47, %v17633_v35  ;;  %v6392_v39 = vadd.f32 %v6293_v18, %v17639_v8 }
 0x2e1   : > { %v6836_v19 = vshrl.u32 %v14039_v36, 16  ;;  %v6839_v12 = vshll.u32 %v14039_v36, 16  ;;  %v6790_v48 = vor.u32 %v6788_v34, %v6787_v5  ;;  %v6792_v23 = vrot.slane %v6787_v5, 4  ;;  %v7497_v34 = vld [vmem:[#allocation3 + $0x14] sm:$0x1] }
 0x2e2   : > { %v6563_v28 = vmax.f32 %v6531_v25, 0.0  ;;  %v6833_v7 = vor.u32 %v6831_v0, %v6830_v50  ;;  %v6834_v61 = vrot.slane %v6830_v50, 4  ;;  %v6816_v1 = vor.u32 %v6814_v21, %v17798_v20  ;;  %15026 = vmatpush3.bf16.msra.mxu1 %v15579_v58  ;;  %v14908_v0 = vpop.f32.mrf.mxu0  ;;  %v7055_v27 = vld [vmem:[#allocation3 + $0x74] sm:$0x1] }
 0x2e3   : > { %v6817_v38 = vrot.slane %v17798_v20, 4  ;;  %v6791_v33 = vsel %vm16138_vm9, %v6783_v32, %v6790_v48  ;;  %v7042_v44 = vsel %vm16145_vm10, %v6792_v23, %v7041_v59  ;;  %v6838_v22 = vrot.slane %v6836_v19, 7  ;;  %15027 = vmatprep.subr.bf16.mxu1 %v15584_v60  ;;  %v15587_v32 = vld [vmem:[#allocation10 + $0x138] sm:$0xff]  }
 0x2e4   : > { %v14037_v13 = vpack.c.bf16 %v6563_v28, %v6563_v28  ;;  %7040 = vst [vmem:[#allocation3 + $0x58] sm:$0xf] %v6791_v33  ;;  %7043 = vst [vmem:[#allocation3 + $0x5c] sm:$0x1] %v7042_v44  ;;  %v7059_v35 = vsel %vm16131_vm8, %v6833_v7, %v7058_v3  ;;  %v7052_v52 = vsel %vm16131_vm8, %v6816_v1, %v7051_v14  ;;  %v7565_v45 = vshrl.u32 %v7495_v62, 16  ;;  %v6296_v7 = vpop.f32.mrf.mxu0 }
 0x2e5   : > { %v6497_v2 = vmul.f32 %v17580_v42, %v6394_v24  ;;  %7060 = vst [vmem:[#allocation3 + $0x78] sm:$0xf] %v7059_v35  ;;  %7053 = vst [vmem:[#allocation3 + $0x6c] sm:$0xf] %v7052_v52  ;;  %v6841_v43 = vor.u32 %v6839_v12, %v6838_v22  ;;  %v6843_v36 = vrot.slane %v6838_v22, 4  ;;  %v6495_v54 = vmul.f32 %v17580_v42, %v6392_v39 }
 0x2e6   : > { %v6819_v25 = vshrl.u32 %v14037_v13, 16  ;;  %v6822_v58 = vshll.u32 %v14037_v13, 16  ;;  %v7568_v63 = vshll.u32 %v7495_v62, 16  ;;  %v7574_v51 = vshll.u32 %v7496_v41, 16  ;;  %15028 = vmatpush3.bf16.msra.mxu1 %v15584_v60  ;;  %v7498_v14 = vld [vmem:[#allocation3 + $0x18] sm:$0xf] }
 0x2e7   : > { %v6536_v4 = vadd.f32 %v17609_v10, %v6497_v2  ;;  %v6842_v47 = vsel %vm16138_vm9, %v6834_v61, %v6841_v43  ;;  %v7063_v8 = vsel %vm16145_vm10, %v6843_v36, %v7062_v49  ;;  %v6534_v31 = vadd.f32 %v17609_v10, %v6495_v54  ;;  %15109 = vmatprep.subr.bf16.mxu1 %v15587_v32  ;;  %v15569_v44 = vld [vmem:[#allocation3 + $0x60] sm:$0xff]   ;;  %v7072_v2 = vld [vmem:[#allocation3 + $0x90] sm:$0xf]  ;;  %v14911_v54 = vpop.f32.mrf.mxu0 }
 0x2e8   : > { %v6821_v16 = vrot.slane %v6819_v25, 7  ;;  %7061 = vst [vmem:[#allocation3 + $0x7c] sm:$0xf] %v6842_v47  ;;  %7064 = vst [vmem:[#allocation3 + $0x80] sm:$0x1] %v7063_v8  ;;  %v7567_v5 = vrot.slane %v7565_v45, 4  ;;  %v6395_v18 = vadd.f32 %v14908_v0, %v17643_v46 }
 0x2e9   : > { %v6568_v15 = vmax.f32 %v6536_v4, 0.0  ;;  %v7570_v59 = vrot.slane %v7568_v63, 5  ;;  %v7576_v20 = vrot.slane %v7574_v51, 5  ;;  %v7578_v19 = vshrl.u32 %v7496_v41, 16  ;;  %v7065_v8 = vld [vmem:[#allocation3 + $0x84] sm:$0xf] }
 0x2ea   : > { %v6824_v21 = vor.u32 %v6822_v58, %v6821_v16  ;;  %v6826_v50 = vrot.slane %v6821_v16, 4  ;;  %v6566_v48 = vmax.f32 %v6534_v31, 0.0  ;;  %v7584_v3 = vshll.u32 %v7497_v34, 16  ;;  %v7500_v0 = vld [vmem:[#allocation3 + $0x20] sm:$0x1] }
 0x2eb   : > { %v14042_v12 = vpack.c.bf16 %v6568_v15, %v6568_v15  ;;  %v7571_v23 = vor.u32 %v7570_v59, %v7567_v5  ;;  %v7580_v24 = vrot.slane %v7578_v19, 4  ;;  %v15567_v61 = vld [vmem:[#allocation3 + $0x54] sm:$0xff]   ;;  %v6498_v41 = vmul.f32 %v17580_v42, %v6395_v18  ;;  %v7501_v18 = vld [vmem:[#allocation3 + $0x24] sm:$0xf] }
 0x2ec   : > { %v6825_v60 = vsel %vm16138_vm9, %v6817_v38, %v6824_v21  ;;  %v7056_v28 = vsel %vm16145_vm10, %v6826_v50, %v7055_v27  ;;  %v14040_v62 = vpack.c.bf16 %v6566_v48, %v6566_v48  ;;  %v7586_v13 = vrot.slane %v7584_v3, 5  ;;  %v7499_v38 = vld [vmem:[#allocation3 + $0x1c] sm:$0xf]  ;;  %14946 = vmatmul.mubr.bf16.gmra.mxu1 %v15567_v61  ;;  %v15577_v50 = vld [vmem:[#allocation10 + $0xf0] sm:$0xff]  }
 0x2ed   : > { %7054 = vst [vmem:[#allocation3 + $0x70] sm:$0xf] %v6825_v60  ;;  %7057 = vst [vmem:[#allocation3 + $0x74] sm:$0x1] %v7056_v28  ;;  %v6862_v1 = vshrl.u32 %v14042_v12, 16  ;;  %v6865_v49 = vshll.u32 %v14042_v12, 16  ;;  %v7581_v22 = vor.u32 %v7580_v24, %v7576_v20  ;;  %14949 = vmatprep.mubr.bf16.mxu1 %v15569_v44  ;;  %v6537_v25 = vadd.f32 %v17609_v10, %v6498_v41 }
 0x2ee   : > { %v7572_v33 = vrot.slane %v7571_v23, 4  ;;  %v7589_v35 = vshrl.u32 %v7498_v14, 16  ;;  %v6845_v46 = vshrl.u32 %v14040_v62, 16  ;;  %v6848_v39 = vshll.u32 %v14040_v62, 16  ;;  %v6309_v23 = vpop.f32.mrf.mxu0 }
 0x2ef   : > { %v17826_v52 = vrot.slane %v6862_v1, 7  ;;  %v7582_v36 = vrot.slane %v7581_v22, 4  ;;  %v7592_v4 = vshll.u32 %v7498_v14, 16  ;;  %v7598_v16 = vshll.u32 %v7499_v38, 16  ;;  %v15572_v61 = vld [vmem:[#allocation3 + $0x78] sm:$0xff]  }
 0x2f0   : > { %v7577_v43 = vsel %vm16125_vm7, %v7572_v33, %v7576_v20  ;;  %v7591_v58 = vrot.slane %v7589_v35, 4  ;;  %v17833_v47 = vrot.slane %v6845_v46, 7  ;;  %v6569_v51 = vmax.f32 %v6537_v25, 0.0 }
 0x2f1   : > { %v6867_v45 = vor.u32 %v6865_v49, %v17826_v52  ;;  %v6868_v63 = vrot.slane %v17826_v52, 4  ;;  %v7587_v34 = vsel %vm16125_vm7, %v7582_v36, %v7586_v13  ;;  %v7594_v27 = vrot.slane %v7592_v4, 5 }
 0x2f2   : > { %v7602_v15 = vshrl.u32 %v7499_v38, 16  ;;  %v6850_v5 = vor.u32 %v6848_v39, %v17833_v47  ;;  %v6851_v59 = vrot.slane %v17833_v47, 4  ;;  %v13773_v21 = vcombine.low %v7577_v43, %v7587_v34  ;;  %v7502_v43 = vld [vmem:[#allocation3 + $0x28] sm:$0xf] }
 0x2f3   : > { %v7073_v31 = vsel %vm16131_vm8, %v6867_v45, %v7072_v2  ;;  %v14043_v20 = vpack.c.bf16 %v6569_v51, %v6569_v51  ;;  %v7595_v19 = vor.u32 %v7594_v27, %v7591_v58  ;;  %v7600_v12 = vrot.slane %v7598_v16, 5  ;;  %v7076_v2 = vld [vmem:[#allocation3 + $0x98] sm:$0x1]  ;;  %v7503_v51 = vld [vmem:[#allocation3 + $0x2c] sm:$0x1] }
 0x2f4   : > { %7074 = vst [vmem:[#allocation3 + $0x90] sm:$0xf] %v7073_v31  ;;  %v7604_v48 = vrot.slane %v7602_v15, 4  ;;  %v15570_v3 = vld [vmem:[#allocation3 + $0x6c] sm:$0xff]   ;;  %v7066_v14 = vsel %vm16131_vm8, %v6850_v5, %v7065_v8  ;;  %14982 = vmatmul.mubr.bf16.vlgmr.msra.gmra.mxu0 %v13773_v21  ;;  %v7608_v60 = vshll.u32 %v7500_v0, 16  ;;  %v6393_v28 = vadd.f32 %v6296_v7, %v17646_v6  ;;  %v15581_v6 = vld [vmem:[#allocation10 + $0xe8] sm:$0xff]   ;;  %v14912_v0 = vpop.f32.mrf.mxu0 }
 0x2f5   : > { %v6398_v24 = vadd.f32 %v14911_v54, %v17652_v9  ;;  %7067 = vst [vmem:[#allocation3 + $0x84] sm:$0xf] %v7066_v14  ;;  %v6870_v1 = vshrl.u32 %v14043_v20, 16  ;;  %v6873_v49 = vshll.u32 %v14043_v20, 16  ;;  %v7596_v62 = vrot.slane %v7595_v19, 4  ;;  %14950 = vmatmul.mubr.bf16.gmra.mxu1 %v15570_v3  ;;  %15062 = vmatpush3.bf16.msra.mxu0 %v17685_v56  ;;  %v15582_v54 = vld [vmem:[#allocation10 + $0xe0] sm:$0xff]  }
 0x2f6   : > { %v7605_v33 = vor.u32 %v7604_v48, %v7600_v12  ;;  %v7610_v44 = vrot.slane %v7608_v60, 5  ;;  %v6496_v22 = vmul.f32 %v17580_v42, %v6393_v28  ;;  %v6396_v41 = vadd.f32 %v6309_v23, %v17656_v55  ;;  %14953 = vmatprep.mubr.bf16.mxu1 %v15572_v61  ;;  %15063 = vmatprep.subr.bf16.mxu0 %v15577_v50  ;;  %v7504_v20 = vld [vmem:[#allocation3 + $0x30] sm:$0xf]  ;;  %v7069_v28 = vld [vmem:[#allocation3 + $0x8c] sm:$0x1] }
 0x2f7   : > { %v6501_v13 = vmul.f32 %v17580_v42, %v6398_v24  ;;  %v6872_v9 = vrot.slane %v6870_v1, 7  ;;  %v7601_v7 = vsel %vm16125_vm7, %v7596_v62, %v7600_v12  ;;  %v7613_v35 = vshrl.u32 %v7501_v18, 16  ;;  %v15585_v19 = vld [vmem:[#allocation10 + $0xd8] sm:$0xff]  }
 0x2f8   : > { %v7606_v38 = vrot.slane %v7605_v33, 4  ;;  %v6535_v46 = vadd.f32 %v17609_v10, %v6496_v22  ;;  %v6499_v39 = vmul.f32 %v17580_v42, %v6396_v41  ;;  %v7616_v36 = vshll.u32 %v7501_v18, 16  ;;  %v15586_v41 = vld [vmem:[#allocation10 + $0xd0] sm:$0xff]  }
 0x2f9   : > { %v6540_v56 = vadd.f32 %v17609_v10, %v6501_v13  ;;  %v6875_v25 = vor.u32 %v6873_v49, %v6872_v9  ;;  %v6877_v55 = vrot.slane %v6872_v9, 4  ;;  %v7615_v4 = vrot.slane %v7613_v35, 4  ;;  %15064 = vmatpush3.bf16.msra.mxu0 %v15577_v50  ;;  %v6312_v49 = vpop.f32.mrf.mxu0  ;;  %v7505_v35 = vld [vmem:[#allocation3 + $0x34] sm:$0xf] }
 0x2fa   : > { %v7611_v58 = vsel %vm16125_vm7, %v7606_v38, %v7610_v44  ;;  %v6567_v8 = vmax.f32 %v6535_v46, 0.0  ;;  %v6538_v34 = vadd.f32 %v17609_v10, %v6499_v39  ;;  %15065 = vmatprep.subr.bf16.mxu0 %v15581_v6  ;;  %v7618_v15 = vrot.slane %v7616_v36, 5  ;;  %v7086_v44 = vld [vmem:[#allocation3 + $0xa8] sm:$0xf] }
 0x2fb   : > { %v13774_v45 = vcombine.low %v7601_v7, %v7611_v58  ;;  %v6572_v16 = vmax.f32 %v6540_v56, 0.0  ;;  %v6876_v42 = vsel %vm16138_vm9, %v6868_v63, %v6875_v25  ;;  %v7077_v27 = vsel %vm16145_vm10, %v6877_v55, %v7076_v2  ;;  %v17881_v25 = vld [vmem:[%s19862_s3] ss:$0 sm:$0xff] }
 0x2fc   : > { %v7622_v31 = vshll.u32 %v7502_v43, 16  ;;  %7075 = vst [vmem:[#allocation3 + $0x94] sm:$0xf] %v6876_v42  ;;  %7078 = vst [vmem:[#allocation3 + $0x98] sm:$0x1] %v7077_v27  ;;  %v14041_v5 = vpack.c.bf16 %v6567_v8, %v6567_v8  ;;  %v6570_v50 = vmax.f32 %v6538_v34, 0.0  ;;  %v7619_v12 = vor.u32 %v7618_v15, %v7615_v4  ;;  %v14915_v4 = vpop.f32.mrf.mxu0 }
 0x2fd   : > { %14985 = vmatprep.mubr.bf16.mxu0 %v13774_v45  ;;  %v14046_v21 = vpack.c.bf16 %v6572_v16, %v6572_v16  ;;  %v7626_v10 = vshrl.u32 %v7502_v43, 16  ;;  %v7632_v52 = vshll.u32 %v7503_v51, 16  ;;  %v6399_v23 = vadd.f32 %v14912_v0, %v17660_v40  ;;  %15066 = vmatpush3.bf16.msra.mxu0 %v15581_v6  ;;  %v17869_v40 = vld [vmem:[%s19861_s2] ss:$0 sm:$0xff]  ;;  %v7079_v16 = vld [vmem:[#allocation3 + $0x9c] sm:$0xf] }
 0x2fe   : > { %v7624_v48 = vrot.slane %v7622_v31, 5  ;;  %v6853_v63 = vshrl.u32 %v14041_v5, 16  ;;  %v6856_v3 = vshll.u32 %v14041_v5, 16  ;;  %15067 = vmatprep.subr.bf16.mxu0 %v15582_v54  ;;  %v14044_v24 = vpack.c.bf16 %v6570_v50, %v6570_v50  ;;  %v7506_v34 = vld [vmem:[#allocation3 + $0x38] sm:$0x1] }
 0x2ff   : > { %v6896_v14 = vshrl.u32 %v14046_v21, 16  ;;  %v6899_v60 = vshll.u32 %v14046_v21, 16  ;;  %v7620_v18 = vrot.slane %v7619_v12, 4  ;;  %v7628_v61 = vrot.slane %v7626_v10, 4  ;;  %v15588_v21 = vld [vmem:[#allocation10 + $0xc8] sm:$0xff]  }
 0x300   : > { %v7634_v1 = vrot.slane %v7632_v52, 5  ;;  %v6855_v62 = vrot.slane %v6853_v63, 7  ;;  %v6502_v22 = vmul.f32 %v17869_v40, %v6399_v23  ;;  %v7637_v13 = vshrl.u32 %v7504_v20, 16 }
 0x301   : > { %v17864_v33 = vrot.slane %v6896_v14, 7  ;;  %v6879_v6 = vshrl.u32 %v14044_v24, 16  ;;  %v6882_v9 = vshll.u32 %v14044_v24, 16  ;;  %v7625_v7 = vsel %vm16125_vm7, %v7620_v18, %v7624_v48  ;;  %15068 = vmatpush3.bf16.msra.mxu0 %v15582_v54 }
 0x302   : > { %v7629_v38 = vor.u32 %v7628_v61, %v7624_v48  ;;  %v6858_v2 = vor.u32 %v6856_v3, %v6855_v62  ;;  %v6860_v46 = vrot.slane %v6855_v62, 4  ;;  %15069 = vmatprep.subr.bf16.mxu0 %v15585_v19  ;;  %v6541_v55 = vadd.f32 %v17881_v25, %v6502_v22  ;;  %v6325_v48 = vpop.f32.mrf.mxu0  ;;  %v7507_v3 = vld [vmem:[#allocation3 + $0x3c] sm:$0xf] }
 0x303   : > { %v6901_v56 = vor.u32 %v6899_v60, %v17864_v33  ;;  %v6902_v39 = vrot.slane %v17864_v33, 4  ;;  %v17876_v43 = vrot.slane %v6879_v6, 7  ;;  %v7639_v58 = vrot.slane %v7637_v13, 4 }
 0x304   : > { %v7630_v36 = vrot.slane %v7629_v38, 4  ;;  %v6859_v54 = vsel %vm16138_vm9, %v6851_v59, %v6858_v2  ;;  %v7070_v45 = vsel %vm16145_vm10, %v6860_v46, %v7069_v28  ;;  %v7640_v51 = vshll.u32 %v7504_v20, 16  ;;  %v7508_v46 = vld [vmem:[#allocation3 + $0x40] sm:$0xf] }
 0x305   : > { %v7087_v8 = vsel %vm16131_vm8, %v6901_v56, %v7086_v44  ;;  %7068 = vst [vmem:[#allocation3 + $0x88] sm:$0xf] %v6859_v54  ;;  %7071 = vst [vmem:[#allocation3 + $0x8c] sm:$0x1] %v7070_v45  ;;  %v6884_v0 = vor.u32 %v6882_v9, %v17876_v43  ;;  %v6885_v42 = vrot.slane %v17876_v43, 4  ;;  %v6573_v59 = vmax.f32 %v6541_v55, 0.0  ;;  %15070 = vmatpush3.bf16.msra.mxu0 %v15585_v19 }
 0x306   : > { %7088 = vst [vmem:[#allocation3 + $0xa8] sm:$0xf] %v7087_v8  ;;  %v7635_v47 = vsel %vm16125_vm7, %v7630_v36, %v7634_v1  ;;  %v7642_v15 = vrot.slane %v7640_v51, 5  ;;  %v7646_v31 = vshll.u32 %v7505_v35, 16  ;;  %v7650_v5 = vshrl.u32 %v7505_v35, 16  ;;  %15071 = vmatprep.subr.bf16.mxu0 %v15586_v41  ;;  %v15575_v36 = vld [vmem:[#allocation3 + $0x90] sm:$0xff]  }
 0x307   : > { %v13775_v27 = vcombine.low %v7625_v7, %v7635_v47  ;;  %v7080_v50 = vsel %vm16131_vm8, %v6884_v0, %v7079_v16  ;;  %v14047_v10 = vpack.c.bf16 %v6573_v59, %v6573_v59  ;;  %v7656_v20 = vshll.u32 %v7506_v34, 16  ;;  %v7090_v44 = vld [vmem:[#allocation3 + $0xb0] sm:$0x1]  ;;  %v7509_v54 = vld [vmem:[#allocation3 + $0x44] sm:$0x1] }
 0x308   : > { %v6397_v12 = vadd.f32 %v6312_v49, %v17663_v17  ;;  %7081 = vst [vmem:[#allocation3 + $0x9c] sm:$0xf] %v7080_v50  ;;  %v7643_v52 = vor.u32 %v7642_v15, %v7639_v58  ;;  %v7648_v23 = vrot.slane %v7646_v31, 5  ;;  %v7652_v63 = vrot.slane %v7650_v5, 4  ;;  %v15590_v49 = vld [vmem:[#allocation10 + $0xc0] sm:$0xff]   ;;  %v17911_v8 = vld [vmem:[#allocation10 + $0x178] sm:$0xff]   ;;  %v14916_v50 = vpop.f32.mrf.mxu0 }
 0x309   : > { %14986 = vmatmul.mubr.bf16.gmra.mxu0 %v13775_v27  ;;  %v6402_v19 = vadd.f32 %v14915_v4, %v17668_v37  ;;  %v6904_v14 = vshrl.u32 %v14047_v10, 16  ;;  %v6907_v60 = vshll.u32 %v14047_v10, 16  ;;  %v7658_v28 = vrot.slane %v7656_v20, 5 }
 0x30a   : > { %v6500_v24 = vmul.f32 %v17869_v40, %v6397_v12  ;;  %15072 = vmatpush3.bf16.msra.mxu0 %v15586_v41  ;;  %v7644_v18 = vrot.slane %v7643_v52, 4  ;;  %v7653_v61 = vor.u32 %v7652_v63, %v7648_v23  ;;  %v6400_v17 = vadd.f32 %v6325_v48, %v17671_v29  ;;  %v7510_v52 = vld [vmem:[#allocation3 + $0x48] sm:$0xf] }
 0x30b   : > { %v6505_v1 = vmul.f32 %v17869_v40, %v6402_v19  ;;  %15073 = vmatprep.subr.bf16.mxu0 %v15588_v21  ;;  %v6906_v62 = vrot.slane %v6904_v14, 7  ;;  %v7661_v37 = vshrl.u32 %v7507_v3, 16  ;;  %v7664_v13 = vshll.u32 %v7507_v3, 16 }
 0x30c   : > { %v6539_v22 = vadd.f32 %v17881_v25, %v6500_v24  ;;  %v7649_v6 = vsel %vm16125_vm7, %v7644_v18, %v7648_v23  ;;  %v7654_v9 = vrot.slane %v7653_v61, 4  ;;  %v6503_v7 = vmul.f32 %v17869_v40, %v6400_v17  ;;  %v15573_v38 = vld [vmem:[#allocation3 + $0x84] sm:$0xff]  }
 0x30d   : > { %v6544_v41 = vadd.f32 %v17881_v25, %v6505_v1  ;;  %v6909_v35 = vor.u32 %v6907_v60, %v6906_v62  ;;  %v6911_v2 = vrot.slane %v6906_v62, 4  ;;  %v7663_v56 = vrot.slane %v7661_v37, 4  ;;  %14954 = vmatmul.mubr.bf16.gmra.mxu1 %v15573_v38  ;;  %v7100_v1 = vld [vmem:[#allocation3 + $0xc0] sm:$0xf] }
 0x30e   : > { %v6571_v29 = vmax.f32 %v6539_v22, 0.0  ;;  %15074 = vmatpush3.bf16.msra.mxu0 %v15588_v21  ;;  %v7659_v55 = vsel %vm16125_vm7, %v7654_v9, %v7658_v28  ;;  %v6542_v4 = vadd.f32 %v17881_v25, %v6503_v7  ;;  %v7666_v45 = vrot.slane %v7664_v13, 5  ;;  %14957 = vmatprep.mubr.bf16.mxu1 %v15575_v36  ;;  %v7511_v13 = vld [vmem:[#allocation3 + $0x4c] sm:$0xf]  ;;  %v7093_v9 = vld [vmem:[#allocation3 + $0xb4] sm:$0xf] }
 0x30f   : > { %v6576_v58 = vmax.f32 %v6544_v41, 0.0  ;;  %15075 = vmatprep.subr.bf16.mxu0 %v15590_v49  ;;  %v6910_v16 = vsel %vm16138_vm9, %v6902_v39, %v6909_v35  ;;  %v7091_v34 = vsel %vm16145_vm10, %v6911_v2, %v7090_v44  ;;  %v13776_v51 = vcombine.low %v7649_v6, %v7659_v55  ;;  %v7083_v39 = vld [vmem:[#allocation3 + $0xa4] sm:$0x1] }
 0x310   : > { %v14045_v0 = vpack.c.bf16 %v6571_v29, %v6571_v29  ;;  %7089 = vst [vmem:[#allocation3 + $0xac] sm:$0xf] %v6910_v16  ;;  %7092 = vst [vmem:[#allocation3 + $0xb0] sm:$0x1] %v7091_v34  ;;  %v6574_v59 = vmax.f32 %v6542_v4, 0.0  ;;  %v7667_v27 = vor.u32 %v7666_v45, %v7663_v56  ;;  %v7670_v15 = vshll.u32 %v7508_v46, 16 }
 0x311   : > { %v14050_v47 = vpack.c.bf16 %v6576_v58, %v6576_v58  ;;  %14989 = vmatprep.mubr.bf16.mxu0 %v13776_v51  ;;  %v7674_v21 = vshrl.u32 %v7508_v46, 16  ;;  %v7680_v33 = vshll.u32 %v7509_v54, 16  ;;  %v6403_v24 = vadd.f32 %v14916_v50, %v17674_v57  ;;  %v7512_v29 = vld [vmem:[#allocation3 + $0x50] sm:$0x1]  ;;  %v6328_v46 = vpop.f32.mrf.mxu0  ;;  %v7513_v58 = vld [vmem:[#allocation3 + $0x54] sm:$0xf] }
 0x312   : > { %v6887_v31 = vshrl.u32 %v14045_v0, 16  ;;  %v6890_v5 = vshll.u32 %v14045_v0, 16  ;;  %15076 = vmatpush3.bf16.msra.mxu0 %v15590_v49  ;;  %v14048_v12 = vpack.c.bf16 %v6574_v59, %v6574_v59  ;;  %v7668_v48 = vrot.slane %v7667_v27, 4  ;;  %v7514_v34 = vld [vmem:[#allocation3 + $0x58] sm:$0xf] }
 0x313   : > { %v6930_v10 = vshrl.u32 %v14050_v47, 16  ;;  %v6933_v20 = vshll.u32 %v14050_v47, 16  ;;  %15157 = vmatprep.subr.bf16.mxu0 %v17911_v8  ;;  %v7672_v63 = vrot.slane %v7670_v15, 5  ;;  %v7676_v19 = vrot.slane %v7674_v21, 4  ;;  %v7515_v50 = vld [vmem:[#allocation3 + $0x5c] sm:$0x1] }
 0x314   : > { %v6889_v23 = vrot.slane %v6887_v31, 7  ;;  %v7682_v3 = vrot.slane %v7680_v33, 5  ;;  %v6913_v60 = vshrl.u32 %v14048_v12, 16  ;;  %v6916_v28 = vshll.u32 %v14048_v12, 16 }
 0x315   : > { %v17920_v14 = vrot.slane %v6930_v10, 7  ;;  %v7673_v17 = vsel %vm16125_vm7, %v7668_v48, %v7672_v63  ;;  %v7677_v49 = vor.u32 %v7676_v19, %v7672_v63  ;;  %v6506_v37 = vmul.f32 %v17869_v40, %v6403_v24 }
 0x316   : > { %v6892_v18 = vor.u32 %v6890_v5, %v6889_v23  ;;  %v6894_v61 = vrot.slane %v6889_v23, 4  ;;  %v17927_v22 = vrot.slane %v6913_v60, 7  ;;  %v7685_v7 = vshrl.u32 %v7510_v52, 16 }
 0x317   : > { %v6935_v62 = vor.u32 %v6933_v20, %v17920_v14  ;;  %v6936_v44 = vrot.slane %v17920_v14, 4  ;;  %v7678_v41 = vrot.slane %v7677_v49, 4  ;;  %v6545_v43 = vadd.f32 %v17881_v25, %v6506_v37 }
 0x318   : > { %v6893_v57 = vsel %vm16138_vm9, %v6885_v42, %v6892_v18  ;;  %v7084_v6 = vsel %vm16145_vm10, %v6894_v61, %v7083_v39  ;;  %v6918_v35 = vor.u32 %v6916_v28, %v17927_v22  ;;  %v6919_v2 = vrot.slane %v17927_v22, 4  ;;  %v15580_v61 = vld [vmem:[#allocation3 + $0xa8] sm:$0xff]  }
 0x319   : > { %7082 = vst [vmem:[#allocation3 + $0xa0] sm:$0xf] %v6893_v57  ;;  %7085 = vst [vmem:[#allocation3 + $0xa4] sm:$0x1] %v7084_v6  ;;  %v7101_v38 = vsel %vm16131_vm8, %v6935_v62, %v7100_v1  ;;  %v7683_v42 = vsel %vm16125_vm7, %v7678_v41, %v7682_v3  ;;  %v7687_v56 = vrot.slane %v7685_v7, 4  ;;  %v7688_v36 = vshll.u32 %v7510_v52, 16 }
 0x31a   : > { %7102 = vst [vmem:[#allocation3 + $0xc0] sm:$0xf] %v7101_v38  ;;  %v7694_v55 = vshll.u32 %v7511_v13, 16  ;;  %v7094_v4 = vsel %vm16131_vm8, %v6918_v35, %v7093_v9  ;;  %v13777_v54 = vcombine.low %v7673_v17, %v7683_v42  ;;  %v6577_v45 = vmax.f32 %v6545_v43, 0.0  ;;  %v7516_v52 = vld [vmem:[#allocation3 + $0x60] sm:$0xf] }
 0x31b   : > { %v7698_v16 = vshrl.u32 %v7511_v13, 16  ;;  %7095 = vst [vmem:[#allocation3 + $0xb4] sm:$0xf] %v7094_v4  ;;  %v7690_v51 = vrot.slane %v7688_v36, 5  ;;  %v7704_v47 = vshll.u32 %v7512_v29, 16  ;;  %v6401_v59 = vadd.f32 %v6328_v46, %v17676_v11 }
 0x31c   : > { %v7696_v0 = vrot.slane %v7694_v55, 5  ;;  %14990 = vmatmul.mubr.bf16.gmra.mxu0 %v13777_v54  ;;  %v14051_v27 = vpack.c.bf16 %v6577_v45, %v6577_v45  ;;  %v7709_v31 = vshrl.u32 %v7513_v58, 16  ;;  %v7712_v5 = vshll.u32 %v7513_v58, 16  ;;  %v7104_v1 = vld [vmem:[#allocation3 + $0xc8] sm:$0x1] }
 0x31d   : > { %v7700_v15 = vrot.slane %v7698_v16, 4  ;;  %v7691_v21 = vor.u32 %v7690_v51, %v7687_v56  ;;  %v7706_v33 = vrot.slane %v7704_v47, 5  ;;  %v6504_v30 = vmul.f32 %v17869_v40, %v6401_v59  ;;  %v7517_v6 = vld [vmem:[#allocation3 + $0x64] sm:$0xf]  ;;  %v7518_v35 = vld [vmem:[#allocation3 + $0x68] sm:$0x1] }
 0x31e   : > { %v7718_v39 = vshll.u32 %v7514_v34, 16  ;;  %v6938_v10 = vshrl.u32 %v14051_v27, 16  ;;  %v6941_v20 = vshll.u32 %v14051_v27, 16  ;;  %v7711_v48 = vrot.slane %v7709_v31, 4  ;;  %v7519_v56 = vld [vmem:[#allocation3 + $0x6c] sm:$0xf] }
 0x31f   : > { %v7701_v12 = vor.u32 %v7700_v15, %v7696_v0  ;;  %v7692_v23 = vrot.slane %v7691_v21, 4  ;;  %v6543_v63 = vadd.f32 %v17881_v25, %v6504_v30  ;;  %v7714_v11 = vrot.slane %v7712_v5, 5  ;;  %v7520_v51 = vld [vmem:[#allocation3 + $0x70] sm:$0xf]  ;;  %v7097_v59 = vld [vmem:[#allocation3 + $0xbc] sm:$0x1] }
 0x320   : > { %v7720_v19 = vrot.slane %v7718_v39, 5  ;;  %v15578_v3 = vld [vmem:[#allocation3 + $0x9c] sm:$0xff]   ;;  %v6940_v60 = vrot.slane %v6938_v10, 7  ;;  %v7722_v24 = vshrl.u32 %v7514_v34, 16  ;;  %v7728_v18 = vshll.u32 %v7515_v50, 16 }
 0x321   : > { %v7702_v28 = vrot.slane %v7701_v12, 4  ;;  %v7697_v40 = vsel %vm16125_vm7, %v7692_v23, %v7696_v0  ;;  %v6575_v17 = vmax.f32 %v6543_v63, 0.0  ;;  %v7715_v49 = vor.u32 %v7714_v11, %v7711_v48  ;;  %14958 = vmatmul.mubr.bf16.gmra.mxu1 %v15578_v3  ;;  %v7521_v39 = vld [vmem:[#allocation3 + $0x74] sm:$0x1]  ;;  %v7523_v3 = vld [vmem:[#allocation3 + $0x7c] sm:$0xf] }
 0x322   : > { %v7733_v62 = vshrl.u32 %v7516_v52, 16  ;;  %v6943_v37 = vor.u32 %v6941_v20, %v6940_v60  ;;  %v6945_v13 = vrot.slane %v6940_v60, 4  ;;  %v7724_v57 = vrot.slane %v7722_v24, 4  ;;  %14961 = vmatprep.mubr.bf16.mxu1 %v15580_v61 }
 0x323   : > { %v7707_v25 = vsel %vm16125_vm7, %v7702_v28, %v7706_v33  ;;  %v14049_v41 = vpack.c.bf16 %v6575_v17, %v6575_v17  ;;  %v7716_v7 = vrot.slane %v7715_v49, 4  ;;  %v7730_v38 = vrot.slane %v7728_v18, 5 }
 0x324   : > { %v13778_v9 = vcombine.low %v7697_v40, %v7707_v25  ;;  %v6944_v43 = vsel %vm16138_vm9, %v6936_v44, %v6943_v37  ;;  %v7105_v29 = vsel %vm16145_vm10, %v6945_v13, %v7104_v1  ;;  %v7725_v46 = vor.u32 %v7724_v57, %v7720_v19  ;;  %v7524_v1 = vld [vmem:[#allocation3 + $0x80] sm:$0x1] }
 0x325   : > { %v7735_v42 = vrot.slane %v7733_v62, 4  ;;  %7103 = vst [vmem:[#allocation3 + $0xc4] sm:$0xf] %v6944_v43  ;;  %7106 = vst [vmem:[#allocation3 + $0xc8] sm:$0x1] %v7105_v29  ;;  %v6921_v36 = vshrl.u32 %v14049_v41, 16  ;;  %v7721_v58 = vsel %vm16125_vm7, %v7716_v7, %v7720_v19 }
 0x326   : > { %14993 = vmatprep.mubr.bf16.mxu0 %v13778_v9  ;;  %v6924_v55 = vshll.u32 %v14049_v41, 16  ;;  %v7736_v4 = vshll.u32 %v7516_v52, 16  ;;  %v7726_v54 = vrot.slane %v7725_v46, 4  ;;  %v7742_v14 = vshll.u32 %v7517_v6, 16  ;;  %v7522_v52 = vld [vmem:[#allocation3 + $0x78] sm:$0xf] }
 0x327   : > { %v7746_v45 = vshrl.u32 %v7517_v6, 16  ;;  %v7752_v16 = vshll.u32 %v7518_v35, 16  ;;  %v6923_v44 = vrot.slane %v6921_v36, 7  ;;  %v7757_v0 = vshrl.u32 %v7519_v56, 16  ;;  %v7525_v62 = vld [vmem:[#allocation3 + $0x84] sm:$0xf] }
 0x328   : > { %v7738_v34 = vrot.slane %v7736_v4, 5  ;;  %v7760_v47 = vshll.u32 %v7519_v56, 16  ;;  %v7731_v27 = vsel %vm16125_vm7, %v7726_v54, %v7730_v38  ;;  %v7744_v15 = vrot.slane %v7742_v14, 5  ;;  %v7526_v6 = vld [vmem:[#allocation3 + $0x88] sm:$0xf] }
 0x329   : > { %v7748_v31 = vrot.slane %v7746_v45, 4  ;;  %v7754_v5 = vrot.slane %v7752_v16, 5  ;;  %v6926_v21 = vor.u32 %v6924_v55, %v6923_v44  ;;  %v6928_v33 = vrot.slane %v6923_v44, 4  ;;  %v7528_v35 = vld [vmem:[#allocation3 + $0x90] sm:$0xf] }
 0x32a   : > { %v13779_v30 = vcombine.low %v7721_v58, %v7731_v27  ;;  %v7739_v50 = vor.u32 %v7738_v34, %v7735_v42  ;;  %v7759_v20 = vrot.slane %v7757_v0, 4  ;;  %v7762_v12 = vrot.slane %v7760_v47, 5  ;;  %v7529_v56 = vld [vmem:[#allocation3 + $0x94] sm:$0xf]  ;;  %v7527_v58 = vld [vmem:[#allocation3 + $0x8c] sm:$0x1] }
 0x32b   : > { %v7749_v10 = vor.u32 %v7748_v31, %v7744_v15  ;;  %v7766_v48 = vshll.u32 %v7520_v51, 16  ;;  %v6927_v23 = vsel %vm16138_vm9, %v6919_v2, %v6926_v21  ;;  %v7098_v63 = vsel %vm16145_vm10, %v6928_v33, %v7097_v59 }
 0x32c   : > { %14994 = vmatmul.mubr.bf16.gmra.mxu0 %v13779_v30  ;;  %v7740_v11 = vrot.slane %v7739_v50, 4  ;;  %v7770_v19 = vshrl.u32 %v7520_v51, 16  ;;  %7096 = vst [vmem:[#allocation3 + $0xb8] sm:$0xf] %v6927_v23  ;;  %7099 = vst [vmem:[#allocation3 + $0xbc] sm:$0x1] %v7098_v63  ;;  %v7763_v28 = vor.u32 %v7762_v12, %v7759_v20 }
 0x32d   : > { %v7750_v60 = vrot.slane %v7749_v10, 4  ;;  %v7768_v24 = vrot.slane %v7766_v48, 5  ;;  %v7776_v18 = vshll.u32 %v7521_v39, 16  ;;  %v7781_v26 = vshrl.u32 %v7522_v52, 16 }
 0x32e   : > { %v7745_v61 = vsel %vm16125_vm7, %v7740_v11, %v7744_v15  ;;  %v7772_v22 = vrot.slane %v7770_v19, 4  ;;  %v7784_v2 = vshll.u32 %v7522_v52, 16  ;;  %v7764_v40 = vrot.slane %v7763_v28, 4  ;;  %v7531_v52 = vld [vmem:[#allocation3 + $0x9c] sm:$0xf] }
 0x32f   : > { %v7755_v53 = vsel %vm16125_vm7, %v7750_v60, %v7754_v5  ;;  %v7778_v17 = vrot.slane %v7776_v18, 5  ;;  %v7790_v49 = vshll.u32 %v7523_v3, 16  ;;  %v7783_v25 = vrot.slane %v7781_v26, 4  ;;  %v7530_v5 = vld [vmem:[#allocation3 + $0x98] sm:$0x1] }
 0x330   : > { %v13780_v37 = vcombine.low %v7745_v61, %v7755_v53  ;;  %v7773_v13 = vor.u32 %v7772_v22, %v7768_v24  ;;  %v7786_v57 = vrot.slane %v7784_v2, 5  ;;  %v7769_v9 = vsel %vm16125_vm7, %v7764_v40, %v7768_v24  ;;  %v7534_v2 = vld [vmem:[#allocation3 + $0xa8] sm:$0xf] }
 0x331   : > { %v7792_v41 = vrot.slane %v7790_v49, 5  ;;  %v7794_v7 = vshrl.u32 %v7523_v3, 16  ;;  %v7800_v38 = vshll.u32 %v7524_v1, 16  ;;  %v7805_v46 = vshrl.u32 %v7525_v62, 16  ;;  %v7532_v3 = vld [vmem:[#allocation3 + $0xa0] sm:$0xf] }
 0x332   : > { %14997 = vmatprep.mubr.bf16.mxu0 %v13780_v37  ;;  %v7774_v43 = vrot.slane %v7773_v13, 4  ;;  %v7787_v29 = vor.u32 %v7786_v57, %v7783_v25  ;;  %v7808_v42 = vshll.u32 %v7525_v62, 16  ;;  %v7814_v4 = vshll.u32 %v7526_v6, 16  ;;  %v7535_v57 = vld [vmem:[#allocation3 + $0xac] sm:$0xf] }
 0x333   : > { %v7796_v36 = vrot.slane %v7794_v7, 4  ;;  %v7802_v55 = vrot.slane %v7800_v38, 5  ;;  %v7818_v54 = vshrl.u32 %v7526_v6, 16  ;;  %v7807_v16 = vrot.slane %v7805_v46, 4  ;;  %v15583_v34 = vld [vmem:[#allocation3 + $0xb4] sm:$0xff]  }
 0x334   : > { %v7779_v14 = vsel %vm16125_vm7, %v7774_v43, %v7778_v17  ;;  %v7788_v45 = vrot.slane %v7787_v29, 4  ;;  %v7810_v44 = vrot.slane %v7808_v42, 5  ;;  %v7816_v47 = vrot.slane %v7814_v4, 5  ;;  %14962 = vmatmul.mubr.bf16.gmra.mxu1 %v15583_v34  ;;  %v7533_v17 = vld [vmem:[#allocation3 + $0xa4] sm:$0x1] }
 0x335   : > { %v13781_v51 = vcombine.low %v7769_v9, %v7779_v14  ;;  %v7797_v0 = vor.u32 %v7796_v36, %v7792_v41  ;;  %v7820_v59 = vrot.slane %v7818_v54, 4  ;;  %v7824_v31 = vshll.u32 %v7527_v58, 16  ;;  %v8310_v38 = vld [vmem:[#allocation3] sm:$0xe]  ;;  %v7536_v46 = vld [vmem:[#allocation3 + $0xb0] sm:$0x1] }
 0x336   : > { %v7793_v27 = vsel %vm16125_vm7, %v7788_v45, %v7792_v41  ;;  %v7811_v15 = vor.u32 %v7810_v44, %v7807_v16  ;;  %v7829_v21 = vshrl.u32 %v7528_v35, 16  ;;  %v7832_v50 = vshll.u32 %v7528_v35, 16  ;;  %v8311_v4 = vld [vmem:[#allocation3 + $0x4] sm:$0xf]  ;;  %v8312_v44 = vld [vmem:[#allocation3 + $0x8] sm:$0x1] }
 0x337   : > { %14998 = vmatmul.mubr.bf16.gmra.mxu0 %v13781_v51  ;;  %v7798_v33 = vrot.slane %v7797_v0, 4  ;;  %v7821_v30 = vor.u32 %v7820_v59, %v7816_v47  ;;  %v7838_v39 = vshll.u32 %v7529_v56, 16  ;;  %v7826_v20 = vrot.slane %v7824_v31, 5  ;;  %v8313_v34 = vld [vmem:[#allocation3 + $0xc] sm:$0xe] }
 0x338   : > { %v7812_v10 = vrot.slane %v7811_v15, 4  ;;  %v7831_v12 = vrot.slane %v7829_v21, 4  ;;  %v7842_v48 = vshrl.u32 %v7529_v56, 16  ;;  %v7834_v11 = vrot.slane %v7832_v50, 5 }
 0x339   : > { %v7803_v23 = vsel %vm16125_vm7, %v7798_v33, %v7802_v55  ;;  %v7822_v63 = vrot.slane %v7821_v30, 4  ;;  %v7840_v19 = vrot.slane %v7838_v39, 5  ;;  %v7848_v18 = vshll.u32 %v7530_v5, 16  ;;  %v8315_v33 = vld [vmem:[#allocation3 + $0x14] sm:$0x1] }
 0x33a   : > { %v13782_v60 = vcombine.low %v7793_v27, %v7803_v23  ;;  %v7817_v28 = vsel %vm16125_vm7, %v7812_v10, %v7816_v47  ;;  %v7844_v24 = vrot.slane %v7842_v48, 4  ;;  %v7835_v22 = vor.u32 %v7834_v11, %v7831_v12  ;;  %v8314_v27 = vld [vmem:[#allocation3 + $0x10] sm:$0xf] }
 0x33b   : > { %v7827_v61 = vsel %vm16125_vm7, %v7822_v63, %v7826_v20  ;;  %v7853_v1 = vshrl.u32 %v7531_v52, 16  ;;  %v7856_v26 = vshll.u32 %v7531_v52, 16  ;;  %v7862_v49 = vshll.u32 %v7532_v3, 16  ;;  %v7537_v20 = vld [vmem:[#allocation3 + $0xb4] sm:$0xf] }
 0x33c   : > { %15001 = vmatprep.mubr.bf16.mxu0 %v13782_v60  ;;  %v13783_v53 = vcombine.low %v7817_v28, %v7827_v61  ;;  %v7845_v40 = vor.u32 %v7844_v24, %v7840_v19  ;;  %v7836_v62 = vrot.slane %v7835_v22, 4  ;;  %v7866_v25 = vshrl.u32 %v7532_v3, 16  ;;  %v7538_v28 = vld [vmem:[#allocation3 + $0xb8] sm:$0xf]  ;;  %v7539_v61 = vld [vmem:[#allocation3 + $0xbc] sm:$0x1] }
 0x33d   : > { %v7855_v37 = vrot.slane %v7853_v1, 4  ;;  %v7858_v13 = vrot.slane %v7856_v26, 5  ;;  %v7850_v9 = vrot.slane %v7848_v18, 5  ;;  %v7864_v41 = vrot.slane %v7862_v49, 5  ;;  %v8317_v49 = vld [vmem:[#allocation3 + $0x1c] sm:$0xf] }
 0x33e   : > { %v7846_v6 = vrot.slane %v7845_v40, 4  ;;  %v7877_v7 = vshrl.u32 %v7534_v2, 16  ;;  %v7868_v43 = vrot.slane %v7866_v25, 4  ;;  %v7872_v29 = vshll.u32 %v7533_v17, 16  ;;  %v8316_v17 = vld [vmem:[#allocation3 + $0x18] sm:$0xe] }
 0x33f   : > { %15002 = vmatmul.mubr.bf16.gmra.mxu0 %v13783_v53  ;;  %v7859_v35 = vor.u32 %v7858_v13, %v7855_v37  ;;  %v7880_v42 = vshll.u32 %v7534_v2, 16  ;;  %v7841_v56 = vsel %vm16125_vm7, %v7836_v62, %v7840_v19  ;;  %v7886_v58 = vshll.u32 %v7535_v57, 16 }
 0x340   : > { %v7851_v36 = vsel %vm16125_vm7, %v7846_v6, %v7850_v9  ;;  %v7879_v55 = vrot.slane %v7877_v7, 4  ;;  %v7869_v45 = vor.u32 %v7868_v43, %v7864_v41  ;;  %v7890_v0 = vshrl.u32 %v7535_v57, 16  ;;  %v8318_v57 = vld [vmem:[#allocation3 + $0x20] sm:$0x1] }
 0x341   : > { %v13784_v54 = vcombine.low %v7841_v56, %v7851_v36  ;;  %v7860_v14 = vrot.slane %v7859_v35, 4  ;;  %v7882_v16 = vrot.slane %v7880_v42, 5  ;;  %v7888_v51 = vrot.slane %v7886_v58, 5  ;;  %v8322_v35 = vld [vmem:[#allocation3 + $0x30] sm:$0xe] }
 0x342   : > { %v7896_v47 = vshll.u32 %v7536_v46, 16  ;;  %v13796_v59 = vrot.slane %v8310_v38, 9  ;;  %v7870_v15 = vrot.slane %v7869_v45, 4  ;;  %v7874_v31 = vrot.slane %v7872_v29, 5  ;;  %v8320_v38 = vld [vmem:[#allocation3 + $0x28] sm:$0xf] }
 0x343   : > { %15005 = vmatprep.mubr.bf16.mxu0 %v13784_v54  ;;  %v7883_v5 = vor.u32 %v7882_v16, %v7879_v55  ;;  %v8408_v21 = vrot.slane %v8311_v4, 5  ;;  %v7865_v30 = vsel %vm16125_vm7, %v7860_v14, %v7864_v41  ;;  %v7892_v50 = vrot.slane %v7890_v0, 4  ;;  %v8319_v56 = vld [vmem:[#allocation3 + $0x24] sm:$0xe]  ;;  %v8321_v36 = vld [vmem:[#allocation3 + $0x2c] sm:$0x1] }
 0x344   : > { %v7898_v39 = vrot.slane %v7896_v47, 5  ;;  %v8411_v10 = vrot.slane %v8312_v44, 5  ;;  %v7875_v12 = vsel %vm16125_vm7, %v7870_v15, %v7874_v31  ;;  %v13797_v3 = vrot.slane %v8313_v34, 9  ;;  %v15591_v55 = vld [vmem:[#allocation10 + $0x130] sm:$0xff]   ;;  %v8323_v14 = vld [vmem:[#allocation3 + $0x34] sm:$0xf] }
 0x345   : > { %v7884_v48 = vrot.slane %v7883_v5, 4  ;;  %v8409_v23 = vsel %vm16346_vm13, %v13796_v59, %v8408_v21  ;;  %v8410_v63 = vrot.slane %v8408_v21, 4  ;;  %v13785_v11 = vcombine.low %v7865_v30, %v7875_v12  ;;  %v15663_v59 = vld [vmem:[#allocation10 + $0x138] sm:$0xff]   ;;  %v8325_v31 = vld [vmem:[#allocation3 + $0x3c] sm:$0xe] }
 0x346   : > { %v7893_v19 = vor.u32 %v7892_v50, %v7888_v51  ;;  %v8415_v60 = vrot.slane %v8314_v27, 5  ;;  %v8418_v18 = vrot.slane %v8315_v33, 5  ;;  %v7901_v22 = vshrl.u32 %v7537_v20, 16  ;;  %v8326_v50 = vld [vmem:[#allocation3 + $0x40] sm:$0xf] }
 0x347   : > { %v8412_v24 = vsel %vm16346_vm13, %v8410_v63, %v8411_v10  ;;  %v7904_v1 = vshll.u32 %v7537_v20, 16  ;;  %15006 = vmatmul.mubr.bf16.gmra.mxu0 %v13785_v11  ;;  %v7889_v26 = vsel %vm16125_vm7, %v7884_v48, %v7888_v51  ;;  %v7910_v13 = vshll.u32 %v7538_v28, 16  ;;  %v8324_v51 = vld [vmem:[#allocation3 + $0x38] sm:$0x1]  ;;  %v8329_v63 = vld [vmem:[#allocation3 + $0x4c] sm:$0xf] }
 0x348   : > { %v7894_v2 = vrot.slane %v7893_v19, 4  ;;  %v13812_v53 = vcombine.low %v8409_v23, %v8412_v24  ;;  %v8417_v40 = vrot.slane %v8415_v60, 4  ;;  %v7903_v62 = vrot.slane %v7901_v22, 4  ;;  %v8327_v23 = vld [vmem:[#allocation3 + $0x44] sm:$0x1] }
 0x349   : > { %v7906_v37 = vrot.slane %v7904_v1, 5  ;;  %v7914_v25 = vshrl.u32 %v7538_v28, 16  ;;  %v8416_v9 = vsel %vm16346_vm13, %v13797_v3, %v8415_v60  ;;  %v7920_v7 = vshll.u32 %v7539_v61, 16  ;;  %v8328_v28 = vld [vmem:[#allocation3 + $0x48] sm:$0xe] }
 0x34a   : > { %v7899_v6 = vsel %vm16125_vm7, %v7894_v2, %v7898_v39  ;;  %15029 = vmatprep.mubr.bf16.mxu1 %v13812_v53  ;;  %v8419_v41 = vsel %vm16346_vm13, %v8417_v40, %v8418_v18  ;;  %v7912_v42 = vrot.slane %v7910_v13, 5  ;;  %v13798_v4 = vrot.slane %v8316_v17, 9  ;;  %v15594_v39 = vld [vmem:[#allocation10 + $0x128] sm:$0xff]   ;;  %v8330_v24 = vld [vmem:[#allocation3 + $0x50] sm:$0x1] }
 0x34b   : > { %v13786_v43 = vcombine.low %v7889_v26, %v7899_v6  ;;  %v13813_v29 = vcombine.low %v8416_v9, %v8419_v41  ;;  %v7907_v46 = vor.u32 %v7906_v37, %v7903_v62  ;;  %v7916_v58 = vrot.slane %v7914_v25, 4  ;;  %v8331_v26 = vld [vmem:[#allocation3 + $0x54] sm:$0xe]  ;;  %v8332_v2 = vld [vmem:[#allocation3 + $0x58] sm:$0xf]  ;;  %v15589_v40 = vld [vmem:[#allocation3 + $0xc] sm:$0xff]  }
 0x34c   : > { %v8422_v54 = vrot.slane %v8317_v49, 5  ;;  %v7922_v16 = vrot.slane %v7920_v7, 5  ;;  %v8425_v44 = vrot.slane %v8318_v57, 5  ;;  %v8429_v34 = vrot.slane %v8320_v38, 5  ;;  %v8334_v37 = vld [vmem:[#allocation3 + $0x60] sm:$0xe] }
 0x34d   : > { %15009 = vmatprep.mubr.bf16.mxu0 %v13786_v43  ;;  %15030 = vmatmul.mubr.bf16.vlgmr.msra.gmra.mxu1 %v13813_v29  ;;  %v7908_v45 = vrot.slane %v7907_v46, 4  ;;  %v7917_v0 = vor.u32 %v7916_v58, %v7912_v42  ;;  %v13799_v27 = vrot.slane %v8319_v56, 9  ;;  %v8432_v15 = vrot.slane %v8321_v36, 5  ;;  %v8335_v13 = vld [vmem:[#allocation3 + $0x64] sm:$0xf]  ;;  %v15597_v38 = vld [vmem:[#allocation10 + $0x120] sm:$0xff]  }
 0x34e   : > { %v8424_v47 = vrot.slane %v8422_v54, 4  ;;  %15110 = vmatpush3.bf16.msra.mxu1 %v15663_v59  ;;  %v8423_v5 = vsel %vm16346_vm13, %v13798_v4, %v8422_v54  ;;  %v8431_v21 = vrot.slane %v8429_v34, 4  ;;  %v13800_v33 = vrot.slane %v8322_v35, 9  ;;  %v8336_v25 = vld [vmem:[#allocation3 + $0x68] sm:$0x1] }
 0x34f   : > { %15111 = vmatprep.subr.bf16.mxu1 %v15591_v55  ;;  %v8436_v30 = vrot.slane %v8323_v14, 5  ;;  %v7913_v10 = vsel %vm16125_vm7, %v7908_v45, %v7912_v42  ;;  %v7918_v20 = vrot.slane %v7917_v0, 4  ;;  %v8430_v48 = vsel %vm16346_vm13, %v13799_v27, %v8429_v34  ;;  %v8333_v7 = vld [vmem:[#allocation3 + $0x5c] sm:$0x1]  ;;  %v8337_v46 = vld [vmem:[#allocation3 + $0x6c] sm:$0xe] }
 0x350   : > { %v8426_v12 = vsel %vm16346_vm13, %v8424_v47, %v8425_v44  ;;  %v8433_v19 = vsel %vm16346_vm13, %v8431_v21, %v8432_v15  ;;  %v8439_v60 = vrot.slane %v8324_v51, 5  ;;  %v13801_v22 = vrot.slane %v8325_v31, 9  ;;  %v8338_v42 = vld [vmem:[#allocation3 + $0x70] sm:$0xf]  ;;  %v8339_v4 = vld [vmem:[#allocation3 + $0x74] sm:$0x1] }
 0x351   : > { %v13814_v11 = vcombine.low %v8423_v5, %v8426_v12  ;;  %v8438_v3 = vrot.slane %v8436_v30, 4  ;;  %v7923_v18 = vsel %vm16125_vm7, %v7918_v20, %v7922_v16  ;;  %v8437_v61 = vsel %vm16346_vm13, %v13800_v33, %v8436_v30  ;;  %v8340_v54 = vld [vmem:[#allocation3 + $0x78] sm:$0xe]  ;;  %v8341_v34 = vld [vmem:[#allocation3 + $0x7c] sm:$0xf]  ;;  %v15600_v27 = vld [vmem:[#allocation10 + $0x118] sm:$0xff]  }
 0x352   : > { %15112 = vmatpush3.bf16.msra.mxu1 %v15591_v55  ;;  %v8443_v1 = vrot.slane %v8326_v50, 5  ;;  %v13787_v53 = vcombine.low %v7913_v10, %v7923_v18  ;;  %v13815_v17 = vcombine.low %v8430_v48, %v8433_v19  ;;  %v8450_v62 = vrot.slane %v8329_v63, 5  ;;  %v8342_v15 = vld [vmem:[#allocation3 + $0x80] sm:$0x1]  ;;  %v15592_v31 = vld [vmem:[#allocation3 + $0x18] sm:$0xff]   ;;  %v15593_v10 = vld [vmem:[#allocation3 + $0x24] sm:$0xff]  }
 0x353   : > { %15033 = vmatprep.mubr.bf16.mxu1 %v13814_v11  ;;  %v8440_v49 = vsel %vm16346_vm13, %v8438_v3, %v8439_v60  ;;  %15113 = vmatprep.subr.bf16.mxu1 %v15594_v39  ;;  %v8446_v9 = vrot.slane %v8327_v23, 5  ;;  %v13802_v41 = vrot.slane %v8328_v28, 9  ;;  %v8453_v43 = vrot.slane %v8330_v24, 5  ;;  %v8343_v50 = vld [vmem:[#allocation3 + $0x84] sm:$0xe] }
 0x354   : > { %v13816_v57 = vcombine.low %v8437_v61, %v8440_v49  ;;  %v8445_v6 = vrot.slane %v8443_v1, 4  ;;  %15010 = vmatmul.mubr.bf16.gmra.mxu0 %v13787_v53  ;;  %v8452_v35 = vrot.slane %v8450_v62, 4  ;;  %v8457_v29 = vrot.slane %v8332_v2, 5  ;;  %v8346_v63 = vld [vmem:[#allocation3 + $0x90] sm:$0xe]  ;;  %v15603_v61 = vld [vmem:[#allocation10 + $0x110] sm:$0xff]  }
 0x355   : > { %15034 = vmatmul.mubr.bf16.gmra.mxu1 %v13815_v17  ;;  %15077 = vmatprep.mubr.bf16.mxu0 %v15589_v40  ;;  %v8444_v56 = vsel %vm16346_vm13, %v13801_v22, %v8443_v1  ;;  %v8451_v55 = vsel %vm16346_vm13, %v13802_v41, %v8450_v62  ;;  %v8464_v58 = vrot.slane %v8335_v13, 5  ;;  %v13803_v45 = vrot.slane %v8331_v26, 9  ;;  %v8347_v11 = vld [vmem:[#allocation3 + $0x94] sm:$0xf]  ;;  %v8348_v19 = vld [vmem:[#allocation3 + $0x98] sm:$0x1] }
 0x356   : > { %15037 = vmatprep.mubr.bf16.mxu1 %v13816_v57  ;;  %v8447_v36 = vsel %vm16346_vm13, %v8445_v6, %v8446_v9  ;;  %v8454_v14 = vsel %vm16346_vm13, %v8452_v35, %v8453_v43  ;;  %15114 = vmatpush3.bf16.msra.mxu1 %v15594_v39  ;;  %v8459_v16 = vrot.slane %v8457_v29, 4  ;;  %v8460_v44 = vrot.slane %v8333_v7, 5  ;;  %v8344_v39 = vld [vmem:[#allocation3 + $0x88] sm:$0xf]  ;;  %v8345_v18 = vld [vmem:[#allocation3 + $0x8c] sm:$0x1] }
 0x357   : > { %v13817_v51 = vcombine.low %v8444_v56, %v8447_v36  ;;  %15115 = vmatprep.subr.bf16.mxu1 %v15597_v38  ;;  %v13804_v0 = vrot.slane %v8334_v37, 9  ;;  %v8466_v47 = vrot.slane %v8464_v58, 4  ;;  %v8467_v59 = vrot.slane %v8336_v25, 5  ;;  %v15607_v53 = vld [vmem:[#allocation10 + $0x170] sm:$0xff]   ;;  %v8349_v40 = vld [vmem:[#allocation3 + $0x9c] sm:$0xe] }
 0x358   : > { %v13818_v5 = vcombine.low %v8451_v55, %v8454_v14  ;;  %v18030_v21 = vsel %vm16346_vm13, %v13803_v45, %v8457_v29  ;;  %v18034_v33 = vsel %vm16346_vm13, %v8459_v16, %v8460_v44  ;;  %v8471_v30 = vrot.slane %v8338_v42, 5  ;;  %v8350_v13 = vld [vmem:[#allocation3 + $0xa0] sm:$0xf]  ;;  %v8352_v25 = vld [vmem:[#allocation3 + $0xa8] sm:$0xe]  ;;  %v15595_v16 = vld [vmem:[#allocation3 + $0x30] sm:$0xff]  }
 0x359   : > { %v18038_v20 = vsel %vm16346_vm13, %v13804_v0, %v8464_v58  ;;  %v18042_v12 = vsel %vm16346_vm13, %v8466_v47, %v8467_v59  ;;  %v13805_v48 = vrot.slane %v8337_v46, 9  ;;  %v8478_v23 = vrot.slane %v8341_v34, 5  ;;  %v8353_v57 = vld [vmem:[#allocation3 + $0xac] sm:$0xf]  ;;  %v8351_v42 = vld [vmem:[#allocation3 + $0xa4] sm:$0x1] }
 0x35a   : > { %v13819_v3 = vcombine.low %v18030_v21, %v18034_v33  ;;  %15116 = vmatpush3.bf16.msra.mxu1 %v15597_v38  ;;  %v8473_v60 = vrot.slane %v8471_v30, 4  ;;  %v8474_v28 = vrot.slane %v8339_v4, 5  ;;  %v13806_v24 = vrot.slane %v8340_v54, 9  ;;  %v8354_v38 = vld [vmem:[#allocation3 + $0xb0] sm:$0x1]  ;;  %v15608_v56 = vld [vmem:[#allocation10 + $0x108] sm:$0xff]  }
 0x35b   : > { %v13820_v22 = vcombine.low %v18038_v20, %v18042_v12  ;;  %15117 = vmatprep.subr.bf16.mxu1 %v15600_v27  ;;  %v8480_v1 = vrot.slane %v8478_v23, 4  ;;  %v8481_v26 = vrot.slane %v8342_v15, 5  ;;  %v8485_v2 = vrot.slane %v8344_v39, 5  ;;  %v9354_v36 = vld [vmem:[#allocation3 + $0xc] sm:$0xf]  ;;  %v15610_v14 = vld [vmem:[#allocation10 + $0x168] sm:$0xff]  }
 0x35c   : > { %15078 = vmatmul.mubr.bf16.vlgmr.msra.gmra.mxu0 %v15592_v31  ;;  %v18050_v17 = vsel %vm16346_vm13, %v13805_v48, %v8471_v30  ;;  %v18054_v49 = vsel %vm16346_vm13, %v8473_v60, %v8474_v28  ;;  %v18058_v62 = vsel %vm16346_vm13, %v13806_v24, %v8478_v23  ;;  %v8492_v37 = vrot.slane %v8347_v11, 5  ;;  %v8355_v45 = vld [vmem:[#allocation3 + $0xb4] sm:$0xe]  ;;  %v9355_v47 = vld [vmem:[#allocation3 + $0x10] sm:$0xf]  ;;  %v15596_v59 = vld [vmem:[#allocation3 + $0x3c] sm:$0xff]  }
 0x35d   : > { %15038 = vmatmul.mubr.bf16.gmra.mxu1 %v13817_v51  ;;  %15081 = vmatprep.mubr.bf16.mxu0 %v15593_v10  ;;  %v18062_v6 = vsel %vm16346_vm13, %v8480_v1, %v8481_v26  ;;  %v13807_v9 = vrot.slane %v8343_v50, 9  ;;  %v8487_v41 = vrot.slane %v8485_v2, 4  ;;  %v8488_v7 = vrot.slane %v8345_v18, 5  ;;  %v15612_v30 = vld [vmem:[#allocation10 + $0x160] sm:$0xff]   ;;  %v18087_v39 = vld [vmem:[#allocation3 + $0x14] sm:$0x1] }
 0x35e   : > { %15041 = vmatprep.mubr.bf16.mxu1 %v13818_v5  ;;  %v13821_v35 = vcombine.low %v18050_v17, %v18054_v49  ;;  %15118 = vmatpush3.bf16.msra.mxu1 %v15600_v27  ;;  %v13808_v43 = vrot.slane %v8346_v63, 9  ;;  %v8494_v29 = vrot.slane %v8492_v37, 4  ;;  %v8495_v46 = vrot.slane %v8348_v19, 5  ;;  %v8357_v50 = vld [vmem:[#allocation3 + $0xbc] sm:$0x1] }
 0x35f   : > { %15158 = vmatpush3.bf16.msra.mxu0 %v17911_v8  ;;  %v13822_v55 = vcombine.low %v18058_v62, %v18062_v6  ;;  %v18071_v58 = vsel %vm16346_vm13, %v13807_v9, %v8485_v2  ;;  %v18075_v4 = vsel %vm16346_vm13, %v8487_v41, %v8488_v7  ;;  %15119 = vmatprep.subr.bf16.mxu1 %v15603_v61  ;;  %v8499_v54 = vrot.slane %v8350_v13, 5  ;;  %v8356_v8 = vld [vmem:[#allocation3 + $0xb8] sm:$0xf]  ;;  %v9358_v1 = vld [vmem:[#allocation3 + $0x1c] sm:$0xf]  ;;  %v18116_v7 = vld [vmem:[#allocation10 + $0x1b8] sm:$0xff]  }
 0x360   : > { %15159 = vmatprep.subr.bf16.mxu0 %v15607_v53  ;;  %v18079_v44 = vsel %vm16346_vm13, %v13808_v43, %v8492_v37  ;;  %v18083_v34 = vsel %vm16346_vm13, %v8494_v29, %v8495_v46  ;;  %v13809_v51 = vrot.slane %v8349_v40, 9  ;;  %v8506_v0 = vrot.slane %v8353_v57, 5  ;;  %v15613_v11 = vld [vmem:[#allocation10 + $0x100] sm:$0xff]   ;;  %v9359_v40 = vld [vmem:[#allocation3 + $0x20] sm:$0x1] }
 0x361   : > { %v13823_v27 = vcombine.low %v18071_v58, %v18075_v4  ;;  %v8501_v15 = vrot.slane %v8499_v54, 4  ;;  %v8502_v31 = vrot.slane %v8351_v42, 5  ;;  %v13810_v5 = vrot.slane %v8352_v25, 9  ;;  %v9357_v19 = vld [vmem:[#allocation3 + $0x18] sm:$0xf] }
 0x362   : > { %v13824_v10 = vcombine.low %v18079_v44, %v18083_v34  ;;  %15120 = vmatpush3.bf16.msra.mxu1 %v15603_v61  ;;  %v8508_v48 = vrot.slane %v8506_v0, 4  ;;  %v8509_v23 = vrot.slane %v8354_v38, 5  ;;  %v8513_v63 = vrot.slane %v8356_v8, 5  ;;  %v9360_v38 = vld [vmem:[#allocation3 + $0x24] sm:$0xf] }
 0x363   : > { %15160 = vmatpush3.bf16.msra.mxu0 %v15607_v53  ;;  %v18093_v60 = vsel %vm16346_vm13, %v13809_v51, %v8499_v54  ;;  %v18097_v28 = vsel %vm16346_vm13, %v8501_v15, %v8502_v31  ;;  %15121 = vmatprep.subr.bf16.mxu1 %v15608_v56  ;;  %v9403_v24 = vshrl.u32 %v9354_v36, 16  ;;  %v9406_v18 = vshll.u32 %v9354_v36, 16  ;;  %v9361_v29 = vld [vmem:[#allocation3 + $0x28] sm:$0xf]  ;;  %v15599_v51 = vld [vmem:[#allocation3 + $0x54] sm:$0xff]  }
 0x364   : > { %15161 = vmatprep.subr.bf16.mxu0 %v15610_v14  ;;  %15082 = vmatmul.mubr.bf16.gmra.mxu0 %v15595_v16  ;;  %v18104_v61 = vsel %vm16346_vm13, %v13810_v5, %v8506_v0  ;;  %v18108_v26 = vsel %vm16346_vm13, %v8508_v48, %v8509_v23  ;;  %v13811_v2 = vrot.slane %v8355_v45, 9  ;;  %v8516_v53 = vrot.slane %v8357_v50, 5  ;;  %v15598_v54 = vld [vmem:[#allocation3 + $0x48] sm:$0xff]   ;;  %v10177_v34 = vld [vmem:[#allocation3 + $0x20] sm:$0x1] }
 0x365   : > { %15042 = vmatmul.mubr.bf16.gmra.mxu1 %v13819_v3  ;;  %15085 = vmatprep.mubr.bf16.mxu0 %v15596_v59  ;;  %v8515_v37 = vrot.slane %v8513_v63, 4  ;;  %v9405_v13 = vrot.slane %v9403_v24, 4  ;;  %v9408_v21 = vrot.slane %v9406_v18, 5  ;;  %v9412_v33 = vshll.u32 %v9355_v47, 16  ;;  %v15615_v3 = vld [vmem:[#allocation10 + $0x158] sm:$0xff]  }
 0x366   : > { %15045 = vmatprep.mubr.bf16.mxu1 %v13820_v22  ;;  %v13825_v25 = vcombine.low %v18093_v60, %v18097_v28  ;;  %15122 = vmatpush3.bf16.msra.mxu1 %v15608_v56  ;;  %v9416_v57 = vshrl.u32 %v9355_v47, 16  ;;  %v9422_v9 = vshll.u32 %v18087_v39, 16  ;;  %v9427_v41 = vshrl.u32 %v9357_v19, 16  ;;  %v9362_v59 = vld [vmem:[#allocation3 + $0x2c] sm:$0x1] }
 0x367   : > { %15162 = vmatpush3.bf16.msra.mxu0 %v15610_v14  ;;  %v18120_v20 = vsel %vm16346_vm13, %v13811_v2, %v8513_v63  ;;  %15123 = vmatprep.subr.bf16.mxu1 %v15613_v11  ;;  %v9409_v12 = vor.u32 %v9408_v21, %v9405_v13  ;;  %v9414_v22 = vrot.slane %v9412_v33, 5  ;;  %v9430_v43 = vshll.u32 %v9357_v19, 16  ;;  %v15617_v39 = vld [vmem:[#allocation10 + $0x150] sm:$0xff]   ;;  %v10173_v18 = vld [vmem:[#allocation3 + $0x10] sm:$0xf] }
 0x368   : > { %15163 = vmatprep.subr.bf16.mxu0 %v15612_v30  ;;  %v13826_v46 = vcombine.low %v18104_v61, %v18108_v26  ;;  %v9418_v42 = vrot.slane %v9416_v57, 4  ;;  %v9429_v56 = vrot.slane %v9427_v41, 4  ;;  %v9436_v36 = vshll.u32 %v9358_v1, 16  ;;  %v18131_v63 = vld [vmem:[#allocation3 + $0xc] sm:$0xe] }
 0x369   : > { %v18126_v14 = vsel %vm16346_vm13, %v8515_v37, %v8516_v53  ;;  %v9432_v45 = vrot.slane %v9430_v43, 5  ;;  %v9440_v8 = vshrl.u32 %v9358_v1, 16  ;;  %v9446_v16 = vshll.u32 %v9359_v40, 16  ;;  %v15620_v37 = vld [vmem:[#allocation10 + $0x148] sm:$0xff]   ;;  %v10174_v13 = vld [vmem:[#allocation3 + $0x14] sm:$0x1] }
 0x36a   : > { %15124 = vmatpush3.bf16.msra.mxu1 %v15613_v11  ;;  %v9419_v0 = vor.u32 %v9418_v42, %v9414_v22  ;;  %v18128_v47 = vrot.slane %v9436_v36, 5  ;;  %v9451_v15 = vshrl.u32 %v9360_v38, 16  ;;  %v9454_v31 = vshll.u32 %v9360_v38, 16  ;;  %v9363_v33 = vld [vmem:[#allocation3 + $0x30] sm:$0xf] }
 0x36b   : > { %15164 = vmatpush3.bf16.msra.mxu0 %v15612_v30  ;;  %v9410_v5 = vrot.slane %v9409_v12, 4  ;;  %v9424_v50 = vrot.slane %v9422_v9, 5  ;;  %v9433_v48 = vor.u32 %v9432_v45, %v9429_v56  ;;  %v9442_v23 = vrot.slane %v9440_v8, 4  ;;  %15205 = vmatprep.subr.bf16.mxu1 %v18116_v7  ;;  %v15601_v9 = vld [vmem:[#allocation3 + $0x60] sm:$0xff]   ;;  %v9364_v43 = vld [vmem:[#allocation3 + $0x34] sm:$0xf] }
 0x36c   : > { %15165 = vmatprep.subr.bf16.mxu0 %v15615_v3  ;;  %15086 = vmatmul.mubr.bf16.gmra.mxu0 %v15598_v54  ;;  %v9420_v30 = vrot.slane %v9419_v0, 4  ;;  %v9453_v11 = vrot.slane %v9451_v15, 4  ;;  %v9456_v19 = vrot.slane %v9454_v31, 5  ;;  %v9460_v24 = vshll.u32 %v9361_v29, 16  ;;  %v9366_v45 = vld [vmem:[#allocation3 + $0x3c] sm:$0xf] }
 0x36d   : > { %15046 = vmatmul.mubr.bf16.gmra.mxu1 %v13821_v35  ;;  %15089 = vmatprep.mubr.bf16.mxu0 %v15599_v51  ;;  %v9434_v1 = vrot.slane %v9433_v48, 4  ;;  %v9443_v2 = vor.u32 %v9442_v23, %v18128_v47  ;;  %v9448_v53 = vrot.slane %v9446_v16, 5  ;;  %v9464_v40 = vshrl.u32 %v9361_v29, 16  ;;  %v15602_v29 = vld [vmem:[#allocation3 + $0x6c] sm:$0xff]  }
 0x36e   : > { %15049 = vmatprep.mubr.bf16.mxu1 %v13822_v55  ;;  %v9425_v17 = vsel %vm16125_vm7, %v9420_v30, %v9424_v50  ;;  %v9457_v49 = vor.u32 %v9456_v19, %v9453_v11  ;;  %v9462_v35 = vrot.slane %v9460_v24, 5  ;;  %v9470_v21 = vshll.u32 %v9362_v59, 16  ;;  %v9365_v59 = vld [vmem:[#allocation3 + $0x38] sm:$0x1]  ;;  %v9367_v50 = vld [vmem:[#allocation3 + $0x40] sm:$0xf] }
 0x36f   : > { %15166 = vmatpush3.bf16.msra.mxu0 %v15615_v3  ;;  %v13827_v57 = vcombine.low %v18120_v20, %v18126_v14  ;;  %v9415_v62 = vsel %vm16125_vm7, %v9410_v5, %v9414_v22  ;;  %v9444_v6 = vrot.slane %v9443_v2, 4  ;;  %v9466_v55 = vrot.slane %v9464_v40, 4  ;;  %v15621_v22 = vld [vmem:[#allocation10 + $0x140] sm:$0xff]   ;;  %v9371_v28 = vld [vmem:[#allocation3 + $0x50] sm:$0x1] }
 0x370   : > { %15167 = vmatprep.subr.bf16.mxu0 %v15617_v39  ;;  %v18146_v41 = vcombine.low %v9415_v62, %v9425_v17  ;;  %v9439_v3 = vsel %vm16125_vm7, %v9434_v1, %v18128_v47  ;;  %v13884_v38 = vrot.slane %v18131_v63, 9  ;;  %v10270_v12 = vrot.slane %v10173_v18, 5  ;;  %v9368_v63 = vld [vmem:[#allocation3 + $0x44] sm:$0x1]  ;;  %v10176_v11 = vld [vmem:[#allocation3 + $0x1c] sm:$0xf] }
 0x371   : > { %v9449_v42 = vsel %vm16125_vm7, %v9444_v6, %v9448_v53  ;;  %v9467_v56 = vor.u32 %v9466_v55, %v9462_v35  ;;  %v9475_v36 = vshrl.u32 %v9363_v33, 16  ;;  %v9478_v54 = vshll.u32 %v9363_v33, 16  ;;  %v10175_v24 = vld [vmem:[#allocation3 + $0x18] sm:$0xe] }
 0x372   : > { %v9458_v8 = vrot.slane %v9457_v49, 4  ;;  %v9472_v16 = vrot.slane %v9470_v21, 5  ;;  %v10272_v51 = vrot.slane %v10270_v12, 4  ;;  %v10273_v0 = vrot.slane %v10174_v13, 5 }
 0x373   : > { %15168 = vmatpush3.bf16.msra.mxu0 %v15617_v39  ;;  %v9468_v47 = vrot.slane %v9467_v56, 4  ;;  %v9477_v15 = vrot.slane %v9475_v36, 4  ;;  %v9480_v31 = vrot.slane %v9478_v54, 5  ;;  %v9484_v5 = vshll.u32 %v9364_v43, 16 }
 0x374   : > { %15169 = vmatprep.subr.bf16.mxu0 %v15620_v37  ;;  %15090 = vmatmul.mubr.bf16.gmra.mxu0 %v15601_v9  ;;  %v18157_v48 = vcombine.low %v9439_v3, %v9449_v42  ;;  %v18161_v39 = vsel %vm16346_vm13, %v10272_v51, %v10273_v0  ;;  %v9488_v23 = vshrl.u32 %v9364_v43, 16  ;;  %v9499_v30 = vshrl.u32 %v9366_v45, 16  ;;  %v15606_v43 = vld [vmem:[#allocation3 + $0x84] sm:$0xff]   ;;  %v10180_v51 = vld [vmem:[#allocation3 + $0x2c] sm:$0x1] }
 0x375   : > { %15050 = vmatmul.mubr.bf16.gmra.mxu1 %v13823_v27  ;;  %15093 = vmatprep.mubr.bf16.mxu0 %v15602_v29  ;;  %v9473_v19 = vsel %vm16125_vm7, %v9468_v47, %v9472_v16  ;;  %v18170_v58 = vsel %vm16346_vm13, %v13884_v38, %v10270_v12  ;;  %v9481_v4 = vor.u32 %v9480_v31, %v9477_v15  ;;  %v9486_v27 = vrot.slane %v9484_v5, 5  ;;  %v9369_v38 = vld [vmem:[#allocation3 + $0x48] sm:$0xf]  ;;  %v15604_v12 = vld [vmem:[#allocation3 + $0x78] sm:$0xff]   ;;  %v9370_v0 = vld [vmem:[#allocation3 + $0x4c] sm:$0xf] }
 0x376   : > { %15053 = vmatprep.mubr.bf16.mxu1 %v13824_v10  ;;  %v9463_v18 = vsel %vm16125_vm7, %v9458_v8, %v9462_v35  ;;  %v13900_v1 = vcombine.low %v18170_v58, %v18161_v39  ;;  %v9490_v2 = vrot.slane %v9488_v23, 4  ;;  %v9494_v44 = vshll.u32 %v9365_v59, 16  ;;  %v18176_v10 = vld [vmem:[#allocation10 + $0x1f8] sm:$0xff]   ;;  %v10178_v35 = vld [vmem:[#allocation3 + $0x24] sm:$0xe] }
 0x377   : > { %15170 = vmatpush3.bf16.msra.mxu0 %v15620_v37  ;;  %v9501_v53 = vrot.slane %v9499_v30, 4  ;;  %v9502_v40 = vshll.u32 %v9366_v45, 16  ;;  %v9508_v13 = vshll.u32 %v9367_v50, 16  ;;  %v9512_v17 = vshrl.u32 %v9367_v50, 16  ;;  %v10179_v37 = vld [vmem:[#allocation3 + $0x28] sm:$0xf] }
 0x378   : > { %15171 = vmatprep.subr.bf16.mxu0 %v15621_v22  ;;  %v18178_v49 = vcombine.low %v9463_v18, %v9473_v19  ;;  %v9491_v21 = vor.u32 %v9490_v2, %v9486_v27  ;;  %v9518_v33 = vshll.u32 %v9368_v63, 16  ;;  %v10277_v62 = vrot.slane %v10176_v11, 5  ;;  %v9372_v31 = vld [vmem:[#allocation3 + $0x54] sm:$0xf] }
 0x379   : > { %v9482_v6 = vrot.slane %v9481_v4, 4  ;;  %v9504_v55 = vrot.slane %v9502_v40, 5  ;;  %v18180_v9 = vrot.slane %v9508_v13, 5  ;;  %v9514_v3 = vrot.slane %v9512_v17, 4  ;;  %v9373_v4 = vld [vmem:[#allocation3 + $0x58] sm:$0xf] }
 0x37a   : > { %v9492_v29 = vrot.slane %v9491_v21, 4  ;;  %v9496_v42 = vrot.slane %v9494_v44, 5  ;;  %v13885_v56 = vrot.slane %v10175_v24, 9  ;;  %v10279_v36 = vrot.slane %v10277_v62, 4  ;;  %v9374_v44 = vld [vmem:[#allocation3 + $0x5c] sm:$0x1] }
 0x37b   : > { %15172 = vmatpush3.bf16.msra.mxu0 %v15621_v22  ;;  %v9505_v54 = vor.u32 %v9504_v55, %v9501_v53  ;;  %v9515_v45 = vor.u32 %v9514_v3, %v18180_v9  ;;  %v9520_v8 = vrot.slane %v9518_v33, 5  ;;  %v10280_v16 = vrot.slane %v10177_v34, 5  ;;  %v15609_v34 = vld [vmem:[#allocation3 + $0x90] sm:$0xff]   ;;  %v10183_v55 = vld [vmem:[#allocation3 + $0x38] sm:$0x1] }
 0x37c   : > { %15253 = vmatprep.subr.bf16.mxu0 %v18176_v10  ;;  %15094 = vmatmul.mubr.bf16.gmra.mxu0 %v15604_v12  ;;  %v9497_v22 = vsel %vm16125_vm7, %v9492_v29, %v9496_v42  ;;  %v13886_v59 = vrot.slane %v10178_v35, 9  ;;  %v10284_v47 = vrot.slane %v10179_v37, 5  ;;  %v9523_v15 = vshrl.u32 %v9369_v38, 16  ;;  %v10181_v21 = vld [vmem:[#allocation3 + $0x30] sm:$0xe] }
 0x37d   : > { %15054 = vmatmul.mubr.bf16.gmra.mxu1 %v13825_v25  ;;  %15097 = vmatprep.mubr.bf16.mxu0 %v15606_v43  ;;  %v9487_v5 = vsel %vm16125_vm7, %v9482_v6, %v9486_v27  ;;  %v9506_v50 = vrot.slane %v9505_v54, 4  ;;  %v9516_v23 = vrot.slane %v9515_v45, 4  ;;  %v18196_v60 = vsel %vm16346_vm13, %v10279_v36, %v10280_v16  ;;  %v10182_v33 = vld [vmem:[#allocation3 + $0x34] sm:$0xf]  ;;  %v10184_v29 = vld [vmem:[#allocation3 + $0x3c] sm:$0xe] }
 0x37e   : > { %15057 = vmatprep.mubr.bf16.mxu1 %v13826_v46  ;;  %v18198_v25 = vcombine.low %v9487_v5, %v9497_v22  ;;  %v18202_v63 = vsel %vm16346_vm13, %v13885_v56, %v10277_v62  ;;  %v10286_v30 = vrot.slane %v10284_v47, 4  ;;  %v10287_v11 = vrot.slane %v10180_v51, 5  ;;  %v10185_v42 = vld [vmem:[#allocation3 + $0x40] sm:$0xf] }
 0x37f   : > { %v13901_v61 = vcombine.low %v18202_v63, %v18196_v60  ;;  %v9525_v26 = vrot.slane %v9523_v15, 4  ;;  %v9526_v46 = vshll.u32 %v9369_v38, 16  ;;  %v9532_v19 = vshll.u32 %v9370_v0, 16 }
 0x380   : > { %v9511_v27 = vsel %vm16125_vm7, %v9506_v50, %v18180_v9  ;;  %v9521_v24 = vsel %vm16125_vm7, %v9516_v23, %v9520_v8  ;;  %v18213_v18 = vsel %vm16346_vm13, %v13886_v59, %v10284_v47  ;;  %v9536_v2 = vshrl.u32 %v9370_v0, 16  ;;  %v15611_v9 = vld [vmem:[#allocation3 + $0x9c] sm:$0xff]   ;;  %v10186_v50 = vld [vmem:[#allocation3 + $0x44] sm:$0x1]  ;;  %v15614_v23 = vld [vmem:[#allocation3 + $0xa8] sm:$0xff]  }
 0x381   : > { %v18217_v53 = vsel %vm16346_vm13, %v10286_v30, %v10287_v11  ;;  %v9528_v40 = vrot.slane %v9526_v46, 5  ;;  %v9534_v13 = vrot.slane %v9532_v19, 5  ;;  %v9547_v17 = vshrl.u32 %v9372_v31, 16  ;;  %v9375_v8 = vld [vmem:[#allocation3 + $0x60] sm:$0xf]  ;;  %v15622_v46 = vld [vmem:[#allocation10 + $0x1b0] sm:$0xff]  }
 0x382   : > { %v9538_v62 = vrot.slane %v9536_v2, 4  ;;  %v9542_v35 = vshll.u32 %v9371_v28, 16  ;;  %v9550_v37 = vshll.u32 %v9372_v31, 16  ;;  %v9556_v6 = vshll.u32 %v9373_v4, 16 }
 0x383   : > { %v9529_v3 = vor.u32 %v9528_v40, %v9525_v26  ;;  %v9549_v38 = vrot.slane %v9547_v17, 4  ;;  %v9560_v12 = vshrl.u32 %v9373_v4, 16  ;;  %v9566_v43 = vshll.u32 %v9374_v44, 16  ;;  %v9376_v26 = vld [vmem:[#allocation3 + $0x64] sm:$0xf] }
 0x384   : > { %15098 = vmatmul.mubr.bf16.gmra.mxu0 %v15609_v34  ;;  %v18222_v56 = vcombine.low %v9511_v27, %v9521_v24  ;;  %v9539_v36 = vor.u32 %v9538_v62, %v9534_v13  ;;  %v9552_v54 = vrot.slane %v9550_v37, 5  ;;  %v18224_v45 = vrot.slane %v9556_v6, 5  ;;  %v9377_v24 = vld [vmem:[#allocation3 + $0x68] sm:$0x1]  ;;  %v9378_v44 = vld [vmem:[#allocation3 + $0x6c] sm:$0xf] }
 0x385   : > { %15058 = vmatmul.mubr.bf16.gmra.mxu1 %v13827_v57  ;;  %15101 = vmatprep.mubr.bf16.mxu0 %v15611_v9  ;;  %v13902_v16 = vcombine.low %v18213_v18, %v18217_v53  ;;  %v9530_v51 = vrot.slane %v9529_v3, 4  ;;  %v9562_v0 = vrot.slane %v9560_v12, 4  ;;  %v10291_v22 = vrot.slane %v10182_v33, 5  ;;  %v9379_v34 = vld [vmem:[#allocation3 + $0x70] sm:$0xf] }
 0x386   : > { %15125 = vmatprep.mubr.bf16.mxu1 %v18146_v41  ;;  %v9540_v59 = vrot.slane %v9539_v36, 4  ;;  %v9544_v47 = vrot.slane %v9542_v35, 5  ;;  %v9553_v20 = vor.u32 %v9552_v54, %v9549_v38  ;;  %v13887_v14 = vrot.slane %v10181_v21, 9  ;;  %v9380_v62 = vld [vmem:[#allocation3 + $0x74] sm:$0x1] }
 0x387   : > { %v9563_v57 = vor.u32 %v9562_v0, %v18224_v45  ;;  %v9568_v15 = vrot.slane %v9566_v43, 5  ;;  %v10293_v31 = vrot.slane %v10291_v22, 4  ;;  %v10294_v5 = vrot.slane %v10183_v55, 5  ;;  %v15616_v35 = vld [vmem:[#allocation3 + $0xb4] sm:$0xff]   ;;  %v18256_v43 = vpop.f32.mrf.mxu1  ;;  %v10188_v0 = vld [vmem:[#allocation3 + $0x4c] sm:$0xf] }
 0x388   : > { %v9545_v41 = vsel %vm16125_vm7, %v9540_v59, %v9544_v47  ;;  %v9554_v28 = vrot.slane %v9553_v20, 4  ;;  %v13888_v30 = vrot.slane %v10184_v29, 9  ;;  %v10298_v11 = vrot.slane %v10185_v42, 5 }
 0x389   : > { %v9535_v19 = vsel %vm16125_vm7, %v9530_v51, %v9534_v13  ;;  %v9564_v4 = vrot.slane %v9563_v57, 4  ;;  %v18236_v27 = vsel %vm16346_vm13, %v10293_v31, %v10294_v5  ;;  %v9571_v2 = vshrl.u32 %v9375_v8, 16 }
 0x38a   : > { %v18238_v40 = vcombine.low %v9535_v19, %v9545_v41  ;;  %v18242_v17 = vsel %vm16346_vm13, %v13887_v14, %v10291_v22  ;;  %v10300_v21 = vrot.slane %v10298_v11, 4  ;;  %v10301_v33 = vrot.slane %v10186_v50, 5  ;;  %v15623_v22 = vld [vmem:[#allocation10 + $0x1a8] sm:$0xff]   ;;  %v10187_v14 = vld [vmem:[#allocation3 + $0x48] sm:$0xe] }
 0x38b   : > { %v9559_v13 = vsel %vm16125_vm7, %v9554_v28, %v18224_v45  ;;  %v9573_v37 = vrot.slane %v9571_v2, 4  ;;  %v9574_v6 = vshll.u32 %v9375_v8, 16  ;;  %v9580_v55 = vshll.u32 %v9376_v26, 16  ;;  %v10189_v50 = vld [vmem:[#allocation3 + $0x50] sm:$0x1]  ;;  %v15619_v19 = vld [vmem:[#allocation3 + $0xc0] sm:$0xff]  }
 0x38c   : > { %15102 = vmatmul.mubr.bf16.gmra.mxu0 %v15614_v23  ;;  %v9569_v9 = vsel %vm16125_vm7, %v9564_v4, %v9568_v15  ;;  %v13903_v3 = vcombine.low %v18242_v17, %v18236_v27  ;;  %v18254_v38 = vsel %vm16346_vm13, %v13888_v30, %v10298_v11  ;;  %v9584_v12 = vshrl.u32 %v9376_v26, 16  ;;  %v18268_v23 = vpop.f32.mrf.mxu1  ;;  %v10191_v26 = vld [vmem:[#allocation3 + $0x58] sm:$0xf] }
 0x38d   : > { %15126 = vmatmul.mubr.bf16.vlgmr.msra.gmra.mxu1 %v18157_v48  ;;  %15105 = vmatprep.mubr.bf16.mxu0 %v15616_v35  ;;  %v18261_v29 = vsel %vm16346_vm13, %v10300_v21, %v10301_v33  ;;  %v9576_v48 = vrot.slane %v9574_v6, 5  ;;  %v9582_v42 = vrot.slane %v9580_v55, 5  ;;  %v9595_v36 = vshrl.u32 %v9378_v44, 16  ;;  %v15624_v21 = vld [vmem:[#allocation10 + $0x1a0] sm:$0xff]  }
 0x38e   : > { %15129 = vmatprep.mubr.bf16.mxu1 %v18178_v49  ;;  %15206 = vmatpush3.bf16.msra.mxu1 %v18116_v7  ;;  %v9586_v54 = vrot.slane %v9584_v12, 4  ;;  %v9590_v45 = vshll.u32 %v9377_v24, 16  ;;  %v9598_v8 = vshll.u32 %v9378_v44, 16  ;;  %v9604_v51 = vshll.u32 %v9379_v34, 16  ;;  %v10190_v7 = vld [vmem:[#allocation3 + $0x54] sm:$0xe] }
 0x38f   : > { %15207 = vmatprep.subr.bf16.mxu1 %v15622_v46  ;;  %v9577_v59 = vor.u32 %v9576_v48, %v9573_v37  ;;  %v9597_v47 = vrot.slane %v9595_v36, 4  ;;  %v9608_v20 = vshrl.u32 %v9379_v34, 16  ;;  %v9614_v49 = vshll.u32 %v9380_v62, 16  ;;  %v9381_v34 = vld [vmem:[#allocation3 + $0x78] sm:$0xf]  ;;  %v18276_v48 = vpop.f32.mrf.mxu1 }
 0x390   : > { %v18264_v57 = vcombine.low %v9559_v13, %v9569_v9  ;;  %v9587_v15 = vor.u32 %v9586_v54, %v9582_v42  ;;  %v9600_v31 = vrot.slane %v9598_v8, 5  ;;  %v18266_v5 = vrot.slane %v9604_v51, 5  ;;  %v10192_v37 = vld [vmem:[#allocation3 + $0x5c] sm:$0x1] }
 0x391   : > { %v13904_v41 = vcombine.low %v18254_v38, %v18261_v29  ;;  %v9578_v28 = vrot.slane %v9577_v59, 4  ;;  %v9610_v30 = vrot.slane %v9608_v20, 4  ;;  %v10305_v11 = vrot.slane %v10188_v0, 5  ;;  %v9382_v12 = vld [vmem:[#allocation3 + $0x7c] sm:$0xf]  ;;  %v15625_v20 = vld [vmem:[#allocation10 + $0x198] sm:$0xff]  }
 0x392   : > { %15208 = vmatpush3.bf16.msra.mxu1 %v15622_v46  ;;  %v9588_v4 = vrot.slane %v9587_v15, 4  ;;  %v9592_v24 = vrot.slane %v9590_v45, 5  ;;  %v9601_v2 = vor.u32 %v9600_v31, %v9597_v47  ;;  %v13889_v44 = vrot.slane %v10187_v14, 9 }
 0x393   : > { %15209 = vmatprep.subr.bf16.mxu1 %v15623_v22  ;;  %v9611_v33 = vor.u32 %v9610_v30, %v18266_v5  ;;  %v9616_v62 = vrot.slane %v9614_v49, 5  ;;  %v10307_v35 = vrot.slane %v10305_v11, 4  ;;  %v10308_v13 = vrot.slane %v10189_v50, 5  ;;  %v9386_v50 = vld [vmem:[#allocation3 + $0x8c] sm:$0x1] }
 0x394   : > { %15106 = vmatmul.mubr.bf16.gmra.mxu0 %v15619_v19  ;;  %v9593_v6 = vsel %vm16125_vm7, %v9588_v4, %v9592_v24  ;;  %v9602_v46 = vrot.slane %v9601_v2, 4  ;;  %v13890_v55 = vrot.slane %v10190_v7, 9  ;;  %v10312_v9 = vrot.slane %v10191_v26, 5  ;;  %v18305_v7 = vpop.f32.mrf.mxu1  ;;  %v10193_v26 = vld [vmem:[#allocation3 + $0x60] sm:$0xe]  ;;  %v15626_v19 = vld [vmem:[#allocation10 + $0x190] sm:$0xff]  }
 0x395   : > { %15130 = vmatmul.mubr.bf16.gmra.mxu1 %v18198_v25  ;;  %15173 = vmatprep.mubr.bf16.mxu0 %v13900_v1  ;;  %v9583_v36 = vsel %vm16125_vm7, %v9578_v28, %v9582_v42  ;;  %v9612_v54 = vrot.slane %v9611_v33, 4  ;;  %v18286_v25 = vsel %vm16346_vm13, %v10307_v35, %v10308_v13  ;;  %v9619_v45 = vshrl.u32 %v9381_v34, 16  ;;  %v9383_v1 = vld [vmem:[#allocation3 + $0x80] sm:$0x1] }
 0x396   : > { %15133 = vmatprep.mubr.bf16.mxu1 %v18222_v56  ;;  %15210 = vmatpush3.bf16.msra.mxu1 %v15623_v22  ;;  %v18288_v8 = vcombine.low %v9583_v36, %v9593_v6  ;;  %v18292_v51 = vsel %vm16346_vm13, %v13889_v44, %v10305_v11  ;;  %v10314_v39 = vrot.slane %v10312_v9, 4  ;;  %v10315_v58 = vrot.slane %v10192_v37, 5  ;;  %v9384_v56 = vld [vmem:[#allocation3 + $0x84] sm:$0xf]  ;;  %v9385_v22 = vld [vmem:[#allocation3 + $0x88] sm:$0xf] }
 0x397   : > { %15211 = vmatprep.subr.bf16.mxu1 %v15624_v21  ;;  %v9607_v42 = vsel %vm16125_vm7, %v9602_v46, %v18266_v5  ;;  %v9621_v0 = vrot.slane %v9619_v45, 4  ;;  %v9622_v59 = vshll.u32 %v9381_v34, 16  ;;  %v9628_v47 = vshll.u32 %v9382_v12, 16  ;;  %v10194_v34 = vld [vmem:[#allocation3 + $0x64] sm:$0xf]  ;;  %v15628_v6 = vld [vmem:[#allocation10 + $0x1f0] sm:$0xff]  }
 0x398   : > { %v9617_v49 = vsel %vm16125_vm7, %v9612_v54, %v9616_v62  ;;  %v13905_v14 = vcombine.low %v18292_v51, %v18286_v25  ;;  %v18303_v15 = vsel %vm16346_vm13, %v13890_v55, %v10312_v9  ;;  %v9632_v31 = vshrl.u32 %v9382_v12, 16  ;;  %v10195_v37 = vld [vmem:[#allocation3 + $0x68] sm:$0x1]  ;;  %v10196_v12 = vld [vmem:[#allocation3 + $0x6c] sm:$0xe]  ;;  %v18319_v54 = vpop.f32.mrf.mxu1 }
 0x399   : > { %v18309_v5 = vsel %vm16346_vm13, %v10314_v39, %v10315_v58  ;;  %v9624_v28 = vrot.slane %v9622_v59, 5  ;;  %v9630_v30 = vrot.slane %v9628_v47, 5  ;;  %v9643_v11 = vshrl.u32 %v9384_v56, 16  ;;  %v10197_v36 = vld [vmem:[#allocation3 + $0x70] sm:$0xf]  ;;  %v15630_v59 = vld [vmem:[#allocation10 + $0x1e8] sm:$0xff]  }
 0x39a   : > { %15212 = vmatpush3.bf16.msra.mxu1 %v15624_v21  ;;  %v9634_v4 = vrot.slane %v9632_v31, 4  ;;  %v9638_v24 = vshll.u32 %v9383_v1, 16  ;;  %v9646_v2 = vshll.u32 %v9384_v56, 16  ;;  %v9652_v44 = vshll.u32 %v9385_v22, 16  ;;  %v10198_v45 = vld [vmem:[#allocation3 + $0x74] sm:$0x1] }
 0x39b   : > { %v9625_v33 = vor.u32 %v9624_v28, %v9621_v0  ;;  %15213 = vmatprep.subr.bf16.mxu1 %v15625_v20  ;;  %v9645_v62 = vrot.slane %v9643_v11, 4  ;;  %v9656_v35 = vshrl.u32 %v9385_v22, 16  ;;  %v9662_v13 = vshll.u32 %v9386_v50, 16  ;;  %v15629_v0 = vld [vmem:[#allocation10 + $0x188] sm:$0xff]   ;;  %v18333_v50 = vpop.f32.mrf.mxu1 }
 0x39c   : > { %15174 = vmatmul.mubr.bf16.vlgmr.msra.gmra.mxu0 %v13901_v61  ;;  %v18315_v46 = vcombine.low %v9607_v42, %v9617_v49  ;;  %v9635_v21 = vor.u32 %v9634_v4, %v9630_v30  ;;  %v9648_v55 = vrot.slane %v9646_v2, 5  ;;  %v18317_v9 = vrot.slane %v9652_v44, 5  ;;  %v9387_v42 = vld [vmem:[#allocation3 + $0x90] sm:$0xf] }
 0x39d   : > { %15134 = vmatmul.mubr.bf16.gmra.mxu1 %v18238_v40  ;;  %15177 = vmatprep.mubr.bf16.mxu0 %v13902_v16  ;;  %v13906_v60 = vcombine.low %v18303_v15, %v18309_v5  ;;  %v9626_v63 = vrot.slane %v9625_v33, 4  ;;  %v9658_v61 = vrot.slane %v9656_v35, 4  ;;  %v10319_v40 = vrot.slane %v10194_v34, 5  ;;  %v9390_v33 = vld [vmem:[#allocation3 + $0x9c] sm:$0xf] }
 0x39e   : > { %15137 = vmatprep.mubr.bf16.mxu1 %v18264_v57  ;;  %v9636_v39 = vrot.slane %v9635_v21, 4  ;;  %v9640_v58 = vrot.slane %v9638_v24, 5  ;;  %v9649_v1 = vor.u32 %v9648_v55, %v9645_v62  ;;  %v13891_v56 = vrot.slane %v10193_v26, 9  ;;  %15214 = vmatpush3.bf16.msra.mxu1 %v15625_v20  ;;  %v9388_v20 = vld [vmem:[#allocation3 + $0x94] sm:$0xf]  ;;  %v15631_v21 = vld [vmem:[#allocation10 + $0x1e0] sm:$0xff]  }
 0x39f   : > { %15254 = vmatpush3.bf16.msra.mxu0 %v18176_v10  ;;  %v9659_v18 = vor.u32 %v9658_v61, %v18317_v9  ;;  %v18329_v53 = vrot.slane %v9662_v13, 5  ;;  %v10321_v16 = vrot.slane %v10319_v40, 4  ;;  %v10322_v57 = vrot.slane %v10195_v37, 5  ;;  %15215 = vmatprep.subr.bf16.mxu1 %v15626_v19  ;;  %v9389_v26 = vld [vmem:[#allocation3 + $0x98] sm:$0x1] }
 0x3a0   : > { %15255 = vmatprep.subr.bf16.mxu0 %v15628_v6  ;;  %v9641_v47 = vsel %vm16125_vm7, %v9636_v39, %v9640_v58  ;;  %v9650_v22 = vrot.slane %v9649_v1, 4  ;;  %v13892_v49 = vrot.slane %v10196_v12, 9  ;;  %v10326_v31 = vrot.slane %v10197_v36, 5  ;;  %v9391_v62 = vld [vmem:[#allocation3 + $0xa0] sm:$0xf]  ;;  %v15632_v55 = vld [vmem:[#allocation10 + $0x180] sm:$0xff]  }
 0x3a1   : > { %v9631_v10 = vsel %vm16125_vm7, %v9626_v63, %v9630_v30  ;;  %v9660_v28 = vrot.slane %v9659_v18, 4  ;;  %v18339_v11 = vsel %vm16346_vm13, %v10321_v16, %v10322_v57  ;;  %v9667_v4 = vshrl.u32 %v9387_v42, 16  ;;  %v9392_v36 = vld [vmem:[#allocation3 + $0xa4] sm:$0x1]  ;;  %v18363_v63 = vpop.f32.mrf.mxu1  ;;  %v10199_v61 = vld [vmem:[#allocation3 + $0x78] sm:$0xe] }
 0x3a2   : > { %v18341_v24 = vcombine.low %v9631_v10, %v9641_v47  ;;  %v18345_v2 = vsel %vm16346_vm13, %v13891_v56, %v10319_v40  ;;  %v10328_v44 = vrot.slane %v10326_v31, 4  ;;  %v10329_v34 = vrot.slane %v10198_v45, 5  ;;  %15216 = vmatpush3.bf16.msra.mxu1 %v15626_v19  ;;  %v10200_v1 = vld [vmem:[#allocation3 + $0x7c] sm:$0xf]  ;;  %v15634_v56 = vld [vmem:[#allocation10 + $0x1d8] sm:$0xff]  }
 0x3a3   : > { %15256 = vmatpush3.bf16.msra.mxu0 %v15628_v6  ;;  %v9655_v30 = vsel %vm16125_vm7, %v9650_v22, %v18317_v9  ;;  %v9669_v35 = vrot.slane %v9667_v4, 4  ;;  %v9670_v13 = vshll.u32 %v9387_v42, 16  ;;  %v9676_v37 = vshll.u32 %v9388_v20, 16  ;;  %15217 = vmatprep.subr.bf16.mxu1 %v15629_v0  ;;  %v18375_v42 = vld [vmem:[#allocation10 + $0x238] sm:$0xff]   ;;  %v10201_v47 = vld [vmem:[#allocation3 + $0x80] sm:$0x1] }
 0x3a4   : > { %15257 = vmatprep.subr.bf16.mxu0 %v15630_v59  ;;  %15178 = vmatmul.mubr.bf16.gmra.mxu0 %v13903_v3  ;;  %v9665_v19 = vsel %vm16125_vm7, %v9660_v28, %v18329_v53  ;;  %v13907_v6 = vcombine.low %v18345_v2, %v18339_v11  ;;  %v18361_v9 = vsel %vm16346_vm13, %v13892_v49, %v10326_v31  ;;  %v9680_v12 = vshrl.u32 %v9388_v20, 16  ;;  %v18378_v22 = vld [vmem:[#allocation3 + $0x84] sm:$0xe]  ;;  %v18380_v49 = vpop.f32.mrf.mxu1  ;;  %v18384_v10 = vld [vmem:[#allocation3 + $0x88] sm:$0xf] }
 0x3a5   : > { %15138 = vmatmul.mubr.bf16.gmra.mxu1 %v18288_v8  ;;  %15181 = vmatprep.mubr.bf16.mxu0 %v13904_v41  ;;  %v18371_v27 = vsel %vm16346_vm13, %v10328_v44, %v10329_v34  ;;  %v9672_v17 = vrot.slane %v9670_v13, 5  ;;  %v18373_v3 = vrot.slane %v9676_v37, 5  ;;  %v9691_v8 = vshrl.u32 %v9390_v33, 16  ;;  %v9393_v34 = vld [vmem:[#allocation3 + $0xa8] sm:$0xf] }
 0x3a6   : > { %15141 = vmatprep.mubr.bf16.mxu1 %v18315_v46  ;;  %v9682_v40 = vrot.slane %v9680_v12, 4  ;;  %v9686_v45 = vshll.u32 %v9389_v26, 16  ;;  %v9694_v39 = vshll.u32 %v9390_v33, 16  ;;  %v9700_v58 = vshll.u32 %v9391_v62, 16  ;;  %15218 = vmatpush3.bf16.msra.mxu1 %v15629_v0  ;;  %v10204_v13 = vld [vmem:[#allocation3 + $0x8c] sm:$0x1] }
 0x3a7   : > { %15258 = vmatpush3.bf16.msra.mxu0 %v15630_v59  ;;  %v9673_v38 = vor.u32 %v9672_v17, %v9669_v35  ;;  %v9693_v29 = vrot.slane %v9691_v8, 4  ;;  %v9704_v41 = vshrl.u32 %v9391_v62, 16  ;;  %v9710_v46 = vshll.u32 %v9392_v36, 16  ;;  %15219 = vmatprep.subr.bf16.mxu1 %v15632_v55  ;;  %v15635_v37 = vld [vmem:[#allocation10 + $0x1d0] sm:$0xff]   ;;  %v18396_v17 = vpop.f32.mrf.mxu1  ;;  %v9395_v5 = vld [vmem:[#allocation3 + $0xb0] sm:$0x1] }
 0x3a8   : > { %15259 = vmatprep.subr.bf16.mxu0 %v15631_v21  ;;  %v13870_v18 = vcombine.low %v9655_v30, %v9665_v19  ;;  %v9683_v53 = vor.u32 %v9682_v40, %v18373_v3  ;;  %v9696_v16 = vrot.slane %v9694_v39, 5  ;;  %v9702_v57 = vrot.slane %v9700_v58, 5  ;;  %v9394_v36 = vld [vmem:[#allocation3 + $0xac] sm:$0xf] }
 0x3a9   : > { %v13908_v0 = vcombine.low %v18361_v9, %v18371_v27  ;;  %v9674_v59 = vrot.slane %v9673_v38, 4  ;;  %v9706_v31 = vrot.slane %v9704_v41, 4  ;;  %v10333_v20 = vrot.slane %v10200_v1, 5  ;;  %v9397_v1 = vld [vmem:[#allocation3 + $0xb8] sm:$0xf]  ;;  %v15639_v38 = vld [vmem:[#allocation10 + $0x1c8] sm:$0xff]  }
 0x3aa   : > { %v9684_v28 = vrot.slane %v9683_v53, 4  ;;  %v9688_v26 = vrot.slane %v9686_v45, 5  ;;  %v9697_v4 = vor.u32 %v9696_v16, %v9693_v29  ;;  %v13893_v44 = vrot.slane %v10199_v61, 9  ;;  %15220 = vmatpush3.bf16.msra.mxu1 %v15632_v55  ;;  %v9398_v53 = vld [vmem:[#allocation3 + $0xbc] sm:$0x1]  ;;  %v18417_v16 = vpop.f32.mrf.mxu1 }
 0x3ab   : > { %15260 = vmatpush3.bf16.msra.mxu0 %v15631_v21  ;;  %v9707_v33 = vor.u32 %v9706_v31, %v9702_v57  ;;  %v9712_v62 = vrot.slane %v9710_v46, 5  ;;  %v10335_v30 = vrot.slane %v10333_v20, 4  ;;  %v10336_v35 = vrot.slane %v10201_v47, 5  ;;  %15301 = vmatprep.subr.bf16.mxu1 %v18375_v42 }
 0x3ac   : > { %15261 = vmatprep.subr.bf16.mxu0 %v15634_v56  ;;  %15182 = vmatmul.mubr.bf16.gmra.mxu0 %v13905_v14  ;;  %v9679_v21 = vsel %vm16125_vm7, %v9674_v59, %v18373_v3  ;;  %v9698_v55 = vrot.slane %v9697_v4, 4  ;;  %v13894_v19 = vrot.slane %v18378_v22, 9  ;;  %v10340_v12 = vrot.slane %v18384_v10, 5  ;;  %v18423_v59 = vld [vmem:[#allocation3 + $0x90] sm:$0xe] }
 0x3ad   : > { %15142 = vmatmul.mubr.bf16.gmra.mxu1 %v18341_v24  ;;  %15185 = vmatprep.mubr.bf16.mxu0 %v13906_v60  ;;  %v9689_v25 = vsel %vm16125_vm7, %v9684_v28, %v9688_v26  ;;  %v9708_v51 = vrot.slane %v9707_v33, 4  ;;  %v18405_v14 = vsel %vm16346_vm13, %v10335_v30, %v10336_v35  ;;  %v9715_v24 = vshrl.u32 %v9393_v34, 16  ;;  %v9396_v60 = vld [vmem:[#allocation3 + $0xb4] sm:$0xf]  ;;  %v15640_v30 = vld [vmem:[#allocation10 + $0x1c0] sm:$0xff]  }
 0x3ae   : > { %15145 = vmatprep.mubr.bf16.mxu1 %v13870_v18  ;;  %v9703_v3 = vsel %vm16125_vm7, %v9698_v55, %v9702_v57  ;;  %v18411_v8 = vsel %vm16346_vm13, %v13893_v44, %v10333_v20  ;;  %v10342_v61 = vrot.slane %v10340_v12, 4  ;;  %v10343_v15 = vrot.slane %v10204_v13, 5  ;;  %v18425_v26 = vld [vmem:[#allocation3 + $0x94] sm:$0xf] }
 0x3af   : > { %15262 = vmatpush3.bf16.msra.mxu0 %v15634_v56  ;;  %v9713_v40 = vsel %vm16125_vm7, %v9708_v51, %v9712_v62  ;;  %v9717_v45 = vrot.slane %v9715_v24, 4  ;;  %v9718_v39 = vshll.u32 %v9393_v34, 16  ;;  %v9724_v58 = vshll.u32 %v9394_v36, 16  ;;  %v10207_v62 = vld [vmem:[#allocation3 + $0x98] sm:$0x1] }
 0x3b0   : > { %15263 = vmatprep.subr.bf16.mxu0 %v15635_v37  ;;  %v13871_v29 = vcombine.low %v9679_v21, %v9689_v25  ;;  %v13872_v41 = vcombine.low %v9703_v3, %v9713_v40  ;;  %v13909_v46 = vcombine.low %v18411_v8, %v18405_v14  ;;  %v9728_v18 = vshrl.u32 %v9394_v36, 16  ;;  %v10208_v36 = vld [vmem:[#allocation3 + $0x9c] sm:$0xe]  ;;  %v18432_v25 = vpop.f32.mrf.mxu1  ;;  %v10210_v24 = vld [vmem:[#allocation3 + $0xa4] sm:$0x1] }
 0x3b1   : > { %v18421_v56 = vsel %vm16346_vm13, %v10342_v61, %v10343_v15  ;;  %v9720_v57 = vrot.slane %v9718_v39, 5  ;;  %v9726_v47 = vrot.slane %v9724_v58, 5  ;;  %v9739_v22 = vshrl.u32 %v9396_v60, 16  ;;  %v9399_v15 = vld [vmem:[#allocation3 + $0xc0] sm:$0xf] }
 0x3b2   : > { %v9730_v31 = vrot.slane %v9728_v18, 4  ;;  %v9734_v20 = vshll.u32 %v9395_v5, 16  ;;  %v9742_v10 = vshll.u32 %v9396_v60, 16  ;;  %v9748_v28 = vshll.u32 %v9397_v1, 16  ;;  %v9400_v58 = vld [vmem:[#allocation3 + $0xc4] sm:$0xf] }
 0x3b3   : > { %15264 = vmatpush3.bf16.msra.mxu0 %v15635_v37  ;;  %v9721_v4 = vor.u32 %v9720_v57, %v9717_v45  ;;  %v9741_v44 = vrot.slane %v9739_v22, 4  ;;  %v9752_v34 = vshrl.u32 %v9397_v1, 16  ;;  %v9758_v33 = vshll.u32 %v9398_v53, 16  ;;  %v10209_v37 = vld [vmem:[#allocation3 + $0xa0] sm:$0xf]  ;;  %v18442_v1 = vpop.f32.mrf.mxu1 }
 0x3b4   : > { %15265 = vmatprep.subr.bf16.mxu0 %v15639_v38  ;;  %15186 = vmatmul.mubr.bf16.gmra.mxu0 %v13907_v6  ;;  %v10341_v35 = vsel %vm16346_vm13, %v13894_v19, %v10340_v12  ;;  %v9731_v13 = vor.u32 %v9730_v31, %v9726_v47  ;;  %v9744_v21 = vrot.slane %v9742_v10, 5  ;;  %v9750_v55 = vrot.slane %v9748_v28, 5  ;;  %v10211_v31 = vld [vmem:[#allocation3 + $0xa8] sm:$0xe] }
 0x3b5   : > { %15146 = vmatmul.mubr.bf16.gmra.mxu1 %v13871_v29  ;;  %15189 = vmatprep.mubr.bf16.mxu0 %v13908_v0  ;;  %v13910_v51 = vcombine.low %v10341_v35, %v18421_v56  ;;  %v9722_v11 = vrot.slane %v9721_v4, 4  ;;  %v9754_v2 = vrot.slane %v9752_v34, 4  ;;  %v10347_v6 = vrot.slane %v18425_v26, 5  ;;  %v10212_v26 = vld [vmem:[#allocation3 + $0xac] sm:$0xf]  ;;  %v14983_v35 = vpop.f32.mrf.mxu0 }
 0x3b6   : > { %15149 = vmatprep.mubr.bf16.mxu1 %v13872_v41  ;;  %v9732_v19 = vrot.slane %v9731_v13, 4  ;;  %v9736_v12 = vrot.slane %v9734_v20, 5  ;;  %v9745_v3 = vor.u32 %v9744_v21, %v9741_v44  ;;  %v13895_v61 = vrot.slane %v18423_v59, 9  ;;  %v18457_v13 = vpop.f32.mrf.mxu1 }
 0x3b7   : > { %15266 = vmatpush3.bf16.msra.mxu0 %v15639_v38  ;;  %v9755_v5 = vor.u32 %v9754_v2, %v9750_v55  ;;  %v9760_v60 = vrot.slane %v9758_v33, 5  ;;  %v10349_v40 = vrot.slane %v10347_v6, 4  ;;  %v10350_v9 = vrot.slane %v10207_v62, 5  ;;  %v9401_v38 = vld [vmem:[#allocation3 + $0xc8] sm:$0x1] }
 0x3b8   : > { %15267 = vmatprep.subr.bf16.mxu0 %v15640_v30  ;;  %v9737_v27 = vsel %vm16125_vm7, %v9732_v19, %v9736_v12  ;;  %v9746_v0 = vrot.slane %v9745_v3, 4  ;;  %v13896_v45 = vrot.slane %v10208_v36, 9  ;;  %v10354_v39 = vrot.slane %v10209_v37, 5  ;;  %v10213_v62 = vld [vmem:[#allocation3 + $0xb0] sm:$0x1] }
 0x3b9   : > { %v9727_v29 = vsel %vm16125_vm7, %v9722_v11, %v9726_v47  ;;  %v9756_v41 = vrot.slane %v9755_v5, 4  ;;  %v10357_v18 = vrot.slane %v10210_v24, 5  ;;  %v9763_v53 = vshrl.u32 %v9399_v15, 16  ;;  %v10216_v36 = vld [vmem:[#allocation3 + $0xbc] sm:$0x1] }
 0x3ba   : > { %v13873_v56 = vcombine.low %v9727_v29, %v9737_v27  ;;  %v9751_v57 = vsel %vm16125_vm7, %v9746_v0, %v9750_v55  ;;  %v10351_v22 = vsel %vm16346_vm13, %v10349_v40, %v10350_v9  ;;  %v10356_v59 = vrot.slane %v10354_v39, 4  ;;  %v10214_v55 = vld [vmem:[#allocation3 + $0xb4] sm:$0xe]  ;;  %v10217_v19 = vld [vmem:[#allocation3 + $0xc0] sm:$0xe]  ;;  %v18465_v0 = vpop.f32.mrf.mxu0 }
 0x3bb   : > { %15268 = vmatpush3.bf16.msra.mxu0 %v15640_v30  ;;  %v9761_v20 = vsel %vm16125_vm7, %v9756_v41, %v9760_v60  ;;  %v9765_v10 = vrot.slane %v9763_v53, 4  ;;  %v9766_v28 = vshll.u32 %v9399_v15, 16  ;;  %v9772_v47 = vshll.u32 %v9400_v58, 16  ;;  %v10215_v30 = vld [vmem:[#allocation3 + $0xb8] sm:$0xf] }
 0x3bc   : > { %15190 = vmatmul.mubr.bf16.gmra.mxu0 %v13909_v46  ;;  %v13874_v4 = vcombine.low %v9751_v57, %v9761_v20  ;;  %v10358_v44 = vsel %vm16346_vm13, %v10356_v59, %v10357_v18  ;;  %v9776_v34 = vshrl.u32 %v9400_v58, 16  ;;  %v9782_v33 = vshll.u32 %v9401_v38, 16  ;;  %v10218_v12 = vld [vmem:[#allocation3 + $0xc4] sm:$0xf]  ;;  %v11217_v60 = vld [vmem:[#allocation3 + $0x18] sm:$0xf] }
 0x3bd   : > { %15150 = vmatmul.mubr.bf16.gmra.mxu1 %v13873_v56  ;;  %15193 = vmatprep.mubr.bf16.mxu0 %v13910_v51  ;;  %v10348_v21 = vsel %vm16346_vm13, %v13895_v61, %v10347_v6  ;;  %v10355_v14 = vsel %vm16346_vm13, %v13896_v45, %v10354_v39  ;;  %v9768_v8 = vrot.slane %v9766_v28, 5  ;;  %v9774_v46 = vrot.slane %v9772_v47, 5  ;;  %v18463_v27 = vld [vmem:[#allocation3 + $0xc8] sm:$0x1]  ;;  %v18467_v45 = vpop.f32.mrf.mxu1  ;;  %v11218_v56 = vld [vmem:[#allocation3 + $0x1c] sm:$0xf] }
 0x3be   : > { %15153 = vmatprep.mubr.bf16.mxu1 %v13874_v4  ;;  %v13911_v37 = vcombine.low %v10348_v21, %v10351_v22  ;;  %v13912_v11 = vcombine.low %v10355_v14, %v10358_v44  ;;  %v9778_v2 = vrot.slane %v9776_v34, 4  ;;  %v10361_v24 = vrot.slane %v10212_v26, 5  ;;  %v11219_v4 = vld [vmem:[#allocation3 + $0x20] sm:$0x1]  ;;  %v18482_v34 = vpop.f32.mrf.mxu0 }
 0x3bf   : > { %v9769_v3 = vor.u32 %v9768_v8, %v9765_v10  ;;  %v9784_v15 = vrot.slane %v9782_v33, 5  ;;  %v13897_v51 = vrot.slane %v10211_v31, 9  ;;  %v10368_v5 = vrot.slane %v10215_v30, 5  ;;  %v11220_v10 = vld [vmem:[#allocation3 + $0x24] sm:$0xf]  ;;  %v18484_v33 = vpop.f32.mrf.mxu1 }
 0x3c0   : > { %v9779_v6 = vor.u32 %v9778_v2, %v9774_v46  ;;  %v10363_v61 = vrot.slane %v10361_v24, 4  ;;  %v10364_v40 = vrot.slane %v10213_v62, 5  ;;  %v13898_v9 = vrot.slane %v10214_v55, 9  ;;  %v11221_v8 = vld [vmem:[#allocation3 + $0x28] sm:$0xf]  ;;  %v15633_v55 = vld [vmem:[#allocation3 + $0x18] sm:$0xff]  }
 0x3c1   : > { %v9770_v39 = vrot.slane %v9769_v3, 4  ;;  %v10362_v58 = vsel %vm16346_vm13, %v13897_v51, %v10361_v24  ;;  %v10370_v29 = vrot.slane %v10368_v5, 4  ;;  %v10371_v41 = vrot.slane %v10216_v36, 5  ;;  %v11222_v2 = vld [vmem:[#allocation3 + $0x2c] sm:$0x1] }
 0x3c2   : > { %v9780_v18 = vrot.slane %v9779_v6, 4  ;;  %v10365_v38 = vsel %vm16346_vm13, %v10363_v61, %v10364_v40  ;;  %v10375_v53 = vrot.slane %v10218_v12, 5  ;;  %v11266_v57 = vshrl.u32 %v11217_v60, 16  ;;  %v18493_v61 = vpop.f32.mrf.mxu0  ;;  %v18495_v40 = vpop.f32.mrf.mxu1 }
 0x3c3   : > { %v10369_v22 = vsel %vm16346_vm13, %v13898_v9, %v10368_v5  ;;  %v10372_v59 = vsel %vm16346_vm13, %v10370_v29, %v10371_v41  ;;  %v13899_v31 = vrot.slane %v10217_v19, 9  ;;  %v10378_v20 = vrot.slane %v18463_v27, 5 }
 0x3c4   : > { %15194 = vmatmul.mubr.bf16.gmra.mxu0 %v13911_v37  ;;  %v9775_v28 = vsel %vm16125_vm7, %v9770_v39, %v9774_v46  ;;  %v9785_v47 = vsel %vm16125_vm7, %v9780_v18, %v9784_v15  ;;  %v13913_v26 = vcombine.low %v10362_v58, %v10365_v38  ;;  %v11268_v44 = vrot.slane %v11266_v57, 4  ;;  %v11223_v15 = vld [vmem:[#allocation3 + $0x30] sm:$0xf]  ;;  %v11224_v39 = vld [vmem:[#allocation3 + $0x34] sm:$0xf] }
 0x3c5   : > { %15197 = vmatprep.mubr.bf16.mxu0 %v13912_v11  ;;  %v13875_v62 = vcombine.low %v9775_v28, %v9785_v47  ;;  %v11269_v30 = vshll.u32 %v11217_v60, 16  ;;  %v11275_v21 = vshll.u32 %v11218_v56, 16  ;;  %v11279_v14 = vshrl.u32 %v11218_v56, 16 }
 0x3c6   : > { %v13914_v36 = vcombine.low %v10369_v22, %v10372_v59  ;;  %v18488_v46 = vsel %vm16346_vm13, %v13899_v31, %v10375_v53  ;;  %v18491_v37 = vadd.f32 %v14983_v35, %v18256_v43  ;;  %v11290_v24 = vshrl.u32 %v11220_v10, 16  ;;  %v11225_v59 = vld [vmem:[#allocation3 + $0x38] sm:$0x1] }
 0x3c7   : > { %15154 = vmatmul.mubr.bf16.gmra.mxu1 %v13875_v62  ;;  %v11271_v19 = vrot.slane %v11269_v30, 5  ;;  %v11277_v12 = vrot.slane %v11275_v21, 5  ;;  %v11281_v11 = vrot.slane %v11279_v14, 4  ;;  %v11285_v3 = vshll.u32 %v11219_v4, 16  ;;  %v18497_v4 = vpop.f32.mrf.mxu1  ;;  %v15642_v21 = vld [vmem:[#allocation10 + $0x230] sm:$0xff]  }
 0x3c8   : > { %15221 = vmatprep.mubr.bf16.mxu1 %v15633_v55  ;;  %v10377_v51 = vrot.slane %v10375_v53, 4  ;;  %v11292_v5 = vrot.slane %v11290_v24, 4  ;;  %v11293_v60 = vshll.u32 %v11220_v10, 16  ;;  %v11299_v6 = vshll.u32 %v11221_v8, 16 }
 0x3c9   : > { %v11272_v9 = vor.u32 %v11271_v19, %v11268_v44  ;;  %v11282_v43 = vor.u32 %v11281_v11, %v11277_v12  ;;  %v11303_v35 = vshrl.u32 %v11221_v8, 16  ;;  %v11309_v27 = vshll.u32 %v11222_v2, 16  ;;  %v14987_v47 = vpop.f32.mrf.mxu0  ;;  %v15636_v44 = vld [vmem:[#allocation3 + $0x24] sm:$0xff]  }
 0x3ca   : > { %v11295_v58 = vrot.slane %v11293_v60, 5  ;;  %v11301_v29 = vrot.slane %v11299_v6, 5  ;;  %v11314_v41 = vshrl.u32 %v11223_v15, 16  ;;  %v11317_v18 = vshll.u32 %v11223_v15, 16  ;;  %v11227_v6 = vld [vmem:[#allocation3 + $0x40] sm:$0xf] }
 0x3cb   : > { %v11273_v38 = vrot.slane %v11272_v9, 4  ;;  %v11283_v56 = vrot.slane %v11282_v43, 4  ;;  %v11287_v57 = vrot.slane %v11285_v3, 5  ;;  %v11305_v53 = vrot.slane %v11303_v35, 4  ;;  %v8103_v9 = vpop.f32.mrf.mxu0  ;;  %v18513_v43 = vpop.f32.mrf.mxu1 }
 0x3cc   : > { %15198 = vmatmul.mubr.bf16.gmra.mxu0 %v13913_v26  ;;  %v11296_v22 = vor.u32 %v11295_v58, %v11292_v5  ;;  %v11316_v31 = vrot.slane %v11314_v41, 4  ;;  %v11319_v10 = vrot.slane %v11317_v18, 5  ;;  %v11323_v28 = vshll.u32 %v11224_v39, 16  ;;  %v15638_v26 = vld [vmem:[#allocation3 + $0x30] sm:$0xff]   ;;  %v11228_v58 = vld [vmem:[#allocation3 + $0x44] sm:$0x1] }
 0x3cd   : > { %15201 = vmatprep.mubr.bf16.mxu0 %v13914_v36  ;;  %v10379_v62 = vsel %vm16346_vm13, %v10377_v51, %v10378_v20  ;;  %v11288_v30 = vsel %vm16125_vm7, %v11283_v56, %v11287_v57  ;;  %v11306_v14 = vor.u32 %v11305_v53, %v11301_v29  ;;  %v11327_v8 = vshrl.u32 %v11224_v39, 16  ;;  %v11226_v20 = vld [vmem:[#allocation3 + $0x3c] sm:$0xf] }
 0x3ce   : > { %v11297_v55 = vrot.slane %v11296_v22, 4  ;;  %v11311_v2 = vrot.slane %v11309_v27, 5  ;;  %v11320_v24 = vor.u32 %v11319_v10, %v11316_v31  ;;  %v18503_v19 = vrot.slane %v11323_v28, 5  ;;  %v11230_v22 = vld [vmem:[#allocation3 + $0x4c] sm:$0xf] }
 0x3cf   : > { %15222 = vmatmul.mubr.bf16.vlgmr.msra.gmra.mxu1 %v15636_v44  ;;  %v11278_v36 = vsel %vm16125_vm7, %v11273_v38, %v11277_v12  ;;  %v11307_v11 = vrot.slane %v11306_v14, 4  ;;  %v11329_v3 = vrot.slane %v11327_v8, 4  ;;  %v11333_v15 = vshll.u32 %v11225_v59, 16  ;;  %v11231_v10 = vld [vmem:[#allocation3 + $0x50] sm:$0x1]  ;;  %v18523_v44 = vpop.f32.mrf.mxu1 }
 0x3d0   : > { %v13915_v51 = vcombine.low %v18488_v46, %v10379_v62  ;;  %15225 = vmatprep.mubr.bf16.mxu1 %v15638_v26  ;;  %15302 = vmatpush3.bf16.msra.mxu1 %v18375_v42  ;;  %v13948_v5 = vcombine.low %v11278_v36, %v11288_v30  ;;  %v18511_v60 = vadd.f32 %v18465_v0, %v18268_v23  ;;  %v11321_v35 = vrot.slane %v11320_v24, 4  ;;  %v15645_v46 = vld [vmem:[#allocation10 + $0x228] sm:$0xff]   ;;  %v11229_v42 = vld [vmem:[#allocation3 + $0x48] sm:$0xf]  ;;  %v15648_v26 = vld [vmem:[#allocation10 + $0x220] sm:$0xff]  }
 0x3d1   : > { %15303 = vmatprep.subr.bf16.mxu1 %v15642_v21  ;;  %v11312_v12 = vsel %vm16125_vm7, %v11307_v11, %v11311_v2  ;;  %v11330_v27 = vor.u32 %v11329_v3, %v18503_v19  ;;  %v18519_v39 = vadd.f32 %v14987_v47, %v18319_v54  ;;  %v11302_v23 = vsel %vm16125_vm7, %v11297_v55, %v11301_v29  ;;  %v14988_v47 = vpop.f32.mrf.mxu0  ;;  %v15641_v29 = vld [vmem:[#allocation3 + $0x3c] sm:$0xff]  }
 0x3d2   : > { %v11335_v0 = vrot.slane %v11333_v15, 5  ;;  %v11338_v41 = vshrl.u32 %v11226_v20, 16  ;;  %v11341_v18 = vshll.u32 %v11226_v20, 16  ;;  %v13949_v38 = vcombine.low %v11302_v23, %v11312_v12 }
 0x3d3   : > { %v11331_v56 = vrot.slane %v11330_v27, 4  ;;  %v11347_v57 = vshll.u32 %v11227_v6, 16  ;;  %v11351_v53 = vshrl.u32 %v11227_v6, 16  ;;  %v11362_v54 = vshrl.u32 %v11229_v42, 16  ;;  %v11233_v27 = vld [vmem:[#allocation3 + $0x58] sm:$0xf] }
 0x3d4   : > { %15202 = vmatmul.mubr.bf16.gmra.mxu0 %v13915_v51  ;;  %15304 = vmatpush3.bf16.msra.mxu1 %v15642_v21  ;;  %v11340_v59 = vrot.slane %v11338_v41, 4  ;;  %v11343_v31 = vrot.slane %v11341_v18, 5  ;;  %v11365_v28 = vshll.u32 %v11229_v42, 16  ;;  %v11326_v62 = vsel %vm16125_vm7, %v11321_v35, %v18503_v19  ;;  %v15643_v21 = vld [vmem:[#allocation3 + $0x48] sm:$0xff]   ;;  %v11232_v51 = vld [vmem:[#allocation3 + $0x54] sm:$0xf]  ;;  %v18536_v35 = vpop.f32.mrf.mxu0  ;;  %v18538_v42 = vpop.f32.mrf.mxu1 }
 0x3d5   : > { %15269 = vmatprep.mubr.bf16.mxu0 %v13948_v5  ;;  %15305 = vmatprep.subr.bf16.mxu1 %v15645_v46  ;;  %v11349_v30 = vrot.slane %v11347_v57, 5  ;;  %v11353_v14 = vrot.slane %v11351_v53, 4  ;;  %v11357_v8 = vshll.u32 %v11228_v58, 16  ;;  %v11336_v55 = vsel %vm16125_vm7, %v11331_v56, %v11335_v0  ;;  %v15651_v18 = vld [vmem:[#allocation10 + $0x218] sm:$0xff]   ;;  %v11234_v53 = vld [vmem:[#allocation3 + $0x5c] sm:$0x1] }
 0x3d6   : > { %v11344_v2 = vor.u32 %v11343_v31, %v11340_v59  ;;  %v11364_v24 = vrot.slane %v11362_v54, 4  ;;  %v11367_v36 = vrot.slane %v11365_v28, 5  ;;  %v11371_v3 = vshll.u32 %v11230_v22, 16  ;;  %v11235_v31 = vld [vmem:[#allocation3 + $0x60] sm:$0xf] }
 0x3d7   : > { %15226 = vmatmul.mubr.bf16.gmra.mxu1 %v15641_v29  ;;  %v11354_v11 = vor.u32 %v11353_v14, %v11349_v30  ;;  %v11375_v15 = vshrl.u32 %v11230_v22, 16  ;;  %v11381_v20 = vshll.u32 %v11231_v10, 16  ;;  %v18531_v6 = vadd.f32 %v8103_v9, %v18333_v50  ;;  %v15644_v14 = vld [vmem:[#allocation3 + $0x54] sm:$0xff]  }
 0x3d8   : > { %15229 = vmatprep.mubr.bf16.mxu1 %v15643_v21  ;;  %v11345_v19 = vrot.slane %v11344_v2, 4  ;;  %15306 = vmatpush3.bf16.msra.mxu1 %v15645_v46  ;;  %v11368_v5 = vor.u32 %v11367_v36, %v11364_v24  ;;  %v18534_v12 = vadd.f32 %v14988_v47, %v18363_v63  ;;  %v11359_v0 = vrot.slane %v11357_v8, 5  ;;  %v15646_v24 = vld [vmem:[#allocation3 + $0x60] sm:$0xff]  }
 0x3d9   : > { %v11355_v23 = vrot.slane %v11354_v11, 4  ;;  %v18540_v58 = vrot.slane %v11371_v3, 5  ;;  %v11377_v41 = vrot.slane %v11375_v15, 4  ;;  %15307 = vmatprep.subr.bf16.mxu1 %v15648_v26  ;;  %v13950_v46 = vcombine.low %v11326_v62, %v11336_v55  ;;  %v11236_v62 = vld [vmem:[#allocation3 + $0x64] sm:$0xf] }
 0x3da   : > { %v11350_v50 = vsel %vm16125_vm7, %v11345_v19, %v11349_v30  ;;  %v11369_v9 = vrot.slane %v11368_v5, 4  ;;  %v11386_v56 = vshrl.u32 %v11232_v51, 16  ;;  %v11389_v22 = vshll.u32 %v11232_v51, 16  ;;  %v18547_v30 = vpop.f32.mrf.mxu1  ;;  %v11237_v19 = vld [vmem:[#allocation3 + $0x68] sm:$0x1] }
 0x3db   : > { %v11360_v63 = vsel %vm16125_vm7, %v11355_v23, %v11359_v0  ;;  %v11378_v57 = vor.u32 %v11377_v41, %v18540_v58  ;;  %v11395_v59 = vshll.u32 %v11233_v27, 16  ;;  %v11383_v54 = vrot.slane %v11381_v20, 5 }
 0x3dc   : > { %15270 = vmatmul.mubr.bf16.vlgmr.msra.gmra.mxu0 %v13949_v38  ;;  %v13951_v10 = vcombine.low %v11350_v50, %v11360_v63  ;;  %v14991_v28 = vpop.f32.mrf.mxu0  ;;  %v11388_v47 = vrot.slane %v11386_v56, 4  ;;  %v11399_v29 = vshrl.u32 %v11233_v27, 16  ;;  %15308 = vmatpush3.bf16.msra.mxu1 %v15648_v26  ;;  %v11391_v55 = vrot.slane %v11389_v22, 5  ;;  %v15654_v38 = vld [vmem:[#allocation10 + $0x210] sm:$0xff]   ;;  %v18560_v56 = vpop.f32.mrf.mxu1 }
 0x3dd   : > { %15273 = vmatprep.mubr.bf16.mxu0 %v13950_v46  ;;  %v11379_v8 = vrot.slane %v11378_v57, 4  ;;  %v18550_v21 = vadd.f32 %v14991_v28, %v18396_v17  ;;  %v18552_v2 = vrot.slane %v11395_v59, 5  ;;  %15309 = vmatprep.subr.bf16.mxu1 %v15651_v18  ;;  %v11405_v11 = vshll.u32 %v11234_v53, 16  ;;  %v11238_v50 = vld [vmem:[#allocation3 + $0x6c] sm:$0xf]  ;;  %v15657_v53 = vld [vmem:[#allocation10 + $0x208] sm:$0xff]  }
 0x3de   : > { %v11401_v36 = vrot.slane %v11399_v29, 4  ;;  %v11410_v3 = vshrl.u32 %v11235_v31, 16  ;;  %v11413_v15 = vshll.u32 %v11235_v31, 16  ;;  %v8119_v26 = vpop.f32.mrf.mxu0  ;;  %v11374_v20 = vsel %vm16125_vm7, %v11369_v9, %v18540_v58  ;;  %v11239_v28 = vld [vmem:[#allocation3 + $0x70] sm:$0xf] }
 0x3df   : > { %15230 = vmatmul.mubr.bf16.gmra.mxu1 %v15644_v14  ;;  %v11392_v51 = vor.u32 %v11391_v55, %v11388_v47  ;;  %v11419_v17 = vshll.u32 %v11236_v62, 16  ;;  %v11423_v5 = vshrl.u32 %v11236_v62, 16  ;;  %v11384_v27 = vsel %vm16125_vm7, %v11379_v8, %v11383_v54  ;;  %v11240_v8 = vld [vmem:[#allocation3 + $0x74] sm:$0x1] }
 0x3e0   : > { %15233 = vmatprep.mubr.bf16.mxu1 %v15646_v24  ;;  %v11402_v23 = vor.u32 %v11401_v36, %v18552_v2  ;;  %v11407_v0 = vrot.slane %v11405_v11, 5  ;;  %v11412_v41 = vrot.slane %v11410_v3, 4  ;;  %v14992_v46 = vpop.f32.mrf.mxu0  ;;  %15310 = vmatpush3.bf16.msra.mxu1 %v15651_v18  ;;  %v11415_v57 = vrot.slane %v11413_v15, 5  ;;  %v11241_v24 = vld [vmem:[#allocation3 + $0x78] sm:$0xf]  ;;  %v18578_v36 = vpop.f32.mrf.mxu1 }
 0x3e1   : > { %v11393_v63 = vrot.slane %v11392_v51, 4  ;;  %v11421_v58 = vrot.slane %v11419_v17, 5  ;;  %v11425_v9 = vrot.slane %v11423_v5, 4  ;;  %15311 = vmatprep.subr.bf16.mxu1 %v15654_v38  ;;  %v11429_v59 = vshll.u32 %v11237_v19, 16  ;;  %v11242_v19 = vld [vmem:[#allocation3 + $0x7c] sm:$0xf] }
 0x3e2   : > { %v11403_v22 = vrot.slane %v11402_v23, 4  ;;  %v18563_v31 = vadd.f32 %v8119_v26, %v18417_v16  ;;  %v18566_v54 = vadd.f32 %v14992_v46, %v18432_v25  ;;  %v18570_v18 = vadd.f32 %v18482_v34, %v18276_v48  ;;  %v15647_v48 = vld [vmem:[#allocation3 + $0x6c] sm:$0xff]   ;;  %v18585_v5 = vpop.f32.mrf.mxu0  ;;  %v11243_v23 = vld [vmem:[#allocation3 + $0x80] sm:$0x1] }
 0x3e3   : > { %v13952_v47 = vcombine.low %v11374_v20, %v11384_v27  ;;  %v11416_v29 = vor.u32 %v11415_v57, %v11412_v41  ;;  %v11426_v62 = vor.u32 %v11425_v9, %v11421_v58  ;;  %v18574_v14 = vadd.f32 %v18493_v61, %v18305_v7  ;;  %v15660_v7 = vld [vmem:[#allocation10 + $0x200] sm:$0xff]   ;;  %v11244_v41 = vld [vmem:[#allocation3 + $0x84] sm:$0xf]  ;;  %v18591_v57 = vpop.f32.mrf.mxu1 }
 0x3e4   : > { %15274 = vmatmul.mubr.bf16.gmra.mxu0 %v13951_v10  ;;  %v11408_v16 = vsel %vm16125_vm7, %v11403_v22, %v11407_v0  ;;  %v11434_v55 = vshrl.u32 %v11238_v50, 16  ;;  %v11437_v25 = vshll.u32 %v11238_v50, 16  ;;  %15312 = vmatpush3.bf16.msra.mxu1 %v15654_v38  ;;  %v11431_v3 = vrot.slane %v11429_v59, 5  ;;  %v15649_v61 = vld [vmem:[#allocation3 + $0x78] sm:$0xff]  }
 0x3e5   : > { %15277 = vmatprep.mubr.bf16.mxu0 %v13952_v47  ;;  %v11417_v34 = vrot.slane %v11416_v29, 4  ;;  %v11427_v11 = vrot.slane %v11426_v62, 4  ;;  %v11443_v15 = vshll.u32 %v11239_v28, 16  ;;  %15313 = vmatprep.subr.bf16.mxu1 %v15657_v53  ;;  %v11398_v10 = vsel %vm16125_vm7, %v11393_v63, %v18552_v2 }
 0x3e6   : > { %v11436_v26 = vrot.slane %v11434_v55, 4  ;;  %v11439_v20 = vrot.slane %v11437_v25, 5  ;;  %v11447_v51 = vshrl.u32 %v11239_v28, 16  ;;  %v13953_v38 = vcombine.low %v11398_v10, %v11408_v16 }
 0x3e7   : > { %15234 = vmatmul.mubr.bf16.gmra.mxu1 %v15647_v48  ;;  %v11432_v17 = vsel %vm16125_vm7, %v11427_v11, %v11431_v3  ;;  %v18587_v27 = vrot.slane %v11443_v15, 5  ;;  %v11458_v0 = vshrl.u32 %v11241_v24, 16  ;;  %v11422_v2 = vsel %vm16125_vm7, %v11417_v34, %v11421_v58  ;;  %v11245_v34 = vld [vmem:[#allocation3 + $0x88] sm:$0xf]  ;;  %v18597_v15 = vpop.f32.mrf.mxu1 }
 0x3e8   : > { %15237 = vmatprep.mubr.bf16.mxu1 %v15649_v61  ;;  %v11440_v46 = vor.u32 %v11439_v20, %v11436_v26  ;;  %v11449_v50 = vrot.slane %v11447_v51, 4  ;;  %v11453_v63 = vshll.u32 %v11240_v8, 16  ;;  %15314 = vmatpush3.bf16.msra.mxu1 %v15657_v53  ;;  %v11461_v22 = vshll.u32 %v11241_v24, 16  ;;  %v15650_v61 = vld [vmem:[#allocation3 + $0x84] sm:$0xff]   ;;  %v11246_v51 = vld [vmem:[#allocation3 + $0x8c] sm:$0x1] }
 0x3e9   : > { %v11460_v9 = vrot.slane %v11458_v0, 4  ;;  %v11467_v59 = vshll.u32 %v11242_v19, 16  ;;  %v11471_v28 = vshrl.u32 %v11242_v19, 16  ;;  %15315 = vmatprep.subr.bf16.mxu1 %v15660_v7  ;;  %v13954_v47 = vcombine.low %v11422_v2, %v11432_v17  ;;  %v11247_v2 = vld [vmem:[#allocation3 + $0x90] sm:$0xf] }
 0x3ea   : > { %v11450_v29 = vor.u32 %v11449_v50, %v18587_v27  ;;  %v11477_v62 = vshll.u32 %v11243_v23, 16  ;;  %v11482_v16 = vshrl.u32 %v11244_v41, 16  ;;  %v11463_v25 = vrot.slane %v11461_v22, 5  ;;  %v15652_v23 = vld [vmem:[#allocation3 + $0x90] sm:$0xff]  }
 0x3eb   : > { %v11469_v48 = vrot.slane %v11467_v59, 5  ;;  %v11473_v58 = vrot.slane %v11471_v28, 4  ;;  %v11485_v11 = vshll.u32 %v11244_v41, 16  ;;  %v11441_v53 = vrot.slane %v11440_v46, 4 }
 0x3ec   : > { %v14995_v55 = vpop.f32.mrf.mxu0  ;;  %15278 = vmatmul.mubr.bf16.gmra.mxu0 %v13953_v38  ;;  %v11451_v24 = vrot.slane %v11450_v29, 4  ;;  %v11455_v3 = vrot.slane %v11453_v63, 5  ;;  %15316 = vmatpush3.bf16.msra.mxu1 %v15660_v7  ;;  %v11464_v10 = vor.u32 %v11463_v25, %v11460_v9  ;;  %v11484_v19 = vrot.slane %v11482_v16, 4  ;;  %v18607_v29 = vpop.f32.mrf.mxu1  ;;  %v11249_v25 = vld [vmem:[#allocation3 + $0x98] sm:$0x1] }
 0x3ed   : > { %v18595_v8 = vadd.f32 %v14995_v55, %v18457_v13  ;;  %15281 = vmatprep.mubr.bf16.mxu0 %v13954_v47  ;;  %v11474_v26 = vor.u32 %v11473_v58, %v11469_v48  ;;  %v11487_v17 = vrot.slane %v11485_v11, 5  ;;  %v11479_v0 = vrot.slane %v11477_v62, 5 }
 0x3ee   : > { %v8135_v20 = vpop.f32.mrf.mxu0  ;;  %v11491_v13 = vshll.u32 %v11245_v34, 16  ;;  %v11495_v41 = vshrl.u32 %v11245_v34, 16  ;;  %v11456_v7 = vsel %vm16125_vm7, %v11451_v24, %v11455_v3  ;;  %v11465_v46 = vrot.slane %v11464_v10, 4  ;;  %v11251_v10 = vld [vmem:[#allocation3 + $0xa0] sm:$0xf] }
 0x3ef   : > { %v18600_v38 = vadd.f32 %v8135_v20, %v18467_v45  ;;  %15238 = vmatmul.mubr.bf16.gmra.mxu1 %v15650_v61  ;;  %v11475_v50 = vrot.slane %v11474_v26, 4  ;;  %v11488_v9 = vor.u32 %v11487_v17, %v11484_v19  ;;  %v11501_v47 = vshll.u32 %v11246_v51, 16  ;;  %v11248_v45 = vld [vmem:[#allocation3 + $0x94] sm:$0xf] }
 0x3f0   : > { %v14996_v63 = vpop.f32.mrf.mxu0  ;;  %15241 = vmatprep.mubr.bf16.mxu1 %v15652_v23  ;;  %v11493_v59 = vrot.slane %v11491_v13, 5  ;;  %v11497_v28 = vrot.slane %v11495_v41, 4  ;;  %v11446_v62 = vsel %vm16125_vm7, %v11441_v53, %v18587_v27  ;;  %v11470_v16 = vsel %vm16125_vm7, %v11465_v46, %v11469_v48  ;;  %v15653_v53 = vld [vmem:[#allocation3 + $0x9c] sm:$0xff]  }
 0x3f1   : > { %v18605_v22 = vadd.f32 %v14996_v63, %v18484_v33  ;;  %v11480_v55 = vsel %vm16125_vm7, %v11475_v50, %v11479_v0  ;;  %v11506_v58 = vshrl.u32 %v11247_v2, 16  ;;  %v11250_v33 = vld [vmem:[#allocation3 + $0x9c] sm:$0xf]  ;;  %v13955_v34 = vcombine.low %v11446_v62, %v11456_v7  ;;  %v18618_v0 = vpop.f32.mrf.mxu1  ;;  %v11252_v7 = vld [vmem:[#allocation3 + $0xa4] sm:$0x1] }
 0x3f2   : > { %v13956_v11 = vcombine.low %v11470_v16, %v11480_v55  ;;  %v18616_v24 = vpop.f32.mrf.mxu0  ;;  %v11489_v3 = vrot.slane %v11488_v9, 4  ;;  %v11498_v61 = vor.u32 %v11497_v28, %v11493_v59  ;;  %v11503_v26 = vrot.slane %v11501_v47, 5  ;;  %v15655_v9 = vld [vmem:[#allocation3 + $0xa8] sm:$0xff]  }
 0x3f3   : > { %v11508_v20 = vrot.slane %v11506_v58, 4  ;;  %v11509_v51 = vshll.u32 %v11247_v2, 16  ;;  %v11515_v27 = vshll.u32 %v11248_v45, 16  ;;  %v11519_v19 = vshrl.u32 %v11248_v45, 16  ;;  %v11253_v62 = vld [vmem:[#allocation3 + $0xa8] sm:$0xf] }
 0x3f4   : > { %15282 = vmatmul.mubr.bf16.gmra.mxu0 %v13955_v34  ;;  %v11499_v48 = vrot.slane %v11498_v61, 4  ;;  %v11525_v17 = vshll.u32 %v11249_v25, 16  ;;  %v11530_v23 = vshrl.u32 %v11250_v33, 16  ;;  %v11533_v46 = vshll.u32 %v11250_v33, 16 }
 0x3f5   : > { %15285 = vmatprep.mubr.bf16.mxu0 %v13956_v11  ;;  %v11511_v13 = vrot.slane %v11509_v51, 5  ;;  %v11517_v41 = vrot.slane %v11515_v27, 5  ;;  %v11539_v50 = vshll.u32 %v11251_v10, 16  ;;  %v11494_v2 = vsel %vm16125_vm7, %v11489_v3, %v11493_v59  ;;  %v18627_v59 = vpop.f32.mrf.mxu1 }
 0x3f6   : > { %v11504_v28 = vsel %vm16125_vm7, %v11499_v48, %v11503_v26  ;;  %v11521_v47 = vrot.slane %v11519_v19, 4  ;;  %v11532_v45 = vrot.slane %v11530_v23, 4  ;;  %v11527_v25 = vrot.slane %v11525_v17, 5 }
 0x3f7   : > { %v14999_v63 = vpop.f32.mrf.mxu0  ;;  %15242 = vmatmul.mubr.bf16.gmra.mxu1 %v15653_v53  ;;  %v11512_v55 = vor.u32 %v11511_v13, %v11508_v20  ;;  %v11535_v58 = vrot.slane %v11533_v46, 5  ;;  %v11541_v11 = vrot.slane %v11539_v50, 5  ;;  %v11543_v61 = vshrl.u32 %v11251_v10, 16  ;;  %v11254_v53 = vld [vmem:[#allocation3 + $0xac] sm:$0xf] }
 0x3f8   : > { %v18625_v16 = vadd.f32 %v14999_v63, %v18497_v4  ;;  %15245 = vmatprep.mubr.bf16.mxu1 %v15655_v9  ;;  %v11522_v33 = vor.u32 %v11521_v47, %v11517_v41  ;;  %v11549_v51 = vshll.u32 %v11252_v7, 16  ;;  %v11554_v48 = vshrl.u32 %v11253_v62, 16  ;;  %v11255_v46 = vld [vmem:[#allocation3 + $0xb0] sm:$0x1]  ;;  %v18641_v47 = vpop.f32.mrf.mxu1 }
 0x3f9   : > { %v8151_v34 = vpop.f32.mrf.mxu0  ;;  %v11513_v3 = vrot.slane %v11512_v55, 4  ;;  %v11536_v27 = vor.u32 %v11535_v58, %v11532_v45  ;;  %v13957_v4 = vcombine.low %v11494_v2, %v11504_v28  ;;  %v11545_v17 = vrot.slane %v11543_v61, 4  ;;  %v11256_v45 = vld [vmem:[#allocation3 + $0xb4] sm:$0xf]  ;;  %v15658_v61 = vld [vmem:[#allocation3 + $0xc0] sm:$0xff]  }
 0x3fa   : > { %v18630_v26 = vadd.f32 %v8151_v34, %v18513_v43  ;;  %v11523_v19 = vrot.slane %v11522_v33, 4  ;;  %v11557_v23 = vshll.u32 %v11253_v62, 16  ;;  %v11556_v50 = vrot.slane %v11554_v48, 4  ;;  %v11257_v33 = vld [vmem:[#allocation3 + $0xb8] sm:$0xf] }
 0x3fb   : > { %v15000_v20 = vpop.f32.mrf.mxu0  ;;  %v11518_v13 = vsel %vm16125_vm7, %v11513_v3, %v11517_v41  ;;  %v11537_v7 = vrot.slane %v11536_v27, 4  ;;  %v11546_v9 = vor.u32 %v11545_v17, %v11541_v11  ;;  %v11563_v28 = vshll.u32 %v11254_v53, 16  ;;  %v15656_v41 = vld [vmem:[#allocation3 + $0xb4] sm:$0xff]  }
 0x3fc   : > { %v18635_v10 = vadd.f32 %v15000_v20, %v18523_v44  ;;  %15286 = vmatmul.mubr.bf16.gmra.mxu0 %v13957_v4  ;;  %v11528_v43 = vsel %vm16125_vm7, %v11523_v19, %v11527_v25  ;;  %v11559_v2 = vrot.slane %v11557_v23, 5  ;;  %v11551_v55 = vrot.slane %v11549_v51, 5  ;;  %v11258_v20 = vld [vmem:[#allocation3 + $0xbc] sm:$0x1] }
 0x3fd   : > { %v18639_v63 = vpop.f32.mrf.mxu0  ;;  %v13958_v62 = vcombine.low %v11518_v13, %v11528_v43  ;;  %v11542_v44 = vsel %vm16125_vm7, %v11537_v7, %v11541_v11  ;;  %v11567_v58 = vshrl.u32 %v11254_v53, 16  ;;  %v11547_v3 = vrot.slane %v11546_v9, 4  ;;  %v18650_v43 = vpop.f32.mrf.mxu1 }
 0x3fe   : > { %v11560_v25 = vor.u32 %v11559_v2, %v11556_v50  ;;  %v11565_v27 = vrot.slane %v11563_v28, 5  ;;  %v11573_v48 = vshll.u32 %v11255_v46, 16  ;;  %v11578_v17 = vshrl.u32 %v11256_v45, 16  ;;  %v12035_v50 = vld [vmem:[#allocation3 + $0x18] sm:$0xe] }
 0x3ff   : > { %v15003_v34 = vpop.f32.mrf.mxu0  ;;  %15289 = vmatprep.mubr.bf16.mxu0 %v13958_v62  ;;  %15246 = vmatmul.mubr.bf16.gmra.mxu1 %v15656_v41  ;;  %v11569_v19 = vrot.slane %v11567_v58, 4  ;;  %v11581_v23 = vshll.u32 %v11256_v45, 16  ;;  %v11552_v11 = vsel %vm16125_vm7, %v11547_v3, %v11551_v55  ;;  %v11587_v7 = vshll.u32 %v11257_v33, 16  ;;  %v12036_v28 = vld [vmem:[#allocation3 + $0x1c] sm:$0xf] }
 0x400   : > { %v18646_v4 = vadd.f32 %v15003_v34, %v18547_v30  ;;  %15249 = vmatprep.mubr.bf16.mxu1 %v15658_v61  ;;  %v11561_v51 = vrot.slane %v11560_v25, 4  ;;  %v11575_v53 = vrot.slane %v11573_v48, 5  ;;  %v13959_v46 = vcombine.low %v11542_v44, %v11552_v11  ;;  %v12037_v62 = vld [vmem:[#allocation3 + $0x20] sm:$0x1]  ;;  %v15659_v44 = vld [vmem:[#allocation3 + $0xcc] sm:$0xff]  }
 0x401   : > { %v8167_v13 = vpop.f32.mrf.mxu0  ;;  %v11570_v9 = vor.u32 %v11569_v19, %v11565_v27  ;;  %v11580_v2 = vrot.slane %v11578_v17, 4  ;;  %v11583_v55 = vrot.slane %v11581_v23, 5  ;;  %v11589_v58 = vrot.slane %v11587_v7, 5  ;;  %v11259_v61 = vld [vmem:[#allocation3 + $0xc0] sm:$0xf] }
 0x402   : > { %20064 = vst [vmem:[#allocation35_spill] sm:$0xff] %v18646_v4  ;;  %v18653_v30 = vadd.f32 %v8167_v13, %v18560_v56  ;;  %v11566_v45 = vsel %vm16125_vm7, %v11561_v51, %v11565_v27  ;;  %v11591_v34 = vshrl.u32 %v11257_v33, 16  ;;  %v11597_v48 = vshll.u32 %v11258_v20, 16  ;;  %v11260_v4 = vld [vmem:[#allocation3 + $0xc4] sm:$0xf]  ;;  %v18660_v27 = vpop.f32.mrf.mxu1 }
 0x403   : > { %v15004_v41 = vpop.f32.mrf.mxu0  ;;  %v11571_v3 = vrot.slane %v11570_v9, 4  ;;  %v13972_v19 = vrot.slane %v12035_v50, 9  ;;  %v11584_v17 = vor.u32 %v11583_v55, %v11580_v2  ;;  %v12133_v13 = vrot.slane %v12036_v28, 5  ;;  %v11261_v9 = vld [vmem:[#allocation3 + $0xc8] sm:$0x1] }
 0x404   : > { %20065 = vst [vmem:[#allocation24_spill] sm:$0xff] %v18653_v30  ;;  %v18658_v25 = vadd.f32 %v15004_v41, %v18578_v36  ;;  %15290 = vmatmul.mubr.bf16.gmra.mxu0 %v13959_v46  ;;  %v11593_v11 = vrot.slane %v11591_v34, 4  ;;  %v12136_v30 = vrot.slane %v12037_v62, 5  ;;  %v11599_v36 = vrot.slane %v11597_v48, 5  ;;  %v12038_v48 = vld [vmem:[#allocation3 + $0x24] sm:$0xe] }
 0x405   : > { %v8170_v56 = vpop.f32.mrf.mxu0  ;;  %v11576_v33 = vsel %vm16125_vm7, %v11571_v3, %v11575_v53  ;;  %v11602_v51 = vshrl.u32 %v11259_v61, 16  ;;  %v11585_v20 = vrot.slane %v11584_v17, 4  ;;  %v12134_v46 = vsel %vm16346_vm13, %v13972_v19, %v12133_v13  ;;  %v18674_v3 = vpop.f32.mrf.mxu1  ;;  %v12039_v19 = vld [vmem:[#allocation3 + $0x28] sm:$0xf] }
 0x406   : > { %v18665_v23 = vadd.f32 %v8170_v56, %v18591_v57  ;;  %v13960_v7 = vcombine.low %v11566_v45, %v11576_v33  ;;  %v11594_v50 = vor.u32 %v11593_v11, %v11589_v58  ;;  %v12135_v28 = vrot.slane %v12133_v13, 4  ;;  %v12040_v13 = vld [vmem:[#allocation3 + $0x2c] sm:$0x1] }
 0x407   : > { %15250 = vmatmul.mubr.bf16.gmra.mxu1 %v15659_v44  ;;  %v15007_v2 = vpop.f32.mrf.mxu0  ;;  %v11604_v62 = vrot.slane %v11602_v51, 4  ;;  %v11605_v41 = vshll.u32 %v11259_v61, 16  ;;  %v11611_v55 = vshll.u32 %v11260_v4, 16  ;;  %v11590_v57 = vsel %vm16125_vm7, %v11585_v20, %v11589_v58 }
 0x408   : > { %15293 = vmatprep.mubr.bf16.mxu0 %v13960_v7  ;;  %v18670_v53 = vadd.f32 %v15007_v2, %v18597_v15  ;;  %v11595_v45 = vrot.slane %v11594_v50, 4  ;;  %v11615_v34 = vshrl.u32 %v11260_v4, 16  ;;  %v12137_v44 = vsel %vm16346_vm13, %v12135_v28, %v12136_v30  ;;  %v11262_v4 = vld [vmem:[#allocation3 + $0xcc] sm:$0xf] }
 0x409   : > { %v11607_v56 = vrot.slane %v11605_v41, 5  ;;  %v11613_v17 = vrot.slane %v11611_v55, 5  ;;  %v11621_v61 = vshll.u32 %v11261_v9, 16  ;;  %v8183_v11 = vpop.f32.mrf.mxu0  ;;  %v13988_v33 = vcombine.low %v12134_v46, %v12137_v44 }
 0x40a   : > { %20066 = vst [vmem:[#allocation25_spill] sm:$0xff] %v18670_v53  ;;  %v11600_v15 = vsel %vm16125_vm7, %v11595_v45, %v11599_v36  ;;  %v11617_v51 = vrot.slane %v11615_v34, 4  ;;  %v18681_v58 = vadd.f32 %v8183_v11, %v18607_v29  ;;  %v13973_v53 = vrot.slane %v12038_v48, 9  ;;  %v11263_v36 = vld [vmem:[#allocation3 + $0xd0] sm:$0xf] }
 0x40b   : > { %v13961_v7 = vcombine.low %v11590_v57, %v11600_v15  ;;  %v11608_v20 = vor.u32 %v11607_v56, %v11604_v62  ;;  %v11623_v50 = vrot.slane %v11621_v61, 5  ;;  %v15008_v2 = vpop.f32.mrf.mxu0  ;;  %15317 = vmatprep.mubr.bf16.mxu1 %v13988_v33  ;;  %v12140_v41 = vrot.slane %v12039_v19, 5  ;;  %v11264_v57 = vld [vmem:[#allocation3 + $0xd4] sm:$0x1] }
 0x40c   : > { %v11618_v30 = vor.u32 %v11617_v51, %v11613_v17  ;;  %v18684_v9 = vadd.f32 %v15008_v2, %v18618_v0  ;;  %v12143_v55 = vrot.slane %v12040_v13, 5  ;;  %v11626_v62 = vshrl.u32 %v11262_v4, 16 }
 0x40d   : > { %v15031_v28 = vpop.f32.mrf.mxu1  ;;  %15294 = vmatmul.mubr.bf16.gmra.mxu0 %v13961_v7  ;;  %v11609_v46 = vrot.slane %v11608_v20, 4  ;;  %v8186_v45 = vpop.f32.mrf.mxu0  ;;  %v11629_v34 = vshll.u32 %v11262_v4, 16  ;;  %v12141_v0 = vsel %vm16346_vm13, %v13973_v53, %v12140_v41  ;;  %v12142_v56 = vrot.slane %v12140_v41, 4  ;;  %v12041_v7 = vld [vmem:[#allocation3 + $0x30] sm:$0xe] }
 0x40e   : > { %v18687_v29 = vadd.f32 %v15031_v28, %v18491_v37  ;;  %v11619_v44 = vrot.slane %v11618_v30, 4  ;;  %v18690_v48 = vadd.f32 %v8186_v45, %v18627_v59  ;;  %v11628_v11 = vrot.slane %v11626_v62, 4  ;;  %v12042_v37 = vld [vmem:[#allocation3 + $0x34] sm:$0xf]  ;;  %v12043_v41 = vld [vmem:[#allocation3 + $0x38] sm:$0x1] }
 0x40f   : > { %v8681_v19 = vpop.f32.mrf.mxu1  ;;  %v11614_v61 = vsel %vm16125_vm7, %v11609_v46, %v11613_v17  ;;  %v11631_v13 = vrot.slane %v11629_v34, 5  ;;  %v11635_v15 = vshll.u32 %v11263_v36, 16  ;;  %v12144_v51 = vsel %vm16346_vm13, %v12142_v56, %v12143_v55 }
 0x410   : > { %v11624_v33 = vsel %vm16125_vm7, %v11619_v44, %v11623_v50  ;;  %v11639_v59 = vshrl.u32 %v11263_v36, 16  ;;  %v11645_v4 = vshll.u32 %v11264_v57, 16  ;;  %v13989_v2 = vcombine.low %v12141_v0, %v12144_v51  ;;  %v12044_v44 = vld [vmem:[#allocation3 + $0x3c] sm:$0xe]  ;;  %v12045_v0 = vld [vmem:[#allocation3 + $0x40] sm:$0xf] }
 0x411   : > { %v15032_v20 = vpop.f32.mrf.mxu1  ;;  %v13962_v53 = vcombine.low %v11614_v61, %v11624_v33  ;;  %v11632_v30 = vor.u32 %v11631_v13, %v11628_v11  ;;  %v11637_v28 = vrot.slane %v11635_v15, 5  ;;  %v8251_v17 = vadd.f32 %v18536_v35, %v18380_v49  ;;  %v12046_v15 = vld [vmem:[#allocation3 + $0x44] sm:$0x1]  ;;  %v12047_v51 = vld [vmem:[#allocation3 + $0x48] sm:$0xe] }
 0x412   : > { %v11641_v46 = vrot.slane %v11639_v59, 4  ;;  %v11647_v45 = vrot.slane %v11645_v4, 5  ;;  %v12147_v62 = vrot.slane %v12042_v37, 5  ;;  %15318 = vmatmul.mubr.bf16.vlgmr.msra.gmra.mxu1 %v13989_v2  ;;  %v13974_v55 = vrot.slane %v12041_v7, 9  ;;  %v12048_v37 = vld [vmem:[#allocation3 + $0x4c] sm:$0xf] }
 0x413   : > { %v8684_v34 = vpop.f32.mrf.mxu1  ;;  %15297 = vmatprep.mubr.bf16.mxu0 %v13962_v53  ;;  %v11633_v50 = vrot.slane %v11632_v30, 4  ;;  %v18703_v36 = vadd.f32 %v8681_v19, %v18511_v60  ;;  %v18706_v57 = vadd.f32 %v15032_v20, %v18570_v18  ;;  %v12150_v49 = vrot.slane %v12043_v41, 5  ;;  %v12049_v53 = vld [vmem:[#allocation3 + $0x50] sm:$0x1] }
 0x414   : > { %v15011_v56 = vpop.f32.mrf.mxu0  ;;  %v11642_v61 = vor.u32 %v11641_v46, %v11637_v28  ;;  %v12149_v11 = vrot.slane %v12147_v62, 4  ;;  %v18709_v35 = vadd.f32 %v8684_v34, %v18574_v14  ;;  %v12148_v18 = vsel %vm16346_vm13, %v13974_v55, %v12147_v62 }
 0x415   : > { %v15035_v13 = vpop.f32.mrf.mxu1  ;;  %v18712_v33 = vadd.f32 %v15011_v56, %v18641_v47  ;;  %v11638_v60 = vsel %vm16125_vm7, %v11633_v50, %v11637_v28  ;;  %v13975_v7 = vrot.slane %v12044_v44, 9  ;;  %v12154_v20 = vrot.slane %v12045_v0, 5 }
 0x416   : > { %v18719_v19 = vadd.f32 %v15035_v13, %v18519_v39  ;;  %v11643_v59 = vrot.slane %v11642_v61, 4  ;;  %v12151_v14 = vsel %vm16346_vm13, %v12149_v11, %v12150_v49  ;;  %v8199_v4 = vpop.f32.mrf.mxu0  ;;  %v12157_v28 = vrot.slane %v12046_v15, 5  ;;  %v12051_v61 = vld [vmem:[#allocation3 + $0x58] sm:$0xf] }
 0x417   : > { %v8697_v47 = vpop.f32.mrf.mxu1  ;;  %v13990_v2 = vcombine.low %v12148_v18, %v12151_v14  ;;  %v18724_v30 = vadd.f32 %v8199_v4, %v18650_v43  ;;  %v12161_v41 = vrot.slane %v12048_v37, 5  ;;  %v12155_v62 = vsel %vm16346_vm13, %v13975_v7, %v12154_v20  ;;  %v12052_v14 = vld [vmem:[#allocation3 + $0x5c] sm:$0x1] }
 0x418   : > { %v11648_v39 = vsel %vm16125_vm7, %v11643_v59, %v11647_v45  ;;  %v15012_v46 = vpop.f32.mrf.mxu0  ;;  %v12156_v34 = vrot.slane %v12154_v20, 4  ;;  %v13976_v50 = vrot.slane %v12047_v51, 9  ;;  %v12164_v43 = vrot.slane %v12049_v53, 5  ;;  %v12055_v53 = vld [vmem:[#allocation3 + $0x68] sm:$0x1] }
 0x419   : > { %v15036_v55 = vpop.f32.mrf.mxu1  ;;  %v13963_v44 = vcombine.low %v11638_v60, %v11648_v39  ;;  %15321 = vmatprep.mubr.bf16.mxu1 %v13990_v2  ;;  %v18731_v0 = vadd.f32 %v15012_v46, %v18660_v27  ;;  %v12163_v56 = vrot.slane %v12161_v41, 4  ;;  %v18738_v13 = vadd.f32 %v8697_v47, %v18531_v6  ;;  %v12054_v60 = vld [vmem:[#allocation3 + $0x64] sm:$0xf]  ;;  %v12053_v46 = vld [vmem:[#allocation3 + $0x60] sm:$0xe] }
 0x41a   : > { %v8202_v11 = vpop.f32.mrf.mxu0  ;;  %v12158_v49 = vsel %vm16346_vm13, %v12156_v34, %v12157_v28  ;;  %v12162_v45 = vsel %vm16346_vm13, %v13976_v50, %v12161_v41  ;;  %v18741_v15 = vadd.f32 %v15036_v55, %v18534_v12  ;;  %v12168_v20 = vrot.slane %v12051_v61, 5  ;;  %v18756_v28 = vld [vmem:[#allocation3 + $0x70] sm:$0xf] }
 0x41b   : > { %v8700_v37 = vpop.f32.mrf.mxu1  ;;  %15298 = vmatmul.mubr.bf16.gmra.mxu0 %v13963_v44  ;;  %v18744_v27 = vadd.f32 %v8202_v11, %v18674_v3  ;;  %v13991_v18 = vcombine.low %v12155_v62, %v12158_v49  ;;  %v12165_v51 = vsel %vm16346_vm13, %v12163_v56, %v12164_v43  ;;  %v12050_v3 = vld [vmem:[#allocation3 + $0x54] sm:$0xe]  ;;  %v12175_v2 = vrot.slane %v12054_v60, 5 }
 0x41c   : > { %v18748_v59 = vadd.f32 %v8700_v37, %v8251_v17  ;;  %v15079_v4 = vpop.f32.mrf.mxu0  ;;  %v13992_v7 = vcombine.low %v12162_v45, %v12165_v51  ;;  %v12170_v41 = vrot.slane %v12168_v20, 4  ;;  %v12171_v39 = vrot.slane %v12052_v14, 5 }
 0x41d   : > { %v15039_v6 = vpop.f32.mrf.mxu1  ;;  %15322 = vmatmul.mubr.bf16.gmra.mxu1 %v13991_v18  ;;  %v18751_v12 = vadd.f32 %v15079_v4, %v18687_v29  ;;  %v12177_v50 = vrot.slane %v12175_v2, 4  ;;  %v12178_v55 = vrot.slane %v12055_v53, 5  ;;  %v8255_v44 = vadd.f32 %v18585_v5, %v18442_v1 }
 0x41e   : > { %v18754_v47 = vadd.f32 %v15039_v6, %v18550_v21  ;;  %15325 = vmatprep.mubr.bf16.mxu1 %v13992_v7  ;;  %v9131_v17 = vpop.f32.mrf.mxu0  ;;  %v12060_v21 = vld [vmem:[#allocation3 + $0x7c] sm:$0xf]  ;;  %v13977_v43 = vrot.slane %v12050_v3, 9  ;;  %v12172_v61 = vsel %vm16346_vm13, %v12170_v41, %v12171_v39  ;;  %v12182_v49 = vrot.slane %v18756_v28, 5  ;;  %v12058_v7 = vld [vmem:[#allocation3 + $0x74] sm:$0x1] }
 0x41f   : > { %v8713_v62 = vpop.f32.mrf.mxu1  ;;  %v18759_v34 = vadd.f32 %v9131_v17, %v18703_v36  ;;  %v13978_v45 = vrot.slane %v12053_v46, 9  ;;  %v12189_v18 = vrot.slane %v12060_v21, 5  ;;  %v12059_v28 = vld [vmem:[#allocation3 + $0x78] sm:$0xe]  ;;  %v12061_v17 = vld [vmem:[#allocation3 + $0x80] sm:$0x1]  ;;  %v8259_v21 = vadd.f32 %v18616_v24, %v18495_v40 }
 0x420   : > { %v18762_v29 = vadd.f32 %v8713_v62, %v18563_v31  ;;  %v15080_v56 = vpop.f32.mrf.mxu0  ;;  %v12179_v31 = vsel %vm16346_vm13, %v12177_v50, %v12178_v55  ;;  %v12169_v1 = vsel %vm16346_vm13, %v13977_v43, %v12168_v20  ;;  %v12184_v3 = vrot.slane %v12182_v49, 4  ;;  %v12056_v41 = vld [vmem:[#allocation3 + $0x6c] sm:$0xe]  ;;  %v12063_v46 = vld [vmem:[#allocation3 + $0x88] sm:$0xf] }
 0x421   : > { %v15040_v11 = vpop.f32.mrf.mxu1  ;;  %v18770_v36 = vadd.f32 %v15080_v56, %v18706_v57  ;;  %v13993_v14 = vcombine.low %v12169_v1, %v12172_v61  ;;  %v12176_v57 = vsel %vm16346_vm13, %v13978_v45, %v12175_v2  ;;  %v12191_v39 = vrot.slane %v12189_v18, 4  ;;  %v12066_v55 = vld [vmem:[#allocation3 + $0x94] sm:$0xf] }
 0x422   : > { %v18775_v37 = vadd.f32 %v15040_v11, %v18566_v54  ;;  %v9134_v60 = vpop.f32.mrf.mxu0  ;;  %v13994_v53 = vcombine.low %v12176_v57, %v12179_v31  ;;  %v12185_v62 = vrot.slane %v12058_v7, 5  ;;  %v12192_v56 = vrot.slane %v12061_v17, 5  ;;  %v12067_v17 = vld [vmem:[#allocation3 + $0x98] sm:$0x1] }
 0x423   : > { %v8716_v5 = vpop.f32.mrf.mxu1  ;;  %v18780_v51 = vadd.f32 %v9134_v60, %v18709_v35  ;;  %v13979_v43 = vrot.slane %v12056_v41, 9  ;;  %v13980_v11 = vrot.slane %v12059_v28, 9  ;;  %v12196_v31 = vrot.slane %v12063_v46, 5  ;;  %v12065_v28 = vld [vmem:[#allocation3 + $0x90] sm:$0xe] }
 0x424   : > { %v18784_v4 = vadd.f32 %v8716_v5, %v8255_v44  ;;  %v15083_v6 = vpop.f32.mrf.mxu0  ;;  %v12186_v61 = vsel %vm16346_vm13, %v12184_v3, %v12185_v62  ;;  %v12193_v40 = vsel %vm16346_vm13, %v12191_v39, %v12192_v56  ;;  %v12062_v41 = vld [vmem:[#allocation3 + $0x84] sm:$0xe]  ;;  %v12069_v46 = vld [vmem:[#allocation3 + $0xa0] sm:$0xf]  ;;  %v12206_v56 = vrot.slane %v12067_v17, 5  ;;  %v20067_v17 = vld [vmem:[#allocation35_spill] sm:$0xff] }
 0x425   : > { %v15043_v54 = vpop.f32.mrf.mxu1  ;;  %15326 = vmatmul.mubr.bf16.gmra.mxu1 %v13993_v14  ;;  %v18787_v20 = vadd.f32 %v15083_v6, %v18719_v19  ;;  %v12183_v1 = vsel %vm16346_vm13, %v13979_v43, %v12182_v49  ;;  %v12064_v6 = vld [vmem:[#allocation3 + $0x8c] sm:$0x1]  ;;  %v12198_v3 = vrot.slane %v12196_v31, 4 }
 0x426   : > { %v18790_v35 = vadd.f32 %v15043_v54, %v18595_v8  ;;  %15329 = vmatprep.mubr.bf16.mxu1 %v13994_v53  ;;  %v9147_v2 = vpop.f32.mrf.mxu0  ;;  %v13995_v57 = vcombine.low %v12183_v1, %v12186_v61  ;;  %v13982_v61 = vrot.slane %v12065_v28, 9  ;;  %v12073_v28 = vld [vmem:[#allocation3 + $0xb0] sm:$0x1] }
 0x427   : > { %v8729_v50 = vpop.f32.mrf.mxu1  ;;  %v18795_v44 = vadd.f32 %v9147_v2, %v18738_v13  ;;  %v12203_v13 = vrot.slane %v12066_v55, 5  ;;  %v12199_v2 = vrot.slane %v12064_v6, 5  ;;  %v8263_v55 = vadd.f32 %v18639_v63, %v18538_v42  ;;  %v12070_v6 = vld [vmem:[#allocation3 + $0xa4] sm:$0x1] }
 0x428   : > { %v18798_v19 = vadd.f32 %v8729_v50, %v18600_v38  ;;  %v15084_v8 = vpop.f32.mrf.mxu0  ;;  %v12072_v50 = vld [vmem:[#allocation3 + $0xac] sm:$0xf] }
 0x429   : > { %v15044_v45 = vpop.f32.mrf.mxu1  ;;  %v18803_v60 = vadd.f32 %v15084_v8, %v18741_v15  ;;  %v12190_v15 = vsel %vm16346_vm13, %v13980_v11, %v12189_v18  ;;  %v12205_v39 = vrot.slane %v12203_v13, 4  ;;  %v13981_v8 = vrot.slane %v12062_v41, 9  ;;  %v12068_v41 = vld [vmem:[#allocation3 + $0x9c] sm:$0xe] }
 0x42a   : > { %v18808_v24 = vadd.f32 %v15044_v45, %v18605_v22  ;;  %v9150_v38 = vpop.f32.mrf.mxu0  ;;  %v13996_v54 = vcombine.low %v12190_v15, %v12193_v40  ;;  %v12200_v43 = vsel %vm16346_vm13, %v12198_v3, %v12199_v2  ;;  %v12210_v45 = vrot.slane %v12069_v46, 5  ;;  %v12071_v3 = vld [vmem:[#allocation3 + $0xa8] sm:$0xe]  ;;  %v12075_v46 = vld [vmem:[#allocation3 + $0xb8] sm:$0xf] }
 0x42b   : > { %v8732_v5 = vpop.f32.mrf.mxu1  ;;  %v18813_v14 = vadd.f32 %v9150_v38, %v18748_v59  ;;  %v12207_v42 = vsel %vm16346_vm13, %v12205_v39, %v12206_v56  ;;  %v12197_v38 = vsel %vm16346_vm13, %v13981_v8, %v12196_v31  ;;  %v20068_v56 = vld [vmem:[#allocation24_spill] sm:$0xff]  ;;  %v13983_v8 = vrot.slane %v12068_v41, 9 }
 0x42c   : > { %v18817_v7 = vadd.f32 %v8732_v5, %v8259_v21  ;;  %v15087_v53 = vpop.f32.mrf.mxu0 }
 0x42d   : > { %v15047_v22 = vpop.f32.mrf.mxu1  ;;  %15330 = vmatmul.mubr.bf16.gmra.mxu1 %v13995_v57  ;;  %v18820_v49 = vadd.f32 %v15087_v53, %v18754_v47  ;;  %v13997_v57 = vcombine.low %v12197_v38, %v12200_v43 }
 0x42e   : > { %v18823_v59 = vadd.f32 %v15047_v22, %v18625_v16  ;;  %15333 = vmatprep.mubr.bf16.mxu1 %v13996_v54  ;;  %v9163_v18 = vpop.f32.mrf.mxu0  ;;  %v12212_v22 = vrot.slane %v12210_v45, 4 }
 0x42f   : > { %v8745_v62 = vpop.f32.mrf.mxu1  ;;  %v18828_v21 = vadd.f32 %v9163_v18, %v18762_v29  ;;  %v12217_v29 = vrot.slane %v12072_v50, 5  ;;  %v12213_v18 = vrot.slane %v12070_v6, 5 }
 0x430   : > { %v18831_v47 = vadd.f32 %v8745_v62, %v18630_v26  ;;  %v15088_v16 = vpop.f32.mrf.mxu0  ;;  %v12078_v62 = vld [vmem:[#allocation3 + $0xc4] sm:$0xf] }
 0x431   : > { %v15048_v11 = vpop.f32.mrf.mxu1  ;;  %v18836_v40 = vadd.f32 %v15088_v16, %v18775_v37  ;;  %v12204_v37 = vsel %vm16346_vm13, %v13982_v61, %v12203_v13  ;;  %v12219_v39 = vrot.slane %v12217_v29, 4  ;;  %v12214_v43 = vsel %vm16346_vm13, %v12212_v22, %v12213_v18  ;;  %v12076_v22 = vld [vmem:[#allocation3 + $0xbc] sm:$0x1] }
 0x432   : > { %v18841_v63 = vadd.f32 %v15048_v11, %v18635_v10  ;;  %v9166_v26 = vpop.f32.mrf.mxu0  ;;  %v13998_v54 = vcombine.low %v12204_v37, %v12207_v42  ;;  %v13984_v61 = vrot.slane %v12071_v3, 9  ;;  %v12224_v42 = vrot.slane %v12075_v46, 5  ;;  %v12081_v3 = vld [vmem:[#allocation3 + $0xd0] sm:$0xf]  ;;  %v20069_v46 = vld [vmem:[#allocation25_spill] sm:$0xff] }
 0x433   : > { %v8748_v1 = vpop.f32.mrf.mxu1  ;;  %v18846_v5 = vadd.f32 %v9166_v26, %v18784_v4  ;;  %v12211_v37 = vsel %vm16346_vm13, %v13983_v8, %v12210_v45 }
 0x434   : > { %v18850_v15 = vadd.f32 %v8748_v1, %v8263_v55  ;;  %v15091_v53 = vpop.f32.mrf.mxu0  ;;  %v12220_v55 = vrot.slane %v12073_v28, 5  ;;  %v12231_v1 = vrot.slane %v12078_v62, 5  ;;  %v12226_v41 = vrot.slane %v12224_v42, 4  ;;  %v12077_v62 = vld [vmem:[#allocation3 + $0xc0] sm:$0xe] }
 0x435   : > { %v15051_v10 = vpop.f32.mrf.mxu1  ;;  %15334 = vmatmul.mubr.bf16.gmra.mxu1 %v13997_v57  ;;  %v18853_v31 = vadd.f32 %v15091_v53, %v18790_v35 }
 0x436   : > { %v18856_v4 = vadd.f32 %v15051_v10, %v20067_v17  ;;  %15337 = vmatprep.mubr.bf16.mxu1 %v13998_v54  ;;  %v9179_v13 = vpop.f32.mrf.mxu0  ;;  %v12221_v38 = vsel %vm16346_vm13, %v12219_v39, %v12220_v55  ;;  %v13999_v54 = vcombine.low %v12211_v37, %v12214_v43  ;;  %v12079_v39 = vld [vmem:[#allocation3 + $0xc8] sm:$0x1]  ;;  %v12233_v18 = vrot.slane %v12231_v1, 4  ;;  %v12080_v43 = vld [vmem:[#allocation3 + $0xcc] sm:$0xe] }
 0x437   : > { %v8761_v2 = vpop.f32.mrf.mxu1  ;;  %v18859_v50 = vadd.f32 %v9179_v13, %v18798_v19  ;;  %v12074_v13 = vld [vmem:[#allocation3 + $0xb4] sm:$0xe]  ;;  %v12238_v55 = vrot.slane %v12081_v3, 5  ;;  %v13987_v3 = vrot.slane %v12080_v43, 9 }
 0x438   : > { %v18862_v16 = vadd.f32 %v8761_v2, %v20068_v56  ;;  %v15092_v35 = vpop.f32.mrf.mxu0 }
 0x439   : > { %v15052_v11 = vpop.f32.mrf.mxu1  ;;  %v18867_v26 = vadd.f32 %v15092_v35, %v18808_v24  ;;  %v12218_v24 = vsel %vm16346_vm13, %v13984_v61, %v12217_v29  ;;  %v12227_v29 = vrot.slane %v12076_v22, 5  ;;  %v12234_v35 = vrot.slane %v12079_v39, 5  ;;  %v12082_v61 = vld [vmem:[#allocation3 + $0xd4] sm:$0x1] }
 0x43a   : > { %v18872_v19 = vadd.f32 %v15052_v11, %v18658_v25  ;;  %v9182_v57 = vpop.f32.mrf.mxu0  ;;  %v14000_v25 = vcombine.low %v12218_v24, %v12221_v38  ;;  %v13985_v11 = vrot.slane %v12074_v13, 9 }
 0x43b   : > { %v8764_v6 = vpop.f32.mrf.mxu1  ;;  %v18877_v53 = vadd.f32 %v9182_v57, %v18817_v7  ;;  %v12228_v38 = vsel %vm16346_vm13, %v12226_v41, %v12227_v29 }
 0x43c   : > { %v8861_v10 = vadd.f32 %v8764_v6, %v18665_v23  ;;  %v15095_v28 = vpop.f32.mrf.mxu0  ;;  %v13986_v6 = vrot.slane %v12077_v62, 9 }
 0x43d   : > { %v15055_v17 = vpop.f32.mrf.mxu1  ;;  %15338 = vmatmul.mubr.bf16.gmra.mxu1 %v13999_v54  ;;  %v18883_v45 = vadd.f32 %v15095_v28, %v18823_v59  ;;  %v12235_v54 = vsel %vm16346_vm13, %v12233_v18, %v12234_v35  ;;  %v12240_v28 = vrot.slane %v12238_v55, 4 }
 0x43e   : > { %v8866_v7 = vadd.f32 %v15055_v17, %v20069_v46  ;;  %15341 = vmatprep.mubr.bf16.mxu1 %v14000_v25  ;;  %v9195_v2 = vpop.f32.mrf.mxu0  ;;  %v12241_v25 = vrot.slane %v12082_v61, 5 }
 0x43f   : > { %v8777_v23 = vpop.f32.mrf.mxu1  ;;  %v18887_v56 = vadd.f32 %v9195_v2, %v18831_v47 }
 0x440   : > { %v8864_v8 = vadd.f32 %v8777_v23, %v18681_v58  ;;  %v15096_v59 = vpop.f32.mrf.mxu0  ;;  %v12225_v58 = vsel %vm16346_vm13, %v13985_v11, %v12224_v42  ;;  %v12242_v29 = vsel %vm16346_vm13, %v12240_v28, %v12241_v25 }
 0x441   : > { %v15056_v57 = vpop.f32.mrf.mxu1  ;;  %v18893_v37 = vadd.f32 %v15096_v59, %v18841_v63  ;;  %v14001_v41 = vcombine.low %v12225_v58, %v12228_v38  ;;  %v12232_v63 = vsel %vm16346_vm13, %v13986_v6, %v12231_v1 }
 0x442   : > { %v8867_v47 = vadd.f32 %v15056_v57, %v18684_v9  ;;  %v9198_v24 = vpop.f32.mrf.mxu0  ;;  %v14002_v13 = vcombine.low %v12232_v63, %v12235_v54 }
 0x443   : > { %v8780_v22 = vpop.f32.mrf.mxu1  ;;  %v18901_v17 = vadd.f32 %v9198_v24, %v18850_v15  ;;  %v12239_v15 = vsel %vm16346_vm13, %v13987_v3, %v12238_v55 }
 0x444   : > { %v8865_v39 = vadd.f32 %v8780_v22, %v18690_v48  ;;  %v15099_v46 = vpop.f32.mrf.mxu0 }
 0x445   : > { %v15059_v9 = vpop.f32.mrf.mxu1  ;;  %15342 = vmatmul.mubr.bf16.gmra.mxu1 %v14001_v41  ;;  %v18907_v18 = vadd.f32 %v15099_v46, %v18856_v4 }
 0x446   : > { %v8870_v42 = vadd.f32 %v15059_v9, %v18712_v33  ;;  %15345 = vmatprep.mubr.bf16.mxu1 %v14002_v13  ;;  %v9211_v2 = vpop.f32.mrf.mxu0  ;;  %v14003_v33 = vcombine.low %v12239_v15, %v12242_v29 }
 0x447   : > { %v8793_v1 = vpop.f32.mrf.mxu1  ;;  %v18915_v48 = vadd.f32 %v9211_v2, %v18862_v16 }
 0x448   : > { %v8868_v62 = vadd.f32 %v8793_v1, %v18724_v30  ;;  %v15100_v23 = vpop.f32.mrf.mxu0 }
 0x449   : > { %v15060_v35 = vpop.f32.mrf.mxu1  ;;  %v18919_v4 = vadd.f32 %v15100_v23, %v18872_v19 }
 0x44a   : > { %v8871_v43 = vadd.f32 %v15060_v35, %v18731_v0  ;;  %v9214_v61 = vpop.f32.mrf.mxu0 }
 0x44b   : > { %v8796_v59 = vpop.f32.mrf.mxu1  ;;  %v18922_v55 = vadd.f32 %v9214_v61, %v8861_v10 }
 0x44c   : > { %v8869_v52 = vadd.f32 %v8796_v59, %v18744_v27  ;;  %v15103_v11 = vpop.f32.mrf.mxu0 }
 0x44d   : > { %v15127_v38 = vpop.f32.mrf.mxu1  ;;  %15346 = vmatmul.mubr.bf16.gmra.mxu1 %v14003_v33  ;;  %v18925_v16 = vadd.f32 %v15103_v11, %v8866_v7 }
 0x44e   : > { %v18928_v30 = vadd.f32 %v15127_v38, %v18751_v12  ;;  %v9227_v57 = vpop.f32.mrf.mxu0 }
 0x44f   : > { %v9949_v19 = vpop.f32.mrf.mxu1  ;;  %v18930_v6 = vadd.f32 %v9227_v57, %v8864_v8 }
 0x450   : > { %v18933_v0 = vadd.f32 %v9949_v19, %v18759_v34  ;;  %v15104_v54 = vpop.f32.mrf.mxu0 }
 0x451   : > { %v15128_v10 = vpop.f32.mrf.mxu1  ;;  %v18935_v24 = vadd.f32 %v15104_v54, %v8867_v47 }
 0x452   : > { %v18938_v27 = vadd.f32 %v15128_v10, %v18770_v36  ;;  %v9230_v58 = vpop.f32.mrf.mxu0 }
 0x453   : > { %v9952_v7 = vpop.f32.mrf.mxu1  ;;  %v18940_v22 = vadd.f32 %v9230_v58, %v8865_v39 }
 0x454   : > { %v18943_v12 = vadd.f32 %v9952_v7, %v18780_v51  ;;  %v15107_v3 = vpop.f32.mrf.mxu0 }
 0x455   : > { %v15131_v8 = vpop.f32.mrf.mxu1  ;;  %v18945_v28 = vadd.f32 %v15107_v3, %v8870_v42 }
 0x456   : > { %v18948_v34 = vadd.f32 %v15131_v8, %v18787_v20  ;;  %v9243_v25 = vpop.f32.mrf.mxu0 }
 0x457   : > { %v9965_v47 = vpop.f32.mrf.mxu1  ;;  %v18950_v41 = vadd.f32 %v9243_v25, %v8868_v62 }
 0x458   : > { %v18953_v36 = vadd.f32 %v9965_v47, %v18795_v44  ;;  %v15108_v63 = vpop.f32.mrf.mxu0 }
 0x459   : > { %v15132_v39 = vpop.f32.mrf.mxu1  ;;  %v18955_v46 = vadd.f32 %v15108_v63, %v8871_v43 }
 0x45a   : > { %v18958_v51 = vadd.f32 %v15132_v39, %v18803_v60  ;;  %v9246_v13 = vpop.f32.mrf.mxu0 }
 0x45b   : > { %v9968_v9 = vpop.f32.mrf.mxu1  ;;  %v18960_v42 = vadd.f32 %v9246_v13, %v8869_v52 }
 0x45c   : > { %v18963_v20 = vadd.f32 %v9968_v9, %v18813_v14  ;;  %v18965_v2 = vpop.f32.mrf.mxu0 }
 0x45d   : > { %v15135_v15 = vpop.f32.mrf.mxu1 }
 0x45e   : > { %v18968_v44 = vadd.f32 %v15135_v15, %v18820_v49  ;;  %v18970_v29 = vpop.f32.mrf.mxu0 }
 0x45f   : > { %v9981_v1 = vpop.f32.mrf.mxu1 }
 0x460   : > { %v18973_v62 = vadd.f32 %v9981_v1, %v18828_v21  ;;  %v18975_v60 = vpop.f32.mrf.mxu0 }
 0x461   : > { %v15136_v23 = vpop.f32.mrf.mxu1 }
 0x462   : > { %v18978_v35 = vadd.f32 %v15136_v23, %v18836_v40  ;;  %v18980_v14 = vpop.f32.mrf.mxu0 }
 0x463   : > { %v9984_v33 = vpop.f32.mrf.mxu1 }
 0x464   : > { %v18983_v43 = vadd.f32 %v9984_v33, %v18846_v5  ;;  %v18985_v49 = vpop.f32.mrf.mxu0 }
 0x465   : > { %v15139_v61 = vpop.f32.mrf.mxu1 }
 0x466   : > { %v18988_v59 = vadd.f32 %v15139_v61, %v18853_v31  ;;  %v18990_v21 = vpop.f32.mrf.mxu0 }
 0x467   : > { %v9997_v52 = vpop.f32.mrf.mxu1 }
 0x468   : > { %v18993_v11 = vadd.f32 %v9997_v52, %v18859_v50  ;;  %v18995_v40 = vpop.f32.mrf.mxu0 }
 0x469   : > { %v15140_v38 = vpop.f32.mrf.mxu1 }
 0x46a   : > { %v18998_v57 = vadd.f32 %v15140_v38, %v18867_v26  ;;  %v19000_v5 = vpop.f32.mrf.mxu0 }
 0x46b   : > { %v10000_v19 = vpop.f32.mrf.mxu1 }
 0x46c   : > { %v19003_v54 = vadd.f32 %v10000_v19, %v18877_v53  ;;  %v19005_v31 = vpop.f32.mrf.mxu0 }
 0x46d   : > { %v15143_v10 = vpop.f32.mrf.mxu1 }
 0x46e   : > { %v19008_v58 = vadd.f32 %v15143_v10, %v18883_v45  ;;  %v19010_v50 = vpop.f32.mrf.mxu0 }
 0x46f   : > { %v10013_v7 = vpop.f32.mrf.mxu1 }
 0x470   : > { %v19013_v3 = vadd.f32 %v10013_v7, %v18887_v56  ;;  %v19015_v26 = vpop.f32.mrf.mxu0 }
 0x471   : > { %v15144_v8 = vpop.f32.mrf.mxu1 }
 0x472   : > { %20070 = vst [vmem:[#allocation26_spill] sm:$0xff] %v19013_v3  ;;  %v19018_v25 = vadd.f32 %v15144_v8, %v18893_v37  ;;  %v19020_v53 = vpop.f32.mrf.mxu0 }
 0x473   : > { %v10016_v47 = vpop.f32.mrf.mxu1 }
 0x474   : > { %20071 = vst [vmem:[#allocation27_spill] sm:$0xff] %v19018_v25  ;;  %v19023_v63 = vadd.f32 %v10016_v47, %v18901_v17  ;;  %v19025_v45 = vpop.f32.mrf.mxu0 }
 0x475   : > { %v15147_v39 = vpop.f32.mrf.mxu1 }
 0x476   : > { %20072 = vst [vmem:[#allocation28_spill] sm:$0xff] %v19023_v63  ;;  %v19028_v13 = vadd.f32 %v15147_v39, %v18907_v18  ;;  %v19030_v56 = vpop.f32.mrf.mxu0 }
 0x477   : > { %v10029_v9 = vpop.f32.mrf.mxu1 }
 0x478   : > { %20073 = vst [vmem:[#allocation29_spill] sm:$0xff] %v19028_v13  ;;  %v19033_v15 = vadd.f32 %v10029_v9, %v18915_v48  ;;  %v19035_v37 = vpop.f32.mrf.mxu0  ;;  %v12748_v13 = vld [vmem:[#allocation2 + $0x30] sm:$0xf] }
 0x479   : > { %v15148_v1 = vpop.f32.mrf.mxu1 }
 0x47a   : > { %20074 = vst [vmem:[#allocation37_spill] sm:$0xff] %v19033_v15  ;;  %v19038_v23 = vadd.f32 %v15148_v1, %v18919_v4  ;;  %v19040_v17 = vpop.f32.mrf.mxu0 }
 0x47b   : > { %v10032_v33 = vpop.f32.mrf.mxu1 }
 0x47c   : > { %20075 = vst [vmem:[#allocation30_spill] sm:$0xff] %v19038_v23  ;;  %v19043_v61 = vadd.f32 %v10032_v33, %v18922_v55  ;;  %v19045_v18 = vpop.f32.mrf.mxu0 }
 0x47d   : > { %20077 = vst [vmem:[#allocation32_spill] sm:$0xff] %v19045_v18  ;;  %v15151_v52 = vpop.f32.mrf.mxu1 }
 0x47e   : > { %20076 = vst [vmem:[#allocation31_spill] sm:$0xff] %v19043_v61  ;;  %v19048_v38 = vadd.f32 %v15151_v52, %v18925_v16  ;;  %v19050_v48 = vpop.f32.mrf.mxu0  ;;  %v12742_v16 = vld [vmem:[#allocation2 + $0x18] sm:$0xf] }
 0x47f   : > { %20079 = vst [vmem:[#allocation33_spill] sm:$0xff] %v19050_v48  ;;  %v10045_v19 = vpop.f32.mrf.mxu1  ;;  %v12812_v33 = vshrl.u32 %v12742_v16, 16 }
 0x480   : > { %20078 = vst [vmem:[#allocation34_spill] sm:$0xff] %v19048_v38  ;;  %v19053_v10 = vadd.f32 %v10045_v19, %v18930_v6  ;;  %v19055_v4 = vpop.f32.mrf.mxu0  ;;  %v12815_v6 = vshll.u32 %v12742_v16, 16  ;;  %v12740_v38 = vld [vmem:[#allocation2 + $0x10] sm:$0xf] }
 0x481   : > { %20081 = vst [vmem:[#allocation38_spill] sm:$0xff] %v19055_v4  ;;  %v15152_v7 = vpop.f32.mrf.mxu1 }
 0x482   : > { %20080 = vst [vmem:[#allocation36_spill] sm:$0xff] %v19053_v10  ;;  %v19058_v8 = vadd.f32 %v15152_v7, %v18935_v24  ;;  %v19060_v55 = vpop.f32.mrf.mxu0  ;;  %v12743_v24 = vld [vmem:[#allocation2 + $0x1c] sm:$0xf]  ;;  %v12739_v7 = vld [vmem:[#allocation2 + $0xc] sm:$0xf] }
 0x483   : > { %20083 = vst [vmem:[#allocation41_spill] sm:$0xff] %v19060_v55  ;;  %v10048_v47 = vpop.f32.mrf.mxu1  ;;  %v12825_v16 = vshrl.u32 %v12743_v24, 16  ;;  %v12788_v15 = vshrl.u32 %v12739_v7, 16 }
 0x484   : > { %20082 = vst [vmem:[#allocation40_spill] sm:$0xff] %v19058_v8  ;;  %v19063_v39 = vadd.f32 %v10048_v47, %v18940_v22  ;;  %v19065_v9 = vpop.f32.mrf.mxu0  ;;  %v12814_v47 = vrot.slane %v12812_v33, 4 }
 0x485   : > { %20085 = vst [vmem:[#allocation43_spill] sm:$0xff] %v19065_v9 }
 0x486   : > { %20084 = vst [vmem:[#allocation42_spill] sm:$0xff] %v19063_v39  ;;  %v19067_v1 = vpop.f32.mrf.mxu0  ;;  %v12817_v39 = vrot.slane %v12815_v6, 5 }
 0x487   : > { %20086 = vst [vmem:[#allocation44_spill] sm:$0xff] %v19067_v1  ;;  %v15155_v52 = vpop.f32.mrf.mxu1  ;;  %v12821_v1 = vshll.u32 %v12743_v24, 16  ;;  %v12827_v24 = vrot.slane %v12825_v16, 4 }
 0x488   : > { %v19069_v19 = vpop.f32.mrf.mxu0  ;;  %v19072_v10 = vadd.f32 %v15155_v52, %v18945_v28  ;;  %v12791_v52 = vshll.u32 %v12739_v7, 16 }
 0x489   : > { %20087 = vst [vmem:[#allocation46_spill] sm:$0xff] %v19069_v19  ;;  %v10061_v8 = vpop.f32.mrf.mxu1  ;;  %v12801_v19 = vshrl.u32 %v12740_v38, 16  ;;  %v12823_v6 = vrot.slane %v12821_v1, 5 }
 0x48a   : > { %20088 = vst [vmem:[#allocation39_spill] sm:$0xff] %v19072_v10  ;;  %v19074_v61 = vpop.f32.mrf.mxu0  ;;  %v19077_v22 = vadd.f32 %v10061_v8, %v18950_v41  ;;  %v12797_v10 = vshll.u32 %v12740_v38, 16  ;;  %v12818_v8 = vor.u32 %v12817_v39, %v12814_v47  ;;  %v12744_v38 = vld [vmem:[#allocation2 + $0x20] sm:$0x1]  ;;  %v12745_v39 = vld [vmem:[#allocation2 + $0x24] sm:$0xf] }
 0x48b   : > { %20089 = vst [vmem:[#allocation48_spill] sm:$0xff] %v19074_v61  ;;  %v15156_v23 = vpop.f32.mrf.mxu1  ;;  %v12828_v1 = vor.u32 %v12827_v24, %v12823_v6  ;;  %v12831_v16 = vshll.u32 %v12744_v38, 16  ;;  %v12839_v25 = vshll.u32 %v12745_v39, 16  ;;  %v12746_v24 = vld [vmem:[#allocation2 + $0x28] sm:$0xf] }
 0x48c   : > { %20090 = vst [vmem:[#allocation50_spill] sm:$0xff] %v19077_v22  ;;  %v19079_v9 = vpop.f32.mrf.mxu0  ;;  %v19082_v28 = vadd.f32 %v15156_v23, %v18955_v46  ;;  %v12860_v22 = vshrl.u32 %v12748_v13, 16  ;;  %v12790_v46 = vrot.slane %v12788_v15, 4  ;;  %v12793_v23 = vrot.slane %v12791_v52, 5 }
 0x48d   : > { %20091 = vst [vmem:[#allocation53_spill] sm:$0xff] %v19079_v9  ;;  %v10064_v55 = vpop.f32.mrf.mxu1  ;;  %v12863_v9 = vshll.u32 %v12748_v13, 16  ;;  %v19093_v7 = vrot.slane %v12797_v10, 5  ;;  %v12845_v3 = vshll.u32 %v12746_v24, 16  ;;  %v12849_v18 = vshrl.u32 %v12746_v24, 16 }
 0x48e   : > { %20092 = vst [vmem:[#allocation45_spill] sm:$0xff] %v19082_v28  ;;  %v19084_v61 = vpop.f32.mrf.mxu0  ;;  %v19087_v41 = vadd.f32 %v10064_v55, %v18960_v42  ;;  %v12803_v28 = vrot.slane %v12801_v19, 4  ;;  %v12819_v55 = vrot.slane %v12818_v8, 4  ;;  %v12862_v13 = vrot.slane %v12860_v22, 4  ;;  %v12749_v19 = vld [vmem:[#allocation2 + $0x34] sm:$0xf] }
 0x48f   : > { %20093 = vst [vmem:[#allocation47_spill] sm:$0xff] %v19084_v61  ;;  %v19089_v33 = vpop.f32.mrf.mxu1  ;;  %v12741_v61 = vld [vmem:[#allocation2 + $0x14] sm:$0x1]  ;;  %v12794_v15 = vor.u32 %v12793_v23, %v12790_v46  ;;  %v12833_v22 = vrot.slane %v12831_v16, 5  ;;  %v12869_v46 = vshll.u32 %v12749_v19, 16 }
 0x490   : > { %20094 = vst [vmem:[#allocation49_spill] sm:$0xff] %v19087_v41  ;;  %20095 = vst [vmem:[#allocation51_spill] sm:$0xff] %v19089_v33  ;;  %v19091_v63 = vpop.f32.mrf.mxu0  ;;  %v12865_v41 = vrot.slane %v12863_v9, 5  ;;  %v12804_v10 = vor.u32 %v12803_v28, %v19093_v7  ;;  %v12807_v52 = vshll.u32 %v12741_v61, 16  ;;  %v12824_v8 = vsel %vm16125_vm7, %v12819_v55, %v12823_v6 }
 0x491   : > { %20096 = vst [vmem:[#allocation52_spill] sm:$0xff] %v19091_v63  ;;  %v19095_v4 = vpop.f32.mrf.mxu1  ;;  %v12829_v9 = vrot.slane %v12828_v1, 4  ;;  %v12795_v61 = vrot.slane %v12794_v15, 4  ;;  %v19118_v6 = vadd.f32 %v18965_v2, %v18928_v30  ;;  %v19126_v55 = vadd.f32 %v18975_v60, %v18938_v27  ;;  %v12750_v2 = vld [vmem:[#allocation2 + $0x38] sm:$0x1] }
 0x492   : > { %20097 = vst [vmem:[#allocation55_spill] sm:$0xff] %v19095_v4  ;;  %v19097_v42 = vpop.f32.mrf.mxu0  ;;  %v12836_v4 = vshrl.u32 %v12745_v39, 16  ;;  %v12805_v28 = vrot.slane %v12804_v10, 4  ;;  %v12871_v30 = vrot.slane %v12869_v46, 5  ;;  %v19142_v27 = vadd.f32 %v18985_v49, %v18948_v34 }
 0x493   : > { %20098 = vst [vmem:[#allocation56_spill] sm:$0xff] %v19097_v42  ;;  %v19099_v47 = vpop.f32.mrf.mxu1  ;;  %v12800_v60 = vsel %vm16125_vm7, %v12795_v61, %v19093_v7  ;;  %v19155_v34 = vadd.f32 %v18990_v21, %v18953_v36  ;;  %v19159_v49 = vadd.f32 %v18995_v40, %v18958_v51  ;;  %v19173_v21 = vadd.f32 %v19000_v5, %v18963_v20  ;;  %v12751_v61 = vld [vmem:[#allocation2 + $0x3c] sm:$0xf] }
 0x494   : > { %20099 = vst [vmem:[#allocation58_spill] sm:$0xff] %v19099_v47  ;;  %v19101_v63 = vpop.f32.mrf.mxu0  ;;  %v12866_v47 = vor.u32 %v12865_v41, %v12862_v13  ;;  %v12838_v39 = vrot.slane %v12836_v4, 4  ;;  %v19122_v41 = vadd.f32 %v18970_v29, %v18933_v0  ;;  %v19132_v4 = vunpack.c.l.bf16 %v12824_v8  ;;  %v12755_v8 = vld [vmem:[#allocation2 + $0x4c] sm:$0xf] }
 0x495   : > { %20100 = vst [vmem:[#allocation57_spill] sm:$0xff] %v19101_v63  ;;  %v19104_v33 = vpop.f32.mrf.mxu1  ;;  %v12809_v63 = vrot.slane %v12807_v52, 5  ;;  %v19138_v0 = vadd.f32 %v18980_v14, %v18943_v12  ;;  %v12851_v14 = vrot.slane %v12849_v18, 4  ;;  %v12921_v46 = vshrl.u32 %v12755_v8, 16 }
 0x496   : > { %20101 = vst [vmem:[#allocation59_spill] sm:$0xff] %v19104_v33  ;;  %v19106_v42 = vpop.f32.mrf.mxu0  ;;  %v12873_v33 = vshrl.u32 %v12749_v19, 16  ;;  %20103 = vst [vmem:[#allocation76_spill] sm:$0xff] %v19132_v4  ;;  %v12867_v13 = vrot.slane %v12866_v47, 4  ;;  %v12754_v47 = vld [vmem:[#allocation2 + $0x48] sm:$0xf]  ;;  %v19187_v20 = vadd.f32 %v19010_v50, %v18973_v62 }
 0x497   : > { %20102 = vst [vmem:[#allocation60_spill] sm:$0xff] %v19106_v42  ;;  %v19110_v38 = vpop.f32.mrf.mxu1  ;;  %v12841_v42 = vrot.slane %v12839_v25, 5  ;;  %v12834_v25 = vsel %vm16125_vm7, %v12829_v9, %v12833_v22  ;;  %v12810_v15 = vsel %vm16125_vm7, %v12805_v28, %v12809_v63  ;;  %v12847_v19 = vrot.slane %v12845_v3, 5  ;;  %v12747_v9 = vld [vmem:[#allocation2 + $0x2c] sm:$0x1] }
 0x498   : > { %v19112_v23 = vpop.f32.mrf.mxu0  ;;  %v12875_v12 = vrot.slane %v12873_v33, 4  ;;  %v19163_v24 = vunpack.c.l.bf16 %v12834_v25  ;;  %v12879_v63 = vshll.u32 %v12750_v2, 16  ;;  %v19167_v3 = vunpack.c.l.bf16 %v12800_v60  ;;  %v12756_v62 = vld [vmem:[#allocation2 + $0x50] sm:$0x1] }
 0x499   : > { %v19114_v48 = vpop.f32.mrf.mxu1  ;;  %v12842_v52 = vor.u32 %v12841_v42, %v12838_v39  ;;  %v12872_v18 = vsel %vm16125_vm7, %v12867_v13, %v12871_v30  ;;  %v12908_v33 = vshrl.u32 %v12754_v47, 16  ;;  %v12911_v36 = vshll.u32 %v12754_v47, 16  ;;  %v12752_v13 = vld [vmem:[#allocation2 + $0x40] sm:$0xf] }
 0x49a   : > { %v19128_v1 = vpop.f32.mrf.mxu0  ;;  %20104 = vst [vmem:[#allocation61_spill] sm:$0xff] %v19163_v24  ;;  %20105 = vst [vmem:[#allocation63_spill] sm:$0xff] %v19167_v3  ;;  %v19177_v40 = vunpack.c.l.bf16 %v12810_v15  ;;  %v12917_v42 = vshll.u32 %v12755_v8, 16  ;;  %v12876_v25 = vor.u32 %v12875_v12, %v12871_v30  ;;  %v12852_v2 = vor.u32 %v12851_v14, %v12847_v19 }
 0x49b   : > { %v19130_v16 = vpop.f32.mrf.mxu1  ;;  %v12843_v39 = vrot.slane %v12842_v52, 4  ;;  %v12855_v60 = vshll.u32 %v12747_v9, 16  ;;  %v19183_v47 = vadd.f32 %v19005_v31, %v18968_v44  ;;  %v19191_v15 = vunpack.c.l.bf16 %v12872_v18  ;;  %v12760_v9 = vld [vmem:[#allocation2 + $0x60] sm:$0xf] }
 0x49c   : > { %v19144_v29 = vpop.f32.mrf.mxu0  ;;  %20106 = vst [vmem:[#allocation62_spill] sm:$0xff] %v19177_v40  ;;  %v12881_v8 = vrot.slane %v12879_v63, 5  ;;  %v12910_v52 = vrot.slane %v12908_v33, 4  ;;  %v12913_v30 = vrot.slane %v12911_v36, 5  ;;  %v12884_v12 = vshrl.u32 %v12751_v61, 16 }
 0x49d   : > { %v19151_v10 = vpop.f32.mrf.mxu1  ;;  %20108 = vst [vmem:[#allocation66_spill] sm:$0xff] %v19191_v15  ;;  %v12887_v14 = vshll.u32 %v12751_v61, 16  ;;  %v19197_v44 = vrot.slane %v12917_v42, 5  ;;  %v12893_v31 = vshll.u32 %v12752_v13, 16  ;;  %v12897_v3 = vshrl.u32 %v12752_v13, 16 }
 0x49e   : > { %v19161_v7 = vpop.f32.mrf.mxu0  ;;  %v12923_v50 = vrot.slane %v12921_v46, 4  ;;  %v12848_v63 = vsel %vm16125_vm7, %v12843_v39, %v12847_v19  ;;  %v12877_v18 = vrot.slane %v12876_v25, 4  ;;  %v12853_v15 = vrot.slane %v12852_v2, 4  ;;  %v12761_v13 = vld [vmem:[#allocation2 + $0x64] sm:$0xf] }
 0x49f   : > { %v19165_v22 = vpop.f32.mrf.mxu1  ;;  %v12857_v33 = vrot.slane %v12855_v60, 5  ;;  %v19205_v36 = vadd.f32 %v19015_v26, %v18978_v35  ;;  %v19209_v42 = vadd.f32 %v19020_v53, %v18983_v43  ;;  %v12956_v46 = vshrl.u32 %v12760_v9, 16  ;;  %v12757_v2 = vld [vmem:[#allocation2 + $0x54] sm:$0xf]  ;;  %v12753_v43 = vld [vmem:[#allocation2 + $0x44] sm:$0x1] }
 0x4a0   : > { %v19175_v51 = vpop.f32.mrf.mxu0  ;;  %v12886_v19 = vrot.slane %v12884_v12, 4  ;;  %v12889_v39 = vrot.slane %v12887_v14, 5  ;;  %v12927_v25 = vshll.u32 %v12756_v62, 16  ;;  %v19215_v60 = vunpack.c.l.bf16 %v12848_v63  ;;  %v12758_v14 = vld [vmem:[#allocation2 + $0x58] sm:$0xf] }
 0x4a1   : > { %v19179_v28 = vpop.f32.mrf.mxu1  ;;  %20112 = vst [vmem:[#allocation70_spill] sm:$0xff] %v19205_v36  ;;  %20113 = vst [vmem:[#allocation68_spill] sm:$0xff] %v19209_v42  ;;  %v19217_v35 = vrot.slane %v12893_v31, 5  ;;  %v12924_v26 = vor.u32 %v12923_v50, %v19197_v44  ;;  %v12899_v53 = vrot.slane %v12897_v3, 4  ;;  %v12969_v12 = vshrl.u32 %v12761_v13, 16 }
 0x4a2   : > { %20107 = vst [vmem:[#allocation64_spill] sm:$0xff] %v19179_v28  ;;  %v19189_v5 = vpop.f32.mrf.mxu0  ;;  %20116 = vst [vmem:[#allocation74_spill] sm:$0xff] %v19215_v60  ;;  %v12958_v63 = vrot.slane %v12956_v46, 4  ;;  %v12932_v60 = vshrl.u32 %v12757_v2, 16  ;;  %v12903_v36 = vshll.u32 %v12753_v43, 16 }
 0x4a3   : > { %v19193_v40 = vpop.f32.mrf.mxu1  ;;  %v12925_v28 = vrot.slane %v12924_v26, 4  ;;  %v12762_v43 = vld [vmem:[#allocation2 + $0x68] sm:$0x1] }
 0x4a4   : > { %20109 = vst [vmem:[#allocation65_spill] sm:$0xff] %v19193_v40  ;;  %v19195_v24 = vpop.f32.mrf.mxu0  ;;  %v12914_v40 = vor.u32 %v12913_v30, %v12910_v52  ;;  %v12858_v52 = vsel %vm16125_vm7, %v12853_v15, %v12857_v33  ;;  %v12965_v30 = vshll.u32 %v12761_v13, 16  ;;  %v12945_v15 = vshrl.u32 %v12758_v14, 16 }
 0x4a5   : > { %20110 = vst [vmem:[#allocation69_spill] sm:$0xff] %v19195_v24  ;;  %v19199_v4 = vpop.f32.mrf.mxu1  ;;  %v12959_v24 = vshll.u32 %v12760_v9, 16  ;;  %v12882_v9 = vsel %vm16125_vm7, %v12877_v18, %v12881_v8  ;;  %v12900_v8 = vor.u32 %v12899_v53, %v19217_v35  ;;  %v12941_v18 = vshll.u32 %v12758_v14, 16  ;;  %v12766_v53 = vld [vmem:[#allocation2 + $0x78] sm:$0xf] }
 0x4a6   : > { %20111 = vst [vmem:[#allocation67_spill] sm:$0xff] %v19199_v4  ;;  %v19211_v61 = vpop.f32.mrf.mxu0  ;;  %v12915_v3 = vrot.slane %v12914_v40, 4  ;;  %v19233_v33 = vadd.f32 %v19025_v45, %v18988_v59  ;;  %v19239_v46 = vrot.slane %v12965_v30, 5  ;;  %v19243_v40 = vadd.f32 %v19030_v56, %v18993_v11 }
 0x4a7   : > { %20114 = vst [vmem:[#allocation72_spill] sm:$0xff] %v19211_v61  ;;  %v19213_v4 = vpop.f32.mrf.mxu1  ;;  %v12961_v31 = vrot.slane %v12959_v24, 5  ;;  %v12890_v61 = vor.u32 %v12889_v39, %v12886_v19  ;;  %v19237_v24 = vunpack.c.l.bf16 %v12882_v9  ;;  %v19249_v45 = vunpack.c.l.bf16 %v12858_v52  ;;  %v12759_v52 = vld [vmem:[#allocation2 + $0x5c] sm:$0x1] }
 0x4a8   : > { %20115 = vst [vmem:[#allocation83_spill] sm:$0xff] %v19213_v4  ;;  %v19226_v62 = vpop.f32.mrf.mxu0  ;;  %v12935_v4 = vshll.u32 %v12757_v2, 16  ;;  %v12971_v2 = vrot.slane %v12969_v12, 4  ;;  %v12920_v9 = vsel %vm16125_vm7, %v12915_v3, %v19197_v44  ;;  %v12905_v12 = vrot.slane %v12903_v36, 5  ;;  %v20122_v3 = vld [vmem:[#allocation32_spill] sm:$0xff] }
 0x4a9   : > { %v19220_v42 = vpop.f32.mrf.mxu1  ;;  %20118 = vst [vmem:[#allocation77_spill] sm:$0xff] %v19237_v24  ;;  %v12962_v39 = vor.u32 %v12961_v31, %v12958_v63  ;;  %20120 = vst [vmem:[#allocation79_spill] sm:$0xff] %v19249_v45  ;;  %v12891_v30 = vrot.slane %v12890_v61, 4  ;;  %v12901_v56 = vrot.slane %v12900_v8, 4  ;;  %v19256_v14 = vrot.slane %v12941_v18, 5  ;;  %v20123_v18 = vld [vmem:[#allocation26_spill] sm:$0xff] }
 0x4aa   : > { %20117 = vst [vmem:[#allocation71_spill] sm:$0xff] %v19220_v42  ;;  %v12929_v42 = vrot.slane %v12927_v25, 5  ;;  %v19245_v19 = vpop.f32.mrf.mxu0  ;;  %v12934_v25 = vrot.slane %v12932_v60, 4  ;;  %v12937_v26 = vrot.slane %v12935_v4, 5  ;;  %v12947_v60 = vrot.slane %v12945_v15, 4  ;;  %v20124_v15 = vld [vmem:[#allocation33_spill] sm:$0xff] }
 0x4ab   : > { %v19228_v50 = vpop.f32.mrf.mxu1  ;;  %v12972_v63 = vor.u32 %v12971_v2, %v19239_v46  ;;  %v12975_v31 = vshll.u32 %v12762_v43, 16  ;;  %v13004_v45 = vshrl.u32 %v12766_v53, 16  ;;  %v13007_v24 = vshll.u32 %v12766_v53, 16 }
 0x4ac   : > { %v12930_v11 = vsel %vm16125_vm7, %v12925_v28, %v12929_v42  ;;  %v19263_v44 = vadd.f32 %v19035_v37, %v18998_v57  ;;  %v19267_v36 = vadd.f32 %v19040_v17, %v19003_v54  ;;  %v19269_v28 = vpop.f32.mrf.mxu0  ;;  %v12963_v42 = vrot.slane %v12962_v39, 4 }
 0x4ad   : > { %v19235_v13 = vpop.f32.mrf.mxu1  ;;  %v12938_v61 = vor.u32 %v12937_v26, %v12934_v25  ;;  %v19273_v8 = vadd.f32 %v20122_v3, %v19008_v58  ;;  %v19277_v2 = vadd.f32 %v20124_v15, %v20123_v18  ;;  %v19281_v57 = vunpack.c.l.bf16 %v12920_v9  ;;  %v12767_v25 = vld [vmem:[#allocation2 + $0x7c] sm:$0xf]  ;;  %v12763_v26 = vld [vmem:[#allocation2 + $0x6c] sm:$0xf] }
 0x4ae   : > { %v12896_v54 = vsel %vm16125_vm7, %v12891_v30, %v19217_v35  ;;  %v19286_v37 = vunpack.c.l.bf16 %v12930_v11  ;;  %v12906_v17 = vsel %vm16125_vm7, %v12901_v56, %v12905_v12  ;;  %v12948_v58 = vor.u32 %v12947_v60, %v19256_v14  ;;  %v19297_v35 = vpop.f32.mrf.mxu0  ;;  %v12764_v56 = vld [vmem:[#allocation2 + $0x70] sm:$0xf] }
 0x4af   : > { %v19247_v59 = vpop.f32.mrf.mxu1  ;;  %20125 = vst [vmem:[#allocation81_spill] sm:$0xff] %v19277_v2  ;;  %20127 = vst [vmem:[#allocation78_spill] sm:$0xff] %v19281_v57  ;;  %v12951_v39 = vshll.u32 %v12759_v52, 16  ;;  %v12973_v3 = vrot.slane %v12972_v63, 4  ;;  %v12977_v18 = vrot.slane %v12975_v31, 5  ;;  %v13006_v9 = vrot.slane %v13004_v45, 4 }
 0x4b0   : > { %20119 = vst [vmem:[#allocation73_spill] sm:$0xff] %v19247_v59  ;;  %20128 = vst [vmem:[#allocation85_spill] sm:$0xff] %v19286_v37  ;;  %v13009_v15 = vrot.slane %v13007_v24, 5  ;;  %v20130_v57 = vld [vmem:[#allocation27_spill] sm:$0xff]  ;;  %v19299_v30 = vunpack.c.l.bf16 %v12896_v54  ;;  %v12968_v12 = vsel %vm16125_vm7, %v12963_v42, %v19239_v46  ;;  %v12939_v11 = vrot.slane %v12938_v61, 4  ;;  %v20135_v52 = vld [vmem:[#allocation28_spill] sm:$0xff] }
 0x4b1   : > { %v19258_v4 = vpop.f32.mrf.mxu1  ;;  %v13013_v63 = vshll.u32 %v12767_v25, 16  ;;  %v13017_v31 = vshrl.u32 %v12767_v25, 16  ;;  %v12980_v45 = vshrl.u32 %v12763_v26, 16  ;;  %v12983_v24 = vshll.u32 %v12763_v26, 16  ;;  %v20141_v25 = vld [vmem:[#allocation43_spill] sm:$0xff]  ;;  %v20143_v26 = vld [vmem:[#allocation37_spill] sm:$0xff] }
 0x4b2   : > { %20121 = vst [vmem:[#allocation75_spill] sm:$0xff] %v19258_v4  ;;  %20133 = vst [vmem:[#allocation82_spill] sm:$0xff] %v19299_v30  ;;  %v12949_v54 = vrot.slane %v12948_v58, 4  ;;  %v12953_v37 = vrot.slane %v12951_v39, 5  ;;  %v12978_v46 = vsel %vm16125_vm7, %v12973_v3, %v12977_v18  ;;  %v13010_v42 = vor.u32 %v13009_v15, %v13006_v9  ;;  %v20144_v59 = vld [vmem:[#allocation44_spill] sm:$0xff] }
 0x4b3   : > { %v19279_v43 = vpop.f32.mrf.mxu1  ;;  %v12989_v61 = vshll.u32 %v12764_v56, 16  ;;  %v19326_v58 = vunpack.c.l.bf16 %v12968_v12  ;;  %v12944_v39 = vsel %vm16125_vm7, %v12939_v11, %v19256_v14  ;;  %v13015_v18 = vrot.slane %v13013_v63, 5  ;;  %v12768_v11 = vld [vmem:[#allocation2 + $0x80] sm:$0x1]  ;;  %v20156_v63 = vld [vmem:[#allocation34_spill] sm:$0xff] }
 0x4b4   : > { %20126 = vst [vmem:[#allocation84_spill] sm:$0xff] %v19279_v43  ;;  %v20131_v43 = vld [vmem:[#allocation38_spill] sm:$0xff]  ;;  %v12982_v9 = vrot.slane %v12980_v45, 4  ;;  %v12985_v15 = vrot.slane %v12983_v24, 5  ;;  %v19341_v12 = vunpack.c.l.bf16 %v12978_v46  ;;  %v12954_v14 = vsel %vm16125_vm7, %v12949_v54, %v12953_v37  ;;  %v20157_v45 = vld [vmem:[#allocation53_spill] sm:$0xff] }
 0x4b5   : > { %v19291_v53 = vpop.f32.mrf.mxu1  ;;  %v19295_v4 = vadd.f32 %v20131_v43, %v20130_v57  ;;  %v19310_v57 = vunpack.c.l.bf16 %v12906_v17  ;;  %v19324_v17 = vpop.f32.mrf.mxu0  ;;  %20147 = vst [vmem:[#allocation54_spill] sm:$0xff] %v19326_v58  ;;  %v19347_v24 = vadd.f32 %v20157_v45, %v20156_v63  ;;  %v19359_v37 = vunpack.c.l.bf16 %v12944_v39  ;;  %v12765_v54 = vld [vmem:[#allocation2 + $0x74] sm:$0x1] }
 0x4b6   : > { %20129 = vst [vmem:[#allocation80_spill] sm:$0xff] %v19291_v53  ;;  %v20136_v53 = vld [vmem:[#allocation41_spill] sm:$0xff]  ;;  %20146 = vst [vmem:[#allocation18_spill] sm:$0xff] %v19324_v17  ;;  %v19363_v45 = vunpack.c.l.bf16 %v12954_v14 }
 0x4b7   : > { %20132 = vst [vmem:[#allocation20_spill] sm:$0xff] %v19295_v4  ;;  %v19304_v60 = vpop.f32.mrf.mxu1  ;;  %v19308_v43 = vadd.f32 %v20136_v53, %v20135_v52  ;;  %20138 = vst [vmem:[#allocation21_spill] sm:$0xff] %v19310_v57  ;;  %v20140_v4 = vld [vmem:[#allocation29_spill] sm:$0xff]  ;;  %v19322_v53 = vadd.f32 %v20144_v59, %v20143_v26  ;;  %v20149_v52 = vld [vmem:[#allocation30_spill] sm:$0xff] }
 0x4b8   : > { %20134 = vst [vmem:[#allocation22_spill] sm:$0xff] %v19304_v60  ;;  %v12993_v60 = vshrl.u32 %v12764_v56, 16  ;;  %v19318_v2 = vadd.f32 %v20141_v25, %v20140_v4  ;;  %v13019_v56 = vrot.slane %v13017_v31, 4  ;;  %v12772_v4 = vld [vmem:[#allocation2 + $0x90] sm:$0xf]  ;;  %v20150_v25 = vld [vmem:[#allocation46_spill] sm:$0xff] }
 0x4b9   : > { %20137 = vst [vmem:[#allocation86_spill] sm:$0xff] %v19308_v43  ;;  %v19312_v30 = vpop.f32.mrf.mxu1  ;;  %20145 = vst [vmem:[#allocation17_spill] sm:$0xff] %v19322_v53  ;;  %v20152_v59 = vld [vmem:[#allocation31_spill] sm:$0xff]  ;;  %v20153_v26 = vld [vmem:[#allocation48_spill] sm:$0xff]  ;;  %v13055_v43 = vshll.u32 %v12772_v4, 16 }
 0x4ba   : > { %20139 = vst [vmem:[#allocation23_spill] sm:$0xff] %v19312_v30  ;;  %20142 = vst [vmem:[#allocation16_spill] sm:$0xff] %v19318_v2  ;;  %v19335_v30 = vadd.f32 %v20150_v25, %v20149_v52  ;;  %v19339_v53 = vadd.f32 %v20153_v26, %v20152_v59  ;;  %v13011_v2 = vrot.slane %v13010_v42, 4  ;;  %v19351_v52 = vrot.slane %v12989_v61, 5  ;;  %v20160_v59 = vld [vmem:[#allocation36_spill] sm:$0xff]  ;;  %v20161_v26 = vld [vmem:[#allocation47_spill] sm:$0xff] }
 0x4bb   : > { %v19331_v3 = vpop.f32.mrf.mxu1  ;;  %20155 = vst [vmem:[#allocation24_spill] sm:$0xff] %v19341_v12  ;;  %20158 = vst [vmem:[#allocation25_spill] sm:$0xff] %v19347_v24  ;;  %v12995_v25 = vrot.slane %v12993_v60, 4  ;;  %v19355_v46 = vadd.f32 %v20161_v26, %v20160_v59  ;;  %v13052_v12 = vshrl.u32 %v12772_v4, 16  ;;  %v12986_v42 = vor.u32 %v12985_v15, %v12982_v9  ;;  %v12770_v60 = vld [vmem:[#allocation2 + $0x88] sm:$0xf] }
 0x4bc   : > { %20148 = vst [vmem:[#allocation15_spill] sm:$0xff] %v19331_v3  ;;  %20151 = vst [vmem:[#allocation19_spill] sm:$0xff] %v19335_v30  ;;  %v12773_v3 = vld [vmem:[#allocation2 + $0x94] sm:$0xf]  ;;  %v12769_v30 = vld [vmem:[#allocation2 + $0x84] sm:$0xf]  ;;  %v13020_v61 = vor.u32 %v13019_v56, %v13015_v18  ;;  %v13016_v4 = vsel %vm16125_vm7, %v13011_v2, %v13015_v18 }
 0x4bd   : > { %20154 = vst [vmem:[#allocation35_spill] sm:$0xff] %v19339_v53  ;;  %v19349_v31 = vpop.f32.mrf.mxu1  ;;  %20162 = vst [vmem:[#allocation26_spill] sm:$0xff] %v19355_v46  ;;  %v19357_v53 = vpop.f32.mrf.mxu0  ;;  %v13023_v24 = vshll.u32 %v12768_v11, 16  ;;  %v13065_v58 = vshrl.u32 %v12773_v3, 16  ;;  %v13028_v57 = vshrl.u32 %v12769_v30, 16  ;;  %v13031_v59 = vshll.u32 %v12769_v30, 16 }
 0x4be   : > { %20159 = vst [vmem:[#allocation32_spill] sm:$0xff] %v19349_v31  ;;  %20163 = vst [vmem:[#allocation33_spill] sm:$0xff] %v19357_v53  ;;  %v13061_v31 = vshll.u32 %v12773_v3, 16  ;;  %v20167_v26 = vld [vmem:[#allocation51_spill] sm:$0xff]  ;;  %v12996_v14 = vor.u32 %v12995_v25, %v19351_v52  ;;  %v13054_v15 = vrot.slane %v13052_v12, 4  ;;  %v13057_v56 = vrot.slane %v13055_v43, 5 }
 0x4bf   : > { %20164 = vst [vmem:[#allocation27_spill] sm:$0xff] %v19359_v37  ;;  %v19361_v63 = vpop.f32.mrf.mxu1  ;;  %20166 = vst [vmem:[#allocation28_spill] sm:$0xff] %v19363_v45  ;;  %v19367_v46 = vadd.f32 %v20167_v26, %v19118_v6  ;;  %v19374_v9 = vpop.f32.mrf.mxu0  ;;  %v13037_v11 = vshll.u32 %v12770_v60, 16  ;;  %v13041_v3 = vshrl.u32 %v12770_v60, 16  ;;  %v20170_v45 = vld [vmem:[#allocation40_spill] sm:$0xff]  ;;  %v12987_v26 = vrot.slane %v12986_v42, 4 }
 0x4c0   : > { %20165 = vst [vmem:[#allocation38_spill] sm:$0xff] %v19361_v63  ;;  %v12999_v63 = vshll.u32 %v12765_v54, 16  ;;  %20169 = vst [vmem:[#allocation29_spill] sm:$0xff] %v19374_v9  ;;  %v20171_v30 = vld [vmem:[#allocation52_spill] sm:$0xff]  ;;  %v13025_v53 = vrot.slane %v13023_v24, 5  ;;  %v19382_v17 = vrot.slane %v13061_v31, 5  ;;  %v19388_v60 = vunpack.c.l.bf16 %v13016_v4 }
 0x4c1   : > { %v19369_v39 = vpop.f32.mrf.mxu1  ;;  %v19378_v37 = vadd.f32 %v20171_v30, %v20170_v45  ;;  %v13030_v2 = vrot.slane %v13028_v57, 4  ;;  %v13033_v18 = vrot.slane %v13031_v59, 5  ;;  %v13067_v25 = vrot.slane %v13065_v58, 4  ;;  %v20174_v54 = vld [vmem:[#allocation55_spill] sm:$0xff]  ;;  %v12774_v30 = vld [vmem:[#allocation2 + $0x98] sm:$0x1]  ;;  %v19394_v24 = vpop.f32.mrf.mxu0 }
 0x4c2   : > { %20168 = vst [vmem:[#allocation41_spill] sm:$0xff] %v19369_v39  ;;  %v13021_v39 = vrot.slane %v13020_v61, 4  ;;  %v11153_v12 = vadd.f32 %v20174_v54, %v19122_v41  ;;  %20176 = vst [vmem:[#allocation30_spill] sm:$0xff] %v19388_v60  ;;  %v12997_v9 = vrot.slane %v12996_v14, 4  ;;  %v13001_v45 = vrot.slane %v12999_v63, 5  ;;  %v20179_v59 = vld [vmem:[#allocation39_spill] sm:$0xff] }
 0x4c3   : > { %20172 = vst [vmem:[#allocation43_spill] sm:$0xff] %v19378_v37  ;;  %v19380_v6 = vpop.f32.mrf.mxu1  ;;  %v20177_v37 = vld [vmem:[#allocation42_spill] sm:$0xff]  ;;  %v13058_v31 = vor.u32 %v13057_v56, %v13054_v15  ;;  %v19396_v57 = vrot.slane %v13037_v11, 5  ;;  %v13043_v58 = vrot.slane %v13041_v3, 4  ;;  %v20180_v41 = vld [vmem:[#allocation57_spill] sm:$0xff]  ;;  %v20182_v63 = vld [vmem:[#allocation59_spill] sm:$0xff]  ;;  %v13034_v11 = vor.u32 %v13033_v18, %v13030_v2 }
 0x4c4   : > { %20173 = vst [vmem:[#allocation37_spill] sm:$0xff] %v19380_v6  ;;  %v20178_v6 = vld [vmem:[#allocation56_spill] sm:$0xff]  ;;  %v12778_v61 = vld [vmem:[#allocation2 + $0xa8] sm:$0xf]  ;;  %v19400_v54 = vadd.f32 %v20180_v41, %v20179_v59  ;;  %v12771_v15 = vld [vmem:[#allocation2 + $0x8c] sm:$0x1]  ;;  %v13026_v56 = vsel %vm16125_vm7, %v13021_v39, %v13025_v53  ;;  %v13068_v3 = vor.u32 %v13067_v25, %v19382_v17 }
 0x4c5   : > { %v19386_v43 = vpop.f32.mrf.mxu1  ;;  %v19392_v42 = vadd.f32 %v20178_v6, %v20177_v37  ;;  %v20181_v4 = vld [vmem:[#allocation58_spill] sm:$0xff]  ;;  %v12992_v37 = vsel %vm16125_vm7, %v12987_v26, %v19351_v52  ;;  %v13071_v6 = vshll.u32 %v12774_v30, 16  ;;  %v20185_v41 = vld [vmem:[#allocation60_spill] sm:$0xff]  ;;  %v11159_v52 = vadd.f32 %v19110_v38, %v19142_v27  ;;  %v19424_v26 = vpop.f32.mrf.mxu0  ;;  %v20186_v18 = vld [vmem:[#allocation45_spill] sm:$0xff] }
 0x4c6   : > { %20175 = vst [vmem:[#allocation44_spill] sm:$0xff] %v19386_v43  ;;  %v11156_v14 = vadd.f32 %v20181_v4, %v19126_v55  ;;  %v11154_v43 = vadd.f32 %v20182_v63, %v19138_v0  ;;  %v20184_v59 = vld [vmem:[#allocation50_spill] sm:$0xff]  ;;  %v13002_v0 = vsel %vm16125_vm7, %v12997_v9, %v13001_v45  ;;  %v13100_v63 = vshrl.u32 %v12778_v61, 16 }
 0x4c7   : > { %v19406_v60 = vpop.f32.mrf.mxu1  ;;  %v19416_v55 = vadd.f32 %v20185_v41, %v20184_v59  ;;  %v13059_v53 = vrot.slane %v13058_v31, 4  ;;  %v13044_v39 = vor.u32 %v13043_v58, %v19396_v57  ;;  %v13047_v2 = vshll.u32 %v12771_v15, 16  ;;  %v12775_v58 = vld [vmem:[#allocation2 + $0x9c] sm:$0xf]  ;;  %v20189_v15 = vld [vmem:[#allocation49_spill] sm:$0xff] }
 0x4c8   : > { %20183 = vst [vmem:[#allocation46_spill] sm:$0xff] %v19406_v60  ;;  %v13103_v60 = vshll.u32 %v12778_v61, 16  ;;  %v19429_v25 = vadd.f32 %v19112_v23, %v20186_v18  ;;  %v11157_v30 = vadd.f32 %v19114_v48, %v19155_v34  ;;  %v19435_v9 = vunpack.c.l.bf16 %v12992_v37  ;;  %v12779_v48 = vld [vmem:[#allocation2 + $0xac] sm:$0xf] }
 0x4c9   : > { %v19418_v4 = vpop.f32.mrf.mxu1  ;;  %v19437_v45 = vunpack.c.l.bf16 %v13026_v56  ;;  %v19439_v38 = vunpack.c.l.bf16 %v13002_v0  ;;  %v13035_v27 = vrot.slane %v13034_v11, 4  ;;  %v13069_v31 = vrot.slane %v13068_v3, 4  ;;  %v19449_v56 = vpop.f32.mrf.mxu0 }
 0x4ca   : > { %20187 = vst [vmem:[#allocation31_spill] sm:$0xff] %v19429_v25  ;;  %v13073_v61 = vrot.slane %v13071_v6, 5  ;;  %v19443_v41 = vadd.f32 %v19128_v1, %v20189_v15  ;;  %v11160_v23 = vadd.f32 %v19130_v16, %v19159_v49  ;;  %v13102_v34 = vrot.slane %v13100_v63, 4  ;;  %v20195_v15 = vld [vmem:[#allocation69_spill] sm:$0xff] }
 0x4cb   : > { %v19433_v59 = vpop.f32.mrf.mxu1  ;;  %v13105_v18 = vrot.slane %v13103_v60, 5  ;;  %v11973_v37 = vadd.f32 %v19144_v29, %v19367_v46  ;;  %v13064_v11 = vsel %vm16125_vm7, %v13059_v53, %v19382_v17  ;;  %v13045_v3 = vrot.slane %v13044_v39, 4  ;;  %v20192_v39 = vld [vmem:[#allocation64_spill] sm:$0xff]  ;;  %v12777_v25 = vld [vmem:[#allocation2 + $0xa4] sm:$0x1] }
 0x4cc   : > { %20188 = vst [vmem:[#allocation48_spill] sm:$0xff] %v19433_v59  ;;  %20190 = vst [vmem:[#allocation34_spill] sm:$0xff] %v19443_v41  ;;  %v13049_v6 = vrot.slane %v13047_v2, 5  ;;  %v11971_v1 = vadd.f32 %v19161_v7, %v11153_v12  ;;  %v11158_v0 = vadd.f32 %v19151_v10, %v19173_v21  ;;  %v13076_v49 = vshrl.u32 %v12775_v58, 16  ;;  %v20200_v41 = vld [vmem:[#allocation83_spill] sm:$0xff] }
 0x4cd   : > { %v19457_v16 = vpop.f32.mrf.mxu1  ;;  %v13079_v60 = vshll.u32 %v12775_v58, 16  ;;  %v13040_v29 = vsel %vm16125_vm7, %v13035_v27, %v19396_v57  ;;  %v13074_v46 = vsel %vm16125_vm7, %v13069_v31, %v13073_v61  ;;  %v13109_v63 = vshll.u32 %v12779_v48, 16  ;;  %v20193_v57 = vld [vmem:[#allocation70_spill] sm:$0xff]  ;;  %v20194_v27 = vld [vmem:[#allocation65_spill] sm:$0xff]  ;;  %v19480_v61 = vpop.f32.mrf.mxu0 }
 0x4ce   : > { %20191 = vst [vmem:[#allocation53_spill] sm:$0xff] %v19457_v16  ;;  %v13113_v17 = vshrl.u32 %v12779_v48, 16  ;;  %v11974_v53 = vadd.f32 %v19175_v51, %v11156_v14  ;;  %v19467_v7 = vadd.f32 %v19165_v22, %v19183_v47  ;;  %v19469_v10 = vunpack.c.l.bf16 %v13064_v11  ;;  %v12776_v22 = vld [vmem:[#allocation2 + $0xa0] sm:$0xf]  ;;  %v12780_v11 = vld [vmem:[#allocation2 + $0xb0] sm:$0x1] }
 0x4cf   : > { %v13106_v21 = vor.u32 %v13105_v18, %v13102_v34  ;;  %v11972_v12 = vadd.f32 %v19189_v5, %v11154_v43  ;;  %v19474_v2 = vadd.f32 %v20192_v39, %v19187_v20  ;;  %v19478_v31 = vadd.f32 %v20194_v27, %v20193_v57  ;;  %v19487_v14 = vld [vmem:[%s19864_s5] ss:$0 sm:$0xff]  ;;  %v20198_v16 = vld [vmem:[#allocation68_spill] sm:$0xff] }
 0x4d0   : > { %v13050_v51 = vsel %vm16125_vm7, %v13045_v3, %v13049_v6  ;;  %v19489_v5 = vunpack.c.l.bf16 %v13040_v29  ;;  %v19491_v20 = vunpack.c.l.bf16 %v13074_v46  ;;  %v13078_v43 = vrot.slane %v13076_v49, 4  ;;  %v19497_v3 = vld [vmem:[%s19865_s6] ss:$0 sm:$0xff]  ;;  %v20197_v49 = vld [vmem:[#allocation72_spill] sm:$0xff] }
 0x4d1   : > { %v13081_v58 = vrot.slane %v13079_v60, 5  ;;  %v11977_v48 = vadd.f32 %v20195_v15, %v11159_v52  ;;  %v13111_v18 = vrot.slane %v13109_v63, 5  ;;  %v13115_v39 = vrot.slane %v13113_v17, 4  ;;  %v20199_v52 = vld [vmem:[#allocation67_spill] sm:$0xff]  ;;  %v19506_v63 = vpop.f32.mrf.mxu0 }
 0x4d2   : > { %v15319_v47 = vpop.f32.mrf.mxu1  ;;  %v19499_v57 = vunpack.c.l.bf16 %v13050_v51  ;;  %v13107_v29 = vrot.slane %v13106_v21, 4  ;;  %v13085_v46 = vshll.u32 %v12776_v22, 16  ;;  %v13089_v27 = vshrl.u32 %v12776_v22, 16 }
 0x4d3   : > { %v12567_v34 = vadd.f32 %v15319_v47, %v11973_v37  ;;  %v11975_v60 = vadd.f32 %v20197_v49, %v11157_v30  ;;  %v19504_v37 = vadd.f32 %v20199_v52, %v20198_v16  ;;  %v11978_v15 = vadd.f32 %v19226_v62, %v11160_v23 }
 0x4d4   : > { %v12406_v6 = vpop.f32.mrf.mxu1  ;;  %20196 = vst [vmem:[#allocation36_spill] sm:$0xff] %v19499_v57  ;;  %v19512_v51 = vadd.f32 %v20200_v41, %v19233_v33  ;;  %v13082_v59 = vor.u32 %v13081_v58, %v13078_v43  ;;  %v13119_v22 = vshll.u32 %v12780_v11, 16  ;;  %v13116_v52 = vor.u32 %v13115_v39, %v13111_v18  ;;  %v19523_v43 = vpop.f32.mrf.mxu0  ;;  %v20202_v58 = vld [vmem:[#allocation76_spill] sm:$0xff]  ;;  %v20203_v57 = vld [vmem:[#allocation63_spill] sm:$0xff] }
 0x4d5   : > { %v12670_v17 = vmul.f32 %v19487_v14, %v12567_v34  ;;  %v12565_v47 = vadd.f32 %v12406_v6, %v11971_v1  ;;  %v20201_v34 = vld [vmem:[#allocation71_spill] sm:$0xff]  ;;  %v13112_v33 = vsel %vm16125_vm7, %v13107_v29, %v13111_v18  ;;  %v13087_v41 = vrot.slane %v13085_v46, 5 }
 0x4d6   : > { %v15320_v21 = vpop.f32.mrf.mxu1  ;;  %v19519_v1 = vadd.f32 %v20201_v34, %v19243_v40  ;;  %v13091_v23 = vrot.slane %v13089_v27, 4  ;;  %v13083_v40 = vrot.slane %v13082_v59, 4  ;;  %v13117_v46 = vrot.slane %v13116_v52, 4 }
 0x4d7   : > { %v12709_v30 = vadd.f32 %v19497_v3, %v12670_v17  ;;  %v12668_v16 = vmul.f32 %v19487_v14, %v12565_v47  ;;  %v12568_v49 = vadd.f32 %v15320_v21, %v11974_v53  ;;  %v11976_v17 = vadd.f32 %v19245_v19, %v11158_v0 }
 0x4d8   : > { %v12409_v62 = vpop.f32.mrf.mxu1  ;;  %v13121_v47 = vrot.slane %v13119_v22, 5  ;;  %v13095_v21 = vshll.u32 %v12777_v25, 16  ;;  %v19533_v27 = vadd.f32 %v19228_v50, %v19263_v44  ;;  %v11981_v19 = vadd.f32 %v19269_v28, %v19467_v7  ;;  %v19540_v25 = vpop.f32.mrf.mxu0  ;;  %v20204_v50 = vld [vmem:[#allocation61_spill] sm:$0xff] }
 0x4d9   : > { %v13237_v11 = vadd.f32 %v20202_v58, %v12709_v30  ;;  %v12707_v6 = vadd.f32 %v19497_v3, %v12668_v16  ;;  %v12671_v53 = vmul.f32 %v19487_v14, %v12568_v49  ;;  %v12566_v39 = vadd.f32 %v12409_v62, %v11972_v12 }
 0x4da   : > { %v19536_v12 = vunpack.c.l.bf16 %v13112_v33  ;;  %v13092_v49 = vor.u32 %v13091_v23, %v13087_v41  ;;  %v19550_v22 = vadd.f32 %v19235_v13, %v19267_v36  ;;  %v13088_v7 = vsel %vm16125_vm7, %v13083_v40, %v13087_v41 }
 0x4db   : > { %v13269_v34 = vmax.f32 %v13237_v11, 0.0  ;;  %v13235_v18 = vadd.f32 %v20203_v57, %v12707_v6  ;;  %v12710_v29 = vadd.f32 %v19497_v3, %v12671_v53  ;;  %v12669_v30 = vmul.f32 %v19487_v14, %v12566_v39  ;;  %v12784_v57 = vld [vmem:[#allocation2 + $0xc0] sm:$0xf]  ;;  %v20205_v11 = vld [vmem:[#allocation62_spill] sm:$0xff] }
 0x4dc   : > { %v13097_v62 = vrot.slane %v13095_v21, 5  ;;  %v13093_v36 = vrot.slane %v13092_v49, 4  ;;  %v13148_v53 = vshrl.u32 %v12784_v57, 16  ;;  %v13151_v39 = vshll.u32 %v12784_v57, 16 }
 0x4dd   : > { %v15323_v16 = vpop.f32.mrf.mxu1  ;;  %13301 = vst [vmem:[%s19544_s19 + $0x10] sm:$0xff] %v13269_v34  ;;  %v13267_v59 = vmax.f32 %v13235_v18, 0.0  ;;  %v13238_v44 = vadd.f32 %v20204_v50, %v12710_v29  ;;  %v12708_v52 = vadd.f32 %v19497_v3, %v12669_v30  ;;  %v11979_v34 = vadd.f32 %v19297_v35, %v19474_v2  ;;  %v19562_v18 = vpop.f32.mrf.mxu0  ;;  %v20207_v35 = vld [vmem:[#allocation66_spill] sm:$0xff] }
 0x4de   : > { %v12571_v0 = vadd.f32 %v15323_v16, %v11977_v48  ;;  %v13122_v48 = vsel %vm16125_vm7, %v13117_v46, %v13121_v47  ;;  %v20206_v47 = vld [vmem:[#allocation73_spill] sm:$0xff]  ;;  %v19571_v30 = vunpack.c.l.bf16 %v13088_v7  ;;  %v13098_v57 = vsel %vm16125_vm7, %v13093_v36, %v13097_v62 }
 0x4df   : > { %v12422_v28 = vpop.f32.mrf.mxu1  ;;  %13299 = vst [vmem:[%s19544_s19] sm:$0xff] %v13267_v59  ;;  %v13270_v33 = vmax.f32 %v13238_v44, 0.0  ;;  %v13236_v6 = vadd.f32 %v20205_v11, %v12708_v52  ;;  %v19569_v21 = vadd.f32 %v20206_v47, %v19273_v8  ;;  %v19573_v16 = vunpack.c.l.bf16 %v13122_v48  ;;  %v19578_v44 = vld [vmem:[#allocation2 + $0xc4] sm:$0xf]  ;;  %v19585_v7 = vpop.f32.mrf.mxu0 }
 0x4e0   : > { %v12674_v23 = vmul.f32 %v19487_v14, %v12571_v0  ;;  %v12569_v58 = vadd.f32 %v12422_v28, %v11975_v60  ;;  %v13150_v52 = vrot.slane %v13148_v53, 4  ;;  %v13153_v28 = vrot.slane %v13151_v39, 5  ;;  %v20210_v11 = vld [vmem:[#allocation81_spill] sm:$0xff] }
 0x4e1   : > { %v15324_v13 = vpop.f32.mrf.mxu1  ;;  %13302 = vst [vmem:[%s19544_s19 + $0x18] sm:$0xff] %v13270_v33  ;;  %v13268_v29 = vmax.f32 %v13236_v6, 0.0  ;;  %v20211_v6 = vld [vmem:[#allocation75_spill] sm:$0xff]  ;;  %v13157_v62 = vshll.u32 %v19578_v44, 16  ;;  %v13161_v36 = vshrl.u32 %v19578_v44, 16  ;;  %v20212_v39 = vld [vmem:[#allocation77_spill] sm:$0xff] }
 0x4e2   : > { %v12713_v41 = vadd.f32 %v19497_v3, %v12674_v23  ;;  %v12672_v60 = vmul.f32 %v19487_v14, %v12569_v58  ;;  %v12572_v40 = vadd.f32 %v15324_v13, %v11978_v15  ;;  %v20208_v15 = vld [vmem:[#allocation18_spill] sm:$0xff] }
 0x4e3   : > { %v12425_v46 = vpop.f32.mrf.mxu1  ;;  %v11982_v0 = vadd.f32 %v20208_v15, %v19478_v31  ;;  %13300 = vst [vmem:[%s19544_s19 + $0x8] sm:$0xff] %v13268_v29  ;;  %v20209_v23 = vld [vmem:[#allocation74_spill] sm:$0xff]  ;;  %v19592_v31 = vadd.f32 %v20211_v6, %v20210_v11  ;;  %v12781_v29 = vld [vmem:[#allocation2 + $0xb4] sm:$0xf]  ;;  %v19614_v11 = vrot.slane %v13157_v62, 5 }
 0x4e4   : > { %v13241_v2 = vadd.f32 %v20207_v35, %v12713_v41  ;;  %v12711_v49 = vadd.f32 %v19497_v3, %v12672_v60  ;;  %v12675_v59 = vmul.f32 %v19487_v14, %v12572_v40  ;;  %v12570_v50 = vadd.f32 %v12425_v46, %v11976_v17  ;;  %v20213_v46 = vld [vmem:[#allocation33_spill] sm:$0xff] }
 0x4e5   : > { %v15327_v8 = vpop.f32.mrf.mxu1  ;;  %v11980_v35 = vadd.f32 %v20213_v46, %v19504_v37  ;;  %v20215_v37 = vld [vmem:[#allocation29_spill] sm:$0xff] }
 0x4e6   : > { %v13273_v33 = vmax.f32 %v13241_v2, 0.0  ;;  %v13239_v58 = vadd.f32 %v20209_v23, %v12711_v49  ;;  %v12714_v17 = vadd.f32 %v19497_v3, %v12675_v59  ;;  %v12673_v48 = vmul.f32 %v19487_v14, %v12570_v50  ;;  %v19604_v50 = vpop.f32.mrf.mxu0 }
 0x4e7   : > { %v12575_v13 = vadd.f32 %v15327_v8, %v11981_v19  ;;  %v12438_v41 = vpop.f32.mrf.mxu1  ;;  %v19602_v49 = vunpack.c.l.bf16 %v13098_v57  ;;  %v13154_v59 = vor.u32 %v13153_v28, %v13150_v52  ;;  %v20214_v8 = vld [vmem:[#allocation79_spill] sm:$0xff]  ;;  %v13124_v52 = vshrl.u32 %v12781_v29, 16 }
 0x4e8   : > { %13305 = vst [vmem:[%s19544_s19 + $0x30] sm:$0xff] %v13273_v33  ;;  %v13271_v53 = vmax.f32 %v13239_v58, 0.0  ;;  %v13242_v60 = vadd.f32 %v20212_v39, %v12714_v17  ;;  %v12712_v40 = vadd.f32 %v19497_v3, %v12673_v48  ;;  %v12573_v47 = vadd.f32 %v12438_v41, %v11979_v34  ;;  %v19609_v58 = vld [vmem:[#allocation2 + $0xb8] sm:$0xf]  ;;  %v19625_v62 = vpop.f32.mrf.mxu0 }
 0x4e9   : > { %v12678_v2 = vmul.f32 %v19487_v14, %v12575_v13  ;;  %v15328_v19 = vpop.f32.mrf.mxu1  ;;  %v11985_v17 = vadd.f32 %v20215_v37, %v19512_v51  ;;  %v13133_v46 = vshll.u32 %v19609_v58, 16  ;;  %v19635_v37 = vrot.slane %v13154_v59, 4 }
 0x4ea   : > { %13303 = vst [vmem:[%s19544_s19 + $0x20] sm:$0xff] %v13271_v53  ;;  %v13274_v15 = vmax.f32 %v13242_v60, 0.0  ;;  %v13240_v33 = vadd.f32 %v20214_v8, %v12712_v40  ;;  %v12676_v23 = vmul.f32 %v19487_v14, %v12573_v47  ;;  %v12576_v34 = vadd.f32 %v15328_v19, %v11982_v0  ;;  %v20216_v0 = vld [vmem:[#allocation20_spill] sm:$0xff]  ;;  %v20218_v60 = vld [vmem:[#allocation78_spill] sm:$0xff] }
 0x4eb   : > { %v12717_v48 = vadd.f32 %v19497_v3, %v12678_v2  ;;  %v12441_v57 = vpop.f32.mrf.mxu1  ;;  %v20217_v53 = vld [vmem:[#allocation84_spill] sm:$0xff]  ;;  %v13127_v47 = vshll.u32 %v12781_v29, 16  ;;  %v20219_v2 = vld [vmem:[#allocation82_spill] sm:$0xff]  ;;  %v11986_v29 = vadd.f32 %v19424_v26, %v19533_v27  ;;  %v13137_v26 = vshrl.u32 %v19609_v58, 16  ;;  %v19646_v27 = vpop.f32.mrf.mxu0 }
 0x4ec   : > { %13306 = vst [vmem:[%s19544_s19 + $0x38] sm:$0xff] %v13274_v15  ;;  %v13272_v28 = vmax.f32 %v13240_v33, 0.0  ;;  %v12715_v6 = vadd.f32 %v19497_v3, %v12676_v23  ;;  %v12679_v13 = vmul.f32 %v19487_v14, %v12576_v34  ;;  %v12574_v41 = vadd.f32 %v12441_v57, %v11980_v35  ;;  %v20220_v57 = vld [vmem:[#allocation85_spill] sm:$0xff] }
 0x4ed   : > { %v19621_v39 = vadd.f32 %v20217_v53, %v20216_v0  ;;  %v13245_v51 = vadd.f32 %v20218_v60, %v12717_v48  ;;  %v15331_v40 = vpop.f32.mrf.mxu1  ;;  %v11983_v33 = vadd.f32 %v19394_v24, %v19519_v1  ;;  %v20221_v0 = vld [vmem:[#allocation21_spill] sm:$0xff] }
 0x4ee   : > { %13304 = vst [vmem:[%s19544_s19 + $0x28] sm:$0xff] %v13272_v28  ;;  %v13243_v19 = vadd.f32 %v20219_v2, %v12715_v6  ;;  %v12718_v15 = vadd.f32 %v19497_v3, %v12679_v13  ;;  %v12677_v35 = vmul.f32 %v19487_v14, %v12574_v41  ;;  %v12579_v8 = vadd.f32 %v15331_v40, %v11985_v17 }
 0x4ef   : > { %v13277_v23 = vmax.f32 %v13245_v51, 0.0  ;;  %v12454_v34 = vpop.f32.mrf.mxu1  ;;  %v11984_v17 = vadd.f32 %v19449_v56, %v19550_v22  ;;  %v19643_v41 = vrot.slane %v13124_v52, 4  ;;  %v11989_v56 = vadd.f32 %v19480_v61, %v19569_v21 }
 0x4f0   : > { %v13275_v48 = vmax.f32 %v13243_v19, 0.0  ;;  %v13246_v28 = vadd.f32 %v20220_v57, %v12718_v15  ;;  %v12716_v6 = vadd.f32 %v19497_v3, %v12677_v35  ;;  %v12682_v13 = vmul.f32 %v19487_v14, %v12579_v8  ;;  %v20222_v19 = vld [vmem:[#allocation54_spill] sm:$0xff] }
 0x4f1   : > { %13309 = vst [vmem:[%s19544_s19 + $0x50] sm:$0xff] %v13277_v23  ;;  %v12577_v24 = vadd.f32 %v12454_v34, %v11983_v33  ;;  %v15332_v1 = vpop.f32.mrf.mxu1  ;;  %v19654_v52 = vrot.slane %v13127_v47, 5  ;;  %v19656_v2 = vrot.slane %v13133_v46, 5  ;;  %v12786_v33 = vld [vmem:[#allocation2 + $0xc8] sm:$0x1]  ;;  %v20224_v23 = vld [vmem:[#allocation80_spill] sm:$0xff]  ;;  %v11987_v61 = vadd.f32 %v19506_v63, %v19592_v31 }
 0x4f2   : > { %13307 = vst [vmem:[%s19544_s19 + $0x40] sm:$0xff] %v13275_v48  ;;  %v13278_v59 = vmax.f32 %v13246_v28, 0.0  ;;  %v13244_v53 = vadd.f32 %v20221_v0, %v12716_v6  ;;  %v12721_v60 = vadd.f32 %v19497_v3, %v12682_v13  ;;  %v12580_v51 = vadd.f32 %v15332_v1, %v11986_v29  ;;  %v20223_v29 = vld [vmem:[#allocation86_spill] sm:$0xff]  ;;  %v19670_v48 = vpop.f32.mrf.mxu0 }
 0x4f3   : > { %v12680_v22 = vmul.f32 %v19487_v14, %v12577_v24  ;;  %v12457_v40 = vpop.f32.mrf.mxu1  ;;  %v11170_v34 = vadd.f32 %v20224_v23, %v20223_v29  ;;  %v19668_v46 = vrot.slane %v13161_v36, 4  ;;  %v13160_v63 = vsel %vm16125_vm7, %v19635_v37, %v19614_v11  ;;  %v20226_v36 = vld [vmem:[#allocation24_spill] sm:$0xff] }
 0x4f4   : > { %13310 = vst [vmem:[%s19544_s19 + $0x58] sm:$0xff] %v13278_v59  ;;  %v13276_v58 = vmax.f32 %v13244_v53, 0.0  ;;  %v13249_v15 = vadd.f32 %v20222_v19, %v12721_v60  ;;  %v12683_v35 = vmul.f32 %v19487_v14, %v12580_v51  ;;  %v12578_v8 = vadd.f32 %v12457_v40, %v11984_v17  ;;  %v20225_v17 = vld [vmem:[#allocation27_spill] sm:$0xff]  ;;  %v20227_v51 = vld [vmem:[#allocation16_spill] sm:$0xff] }
 0x4f5   : > { %v12719_v21 = vadd.f32 %v19497_v3, %v12680_v22  ;;  %v15335_v47 = vpop.f32.mrf.mxu1  ;;  %v13167_v44 = vshll.u32 %v12786_v33, 16  ;;  %v19680_v31 = vrot.slane %v13137_v26, 4  ;;  %v11990_v40 = vadd.f32 %v19523_v43, %v19621_v39 }
 0x4f6   : > { %13308 = vst [vmem:[%s19544_s19 + $0x48] sm:$0xff] %v13276_v58  ;;  %v13281_v57 = vmax.f32 %v13249_v15, 0.0  ;;  %v12722_v28 = vadd.f32 %v19497_v3, %v12683_v35  ;;  %v12681_v6 = vmul.f32 %v19487_v14, %v12578_v8  ;;  %v12583_v13 = vadd.f32 %v15335_v47, %v11989_v56  ;;  %v20228_v56 = vld [vmem:[#allocation22_spill] sm:$0xff]  ;;  %v19691_v15 = vpop.f32.mrf.mxu0  ;;  %v20229_v8 = vld [vmem:[#allocation28_spill] sm:$0xff] }
 0x4f7   : > { %v13247_v24 = vadd.f32 %v20225_v17, %v12719_v21  ;;  %v12470_v1 = vpop.f32.mrf.mxu1  ;;  %v11175_v22 = vadd.f32 %v20228_v56, %v20227_v51  ;;  %v11988_v58 = vadd.f32 %v19540_v25, %v11170_v34  ;;  %v20231_v21 = vld [vmem:[#allocation23_spill] sm:$0xff]  ;;  %v13130_v39 = vor.u32 %v19654_v52, %v19643_v41 }
 0x4f8   : > { %13313 = vst [vmem:[%s19544_s19 + $0x70] sm:$0xff] %v13281_v57  ;;  %v13250_v59 = vadd.f32 %v20226_v36, %v12722_v28  ;;  %v12720_v0 = vadd.f32 %v19497_v3, %v12681_v6  ;;  %v12686_v53 = vmul.f32 %v19487_v14, %v12583_v13  ;;  %v12581_v60 = vadd.f32 %v12470_v1, %v11987_v61  ;;  %v20230_v61 = vld [vmem:[#allocation17_spill] sm:$0xff]  ;;  %v20232_v28 = vld [vmem:[#allocation30_spill] sm:$0xff]  ;;  %v20234_v1 = vld [vmem:[#allocation15_spill] sm:$0xff]  ;;  %v11911_v41 = vpop.f32.mrf.mxu0 }
 0x4f9   : > { %v13279_v26 = vmax.f32 %v13247_v24, 0.0  ;;  %v15336_v19 = vpop.f32.mrf.mxu1  ;;  %v11173_v47 = vadd.f32 %v20231_v21, %v20230_v61  ;;  %v11993_v57 = vadd.f32 %v19562_v18, %v11175_v22  ;;  %v20233_v24 = vld [vmem:[#allocation19_spill] sm:$0xff]  ;;  %v12783_v22 = vld [vmem:[#allocation2 + $0xbc] sm:$0x1]  ;;  %v20238_v61 = vld [vmem:[#allocation38_spill] sm:$0xff] }
 0x4fa   : > { %v13282_v35 = vmax.f32 %v13250_v59, 0.0  ;;  %v13248_v33 = vadd.f32 %v20229_v8, %v12720_v0  ;;  %v12725_v29 = vadd.f32 %v19497_v3, %v12686_v53  ;;  %v12684_v23 = vmul.f32 %v19487_v14, %v12581_v60 }
 0x4fb   : > { %13311 = vst [vmem:[%s19544_s19 + $0x60] sm:$0xff] %v13279_v26  ;;  %v12584_v43 = vadd.f32 %v15336_v19, %v11990_v40  ;;  %v12473_v25 = vpop.f32.mrf.mxu1  ;;  %v11176_v36 = vadd.f32 %v20234_v1, %v20233_v24  ;;  %v11991_v59 = vadd.f32 %v19585_v7, %v11173_v47  ;;  %v13164_v53 = vor.u32 %v19668_v46, %v19614_v11 }
 0x4fc   : > { %13314 = vst [vmem:[%s19544_s19 + $0x78] sm:$0xff] %v13282_v35  ;;  %v13280_v34 = vmax.f32 %v13248_v33, 0.0  ;;  %v13253_v6 = vadd.f32 %v20232_v28, %v12725_v29  ;;  %v12723_v13 = vadd.f32 %v19497_v3, %v12684_v23  ;;  %v12582_v17 = vadd.f32 %v12473_v25, %v11988_v58  ;;  %v20235_v33 = vld [vmem:[#allocation35_spill] sm:$0xff]  ;;  %v20236_v29 = vld [vmem:[#allocation32_spill] sm:$0xff] }
 0x4fd   : > { %v12687_v18 = vmul.f32 %v19487_v14, %v12584_v43  ;;  %v15339_v0 = vpop.f32.mrf.mxu1  ;;  %v11994_v40 = vadd.f32 %v19604_v50, %v11176_v36  ;;  %v19716_v26 = vrot.slane %v13167_v44, 5  ;;  %v13140_v46 = vor.u32 %v19680_v31, %v19656_v2  ;;  %v20237_v50 = vld [vmem:[#allocation25_spill] sm:$0xff]  ;;  %v15299_v43 = vpop.f32.mrf.mxu0 }
 0x4fe   : > { %13312 = vst [vmem:[%s19544_s19 + $0x68] sm:$0xff] %v13280_v34  ;;  %v13285_v52 = vmax.f32 %v13253_v6, 0.0  ;;  %v13251_v60 = vadd.f32 %v19435_v9, %v12723_v13  ;;  %v12685_v51 = vmul.f32 %v19487_v14, %v12582_v17  ;;  %v12587_v56 = vadd.f32 %v15339_v0, %v11993_v57  ;;  %v20239_v6 = vld [vmem:[#allocation26_spill] sm:$0xff]  ;;  %v20240_v13 = vld [vmem:[#allocation41_spill] sm:$0xff] }
 0x4ff   : > { %v12726_v7 = vadd.f32 %v19497_v3, %v12687_v18  ;;  %v12486_v58 = vpop.f32.mrf.mxu1  ;;  %v11174_v23 = vadd.f32 %v20236_v29, %v20235_v33  ;;  %v11179_v21 = vadd.f32 %v20238_v61, %v20237_v50  ;;  %v13143_v57 = vshll.u32 %v12783_v22, 16 }
 0x500   : > { %13317 = vst [vmem:[%s19544_s19 + $0x90] sm:$0xff] %v13285_v52  ;;  %v13283_v19 = vmax.f32 %v13251_v60, 0.0  ;;  %v12724_v35 = vadd.f32 %v19497_v3, %v12685_v51  ;;  %v12690_v9 = vmul.f32 %v19487_v14, %v12587_v56  ;;  %v12585_v8 = vadd.f32 %v12486_v58, %v11991_v59  ;;  %v20241_v52 = vld [vmem:[#allocation43_spill] sm:$0xff]  ;;  %v20242_v60 = vld [vmem:[#allocation37_spill] sm:$0xff] }
 0x501   : > { %v13254_v47 = vadd.f32 %v19437_v45, %v12726_v7  ;;  %v15340_v44 = vpop.f32.mrf.mxu1  ;;  %v11177_v17 = vadd.f32 %v20240_v13, %v20239_v6  ;;  %v11992_v24 = vadd.f32 %v19625_v62, %v11174_v23  ;;  %v11997_v45 = vadd.f32 %v19646_v27, %v11179_v21  ;;  %v11924_v27 = vpop.f32.mrf.mxu0  ;;  %v20245_v6 = vld [vmem:[#allocation36_spill] sm:$0xff] }
 0x502   : > { %13315 = vst [vmem:[%s19544_s19 + $0x80] sm:$0xff] %v13283_v19  ;;  %v13252_v31 = vadd.f32 %v19439_v38, %v12724_v35  ;;  %v12729_v25 = vadd.f32 %v19497_v3, %v12690_v9  ;;  %v12688_v34 = vmul.f32 %v19487_v14, %v12585_v8  ;;  %v12588_v28 = vadd.f32 %v15340_v44, %v11994_v40  ;;  %v20243_v35 = vld [vmem:[#allocation44_spill] sm:$0xff] }
 0x503   : > { %v13286_v1 = vmax.f32 %v13254_v47, 0.0  ;;  %v12489_v36 = vpop.f32.mrf.mxu1  ;;  %v11180_v51 = vadd.f32 %v20242_v60, %v20241_v52  ;;  %v11995_v56 = vadd.f32 %v19670_v48, %v11177_v17  ;;  %v13131_v40 = vrot.slane %v13130_v39, 4 }
 0x504   : > { %v13284_v59 = vmax.f32 %v13252_v31, 0.0  ;;  %v13257_v18 = vadd.f32 %v19469_v10, %v12729_v25  ;;  %v12727_v38 = vadd.f32 %v19497_v3, %v12688_v34  ;;  %v12691_v0 = vmul.f32 %v19487_v14, %v12588_v28 }
 0x505   : > { %13318 = vst [vmem:[%s19544_s19 + $0x98] sm:$0xff] %v13286_v1  ;;  %v12586_v22 = vadd.f32 %v12489_v36, %v11992_v24  ;;  %v15343_v62 = vpop.f32.mrf.mxu1  ;;  %v11178_v9 = vadd.f32 %v20243_v35, %v19392_v42  ;;  %v11998_v8 = vadd.f32 %v19691_v15, %v11180_v51  ;;  %v13165_v29 = vrot.slane %v13164_v53, 4  ;;  %v15300_v15 = vpop.f32.mrf.mxu0  ;;  %v20247_v36 = vld [vmem:[#allocation48_spill] sm:$0xff]  ;;  %v20248_v51 = vld [vmem:[#allocation34_spill] sm:$0xff] }
 0x506   : > { %13316 = vst [vmem:[%s19544_s19 + $0x88] sm:$0xff] %v13284_v59  ;;  %v13289_v7 = vmax.f32 %v13257_v18, 0.0  ;;  %v13255_v58 = vadd.f32 %v19489_v5, %v12727_v38  ;;  %v12730_v10 = vadd.f32 %v19497_v3, %v12691_v0  ;;  %v12591_v19 = vadd.f32 %v15343_v62, %v11997_v45 }
 0x507   : > { %v12689_v48 = vmul.f32 %v19487_v14, %v12586_v22  ;;  %v12502_v33 = vpop.f32.mrf.mxu1  ;;  %v11996_v61 = vadd.f32 %v11911_v41, %v11178_v9  ;;  %v19754_v42 = vrot.slane %v13140_v46, 4  ;;  %v13145_v44 = vrot.slane %v13143_v57, 5  ;;  %v11927_v0 = vpop.f32.mrf.mxu0 }
 0x508   : > { %13321 = vst [vmem:[%s19544_s19 + $0xb0] sm:$0xff] %v13289_v7  ;;  %v13287_v39 = vmax.f32 %v13255_v58, 0.0  ;;  %v13258_v23 = vadd.f32 %v19491_v20, %v12730_v10  ;;  %v12694_v50 = vmul.f32 %v19487_v14, %v12591_v19  ;;  %v12589_v5 = vadd.f32 %v12502_v33, %v11995_v56  ;;  %v20244_v20 = vld [vmem:[#allocation46_spill] sm:$0xff]  ;;  %v20249_v56 = vld [vmem:[#allocation53_spill] sm:$0xff] }
 0x509   : > { %v12728_v21 = vadd.f32 %v19497_v3, %v12689_v48  ;;  %v15344_v47 = vpop.f32.mrf.mxu1  ;;  %v11183_v28 = vadd.f32 %v20244_v20, %v19400_v54  ;;  %v11181_v41 = vadd.f32 %v19418_v4, %v19416_v55  ;;  %v13136_v46 = vsel %vm16125_vm7, %v13131_v40, %v19656_v2  ;;  %v20246_v54 = vld [vmem:[#allocation31_spill] sm:$0xff] }
 0x50a   : > { %13319 = vst [vmem:[%s19544_s19 + $0xa0] sm:$0xff] %v13287_v39  ;;  %v13290_v31 = vmax.f32 %v13258_v23, 0.0  ;;  %v12733_v53 = vadd.f32 %v19497_v3, %v12694_v50  ;;  %v12692_v25 = vmul.f32 %v19487_v14, %v12589_v5  ;;  %v12592_v34 = vadd.f32 %v15344_v47, %v11998_v8 }
 0x50b   : > { %v13256_v13 = vadd.f32 %v20245_v6, %v12728_v21  ;;  %v12505_v17 = vpop.f32.mrf.mxu1  ;;  %v11184_v59 = vadd.f32 %v20247_v36, %v20246_v54  ;;  %v12001_v55 = vadd.f32 %v15299_v43, %v11183_v28  ;;  %v11999_v4 = vadd.f32 %v11924_v27, %v11181_v41 }
 0x50c   : > { %13322 = vst [vmem:[%s19544_s19 + $0xb8] sm:$0xff] %v13290_v31  ;;  %v13261_v57 = vadd.f32 %v19536_v12, %v12733_v53  ;;  %v12731_v24 = vadd.f32 %v19497_v3, %v12692_v25  ;;  %v12695_v45 = vmul.f32 %v19487_v14, %v12592_v34  ;;  %v12590_v1 = vadd.f32 %v12505_v17, %v11996_v61 }
 0x50d   : > { %v13288_v18 = vmax.f32 %v13256_v13, 0.0  ;;  %v15347_v38 = vpop.f32.mrf.mxu1  ;;  %v11182_v22 = vadd.f32 %v20249_v56, %v20248_v51  ;;  %v12002_v62 = vadd.f32 %v15300_v15, %v11184_v59  ;;  %v13170_v43 = vsel %vm16125_vm7, %v13165_v29, %v19716_v26 }
 0x50e   : > { %v13293_v52 = vmax.f32 %v13261_v57, 0.0  ;;  %v13259_v2 = vadd.f32 %v19571_v30, %v12731_v24  ;;  %v12734_v12 = vadd.f32 %v19497_v3, %v12695_v45  ;;  %v12693_v60 = vmul.f32 %v19487_v14, %v12590_v1 }
 0x50f   : > { %13320 = vst [vmem:[%s19544_s19 + $0xa8] sm:$0xff] %v13288_v18  ;;  %v12595_v40 = vadd.f32 %v15347_v38, %v12001_v55  ;;  %v12518_v7 = vpop.f32.mrf.mxu1  ;;  %v12000_v19 = vadd.f32 %v11927_v0, %v11182_v22  ;;  %v13233_v9 = vunpack.c.l.bf16 %v13160_v63  ;;  %v13231_v8 = vunpack.c.l.bf16 %v13136_v46 }
 0x510   : > { %13325 = vst [vmem:[%s19544_s19 + $0xd0] sm:$0xff] %v13293_v52  ;;  %v13291_v27 = vmax.f32 %v13259_v2, 0.0  ;;  %v13262_v30 = vadd.f32 %v19573_v16, %v12734_v12  ;;  %v12732_v58 = vadd.f32 %v19497_v3, %v12693_v60  ;;  %v12593_v10 = vadd.f32 %v12518_v7, %v11999_v4 }
 0x511   : > { %v12698_v35 = vmul.f32 %v19487_v14, %v12595_v40  ;;  %v15348_v48 = vpop.f32.mrf.mxu1  ;;  %v13234_v23 = vunpack.c.l.bf16 %v13170_v43  ;;  %v13146_v5 = vsel %vm16125_vm7, %v19754_v42, %v13145_v44 }
 0x512   : > { %13323 = vst [vmem:[%s19544_s19 + $0xc0] sm:$0xff] %v13291_v27  ;;  %v13294_v26 = vmax.f32 %v13262_v30, 0.0  ;;  %v13260_v16 = vadd.f32 %v19602_v49, %v12732_v58  ;;  %v12696_v33 = vmul.f32 %v19487_v14, %v12593_v10  ;;  %v12596_v29 = vadd.f32 %v15348_v48, %v12002_v62 }
 0x513   : > { %v12737_v39 = vadd.f32 %v19497_v3, %v12698_v35  ;;  %v12521_v50 = vpop.f32.mrf.mxu1  ;;  %v13232_v42 = vunpack.c.l.bf16 %v13146_v5 }
 0x514   : > { %13326 = vst [vmem:[%s19544_s19 + $0xd8] sm:$0xff] %v13294_v26  ;;  %v13292_v11 = vmax.f32 %v13260_v16, 0.0  ;;  %v12735_v37 = vadd.f32 %v19497_v3, %v12696_v33  ;;  %v12699_v49 = vmul.f32 %v19487_v14, %v12596_v29  ;;  %v12594_v63 = vadd.f32 %v12521_v50, %v12000_v19 }
 0x515   : > { %v13265_v61 = vadd.f32 %v13233_v9, %v12737_v39 }
 0x516   : > { %13324 = vst [vmem:[%s19544_s19 + $0xc8] sm:$0xff] %v13292_v11  ;;  %v13263_v21 = vadd.f32 %v13231_v8, %v12735_v37  ;;  %v12738_v47 = vadd.f32 %v19497_v3, %v12699_v49  ;;  %v12697_v32 = vmul.f32 %v19487_v14, %v12594_v63 }
 0x517   : > { %v13297_v44 = vmax.f32 %v13265_v61, 0.0 }
 0x518   : > { %v13295_v15 = vmax.f32 %v13263_v21, 0.0  ;;  %v13266_v31 = vadd.f32 %v13234_v23, %v12738_v47  ;;  %v12736_v53 = vadd.f32 %v19497_v3, %v12697_v32 }
 0x519   : > { %13329 = vst [vmem:[%s19544_s19 + $0xf0] sm:$0xff] %v13297_v44 }
 0x51a   : > { %13327 = vst [vmem:[%s19544_s19 + $0xe0] sm:$0xff] %v13295_v15  ;;  %v13298_v25 = vmax.f32 %v13266_v31, 0.0  ;;  %v13264_v34 = vadd.f32 %v13232_v42, %v12736_v53 }
 0x51c   : > { %13330 = vst [vmem:[%s19544_s19 + $0xf8] sm:$0xff] %v13298_v25  ;;  %v13296_v14 = vmax.f32 %v13264_v34, 0.0 }
 0x51e   : > { %13328 = vst [vmem:[%s19544_s19 + $0xe8] sm:$0xff] %v13296_v14 }
 0x51f   : > { %15757 = shalt.err (!%p15754_p3)
}
 0x520   : > { %s15758_s16 = scalar_lea.hbm %s19812_s10, 4096  ;;  %s15762_s15 = scalar_lea.hbm %s19866_s7, 8192 }
 0x521   : > { %p15759_p11 = scmp.ne.s32.totalorder %s19812_s10, %s15758_s16  ;;  %p15763_p4 = scmp.lt.s32.totalorder %s19812_s10, %s19866_s7 }
 0x522   : > { %p15764_p6 = scmp.lt.s32.totalorder %s15762_s15, %s15758_s16 }
 0x523   : > { %p15760_p9 = pnand %p15759_p11, %p20250_p2 }
 0x524   : > { %p15765_p8 = por %p15764_p6, %p15763_p4 }
 0x525   : > { %p15761_p1 = pneg %p15760_p9 }
 0x527   : > { %p15766_p5 = pnand %p15765_p8, %p15761_p1 }
 0x529   : > { %15769 = shalt.err (!%p15766_p5)
}
 0x52a   : > { %s15821_s20 = smov 128   ;;  %s15822_s22 = smov 8  }
 0x52b   : > { %15359 = dma.vmem_to_hbm [thread:$0]  (%p20250_p2), %s19814_s9, 4096, %s19812_s10, %s13332_s29, %s15821_s20, %s15821_s20, %s15822_s22  }
 0x52c PF: > { %s13360_s28 = sand.u32 1, %s15800_s24   ;;  %p20251_p7 = scmp.ne.s32.totalorder %s19886_s8, 0 }
 0x52d   : > { %p20252_p12 = scmp.ge.s32.totalorder %s15812_s27, 2  ;;  %s13361_s21 = scalar_lea.sflag [#allocation7], %s13360_s28 }
 0x52f   : > { %p15373_p13 = pnand %p20252_p12, %p20251_p7 }
 0x531   : > { %p15374_p0 = pneg %p15373_p13 }
 0x533   : > { %15795 = dma.done.wait (%p15374_p0), %s13361_s21, 4096  }
 0x534   : > { %15797 = vsyncadd (%p15374_p0), %s13361_s21, 4294963200  ;;  %p21_p10 = scmp.ge.s32.totalorder %s15941_s23, 4   ;;  %s20253_s24 = smov %s15804_s25 }
 0x535   : > { %s20254_s25 = smov %s15808_s26  ;;  %s20255_s26 = smov %s15957_s12 }
 0x536   : > { %s20256_s27 = smov %s15941_s23  ;;  %23 = sbr.rel (!%p21_p10) target bundleno = 8 (0x8), region = 121 }
 0x53b   :  { %13366 = vsyncpa [#allocation6], 1 }
 0x53c   :  { %13368 = vsyncpa [#allocation6 + $0x1], 1 }
 0x53d   :  { %13369 = vsyncpa [#allocation9], 1 }
 0x53e   :  { %13370 = vsyncpa [#allocation7], 1 }
 0x53f   :  { %13372 = vsyncpa [#allocation7 + $0x1], 1 }

</bundles_post_ra>
